<compile_context>
chip_gen: v6e
topology: v6e:2x2x1
jax: 0.10.0
libtpu: 0.0.40
codegen_flags: <defaults>
</compile_context>

<pallas_src>
import functools

import jax
import jax.numpy as jnp
from jax.experimental import pallas as pl
from jax.experimental.pallas import tpu as pltpu

EPS = 1e-5
LANE = 128


# ----------------------------------------------------------------------------
# Fused forward kernel: everything lives in VMEM, single invocation.
# ----------------------------------------------------------------------------
def _fused_forward_kernel(*refs):
    it = iter(refs)
    nxt = lambda: next(it)

    x_ref = nxt()
    conv_params = [tuple(nxt() for _ in range(4)) for _ in range(3)]   # w,b,g,beta
    enc_params = [tuple(nxt() for _ in range(4)) for _ in range(5)]    # w,b,g,beta
    dec_bn_params = [tuple(nxt() for _ in range(4)) for _ in range(3)] # w,b,g,beta
    dec_last_w, dec_last_b = nxt(), nxt()
    inv_w, inv_b = nxt(), nxt()
    enc_out_ref, rec_out_ref = nxt(), nxt()
    buf1, buf2, buf3 = nxt(), nxt(), nxt()                             # conv scratch

    N = x_ref.shape[0]

    def conv_same(buf_ref, x, w_ref, b_ref):
        """Same-padding Conv1d via K shifted matmuls on a zero-padded VMEM scratch."""
        K = w_ref.shape[0]
        pad = (K - 1) // 2
        buf_ref[...] = jnp.zeros_like(buf_ref)       # in-VMEM memset (the padding)
        buf_ref[pl.ds(pad, N), :] = x
        acc = jnp.zeros((N, w_ref.shape[2]), jnp.float32)
        for k in range(K):                           # K in {3,5}: unrolled
            acc = acc + jnp.dot(buf_ref[pl.ds(k, N), :], w_ref[k],
                                preferred_element_type=jnp.float32)
        return acc + b_ref[...]

    def bn(y, g_ref, beta_ref):
        mean = jnp.mean(y, axis=0, keepdims=True)
        var = jnp.mean((y - mean) ** 2, axis=0, keepdims=True)
        return (y - mean) * jax.lax.rsqrt(var + EPS) * g_ref[...] + beta_ref[...]

    relu = lambda t: jnp.maximum(t, 0.0)

    # conv stack: Conv1d -> BN -> ReLU, three times
    h = x_ref[...]
    for (w, b, g, bt), buf in zip(conv_params, [buf1, buf2, buf2]):
        h = relu(bn(conv_same(buf, h, w, b), g, bt))

    # encoder: 5x (Linear -> BN -> ReLU), last layer BN but no ReLU
    for i, (w, b, g, bt) in enumerate(enc_params):
        y = bn(jnp.dot(h, w[...], preferred_element_type=jnp.float32) + b[...], g, bt)
        h = relu(y) if i < 4 else y
    enc_out_ref[...] = h                              # lane-dense (N, 128) slab

    # decoder: (ReLU -> Linear -> BN) x3, then ReLU -> Linear
    for (w, b, g, bt) in dec_bn_params:
        h = bn(jnp.dot(relu(h), w[...], preferred_element_type=jnp.float32) + b[...], g, bt)
    h = jnp.dot(relu(h), dec_last_w[...], preferred_element_type=jnp.float32) + dec_last_b[...]

    # ConvTranspose1d (stride 1, same padding) == flipped-kernel conv
    rec_out_ref[...] = conv_same(buf3, h, inv_w, inv_b)


# ----------------------------------------------------------------------------
# Wrapper: single pallas_call, whole model resident in VMEM.
# ----------------------------------------------------------------------------
def _rup(n, m=LANE):
    return ((n + m - 1) // m) * m


def make_forward(N, input_dim, latent_dim, conv_dim):
    cin_p, cd_p, lat_p = _rup(input_dim), _rup(conv_dim), _rup(latent_dim)

    def forward(x, flat_params):
        xp = jnp.pad(x, ((0, 0), (0, cin_p - input_dim)))    # lane-pad input once
        n_in = 1 + len(flat_params)
        enc_p, rec_p = pl.pallas_call(
            _fused_forward_kernel,
            out_shape=(jax.ShapeDtypeStruct((N, lat_p), jnp.float32),
                       jax.ShapeDtypeStruct((N, cin_p), jnp.float32)),
            in_specs=[pl.BlockSpec(memory_space=pltpu.MemorySpace.VMEM)] * n_in,
            out_specs=(pl.BlockSpec(memory_space=pltpu.MemorySpace.VMEM),
                       pl.BlockSpec(memory_space=pltpu.MemorySpace.VMEM)),
            scratch_shapes=[pltpu.VMEM((N + 4, cin_p), jnp.float32),   # conv1 (K=5)
                            pltpu.VMEM((N + 2, cd_p), jnp.float32),    # conv2/3 (K=3)
                            pltpu.VMEM((N + 2, cin_p), jnp.float32)],  # invconv (K=3)
        )(xp, *flat_params)
        return enc_p[:, :latent_dim], rec_p[:, :input_dim]

    return jax.jit(forward)


# ----------------------------------------------------------------------------
# Deterministic parameter initialization (synthetic — no checkpoint load)
# ----------------------------------------------------------------------------
def init_params(key, input_dim, latent_dim, conv_dim):
    keys = iter(jax.random.split(key, 64))
    nxt = lambda: next(keys)

    def lin(cin, cout):
        return {"w": jax.random.normal(nxt(), (cin, cout), jnp.float32) / jnp.sqrt(cin),
                "b": 0.1 * jax.random.normal(nxt(), (1, cout), jnp.float32)}

    def conv(k, cin, cout):
        return {"w": jax.random.normal(nxt(), (k, cin, cout), jnp.float32) / jnp.sqrt(cin * k),
                "b": 0.1 * jax.random.normal(nxt(), (1, cout), jnp.float32)}

    def bn(c):
        return {"g": 1.0 + 0.1 * jax.random.normal(nxt(), (1, c), jnp.float32),
                "beta": 0.1 * jax.random.normal(nxt(), (1, c), jnp.float32)}

    p = {}
    p["conv1"], p["bn1"] = conv(5, input_dim, conv_dim), bn(conv_dim)
    p["conv2"], p["bn2"] = conv(3, conv_dim, conv_dim), bn(conv_dim)
    p["conv3"], p["bn3"] = conv(3, conv_dim, conv_dim), bn(conv_dim)

    enc_dims = [conv_dim, 256, 128, 64, 32, latent_dim]
    p["enc"] = [{"lin": lin(enc_dims[i], enc_dims[i + 1]), "bn": bn(enc_dims[i + 1])}
                for i in range(5)]

    dec_dims = [latent_dim, 32, 64, 128, input_dim]
    p["dec"] = [{"lin": lin(dec_dims[i], dec_dims[i + 1]),
                 "bn": bn(dec_dims[i + 1]) if i < 3 else None}
                for i in range(4)]

    # ConvTranspose1d(input_dim, input_dim, k=3, padding=1): torch weight (Cin, Cout, K).
    # stride=1 + padding=(K-1)/2 => conv-transpose == same-padding conv with kernel
    # flipped along K -> store as (K, Cin, Cout) already flipped.
    wt = jax.random.normal(nxt(), (input_dim, input_dim, 3), jnp.float32) / jnp.sqrt(input_dim * 3)
    p["invconv"] = {"w": jnp.transpose(jnp.flip(wt, axis=2), (2, 0, 1)),
                    "b": 0.1 * jax.random.normal(nxt(), (1, input_dim), jnp.float32)}
    return p


# Zero-pad every channel dim to a multiple of 128 lanes and flatten into the
# kernel's positional order.  gamma/beta padding is 0 so padded columns stay
# exactly 0 through every layer (numerically identical to the unpadded model).
def flatten_padded_params(p, input_dim, latent_dim, conv_dim):
    def pad2(a, r, c):
        return jnp.pad(a, ((0, r - a.shape[0]), (0, c - a.shape[1])))

    def padv(a, c):
        return jnp.pad(a, ((0, 0), (0, c - a.shape[1])))

    def padcw(w, ci, co):
        return jnp.pad(w, ((0, 0), (0, ci - w.shape[1]), (0, co - w.shape[2])))

    cin_p, cd_p = _rup(input_dim), _rup(conv_dim)
    enc_p = [_rup(d) for d in [conv_dim, 256, 128, 64, 32, latent_dim]]
    dec_p = [_rup(d) for d in [latent_dim, 32, 64, 128, input_dim]]

    flat = []
    conv_io = [(cin_p, cd_p), (cd_p, cd_p), (cd_p, cd_p)]
    for cname, bname, (ci, co) in zip(["conv1", "conv2", "conv3"],
                                      ["bn1", "bn2", "bn3"], conv_io):
        flat += [padcw(p[cname]["w"], ci, co), padv(p[cname]["b"], co),
                 padv(p[bname]["g"], co), padv(p[bname]["beta"], co)]
    for i, layer in enumerate(p["enc"]):
        di, do = enc_p[i], enc_p[i + 1]
        flat += [pad2(layer["lin"]["w"], di, do), padv(layer["lin"]["b"], do),
                 padv(layer["bn"]["g"], do), padv(layer["bn"]["beta"], do)]
    for i, layer in enumerate(p["dec"]):
        di, do = dec_p[i], dec_p[i + 1]
        flat += [pad2(layer["lin"]["w"], di, do), padv(layer["lin"]["b"], do)]
        if layer["bn"] is not None:
            flat += [padv(layer["bn"]["g"], do), padv(layer["bn"]["beta"], do)]
    flat += [padcw(p["invconv"]["w"], cin_p, cin_p), padv(p["invconv"]["b"], cin_p)]
    return tuple(flat)


# ----------------------------------------------------------------------------
# Pure-JAX reference (unpadded params; structural correctness check)
# ----------------------------------------------------------------------------
def _ref_conv(x, w, b):
    K = w.shape[0]
    pad = (K - 1) // 2
    N = x.shape[0]
    xp = jnp.pad(x, ((pad, pad), (0, 0)))
    out = b
    for k in range(K):
        out = out + jnp.dot(xp[k:k + N], w[k])
    return out


def _ref_bn(y, g, bta):
    m = jnp.mean(y, axis=0, keepdims=True)
    v = jnp.mean((y - m) ** 2, axis=0, keepdims=True)
    return (y - m) * jax.lax.rsqrt(v + EPS) * g + bta


def reference(x, p):
    relu = lambda t: jnp.maximum(t, 0.0)
    h = relu(_ref_bn(_ref_conv(x, p["conv1"]["w"], p["conv1"]["b"]), p["bn1"]["g"], p["bn1"]["beta"]))
    h = relu(_ref_bn(_ref_conv(h, p["conv2"]["w"], p["conv2"]["b"]), p["bn2"]["g"], p["bn2"]["beta"]))
    h = relu(_ref_bn(_ref_conv(h, p["conv3"]["w"], p["conv3"]["b"]), p["bn3"]["g"], p["bn3"]["beta"]))

    for i, layer in enumerate(p["enc"]):
        h = _ref_bn(jnp.dot(h, layer["lin"]["w"]) + layer["lin"]["b"],
                    layer["bn"]["g"], layer["bn"]["beta"])
        if i < len(p["enc"]) - 1:
            h = relu(h)
    encoded = h

    for layer in p["dec"]:
        h = jnp.dot(relu(h), layer["lin"]["w"]) + layer["lin"]["b"]
        if layer["bn"] is not None:
            h = _ref_bn(h, layer["bn"]["g"], layer["bn"]["beta"])
    decoded = h

    reconstruction = _ref_conv(decoded, p["invconv"]["w"], p["invconv"]["b"])
    return encoded, reconstruction


# ----------------------------------------------------------------------------
if __name__ == "__main__":
    # Small but MXU-friendly shapes: N=128 time steps (full sublane M),
    # input_dim=8, latent_dim=10 as in the script, conv_dim shrunk 512 -> 64.
    N, INPUT_DIM, LATENT_DIM, CONV_DIM = 128, 8, 10, 64

    key = jax.random.PRNGKey(0)
    xkey, pkey = jax.random.split(key)
    x = jax.random.normal(xkey, (N, INPUT_DIM), jnp.float32)

    params = init_params(pkey, INPUT_DIM, LATENT_DIM, CONV_DIM)
    flat = flatten_padded_params(params, INPUT_DIM, LATENT_DIM, CONV_DIM)
    forward = make_forward(N, INPUT_DIM, LATENT_DIM, CONV_DIM)

    encoded, recon = forward(x, flat)
    jax.block_until_ready((encoded, recon))

    assert encoded.shape == (N, LATENT_DIM), encoded.shape
    assert recon.shape == (N, INPUT_DIM), recon.shape

    enc_ref, rec_ref = reference(x, params)
    # DEFAULT (single-pass bf16) MXU precision in both kernel and reference:
    # tolerance reflects bf16 matmul rounding through 13 layers, not structure.
    assert jnp.allclose(encoded, enc_ref, atol=2e-2, rtol=2e-2), \
        float(jnp.max(jnp.abs(encoded - enc_ref)))
    assert jnp.allclose(recon, rec_ref, atol=2e-2, rtol=2e-2), \
        float(jnp.max(jnp.abs(recon - rec_ref)))

    print("KERNEL_OK")
</pallas_src>

<mosaic_0001>
module attributes {stable_mosaic.version = 11 : i64} {
  func.func @_fused_forward_kernel(%arg0: memref<128x128xf32, #tpu.memory_space<vmem>>, %arg1: memref<5x128x128xf32, #tpu.memory_space<vmem>>, %arg2: memref<1x128xf32, #tpu.memory_space<vmem>>, %arg3: memref<1x128xf32, #tpu.memory_space<vmem>>, %arg4: memref<1x128xf32, #tpu.memory_space<vmem>>, %arg5: memref<3x128x128xf32, #tpu.memory_space<vmem>>, %arg6: memref<1x128xf32, #tpu.memory_space<vmem>>, %arg7: memref<1x128xf32, #tpu.memory_space<vmem>>, %arg8: memref<1x128xf32, #tpu.memory_space<vmem>>, %arg9: memref<3x128x128xf32, #tpu.memory_space<vmem>>, %arg10: memref<1x128xf32, #tpu.memory_space<vmem>>, %arg11: memref<1x128xf32, #tpu.memory_space<vmem>>, %arg12: memref<1x128xf32, #tpu.memory_space<vmem>>, %arg13: memref<128x256xf32, #tpu.memory_space<vmem>>, %arg14: memref<1x256xf32, #tpu.memory_space<vmem>>, %arg15: memref<1x256xf32, #tpu.memory_space<vmem>>, %arg16: memref<1x256xf32, #tpu.memory_space<vmem>>, %arg17: memref<256x128xf32, #tpu.memory_space<vmem>>, %arg18: memref<1x128xf32, #tpu.memory_space<vmem>>, %arg19: memref<1x128xf32, #tpu.memory_space<vmem>>, %arg20: memref<1x128xf32, #tpu.memory_space<vmem>>, %arg21: memref<128x128xf32, #tpu.memory_space<vmem>>, %arg22: memref<1x128xf32, #tpu.memory_space<vmem>>, %arg23: memref<1x128xf32, #tpu.memory_space<vmem>>, %arg24: memref<1x128xf32, #tpu.memory_space<vmem>>, %arg25: memref<128x128xf32, #tpu.memory_space<vmem>>, %arg26: memref<1x128xf32, #tpu.memory_space<vmem>>, %arg27: memref<1x128xf32, #tpu.memory_space<vmem>>, %arg28: memref<1x128xf32, #tpu.memory_space<vmem>>, %arg29: memref<128x128xf32, #tpu.memory_space<vmem>>, %arg30: memref<1x128xf32, #tpu.memory_space<vmem>>, %arg31: memref<1x128xf32, #tpu.memory_space<vmem>>, %arg32: memref<1x128xf32, #tpu.memory_space<vmem>>, %arg33: memref<128x128xf32, #tpu.memory_space<vmem>>, %arg34: memref<1x128xf32, #tpu.memory_space<vmem>>, %arg35: memref<1x128xf32, #tpu.memory_space<vmem>>, %arg36: memref<1x128xf32, #tpu.memory_space<vmem>>, %arg37: memref<128x128xf32, #tpu.memory_space<vmem>>, %arg38: memref<1x128xf32, #tpu.memory_space<vmem>>, %arg39: memref<1x128xf32, #tpu.memory_space<vmem>>, %arg40: memref<1x128xf32, #tpu.memory_space<vmem>>, %arg41: memref<128x128xf32, #tpu.memory_space<vmem>>, %arg42: memref<1x128xf32, #tpu.memory_space<vmem>>, %arg43: memref<1x128xf32, #tpu.memory_space<vmem>>, %arg44: memref<1x128xf32, #tpu.memory_space<vmem>>, %arg45: memref<128x128xf32, #tpu.memory_space<vmem>>, %arg46: memref<1x128xf32, #tpu.memory_space<vmem>>, %arg47: memref<3x128x128xf32, #tpu.memory_space<vmem>>, %arg48: memref<1x128xf32, #tpu.memory_space<vmem>>, %arg49: memref<128x128xf32, #tpu.memory_space<vmem>>, %arg50: memref<128x128xf32, #tpu.memory_space<vmem>>, %arg51: memref<132x128xf32, #tpu.memory_space<vmem>>, %arg52: memref<130x128xf32, #tpu.memory_space<vmem>>, %arg53: memref<130x128xf32, #tpu.memory_space<vmem>>) attributes {dimension_semantics = [], scalar_prefetch = 0 : i64, scratch_operands = 3 : i64, tpu.core_type = #tpu.core_type<tc>} {
    %c0 = arith.constant 0 : index
    %c0_0 = arith.constant 0 : index
    %0 = vector.load %arg0[%c0, %c0_0] : memref<128x128xf32, #tpu.memory_space<vmem>>, vector<128x128xf32>
    %cst = arith.constant 0.000000e+00 : f32
    %1 = vector.broadcast %cst : f32 to vector<132x128xf32>
    %c0_1 = arith.constant 0 : index
    %c0_2 = arith.constant 0 : index
    %2 = vector.load %arg51[%c0_1, %c0_2] : memref<132x128xf32, #tpu.memory_space<vmem>>, vector<132x128xf32>
    tpu.vector_store %arg51[%c0_1, %c0_2], %1 {strides = array<i32>} : memref<132x128xf32, #tpu.memory_space<vmem>>, vector<132x128xf32>,
    %c2 = arith.constant 2 : index
    %c0_3 = arith.constant 0 : index
    %3 = vector.load %arg51[%c2, %c0_3] : memref<132x128xf32, #tpu.memory_space<vmem>>, vector<128x128xf32>
    tpu.vector_store %arg51[%c2, %c0_3], %0 {strides = array<i32>} : memref<132x128xf32, #tpu.memory_space<vmem>>, vector<128x128xf32>,
    %cst_4 = arith.constant 0.000000e+00 : f32
    %4 = vector.broadcast %cst_4 : f32 to vector<128x128xf32>
    %c0_5 = arith.constant 0 : index
    %c0_6 = arith.constant 0 : index
    %5 = vector.load %arg51[%c0_5, %c0_6] : memref<132x128xf32, #tpu.memory_space<vmem>>, vector<128x128xf32>
    %c0_7 = arith.constant 0 : index
    %c0_8 = arith.constant 0 : index
    %c0_9 = arith.constant 0 : index
    %6 = vector.load %arg1[%c0_7, %c0_8, %c0_9] : memref<5x128x128xf32, #tpu.memory_space<vmem>>, vector<1x128x128xf32>
    %7 = vector.shape_cast %6 : vector<1x128x128xf32> to vector<128x128xf32>
    %cst_10 = arith.constant dense<0.000000e+00> : vector<128x128xf32>
    %8 = tpu.matmul %5, %7, %cst_10 {dimension_numbers = #tpu.dot_dimension_numbers<[1], [0], [0], [1], [0, 0, 1, 1], [], []>} : vector<128x128xf32>, vector<128x128xf32>, vector<128x128xf32> -> vector<128x128xf32>
    %9 = arith.addf %4, %8 : vector<128x128xf32>
    %c1 = arith.constant 1 : index
    %c0_11 = arith.constant 0 : index
    %10 = vector.load %arg51[%c1, %c0_11] : memref<132x128xf32, #tpu.memory_space<vmem>>, vector<128x128xf32>
    %c1_12 = arith.constant 1 : index
    %c0_13 = arith.constant 0 : index
    %c0_14 = arith.constant 0 : index
    %11 = vector.load %arg1[%c1_12, %c0_13, %c0_14] : memref<5x128x128xf32, #tpu.memory_space<vmem>>, vector<1x128x128xf32>
    %12 = vector.shape_cast %11 : vector<1x128x128xf32> to vector<128x128xf32>
    %cst_15 = arith.constant dense<0.000000e+00> : vector<128x128xf32>
    %13 = tpu.matmul %10, %12, %cst_15 {dimension_numbers = #tpu.dot_dimension_numbers<[1], [0], [0], [1], [0, 0, 1, 1], [], []>} : vector<128x128xf32>, vector<128x128xf32>, vector<128x128xf32> -> vector<128x128xf32>
    %14 = arith.addf %9, %13 : vector<128x128xf32>
    %c2_16 = arith.constant 2 : index
    %c0_17 = arith.constant 0 : index
    %15 = vector.load %arg51[%c2_16, %c0_17] : memref<132x128xf32, #tpu.memory_space<vmem>>, vector<128x128xf32>
    %c2_18 = arith.constant 2 : index
    %c0_19 = arith.constant 0 : index
    %c0_20 = arith.constant 0 : index
    %16 = vector.load %arg1[%c2_18, %c0_19, %c0_20] : memref<5x128x128xf32, #tpu.memory_space<vmem>>, vector<1x128x128xf32>
    %17 = vector.shape_cast %16 : vector<1x128x128xf32> to vector<128x128xf32>
    %cst_21 = arith.constant dense<0.000000e+00> : vector<128x128xf32>
    %18 = tpu.matmul %15, %17, %cst_21 {dimension_numbers = #tpu.dot_dimension_numbers<[1], [0], [0], [1], [0, 0, 1, 1], [], []>} : vector<128x128xf32>, vector<128x128xf32>, vector<128x128xf32> -> vector<128x128xf32>
    %19 = arith.addf %14, %18 : vector<128x128xf32>
    %c3 = arith.constant 3 : index
    %c0_22 = arith.constant 0 : index
    %20 = vector.load %arg51[%c3, %c0_22] : memref<132x128xf32, #tpu.memory_space<vmem>>, vector<128x128xf32>
    %c3_23 = arith.constant 3 : index
    %c0_24 = arith.constant 0 : index
    %c0_25 = arith.constant 0 : index
    %21 = vector.load %arg1[%c3_23, %c0_24, %c0_25] : memref<5x128x128xf32, #tpu.memory_space<vmem>>, vector<1x128x128xf32>
    %22 = vector.shape_cast %21 : vector<1x128x128xf32> to vector<128x128xf32>
    %cst_26 = arith.constant dense<0.000000e+00> : vector<128x128xf32>
    %23 = tpu.matmul %20, %22, %cst_26 {dimension_numbers = #tpu.dot_dimension_numbers<[1], [0], [0], [1], [0, 0, 1, 1], [], []>} : vector<128x128xf32>, vector<128x128xf32>, vector<128x128xf32> -> vector<128x128xf32>
    %24 = arith.addf %19, %23 : vector<128x128xf32>
    %c4 = arith.constant 4 : index
    %c0_27 = arith.constant 0 : index
    %25 = vector.load %arg51[%c4, %c0_27] : memref<132x128xf32, #tpu.memory_space<vmem>>, vector<128x128xf32>
    %c4_28 = arith.constant 4 : index
    %c0_29 = arith.constant 0 : index
    %c0_30 = arith.constant 0 : index
    %26 = vector.load %arg1[%c4_28, %c0_29, %c0_30] : memref<5x128x128xf32, #tpu.memory_space<vmem>>, vector<1x128x128xf32>
    %27 = vector.shape_cast %26 : vector<1x128x128xf32> to vector<128x128xf32>
    %cst_31 = arith.constant dense<0.000000e+00> : vector<128x128xf32>
    %28 = tpu.matmul %25, %27, %cst_31 {dimension_numbers = #tpu.dot_dimension_numbers<[1], [0], [0], [1], [0, 0, 1, 1], [], []>} : vector<128x128xf32>, vector<128x128xf32>, vector<128x128xf32> -> vector<128x128xf32>
    %29 = arith.addf %24, %28 : vector<128x128xf32>
    %c0_32 = arith.constant 0 : index
    %c0_33 = arith.constant 0 : index
    %30 = vector.load %arg2[%c0_32, %c0_33] : memref<1x128xf32, #tpu.memory_space<vmem>>, vector<1x128xf32>
    %31 = vector.broadcast %30 : vector<1x128xf32> to vector<128x128xf32>
    %32 = arith.addf %29, %31 : vector<128x128xf32>
    %cst_34 = arith.constant dense<0.000000e+00> : vector<128xf32>
    %33 = vector.multi_reduction <add>, %32, %cst_34 [0] : vector<128x128xf32> to vector<128xf32>
    %34 = vector.shape_cast %33 : vector<128xf32> to vector<1x128xf32>
    %cst_35 = arith.constant 1.280000e+02 : f32
    %35 = vector.broadcast %cst_35 : f32 to vector<1x128xf32>
    %36 = arith.divf %34, %35 : vector<1x128xf32>
    %37 = vector.broadcast %36 : vector<1x128xf32> to vector<128x128xf32>
    %38 = arith.subf %32, %37 : vector<128x128xf32>
    %39 = arith.mulf %38, %38 : vector<128x128xf32>
    %cst_36 = arith.constant dense<0.000000e+00> : vector<128xf32>
    %40 = vector.multi_reduction <add>, %39, %cst_36 [0] : vector<128x128xf32> to vector<128xf32>
    %41 = vector.shape_cast %40 : vector<128xf32> to vector<1x128xf32>
    %cst_37 = arith.constant 1.280000e+02 : f32
    %42 = vector.broadcast %cst_37 : f32 to vector<1x128xf32>
    %43 = arith.divf %41, %42 : vector<1x128xf32>
    %44 = vector.broadcast %36 : vector<1x128xf32> to vector<128x128xf32>
    %45 = arith.subf %32, %44 : vector<128x128xf32>
    %cst_38 = arith.constant 9.99999974E-6 : f32
    %46 = vector.broadcast %cst_38 : f32 to vector<1x128xf32>
    %47 = arith.addf %43, %46 : vector<1x128xf32>
    %48 = math.rsqrt %47 : vector<1x128xf32>
    %49 = vector.broadcast %48 : vector<1x128xf32> to vector<128x128xf32>
    %50 = arith.mulf %45, %49 : vector<128x128xf32>
    %c0_39 = arith.constant 0 : index
    %c0_40 = arith.constant 0 : index
    %51 = vector.load %arg3[%c0_39, %c0_40] : memref<1x128xf32, #tpu.memory_space<vmem>>, vector<1x128xf32>
    %52 = vector.broadcast %51 : vector<1x128xf32> to vector<128x128xf32>
    %53 = arith.mulf %50, %52 : vector<128x128xf32>
    %c0_41 = arith.constant 0 : index
    %c0_42 = arith.constant 0 : index
    %54 = vector.load %arg4[%c0_41, %c0_42] : memref<1x128xf32, #tpu.memory_space<vmem>>, vector<1x128xf32>
    %55 = vector.broadcast %54 : vector<1x128xf32> to vector<128x128xf32>
    %56 = arith.addf %53, %55 : vector<128x128xf32>
    %cst_43 = arith.constant 0.000000e+00 : f32
    %57 = vector.broadcast %cst_43 : f32 to vector<128x128xf32>
    %58 = arith.maximumf %56, %57 : vector<128x128xf32>
    %cst_44 = arith.constant 0.000000e+00 : f32
    %59 = vector.broadcast %cst_44 : f32 to vector<130x128xf32>
    %c0_45 = arith.constant 0 : index
    %c0_46 = arith.constant 0 : index
    %60 = vector.load %arg52[%c0_45, %c0_46] : memref<130x128xf32, #tpu.memory_space<vmem>>, vector<130x128xf32>
    tpu.vector_store %arg52[%c0_45, %c0_46], %59 {strides = array<i32>} : memref<130x128xf32, #tpu.memory_space<vmem>>, vector<130x128xf32>,
    %c1_47 = arith.constant 1 : index
    %c0_48 = arith.constant 0 : index
    %61 = vector.load %arg52[%c1_47, %c0_48] : memref<130x128xf32, #tpu.memory_space<vmem>>, vector<128x128xf32>
    tpu.vector_store %arg52[%c1_47, %c0_48], %58 {strides = array<i32>} : memref<130x128xf32, #tpu.memory_space<vmem>>, vector<128x128xf32>,
    %cst_49 = arith.constant 0.000000e+00 : f32
    %62 = vector.broadcast %cst_49 : f32 to vector<128x128xf32>
    %c0_50 = arith.constant 0 : index
    %c0_51 = arith.constant 0 : index
    %63 = vector.load %arg52[%c0_50, %c0_51] : memref<130x128xf32, #tpu.memory_space<vmem>>, vector<128x128xf32>
    %c0_52 = arith.constant 0 : index
    %c0_53 = arith.constant 0 : index
    %c0_54 = arith.constant 0 : index
    %64 = vector.load %arg5[%c0_52, %c0_53, %c0_54] : memref<3x128x128xf32, #tpu.memory_space<vmem>>, vector<1x128x128xf32>
    %65 = vector.shape_cast %64 : vector<1x128x128xf32> to vector<128x128xf32>
    %cst_55 = arith.constant dense<0.000000e+00> : vector<128x128xf32>
    %66 = tpu.matmul %63, %65, %cst_55 {dimension_numbers = #tpu.dot_dimension_numbers<[1], [0], [0], [1], [0, 0, 1, 1], [], []>} : vector<128x128xf32>, vector<128x128xf32>, vector<128x128xf32> -> vector<128x128xf32>
    %67 = arith.addf %62, %66 : vector<128x128xf32>
    %c1_56 = arith.constant 1 : index
    %c0_57 = arith.constant 0 : index
    %68 = vector.load %arg52[%c1_56, %c0_57] : memref<130x128xf32, #tpu.memory_space<vmem>>, vector<128x128xf32>
    %c1_58 = arith.constant 1 : index
    %c0_59 = arith.constant 0 : index
    %c0_60 = arith.constant 0 : index
    %69 = vector.load %arg5[%c1_58, %c0_59, %c0_60] : memref<3x128x128xf32, #tpu.memory_space<vmem>>, vector<1x128x128xf32>
    %70 = vector.shape_cast %69 : vector<1x128x128xf32> to vector<128x128xf32>
    %cst_61 = arith.constant dense<0.000000e+00> : vector<128x128xf32>
    %71 = tpu.matmul %68, %70, %cst_61 {dimension_numbers = #tpu.dot_dimension_numbers<[1], [0], [0], [1], [0, 0, 1, 1], [], []>} : vector<128x128xf32>, vector<128x128xf32>, vector<128x128xf32> -> vector<128x128xf32>
    %72 = arith.addf %67, %71 : vector<128x128xf32>
    %c2_62 = arith.constant 2 : index
    %c0_63 = arith.constant 0 : index
    %73 = vector.load %arg52[%c2_62, %c0_63] : memref<130x128xf32, #tpu.memory_space<vmem>>, vector<128x128xf32>
    %c2_64 = arith.constant 2 : index
    %c0_65 = arith.constant 0 : index
    %c0_66 = arith.constant 0 : index
    %74 = vector.load %arg5[%c2_64, %c0_65, %c0_66] : memref<3x128x128xf32, #tpu.memory_space<vmem>>, vector<1x128x128xf32>
    %75 = vector.shape_cast %74 : vector<1x128x128xf32> to vector<128x128xf32>
    %cst_67 = arith.constant dense<0.000000e+00> : vector<128x128xf32>
    %76 = tpu.matmul %73, %75, %cst_67 {dimension_numbers = #tpu.dot_dimension_numbers<[1], [0], [0], [1], [0, 0, 1, 1], [], []>} : vector<128x128xf32>, vector<128x128xf32>, vector<128x128xf32> -> vector<128x128xf32>
    %77 = arith.addf %72, %76 : vector<128x128xf32>
    %c0_68 = arith.constant 0 : index
    %c0_69 = arith.constant 0 : index
    %78 = vector.load %arg6[%c0_68, %c0_69] : memref<1x128xf32, #tpu.memory_space<vmem>>, vector<1x128xf32>
    %79 = vector.broadcast %78 : vector<1x128xf32> to vector<128x128xf32>
    %80 = arith.addf %77, %79 : vector<128x128xf32>
    %cst_70 = arith.constant dense<0.000000e+00> : vector<128xf32>
    %81 = vector.multi_reduction <add>, %80, %cst_70 [0] : vector<128x128xf32> to vector<128xf32>
    %82 = vector.shape_cast %81 : vector<128xf32> to vector<1x128xf32>
    %cst_71 = arith.constant 1.280000e+02 : f32
    %83 = vector.broadcast %cst_71 : f32 to vector<1x128xf32>
    %84 = arith.divf %82, %83 : vector<1x128xf32>
    %85 = vector.broadcast %84 : vector<1x128xf32> to vector<128x128xf32>
    %86 = arith.subf %80, %85 : vector<128x128xf32>
    %87 = arith.mulf %86, %86 : vector<128x128xf32>
    %cst_72 = arith.constant dense<0.000000e+00> : vector<128xf32>
    %88 = vector.multi_reduction <add>, %87, %cst_72 [0] : vector<128x128xf32> to vector<128xf32>
    %89 = vector.shape_cast %88 : vector<128xf32> to vector<1x128xf32>
    %cst_73 = arith.constant 1.280000e+02 : f32
    %90 = vector.broadcast %cst_73 : f32 to vector<1x128xf32>
    %91 = arith.divf %89, %90 : vector<1x128xf32>
    %92 = vector.broadcast %84 : vector<1x128xf32> to vector<128x128xf32>
    %93 = arith.subf %80, %92 : vector<128x128xf32>
    %cst_74 = arith.constant 9.99999974E-6 : f32
    %94 = vector.broadcast %cst_74 : f32 to vector<1x128xf32>
    %95 = arith.addf %91, %94 : vector<1x128xf32>
    %96 = math.rsqrt %95 : vector<1x128xf32>
    %97 = vector.broadcast %96 : vector<1x128xf32> to vector<128x128xf32>
    %98 = arith.mulf %93, %97 : vector<128x128xf32>
    %c0_75 = arith.constant 0 : index
    %c0_76 = arith.constant 0 : index
    %99 = vector.load %arg7[%c0_75, %c0_76] : memref<1x128xf32, #tpu.memory_space<vmem>>, vector<1x128xf32>
    %100 = vector.broadcast %99 : vector<1x128xf32> to vector<128x128xf32>
    %101 = arith.mulf %98, %100 : vector<128x128xf32>
    %c0_77 = arith.constant 0 : index
    %c0_78 = arith.constant 0 : index
    %102 = vector.load %arg8[%c0_77, %c0_78] : memref<1x128xf32, #tpu.memory_space<vmem>>, vector<1x128xf32>
    %103 = vector.broadcast %102 : vector<1x128xf32> to vector<128x128xf32>
    %104 = arith.addf %101, %103 : vector<128x128xf32>
    %cst_79 = arith.constant 0.000000e+00 : f32
    %105 = vector.broadcast %cst_79 : f32 to vector<128x128xf32>
    %106 = arith.maximumf %104, %105 : vector<128x128xf32>
    %cst_80 = arith.constant 0.000000e+00 : f32
    %107 = vector.broadcast %cst_80 : f32 to vector<130x128xf32>
    %c0_81 = arith.constant 0 : index
    %c0_82 = arith.constant 0 : index
    %108 = vector.load %arg52[%c0_81, %c0_82] : memref<130x128xf32, #tpu.memory_space<vmem>>, vector<130x128xf32>
    tpu.vector_store %arg52[%c0_81, %c0_82], %107 {strides = array<i32>} : memref<130x128xf32, #tpu.memory_space<vmem>>, vector<130x128xf32>,
    %c1_83 = arith.constant 1 : index
    %c0_84 = arith.constant 0 : index
    %109 = vector.load %arg52[%c1_83, %c0_84] : memref<130x128xf32, #tpu.memory_space<vmem>>, vector<128x128xf32>
    tpu.vector_store %arg52[%c1_83, %c0_84], %106 {strides = array<i32>} : memref<130x128xf32, #tpu.memory_space<vmem>>, vector<128x128xf32>,
    %cst_85 = arith.constant 0.000000e+00 : f32
    %110 = vector.broadcast %cst_85 : f32 to vector<128x128xf32>
    %c0_86 = arith.constant 0 : index
    %c0_87 = arith.constant 0 : index
    %111 = vector.load %arg52[%c0_86, %c0_87] : memref<130x128xf32, #tpu.memory_space<vmem>>, vector<128x128xf32>
    %c0_88 = arith.constant 0 : index
    %c0_89 = arith.constant 0 : index
    %c0_90 = arith.constant 0 : index
    %112 = vector.load %arg9[%c0_88, %c0_89, %c0_90] : memref<3x128x128xf32, #tpu.memory_space<vmem>>, vector<1x128x128xf32>
    %113 = vector.shape_cast %112 : vector<1x128x128xf32> to vector<128x128xf32>
    %cst_91 = arith.constant dense<0.000000e+00> : vector<128x128xf32>
    %114 = tpu.matmul %111, %113, %cst_91 {dimension_numbers = #tpu.dot_dimension_numbers<[1], [0], [0], [1], [0, 0, 1, 1], [], []>} : vector<128x128xf32>, vector<128x128xf32>, vector<128x128xf32> -> vector<128x128xf32>
    %115 = arith.addf %110, %114 : vector<128x128xf32>
    %c1_92 = arith.constant 1 : index
    %c0_93 = arith.constant 0 : index
    %116 = vector.load %arg52[%c1_92, %c0_93] : memref<130x128xf32, #tpu.memory_space<vmem>>, vector<128x128xf32>
    %c1_94 = arith.constant 1 : index
    %c0_95 = arith.constant 0 : index
    %c0_96 = arith.constant 0 : index
    %117 = vector.load %arg9[%c1_94, %c0_95, %c0_96] : memref<3x128x128xf32, #tpu.memory_space<vmem>>, vector<1x128x128xf32>
    %118 = vector.shape_cast %117 : vector<1x128x128xf32> to vector<128x128xf32>
    %cst_97 = arith.constant dense<0.000000e+00> : vector<128x128xf32>
    %119 = tpu.matmul %116, %118, %cst_97 {dimension_numbers = #tpu.dot_dimension_numbers<[1], [0], [0], [1], [0, 0, 1, 1], [], []>} : vector<128x128xf32>, vector<128x128xf32>, vector<128x128xf32> -> vector<128x128xf32>
    %120 = arith.addf %115, %119 : vector<128x128xf32>
    %c2_98 = arith.constant 2 : index
    %c0_99 = arith.constant 0 : index
    %121 = vector.load %arg52[%c2_98, %c0_99] : memref<130x128xf32, #tpu.memory_space<vmem>>, vector<128x128xf32>
    %c2_100 = arith.constant 2 : index
    %c0_101 = arith.constant 0 : index
    %c0_102 = arith.constant 0 : index
    %122 = vector.load %arg9[%c2_100, %c0_101, %c0_102] : memref<3x128x128xf32, #tpu.memory_space<vmem>>, vector<1x128x128xf32>
    %123 = vector.shape_cast %122 : vector<1x128x128xf32> to vector<128x128xf32>
    %cst_103 = arith.constant dense<0.000000e+00> : vector<128x128xf32>
    %124 = tpu.matmul %121, %123, %cst_103 {dimension_numbers = #tpu.dot_dimension_numbers<[1], [0], [0], [1], [0, 0, 1, 1], [], []>} : vector<128x128xf32>, vector<128x128xf32>, vector<128x128xf32> -> vector<128x128xf32>
    %125 = arith.addf %120, %124 : vector<128x128xf32>
    %c0_104 = arith.constant 0 : index
    %c0_105 = arith.constant 0 : index
    %126 = vector.load %arg10[%c0_104, %c0_105] : memref<1x128xf32, #tpu.memory_space<vmem>>, vector<1x128xf32>
    %127 = vector.broadcast %126 : vector<1x128xf32> to vector<128x128xf32>
    %128 = arith.addf %125, %127 : vector<128x128xf32>
    %cst_106 = arith.constant dense<0.000000e+00> : vector<128xf32>
    %129 = vector.multi_reduction <add>, %128, %cst_106 [0] : vector<128x128xf32> to vector<128xf32>
    %130 = vector.shape_cast %129 : vector<128xf32> to vector<1x128xf32>
    %cst_107 = arith.constant 1.280000e+02 : f32
    %131 = vector.broadcast %cst_107 : f32 to vector<1x128xf32>
    %132 = arith.divf %130, %131 : vector<1x128xf32>
    %133 = vector.broadcast %132 : vector<1x128xf32> to vector<128x128xf32>
    %134 = arith.subf %128, %133 : vector<128x128xf32>
    %135 = arith.mulf %134, %134 : vector<128x128xf32>
    %cst_108 = arith.constant dense<0.000000e+00> : vector<128xf32>
    %136 = vector.multi_reduction <add>, %135, %cst_108 [0] : vector<128x128xf32> to vector<128xf32>
    %137 = vector.shape_cast %136 : vector<128xf32> to vector<1x128xf32>
    %cst_109 = arith.constant 1.280000e+02 : f32
    %138 = vector.broadcast %cst_109 : f32 to vector<1x128xf32>
    %139 = arith.divf %137, %138 : vector<1x128xf32>
    %140 = vector.broadcast %132 : vector<1x128xf32> to vector<128x128xf32>
    %141 = arith.subf %128, %140 : vector<128x128xf32>
    %cst_110 = arith.constant 9.99999974E-6 : f32
    %142 = vector.broadcast %cst_110 : f32 to vector<1x128xf32>
    %143 = arith.addf %139, %142 : vector<1x128xf32>
    %144 = math.rsqrt %143 : vector<1x128xf32>
    %145 = vector.broadcast %144 : vector<1x128xf32> to vector<128x128xf32>
    %146 = arith.mulf %141, %145 : vector<128x128xf32>
    %c0_111 = arith.constant 0 : index
    %c0_112 = arith.constant 0 : index
    %147 = vector.load %arg11[%c0_111, %c0_112] : memref<1x128xf32, #tpu.memory_space<vmem>>, vector<1x128xf32>
    %148 = vector.broadcast %147 : vector<1x128xf32> to vector<128x128xf32>
    %149 = arith.mulf %146, %148 : vector<128x128xf32>
    %c0_113 = arith.constant 0 : index
    %c0_114 = arith.constant 0 : index
    %150 = vector.load %arg12[%c0_113, %c0_114] : memref<1x128xf32, #tpu.memory_space<vmem>>, vector<1x128xf32>
    %151 = vector.broadcast %150 : vector<1x128xf32> to vector<128x128xf32>
    %152 = arith.addf %149, %151 : vector<128x128xf32>
    %cst_115 = arith.constant 0.000000e+00 : f32
    %153 = vector.broadcast %cst_115 : f32 to vector<128x128xf32>
    %154 = arith.maximumf %152, %153 : vector<128x128xf32>
    %c0_116 = arith.constant 0 : index
    %c0_117 = arith.constant 0 : index
    %155 = vector.load %arg13[%c0_116, %c0_117] : memref<128x256xf32, #tpu.memory_space<vmem>>, vector<128x256xf32>
    %cst_118 = arith.constant dense<0.000000e+00> : vector<128x256xf32>
    %156 = tpu.matmul %154, %155, %cst_118 {dimension_numbers = #tpu.dot_dimension_numbers<[1], [0], [0], [1], [0, 0, 1, 1], [], []>} : vector<128x128xf32>, vector<128x256xf32>, vector<128x256xf32> -> vector<128x256xf32>
    %c0_119 = arith.constant 0 : index
    %c0_120 = arith.constant 0 : index
    %157 = vector.load %arg14[%c0_119, %c0_120] : memref<1x256xf32, #tpu.memory_space<vmem>>, vector<1x256xf32>
    %158 = vector.broadcast %157 : vector<1x256xf32> to vector<128x256xf32>
    %159 = arith.addf %156, %158 : vector<128x256xf32>
    %cst_121 = arith.constant dense<0.000000e+00> : vector<256xf32>
    %160 = vector.multi_reduction <add>, %159, %cst_121 [0] : vector<128x256xf32> to vector<256xf32>
    %161 = vector.shape_cast %160 : vector<256xf32> to vector<1x256xf32>
    %cst_122 = arith.constant 1.280000e+02 : f32
    %162 = vector.broadcast %cst_122 : f32 to vector<1x256xf32>
    %163 = arith.divf %161, %162 : vector<1x256xf32>
    %164 = vector.broadcast %163 : vector<1x256xf32> to vector<128x256xf32>
    %165 = arith.subf %159, %164 : vector<128x256xf32>
    %166 = arith.mulf %165, %165 : vector<128x256xf32>
    %cst_123 = arith.constant dense<0.000000e+00> : vector<256xf32>
    %167 = vector.multi_reduction <add>, %166, %cst_123 [0] : vector<128x256xf32> to vector<256xf32>
    %168 = vector.shape_cast %167 : vector<256xf32> to vector<1x256xf32>
    %cst_124 = arith.constant 1.280000e+02 : f32
    %169 = vector.broadcast %cst_124 : f32 to vector<1x256xf32>
    %170 = arith.divf %168, %169 : vector<1x256xf32>
    %171 = vector.broadcast %163 : vector<1x256xf32> to vector<128x256xf32>
    %172 = arith.subf %159, %171 : vector<128x256xf32>
    %cst_125 = arith.constant 9.99999974E-6 : f32
    %173 = vector.broadcast %cst_125 : f32 to vector<1x256xf32>
    %174 = arith.addf %170, %173 : vector<1x256xf32>
    %175 = math.rsqrt %174 : vector<1x256xf32>
    %176 = vector.broadcast %175 : vector<1x256xf32> to vector<128x256xf32>
    %177 = arith.mulf %172, %176 : vector<128x256xf32>
    %c0_126 = arith.constant 0 : index
    %c0_127 = arith.constant 0 : index
    %178 = vector.load %arg15[%c0_126, %c0_127] : memref<1x256xf32, #tpu.memory_space<vmem>>, vector<1x256xf32>
    %179 = vector.broadcast %178 : vector<1x256xf32> to vector<128x256xf32>
    %180 = arith.mulf %177, %179 : vector<128x256xf32>
    %c0_128 = arith.constant 0 : index
    %c0_129 = arith.constant 0 : index
    %181 = vector.load %arg16[%c0_128, %c0_129] : memref<1x256xf32, #tpu.memory_space<vmem>>, vector<1x256xf32>
    %182 = vector.broadcast %181 : vector<1x256xf32> to vector<128x256xf32>
    %183 = arith.addf %180, %182 : vector<128x256xf32>
    %cst_130 = arith.constant 0.000000e+00 : f32
    %184 = vector.broadcast %cst_130 : f32 to vector<128x256xf32>
    %185 = arith.maximumf %183, %184 : vector<128x256xf32>
    %c0_131 = arith.constant 0 : index
    %c0_132 = arith.constant 0 : index
    %186 = vector.load %arg17[%c0_131, %c0_132] : memref<256x128xf32, #tpu.memory_space<vmem>>, vector<256x128xf32>
    %cst_133 = arith.constant dense<0.000000e+00> : vector<128x128xf32>
    %187 = tpu.matmul %185, %186, %cst_133 {dimension_numbers = #tpu.dot_dimension_numbers<[1], [0], [0], [1], [0, 0, 1, 1], [], []>} : vector<128x256xf32>, vector<256x128xf32>, vector<128x128xf32> -> vector<128x128xf32>
    %c0_134 = arith.constant 0 : index
    %c0_135 = arith.constant 0 : index
    %188 = vector.load %arg18[%c0_134, %c0_135] : memref<1x128xf32, #tpu.memory_space<vmem>>, vector<1x128xf32>
    %189 = vector.broadcast %188 : vector<1x128xf32> to vector<128x128xf32>
    %190 = arith.addf %187, %189 : vector<128x128xf32>
    %cst_136 = arith.constant dense<0.000000e+00> : vector<128xf32>
    %191 = vector.multi_reduction <add>, %190, %cst_136 [0] : vector<128x128xf32> to vector<128xf32>
    %192 = vector.shape_cast %191 : vector<128xf32> to vector<1x128xf32>
    %cst_137 = arith.constant 1.280000e+02 : f32
    %193 = vector.broadcast %cst_137 : f32 to vector<1x128xf32>
    %194 = arith.divf %192, %193 : vector<1x128xf32>
    %195 = vector.broadcast %194 : vector<1x128xf32> to vector<128x128xf32>
    %196 = arith.subf %190, %195 : vector<128x128xf32>
    %197 = arith.mulf %196, %196 : vector<128x128xf32>
    %cst_138 = arith.constant dense<0.000000e+00> : vector<128xf32>
    %198 = vector.multi_reduction <add>, %197, %cst_138 [0] : vector<128x128xf32> to vector<128xf32>
    %199 = vector.shape_cast %198 : vector<128xf32> to vector<1x128xf32>
    %cst_139 = arith.constant 1.280000e+02 : f32
    %200 = vector.broadcast %cst_139 : f32 to vector<1x128xf32>
    %201 = arith.divf %199, %200 : vector<1x128xf32>
    %202 = vector.broadcast %194 : vector<1x128xf32> to vector<128x128xf32>
    %203 = arith.subf %190, %202 : vector<128x128xf32>
    %cst_140 = arith.constant 9.99999974E-6 : f32
    %204 = vector.broadcast %cst_140 : f32 to vector<1x128xf32>
    %205 = arith.addf %201, %204 : vector<1x128xf32>
    %206 = math.rsqrt %205 : vector<1x128xf32>
    %207 = vector.broadcast %206 : vector<1x128xf32> to vector<128x128xf32>
    %208 = arith.mulf %203, %207 : vector<128x128xf32>
    %c0_141 = arith.constant 0 : index
    %c0_142 = arith.constant 0 : index
    %209 = vector.load %arg19[%c0_141, %c0_142] : memref<1x128xf32, #tpu.memory_space<vmem>>, vector<1x128xf32>
    %210 = vector.broadcast %209 : vector<1x128xf32> to vector<128x128xf32>
    %211 = arith.mulf %208, %210 : vector<128x128xf32>
    %c0_143 = arith.constant 0 : index
    %c0_144 = arith.constant 0 : index
    %212 = vector.load %arg20[%c0_143, %c0_144] : memref<1x128xf32, #tpu.memory_space<vmem>>, vector<1x128xf32>
    %213 = vector.broadcast %212 : vector<1x128xf32> to vector<128x128xf32>
    %214 = arith.addf %211, %213 : vector<128x128xf32>
    %cst_145 = arith.constant 0.000000e+00 : f32
    %215 = vector.broadcast %cst_145 : f32 to vector<128x128xf32>
    %216 = arith.maximumf %214, %215 : vector<128x128xf32>
    %c0_146 = arith.constant 0 : index
    %c0_147 = arith.constant 0 : index
    %217 = vector.load %arg21[%c0_146, %c0_147] : memref<128x128xf32, #tpu.memory_space<vmem>>, vector<128x128xf32>
    %cst_148 = arith.constant dense<0.000000e+00> : vector<128x128xf32>
    %218 = tpu.matmul %216, %217, %cst_148 {dimension_numbers = #tpu.dot_dimension_numbers<[1], [0], [0], [1], [0, 0, 1, 1], [], []>} : vector<128x128xf32>, vector<128x128xf32>, vector<128x128xf32> -> vector<128x128xf32>
    %c0_149 = arith.constant 0 : index
    %c0_150 = arith.constant 0 : index
    %219 = vector.load %arg22[%c0_149, %c0_150] : memref<1x128xf32, #tpu.memory_space<vmem>>, vector<1x128xf32>
    %220 = vector.broadcast %219 : vector<1x128xf32> to vector<128x128xf32>
    %221 = arith.addf %218, %220 : vector<128x128xf32>
    %cst_151 = arith.constant dense<0.000000e+00> : vector<128xf32>
    %222 = vector.multi_reduction <add>, %221, %cst_151 [0] : vector<128x128xf32> to vector<128xf32>
    %223 = vector.shape_cast %222 : vector<128xf32> to vector<1x128xf32>
    %cst_152 = arith.constant 1.280000e+02 : f32
    %224 = vector.broadcast %cst_152 : f32 to vector<1x128xf32>
    %225 = arith.divf %223, %224 : vector<1x128xf32>
    %226 = vector.broadcast %225 : vector<1x128xf32> to vector<128x128xf32>
    %227 = arith.subf %221, %226 : vector<128x128xf32>
    %228 = arith.mulf %227, %227 : vector<128x128xf32>
    %cst_153 = arith.constant dense<0.000000e+00> : vector<128xf32>
    %229 = vector.multi_reduction <add>, %228, %cst_153 [0] : vector<128x128xf32> to vector<128xf32>
    %230 = vector.shape_cast %229 : vector<128xf32> to vector<1x128xf32>
    %cst_154 = arith.constant 1.280000e+02 : f32
    %231 = vector.broadcast %cst_154 : f32 to vector<1x128xf32>
    %232 = arith.divf %230, %231 : vector<1x128xf32>
    %233 = vector.broadcast %225 : vector<1x128xf32> to vector<128x128xf32>
    %234 = arith.subf %221, %233 : vector<128x128xf32>
    %cst_155 = arith.constant 9.99999974E-6 : f32
    %235 = vector.broadcast %cst_155 : f32 to vector<1x128xf32>
    %236 = arith.addf %232, %235 : vector<1x128xf32>
    %237 = math.rsqrt %236 : vector<1x128xf32>
    %238 = vector.broadcast %237 : vector<1x128xf32> to vector<128x128xf32>
    %239 = arith.mulf %234, %238 : vector<128x128xf32>
    %c0_156 = arith.constant 0 : index
    %c0_157 = arith.constant 0 : index
    %240 = vector.load %arg23[%c0_156, %c0_157] : memref<1x128xf32, #tpu.memory_space<vmem>>, vector<1x128xf32>
    %241 = vector.broadcast %240 : vector<1x128xf32> to vector<128x128xf32>
    %242 = arith.mulf %239, %241 : vector<128x128xf32>
    %c0_158 = arith.constant 0 : index
    %c0_159 = arith.constant 0 : index
    %243 = vector.load %arg24[%c0_158, %c0_159] : memref<1x128xf32, #tpu.memory_space<vmem>>, vector<1x128xf32>
    %244 = vector.broadcast %243 : vector<1x128xf32> to vector<128x128xf32>
    %245 = arith.addf %242, %244 : vector<128x128xf32>
    %cst_160 = arith.constant 0.000000e+00 : f32
    %246 = vector.broadcast %cst_160 : f32 to vector<128x128xf32>
    %247 = arith.maximumf %245, %246 : vector<128x128xf32>
    %c0_161 = arith.constant 0 : index
    %c0_162 = arith.constant 0 : index
    %248 = vector.load %arg25[%c0_161, %c0_162] : memref<128x128xf32, #tpu.memory_space<vmem>>, vector<128x128xf32>
    %cst_163 = arith.constant dense<0.000000e+00> : vector<128x128xf32>
    %249 = tpu.matmul %247, %248, %cst_163 {dimension_numbers = #tpu.dot_dimension_numbers<[1], [0], [0], [1], [0, 0, 1, 1], [], []>} : vector<128x128xf32>, vector<128x128xf32>, vector<128x128xf32> -> vector<128x128xf32>
    %c0_164 = arith.constant 0 : index
    %c0_165 = arith.constant 0 : index
    %250 = vector.load %arg26[%c0_164, %c0_165] : memref<1x128xf32, #tpu.memory_space<vmem>>, vector<1x128xf32>
    %251 = vector.broadcast %250 : vector<1x128xf32> to vector<128x128xf32>
    %252 = arith.addf %249, %251 : vector<128x128xf32>
    %cst_166 = arith.constant dense<0.000000e+00> : vector<128xf32>
    %253 = vector.multi_reduction <add>, %252, %cst_166 [0] : vector<128x128xf32> to vector<128xf32>
    %254 = vector.shape_cast %253 : vector<128xf32> to vector<1x128xf32>
    %cst_167 = arith.constant 1.280000e+02 : f32
    %255 = vector.broadcast %cst_167 : f32 to vector<1x128xf32>
    %256 = arith.divf %254, %255 : vector<1x128xf32>
    %257 = vector.broadcast %256 : vector<1x128xf32> to vector<128x128xf32>
    %258 = arith.subf %252, %257 : vector<128x128xf32>
    %259 = arith.mulf %258, %258 : vector<128x128xf32>
    %cst_168 = arith.constant dense<0.000000e+00> : vector<128xf32>
    %260 = vector.multi_reduction <add>, %259, %cst_168 [0] : vector<128x128xf32> to vector<128xf32>
    %261 = vector.shape_cast %260 : vector<128xf32> to vector<1x128xf32>
    %cst_169 = arith.constant 1.280000e+02 : f32
    %262 = vector.broadcast %cst_169 : f32 to vector<1x128xf32>
    %263 = arith.divf %261, %262 : vector<1x128xf32>
    %264 = vector.broadcast %256 : vector<1x128xf32> to vector<128x128xf32>
    %265 = arith.subf %252, %264 : vector<128x128xf32>
    %cst_170 = arith.constant 9.99999974E-6 : f32
    %266 = vector.broadcast %cst_170 : f32 to vector<1x128xf32>
    %267 = arith.addf %263, %266 : vector<1x128xf32>
    %268 = math.rsqrt %267 : vector<1x128xf32>
    %269 = vector.broadcast %268 : vector<1x128xf32> to vector<128x128xf32>
    %270 = arith.mulf %265, %269 : vector<128x128xf32>
    %c0_171 = arith.constant 0 : index
    %c0_172 = arith.constant 0 : index
    %271 = vector.load %arg27[%c0_171, %c0_172] : memref<1x128xf32, #tpu.memory_space<vmem>>, vector<1x128xf32>
    %272 = vector.broadcast %271 : vector<1x128xf32> to vector<128x128xf32>
    %273 = arith.mulf %270, %272 : vector<128x128xf32>
    %c0_173 = arith.constant 0 : index
    %c0_174 = arith.constant 0 : index
    %274 = vector.load %arg28[%c0_173, %c0_174] : memref<1x128xf32, #tpu.memory_space<vmem>>, vector<1x128xf32>
    %275 = vector.broadcast %274 : vector<1x128xf32> to vector<128x128xf32>
    %276 = arith.addf %273, %275 : vector<128x128xf32>
    %cst_175 = arith.constant 0.000000e+00 : f32
    %277 = vector.broadcast %cst_175 : f32 to vector<128x128xf32>
    %278 = arith.maximumf %276, %277 : vector<128x128xf32>
    %c0_176 = arith.constant 0 : index
    %c0_177 = arith.constant 0 : index
    %279 = vector.load %arg29[%c0_176, %c0_177] : memref<128x128xf32, #tpu.memory_space<vmem>>, vector<128x128xf32>
    %cst_178 = arith.constant dense<0.000000e+00> : vector<128x128xf32>
    %280 = tpu.matmul %278, %279, %cst_178 {dimension_numbers = #tpu.dot_dimension_numbers<[1], [0], [0], [1], [0, 0, 1, 1], [], []>} : vector<128x128xf32>, vector<128x128xf32>, vector<128x128xf32> -> vector<128x128xf32>
    %c0_179 = arith.constant 0 : index
    %c0_180 = arith.constant 0 : index
    %281 = vector.load %arg30[%c0_179, %c0_180] : memref<1x128xf32, #tpu.memory_space<vmem>>, vector<1x128xf32>
    %282 = vector.broadcast %281 : vector<1x128xf32> to vector<128x128xf32>
    %283 = arith.addf %280, %282 : vector<128x128xf32>
    %cst_181 = arith.constant dense<0.000000e+00> : vector<128xf32>
    %284 = vector.multi_reduction <add>, %283, %cst_181 [0] : vector<128x128xf32> to vector<128xf32>
    %285 = vector.shape_cast %284 : vector<128xf32> to vector<1x128xf32>
    %cst_182 = arith.constant 1.280000e+02 : f32
    %286 = vector.broadcast %cst_182 : f32 to vector<1x128xf32>
    %287 = arith.divf %285, %286 : vector<1x128xf32>
    %288 = vector.broadcast %287 : vector<1x128xf32> to vector<128x128xf32>
    %289 = arith.subf %283, %288 : vector<128x128xf32>
    %290 = arith.mulf %289, %289 : vector<128x128xf32>
    %cst_183 = arith.constant dense<0.000000e+00> : vector<128xf32>
    %291 = vector.multi_reduction <add>, %290, %cst_183 [0] : vector<128x128xf32> to vector<128xf32>
    %292 = vector.shape_cast %291 : vector<128xf32> to vector<1x128xf32>
    %cst_184 = arith.constant 1.280000e+02 : f32
    %293 = vector.broadcast %cst_184 : f32 to vector<1x128xf32>
    %294 = arith.divf %292, %293 : vector<1x128xf32>
    %295 = vector.broadcast %287 : vector<1x128xf32> to vector<128x128xf32>
    %296 = arith.subf %283, %295 : vector<128x128xf32>
    %cst_185 = arith.constant 9.99999974E-6 : f32
    %297 = vector.broadcast %cst_185 : f32 to vector<1x128xf32>
    %298 = arith.addf %294, %297 : vector<1x128xf32>
    %299 = math.rsqrt %298 : vector<1x128xf32>
    %300 = vector.broadcast %299 : vector<1x128xf32> to vector<128x128xf32>
    %301 = arith.mulf %296, %300 : vector<128x128xf32>
    %c0_186 = arith.constant 0 : index
    %c0_187 = arith.constant 0 : index
    %302 = vector.load %arg31[%c0_186, %c0_187] : memref<1x128xf32, #tpu.memory_space<vmem>>, vector<1x128xf32>
    %303 = vector.broadcast %302 : vector<1x128xf32> to vector<128x128xf32>
    %304 = arith.mulf %301, %303 : vector<128x128xf32>
    %c0_188 = arith.constant 0 : index
    %c0_189 = arith.constant 0 : index
    %305 = vector.load %arg32[%c0_188, %c0_189] : memref<1x128xf32, #tpu.memory_space<vmem>>, vector<1x128xf32>
    %306 = vector.broadcast %305 : vector<1x128xf32> to vector<128x128xf32>
    %307 = arith.addf %304, %306 : vector<128x128xf32>
    %c0_190 = arith.constant 0 : index
    %c0_191 = arith.constant 0 : index
    %308 = vector.load %arg49[%c0_190, %c0_191] : memref<128x128xf32, #tpu.memory_space<vmem>>, vector<128x128xf32>
    tpu.vector_store %arg49[%c0_190, %c0_191], %307 {strides = array<i32>} : memref<128x128xf32, #tpu.memory_space<vmem>>, vector<128x128xf32>,
    %cst_192 = arith.constant 0.000000e+00 : f32
    %309 = vector.broadcast %cst_192 : f32 to vector<128x128xf32>
    %310 = arith.maximumf %307, %309 : vector<128x128xf32>
    %c0_193 = arith.constant 0 : index
    %c0_194 = arith.constant 0 : index
    %311 = vector.load %arg33[%c0_193, %c0_194] : memref<128x128xf32, #tpu.memory_space<vmem>>, vector<128x128xf32>
    %cst_195 = arith.constant dense<0.000000e+00> : vector<128x128xf32>
    %312 = tpu.matmul %310, %311, %cst_195 {dimension_numbers = #tpu.dot_dimension_numbers<[1], [0], [0], [1], [0, 0, 1, 1], [], []>} : vector<128x128xf32>, vector<128x128xf32>, vector<128x128xf32> -> vector<128x128xf32>
    %c0_196 = arith.constant 0 : index
    %c0_197 = arith.constant 0 : index
    %313 = vector.load %arg34[%c0_196, %c0_197] : memref<1x128xf32, #tpu.memory_space<vmem>>, vector<1x128xf32>
    %314 = vector.broadcast %313 : vector<1x128xf32> to vector<128x128xf32>
    %315 = arith.addf %312, %314 : vector<128x128xf32>
    %cst_198 = arith.constant dense<0.000000e+00> : vector<128xf32>
    %316 = vector.multi_reduction <add>, %315, %cst_198 [0] : vector<128x128xf32> to vector<128xf32>
    %317 = vector.shape_cast %316 : vector<128xf32> to vector<1x128xf32>
    %cst_199 = arith.constant 1.280000e+02 : f32
    %318 = vector.broadcast %cst_199 : f32 to vector<1x128xf32>
    %319 = arith.divf %317, %318 : vector<1x128xf32>
    %320 = vector.broadcast %319 : vector<1x128xf32> to vector<128x128xf32>
    %321 = arith.subf %315, %320 : vector<128x128xf32>
    %322 = arith.mulf %321, %321 : vector<128x128xf32>
    %cst_200 = arith.constant dense<0.000000e+00> : vector<128xf32>
    %323 = vector.multi_reduction <add>, %322, %cst_200 [0] : vector<128x128xf32> to vector<128xf32>
    %324 = vector.shape_cast %323 : vector<128xf32> to vector<1x128xf32>
    %cst_201 = arith.constant 1.280000e+02 : f32
    %325 = vector.broadcast %cst_201 : f32 to vector<1x128xf32>
    %326 = arith.divf %324, %325 : vector<1x128xf32>
    %327 = vector.broadcast %319 : vector<1x128xf32> to vector<128x128xf32>
    %328 = arith.subf %315, %327 : vector<128x128xf32>
    %cst_202 = arith.constant 9.99999974E-6 : f32
    %329 = vector.broadcast %cst_202 : f32 to vector<1x128xf32>
    %330 = arith.addf %326, %329 : vector<1x128xf32>
    %331 = math.rsqrt %330 : vector<1x128xf32>
    %332 = vector.broadcast %331 : vector<1x128xf32> to vector<128x128xf32>
    %333 = arith.mulf %328, %332 : vector<128x128xf32>
    %c0_203 = arith.constant 0 : index
    %c0_204 = arith.constant 0 : index
    %334 = vector.load %arg35[%c0_203, %c0_204] : memref<1x128xf32, #tpu.memory_space<vmem>>, vector<1x128xf32>
    %335 = vector.broadcast %334 : vector<1x128xf32> to vector<128x128xf32>
    %336 = arith.mulf %333, %335 : vector<128x128xf32>
    %c0_205 = arith.constant 0 : index
    %c0_206 = arith.constant 0 : index
    %337 = vector.load %arg36[%c0_205, %c0_206] : memref<1x128xf32, #tpu.memory_space<vmem>>, vector<1x128xf32>
    %338 = vector.broadcast %337 : vector<1x128xf32> to vector<128x128xf32>
    %339 = arith.addf %336, %338 : vector<128x128xf32>
    %cst_207 = arith.constant 0.000000e+00 : f32
    %340 = vector.broadcast %cst_207 : f32 to vector<128x128xf32>
    %341 = arith.maximumf %339, %340 : vector<128x128xf32>
    %c0_208 = arith.constant 0 : index
    %c0_209 = arith.constant 0 : index
    %342 = vector.load %arg37[%c0_208, %c0_209] : memref<128x128xf32, #tpu.memory_space<vmem>>, vector<128x128xf32>
    %cst_210 = arith.constant dense<0.000000e+00> : vector<128x128xf32>
    %343 = tpu.matmul %341, %342, %cst_210 {dimension_numbers = #tpu.dot_dimension_numbers<[1], [0], [0], [1], [0, 0, 1, 1], [], []>} : vector<128x128xf32>, vector<128x128xf32>, vector<128x128xf32> -> vector<128x128xf32>
    %c0_211 = arith.constant 0 : index
    %c0_212 = arith.constant 0 : index
    %344 = vector.load %arg38[%c0_211, %c0_212] : memref<1x128xf32, #tpu.memory_space<vmem>>, vector<1x128xf32>
    %345 = vector.broadcast %344 : vector<1x128xf32> to vector<128x128xf32>
    %346 = arith.addf %343, %345 : vector<128x128xf32>
    %cst_213 = arith.constant dense<0.000000e+00> : vector<128xf32>
    %347 = vector.multi_reduction <add>, %346, %cst_213 [0] : vector<128x128xf32> to vector<128xf32>
    %348 = vector.shape_cast %347 : vector<128xf32> to vector<1x128xf32>
    %cst_214 = arith.constant 1.280000e+02 : f32
    %349 = vector.broadcast %cst_214 : f32 to vector<1x128xf32>
    %350 = arith.divf %348, %349 : vector<1x128xf32>
    %351 = vector.broadcast %350 : vector<1x128xf32> to vector<128x128xf32>
    %352 = arith.subf %346, %351 : vector<128x128xf32>
    %353 = arith.mulf %352, %352 : vector<128x128xf32>
    %cst_215 = arith.constant dense<0.000000e+00> : vector<128xf32>
    %354 = vector.multi_reduction <add>, %353, %cst_215 [0] : vector<128x128xf32> to vector<128xf32>
    %355 = vector.shape_cast %354 : vector<128xf32> to vector<1x128xf32>
    %cst_216 = arith.constant 1.280000e+02 : f32
    %356 = vector.broadcast %cst_216 : f32 to vector<1x128xf32>
    %357 = arith.divf %355, %356 : vector<1x128xf32>
    %358 = vector.broadcast %350 : vector<1x128xf32> to vector<128x128xf32>
    %359 = arith.subf %346, %358 : vector<128x128xf32>
    %cst_217 = arith.constant 9.99999974E-6 : f32
    %360 = vector.broadcast %cst_217 : f32 to vector<1x128xf32>
    %361 = arith.addf %357, %360 : vector<1x128xf32>
    %362 = math.rsqrt %361 : vector<1x128xf32>
    %363 = vector.broadcast %362 : vector<1x128xf32> to vector<128x128xf32>
    %364 = arith.mulf %359, %363 : vector<128x128xf32>
    %c0_218 = arith.constant 0 : index
    %c0_219 = arith.constant 0 : index
    %365 = vector.load %arg39[%c0_218, %c0_219] : memref<1x128xf32, #tpu.memory_space<vmem>>, vector<1x128xf32>
    %366 = vector.broadcast %365 : vector<1x128xf32> to vector<128x128xf32>
    %367 = arith.mulf %364, %366 : vector<128x128xf32>
    %c0_220 = arith.constant 0 : index
    %c0_221 = arith.constant 0 : index
    %368 = vector.load %arg40[%c0_220, %c0_221] : memref<1x128xf32, #tpu.memory_space<vmem>>, vector<1x128xf32>
    %369 = vector.broadcast %368 : vector<1x128xf32> to vector<128x128xf32>
    %370 = arith.addf %367, %369 : vector<128x128xf32>
    %cst_222 = arith.constant 0.000000e+00 : f32
    %371 = vector.broadcast %cst_222 : f32 to vector<128x128xf32>
    %372 = arith.maximumf %370, %371 : vector<128x128xf32>
    %c0_223 = arith.constant 0 : index
    %c0_224 = arith.constant 0 : index
    %373 = vector.load %arg41[%c0_223, %c0_224] : memref<128x128xf32, #tpu.memory_space<vmem>>, vector<128x128xf32>
    %cst_225 = arith.constant dense<0.000000e+00> : vector<128x128xf32>
    %374 = tpu.matmul %372, %373, %cst_225 {dimension_numbers = #tpu.dot_dimension_numbers<[1], [0], [0], [1], [0, 0, 1, 1], [], []>} : vector<128x128xf32>, vector<128x128xf32>, vector<128x128xf32> -> vector<128x128xf32>
    %c0_226 = arith.constant 0 : index
    %c0_227 = arith.constant 0 : index
    %375 = vector.load %arg42[%c0_226, %c0_227] : memref<1x128xf32, #tpu.memory_space<vmem>>, vector<1x128xf32>
    %376 = vector.broadcast %375 : vector<1x128xf32> to vector<128x128xf32>
    %377 = arith.addf %374, %376 : vector<128x128xf32>
    %cst_228 = arith.constant dense<0.000000e+00> : vector<128xf32>
    %378 = vector.multi_reduction <add>, %377, %cst_228 [0] : vector<128x128xf32> to vector<128xf32>
    %379 = vector.shape_cast %378 : vector<128xf32> to vector<1x128xf32>
    %cst_229 = arith.constant 1.280000e+02 : f32
    %380 = vector.broadcast %cst_229 : f32 to vector<1x128xf32>
    %381 = arith.divf %379, %380 : vector<1x128xf32>
    %382 = vector.broadcast %381 : vector<1x128xf32> to vector<128x128xf32>
    %383 = arith.subf %377, %382 : vector<128x128xf32>
    %384 = arith.mulf %383, %383 : vector<128x128xf32>
    %cst_230 = arith.constant dense<0.000000e+00> : vector<128xf32>
    %385 = vector.multi_reduction <add>, %384, %cst_230 [0] : vector<128x128xf32> to vector<128xf32>
    %386 = vector.shape_cast %385 : vector<128xf32> to vector<1x128xf32>
    %cst_231 = arith.constant 1.280000e+02 : f32
    %387 = vector.broadcast %cst_231 : f32 to vector<1x128xf32>
    %388 = arith.divf %386, %387 : vector<1x128xf32>
    %389 = vector.broadcast %381 : vector<1x128xf32> to vector<128x128xf32>
    %390 = arith.subf %377, %389 : vector<128x128xf32>
    %cst_232 = arith.constant 9.99999974E-6 : f32
    %391 = vector.broadcast %cst_232 : f32 to vector<1x128xf32>
    %392 = arith.addf %388, %391 : vector<1x128xf32>
    %393 = math.rsqrt %392 : vector<1x128xf32>
    %394 = vector.broadcast %393 : vector<1x128xf32> to vector<128x128xf32>
    %395 = arith.mulf %390, %394 : vector<128x128xf32>
    %c0_233 = arith.constant 0 : index
    %c0_234 = arith.constant 0 : index
    %396 = vector.load %arg43[%c0_233, %c0_234] : memref<1x128xf32, #tpu.memory_space<vmem>>, vector<1x128xf32>
    %397 = vector.broadcast %396 : vector<1x128xf32> to vector<128x128xf32>
    %398 = arith.mulf %395, %397 : vector<128x128xf32>
    %c0_235 = arith.constant 0 : index
    %c0_236 = arith.constant 0 : index
    %399 = vector.load %arg44[%c0_235, %c0_236] : memref<1x128xf32, #tpu.memory_space<vmem>>, vector<1x128xf32>
    %400 = vector.broadcast %399 : vector<1x128xf32> to vector<128x128xf32>
    %401 = arith.addf %398, %400 : vector<128x128xf32>
    %cst_237 = arith.constant 0.000000e+00 : f32
    %402 = vector.broadcast %cst_237 : f32 to vector<128x128xf32>
    %403 = arith.maximumf %401, %402 : vector<128x128xf32>
    %c0_238 = arith.constant 0 : index
    %c0_239 = arith.constant 0 : index
    %404 = vector.load %arg45[%c0_238, %c0_239] : memref<128x128xf32, #tpu.memory_space<vmem>>, vector<128x128xf32>
    %cst_240 = arith.constant dense<0.000000e+00> : vector<128x128xf32>
    %405 = tpu.matmul %403, %404, %cst_240 {dimension_numbers = #tpu.dot_dimension_numbers<[1], [0], [0], [1], [0, 0, 1, 1], [], []>} : vector<128x128xf32>, vector<128x128xf32>, vector<128x128xf32> -> vector<128x128xf32>
    %c0_241 = arith.constant 0 : index
    %c0_242 = arith.constant 0 : index
    %406 = vector.load %arg46[%c0_241, %c0_242] : memref<1x128xf32, #tpu.memory_space<vmem>>, vector<1x128xf32>
    %407 = vector.broadcast %406 : vector<1x128xf32> to vector<128x128xf32>
    %408 = arith.addf %405, %407 : vector<128x128xf32>
    %cst_243 = arith.constant 0.000000e+00 : f32
    %409 = vector.broadcast %cst_243 : f32 to vector<130x128xf32>
    %c0_244 = arith.constant 0 : index
    %c0_245 = arith.constant 0 : index
    %410 = vector.load %arg53[%c0_244, %c0_245] : memref<130x128xf32, #tpu.memory_space<vmem>>, vector<130x128xf32>
    tpu.vector_store %arg53[%c0_244, %c0_245], %409 {strides = array<i32>} : memref<130x128xf32, #tpu.memory_space<vmem>>, vector<130x128xf32>,
    %c1_246 = arith.constant 1 : index
    %c0_247 = arith.constant 0 : index
    %411 = vector.load %arg53[%c1_246, %c0_247] : memref<130x128xf32, #tpu.memory_space<vmem>>, vector<128x128xf32>
    tpu.vector_store %arg53[%c1_246, %c0_247], %408 {strides = array<i32>} : memref<130x128xf32, #tpu.memory_space<vmem>>, vector<128x128xf32>,
    %cst_248 = arith.constant 0.000000e+00 : f32
    %412 = vector.broadcast %cst_248 : f32 to vector<128x128xf32>
    %c0_249 = arith.constant 0 : index
    %c0_250 = arith.constant 0 : index
    %413 = vector.load %arg53[%c0_249, %c0_250] : memref<130x128xf32, #tpu.memory_space<vmem>>, vector<128x128xf32>
    %c0_251 = arith.constant 0 : index
    %c0_252 = arith.constant 0 : index
    %c0_253 = arith.constant 0 : index
    %414 = vector.load %arg47[%c0_251, %c0_252, %c0_253] : memref<3x128x128xf32, #tpu.memory_space<vmem>>, vector<1x128x128xf32>
    %415 = vector.shape_cast %414 : vector<1x128x128xf32> to vector<128x128xf32>
    %cst_254 = arith.constant dense<0.000000e+00> : vector<128x128xf32>
    %416 = tpu.matmul %413, %415, %cst_254 {dimension_numbers = #tpu.dot_dimension_numbers<[1], [0], [0], [1], [0, 0, 1, 1], [], []>} : vector<128x128xf32>, vector<128x128xf32>, vector<128x128xf32> -> vector<128x128xf32>
    %417 = arith.addf %412, %416 : vector<128x128xf32>
    %c1_255 = arith.constant 1 : index
    %c0_256 = arith.constant 0 : index
    %418 = vector.load %arg53[%c1_255, %c0_256] : memref<130x128xf32, #tpu.memory_space<vmem>>, vector<128x128xf32>
    %c1_257 = arith.constant 1 : index
    %c0_258 = arith.constant 0 : index
    %c0_259 = arith.constant 0 : index
    %419 = vector.load %arg47[%c1_257, %c0_258, %c0_259] : memref<3x128x128xf32, #tpu.memory_space<vmem>>, vector<1x128x128xf32>
    %420 = vector.shape_cast %419 : vector<1x128x128xf32> to vector<128x128xf32>
    %cst_260 = arith.constant dense<0.000000e+00> : vector<128x128xf32>
    %421 = tpu.matmul %418, %420, %cst_260 {dimension_numbers = #tpu.dot_dimension_numbers<[1], [0], [0], [1], [0, 0, 1, 1], [], []>} : vector<128x128xf32>, vector<128x128xf32>, vector<128x128xf32> -> vector<128x128xf32>
    %422 = arith.addf %417, %421 : vector<128x128xf32>
    %c2_261 = arith.constant 2 : index
    %c0_262 = arith.constant 0 : index
    %423 = vector.load %arg53[%c2_261, %c0_262] : memref<130x128xf32, #tpu.memory_space<vmem>>, vector<128x128xf32>
    %c2_263 = arith.constant 2 : index
    %c0_264 = arith.constant 0 : index
    %c0_265 = arith.constant 0 : index
    %424 = vector.load %arg47[%c2_263, %c0_264, %c0_265] : memref<3x128x128xf32, #tpu.memory_space<vmem>>, vector<1x128x128xf32>
    %425 = vector.shape_cast %424 : vector<1x128x128xf32> to vector<128x128xf32>
    %cst_266 = arith.constant dense<0.000000e+00> : vector<128x128xf32>
    %426 = tpu.matmul %423, %425, %cst_266 {dimension_numbers = #tpu.dot_dimension_numbers<[1], [0], [0], [1], [0, 0, 1, 1], [], []>} : vector<128x128xf32>, vector<128x128xf32>, vector<128x128xf32> -> vector<128x128xf32>
    %427 = arith.addf %422, %426 : vector<128x128xf32>
    %c0_267 = arith.constant 0 : index
    %c0_268 = arith.constant 0 : index
    %428 = vector.load %arg48[%c0_267, %c0_268] : memref<1x128xf32, #tpu.memory_space<vmem>>, vector<1x128xf32>
    %429 = vector.broadcast %428 : vector<1x128xf32> to vector<128x128xf32>
    %430 = arith.addf %427, %429 : vector<128x128xf32>
    %c0_269 = arith.constant 0 : index
    %c0_270 = arith.constant 0 : index
    %431 = vector.load %arg50[%c0_269, %c0_270] : memref<128x128xf32, #tpu.memory_space<vmem>>, vector<128x128xf32>
    tpu.vector_store %arg50[%c0_269, %c0_270], %430 {strides = array<i32>} : memref<128x128xf32, #tpu.memory_space<vmem>>, vector<128x128xf32>,
    return
  }
}

</mosaic_0001>

<bundles_post_ra>
// kernel: forward.1
= control target key start
LH: loop header
LB: loop body
LE: loop exit
PB: predicated region body
PF: predicated region fallthrough
CT: control target
= control target key end

     0   :  { %s9094_s6 = smov 1   ;;  %s9095_s10 = smov 2   ;;  %s11819_s0 = inlined_call_operand.smem [shape: u32[51], index: -1, kind: input, shape index: {}] }
   0x1   :  { %s9169_s5 = sld [smem:[%s11819_s0]]   ;;  %s9096_s14 = smov 3  }
   0x2   :  { %s9174_s9 = sld [smem:[%s11819_s0 + %s9094_s6]]   ;;  %s9097_s18 = smov 4  }
   0x3   :  { %s9179_s13 = sld [smem:[%s11819_s0 + %s9095_s10]]   ;;  %s9098_s22 = smov 5  }
   0x4   :  { %s9184_s17 = sld [smem:[%s11819_s0 + %s9096_s14]]   ;;  %s9099_s26 = smov 6  }
   0x5   :  { %s9189_s21 = sld [smem:[%s11819_s0 + %s9097_s18]]   ;;  %s9100_s30 = smov 7  }
   0x6   :  { %s9194_s25 = sld [smem:[%s11819_s0 + %s9098_s22]]   ;;  %s9101_s4 = smov 8  }
   0x7   :  { %s9199_s29 = sld [smem:[%s11819_s0 + %s9099_s26]]   ;;  %s9102_s10 = smov 9  }
   0x8   :  { %s9204_s3 = sld [smem:[%s11819_s0 + %s9100_s30]]   ;;  %s9103_s15 = smov 10  }
   0x9   :  { %s9209_s8 = sld [smem:[%s11819_s0 + %s9101_s4]]   ;;  %s9104_s20 = smov 11  }
   0xa   :  { %11820 = sst [smem:[#allocation31_spill]] %s9184_s17  ;;  %s9105_s26 = smov 12  }
   0xb   :  { %11821 = sst [smem:[#allocation32_spill]] %s9189_s21  ;;  %s9106_s1 = smov 13  }
   0xc   :  { %s9214_s14 = sld [smem:[%s11819_s0 + %s9102_s10]]   ;;  %s9107_s7 = smov 14  }
   0xd   :  { %11822 = sst [smem:[#allocation33_spill]] %s9199_s29  ;;  %s9109_s22 = smov 16  }
   0xe   :  { %11823 = sst [smem:[#allocation34_spill]] %s9204_s3  ;;  %s9110_s28 = smov 17  }
   0xf   :  { %11824 = sst [smem:[#allocation35_spill]] %s9209_s8 }
  0x10   :  { %s9219_s19 = sld [smem:[%s11819_s0 + %s9103_s15]]   ;;  %s9108_s15 = smov 15  }
  0x11   :  { %s9224_s24 = sld [smem:[%s11819_s0 + %s9104_s20]]  }
  0x12   :  { %s9229_s30 = sld [smem:[%s11819_s0 + %s9105_s26]]  }
  0x13   :  { %s9234_s6 = sld [smem:[%s11819_s0 + %s9106_s1]]  }
  0x14   :  { %s9239_s12 = sld [smem:[%s11819_s0 + %s9107_s7]]   ;;  %s9111_s7 = smov 18  }
  0x15   :  { %s9244_s20 = sld [smem:[%s11819_s0 + %s9108_s15]]   ;;  %s9112_s15 = smov 19  }
  0x16   :  { %11825 = sst [smem:[#allocation36_spill]] %s9219_s19 }
  0x17   :  { %11826 = sst [smem:[#allocation37_spill]] %s9224_s24 }
  0x18   :  { %11827 = sst [smem:[#allocation38_spill]] %s9229_s30 }
  0x19   :  { %s9249_s27 = sld [smem:[%s11819_s0 + %s9109_s22]]   ;;  %s9113_s22 = smov 20  }
  0x1a   :  { %11828 = sst [smem:[#allocation39_spill]] %s9239_s12 }
  0x1b   :  { %11829 = sst [smem:[#allocation40_spill]] %s9244_s20 }
  0x1c   :  { %s9254_s4 = sld [smem:[%s11819_s0 + %s9110_s28]]   ;;  %s9114_s28 = smov 21  }
  0x1d   :  { %s9259_s12 = sld [smem:[%s11819_s0 + %s9111_s7]]   ;;  %s9115_s7 = smov 22  }
  0x1e   :  { %s9264_s20 = sld [smem:[%s11819_s0 + %s9112_s15]]   ;;  %s9116_s15 = smov 23  }
  0x1f   :  { %11830 = sst [smem:[#allocation41_spill]] %s9249_s27 }
  0x20   :  { %s9269_s27 = sld [smem:[%s11819_s0 + %s9113_s22]]   ;;  %s9117_s22 = smov 24  }
  0x21   :  { %s9274_s30 = sld [smem:[%s11819_s0 + %s9114_s28]]   ;;  %s9118_s28 = smov 25  }
  0x22   :  { %s9294_s24 = sld [smem:[%s11819_s0 + %s9118_s28]]   ;;  %s9122_s28 = smov 29  }
  0x23   :  { %11831 = sst [smem:[#allocation42_spill]] %s9259_s12 }
  0x24   :  { %11832 = sst [smem:[#allocation43_spill]] %s9264_s20 }
  0x25   :  { %s9279_s12 = sld [smem:[%s11819_s0 + %s9115_s7]]   ;;  %s9119_s7 = smov 26  }
  0x26   :  { %11833 = sst [smem:[#allocation44_spill]] %s9269_s27 }
  0x27   :  { %s9284_s20 = sld [smem:[%s11819_s0 + %s9116_s15]]   ;;  %s9120_s15 = smov 27  }
  0x28   :  { %s9289_s27 = sld [smem:[%s11819_s0 + %s9117_s22]]   ;;  %s9121_s22 = smov 28  }
  0x29   :  { %s9314_s19 = sld [smem:[%s11819_s0 + %s9122_s28]]   ;;  %s9126_s28 = smov 33  }
  0x2a   :  { %s9334_s8 = sld [smem:[%s11819_s0 + %s9126_s28]]   ;;  %s9130_s28 = smov 37  }
  0x2b   :  { %11834 = sst [smem:[#allocation45_spill]] %s9279_s12 }
  0x2c   :  { %s9299_s12 = sld [smem:[%s11819_s0 + %s9119_s7]]   ;;  %s9123_s7 = smov 30  }
  0x2d   :  { %11835 = sst [smem:[#allocation46_spill]] %s9284_s20 }
  0x2e   :  { %11836 = sst [smem:[#allocation47_spill]] %s9289_s27 }
  0x2f   :  { %s9304_s20 = sld [smem:[%s11819_s0 + %s9120_s15]]   ;;  %s9124_s15 = smov 31  }
  0x30   :  { %s9309_s27 = sld [smem:[%s11819_s0 + %s9121_s22]]   ;;  %s9125_s22 = smov 32  }
  0x31   :  { %s9354_s3 = sld [smem:[%s11819_s0 + %s9130_s28]]   ;;  %s9134_s28 = smov 41  }
  0x32   :  { %11837 = sst [smem:[#allocation48_spill]] %s9299_s12 }
  0x33   :  { %s9319_s12 = sld [smem:[%s11819_s0 + %s9123_s7]]   ;;  %s9127_s7 = smov 34  }
  0x34   :  { %s9374_s29 = sld [smem:[%s11819_s0 + %s9134_s28]]   ;;  %s9138_s28 = smov 45  }
  0x35   :  { %11838 = sst [smem:[#allocation49_spill]] %s9304_s20 }
  0x36   :  { %11839 = sst [smem:[#allocation50_spill]] %s9309_s27 }
  0x37   :  { %s9324_s20 = sld [smem:[%s11819_s0 + %s9124_s15]]   ;;  %s9128_s15 = smov 35  }
  0x38   :  { %s9329_s27 = sld [smem:[%s11819_s0 + %s9125_s22]]   ;;  %s9129_s22 = smov 36  }
  0x39   :  { %11840 = sst [smem:[#allocation51_spill]] %s9319_s12 }
  0x3a   :  { %s9339_s12 = sld [smem:[%s11819_s0 + %s9127_s7]]   ;;  %s9131_s7 = smov 38  }
  0x3b   :  { %s9394_s21 = sld [smem:[%s11819_s0 + %s9138_s28]]   ;;  %s9142_s28 = smov 49  }
  0x3c   :  { %s9414_s17 = sld [smem:[%s11819_s0 + %s9142_s28]]  }
  0x3d   :  { %11841 = sst [smem:[#allocation52_spill]] %s9324_s20 }
  0x3e   :  { %11842 = sst [smem:[#allocation53_spill]] %s9329_s27 }
  0x3f   :  { %s9344_s20 = sld [smem:[%s11819_s0 + %s9128_s15]]   ;;  %s9132_s15 = smov 39  }
  0x40   :  { %11843 = sst [smem:[#allocation54_spill]] %s9339_s12 }
  0x41   :  { %s9349_s27 = sld [smem:[%s11819_s0 + %s9129_s22]]   ;;  %s9133_s22 = smov 40  }
  0x42   :  { %s9359_s12 = sld [smem:[%s11819_s0 + %s9131_s7]]   ;;  %s9135_s7 = smov 42  }
  0x45   :  { %11844 = sst [smem:[#allocation55_spill]] %s9344_s20 }
  0x46   :  { %s9364_s20 = sld [smem:[%s11819_s0 + %s9132_s15]]   ;;  %s9136_s15 = smov 43  }
  0x47   :  { %11845 = sst [smem:[#allocation56_spill]] %s9349_s27 }
  0x48   :  { %11846 = sst [smem:[#allocation57_spill]] %s9359_s12 }
  0x49   :  { %s9369_s27 = sld [smem:[%s11819_s0 + %s9133_s22]]   ;;  %s9137_s22 = smov 44  }
  0x4a   :  { %s9379_s12 = sld [smem:[%s11819_s0 + %s9135_s7]]   ;;  %s9139_s7 = smov 46  }
  0x4c   :  { %11847 = sst [smem:[#allocation58_spill]] %s9364_s20 }
  0x4d   :  { %s9384_s20 = sld [smem:[%s11819_s0 + %s9136_s15]]   ;;  %s9140_s15 = smov 47  }
  0x4f   :  { %11848 = sst [smem:[#allocation59_spill]] %s9369_s27 }
  0x50   :  { %11849 = sst [smem:[#allocation60_spill]] %s9379_s12 }
  0x51   :  { %s9389_s27 = sld [smem:[%s11819_s0 + %s9137_s22]]   ;;  %s9141_s22 = smov 48  }
  0x52   :  { %s9399_s12 = sld [smem:[%s11819_s0 + %s9139_s7]]   ;;  %s9143_s7 = smov 50  }
  0x53   :  { %11850 = sst [smem:[#allocation61_spill]] %s9384_s20 }
  0x54   :  { %s9404_s20 = sld [smem:[%s11819_s0 + %s9140_s15]]  }
  0x57   :  { %11851 = sst [smem:[#allocation62_spill]] %s9389_s27 }
  0x58   :  { %11852 = sst [smem:[#allocation63_spill]] %s9399_s12 }
  0x59   :  { %s9409_s27 = sld [smem:[%s11819_s0 + %s9141_s22]]  }
  0x5a   :  { %s9419_s12 = sld [smem:[%s11819_s0 + %s9143_s7]]  }
  0x5b   :  { %107 = vsyncpa [#allocation6], 0 }
  0x5c   :  { %108 = vsyncpa [#allocation8], 0 }
  0x5d   :  { %109 = vsyncpa [#allocation11], 0 }
  0x5e   :  { %110 = vsyncpa [#allocation14], 0 }
  0x5f   :  { %111 = vsyncpa [#allocation17], 0 }
  0x60   :  { %112 = vsyncpa [#allocation20], 0 }
  0x61   :  { %113 = vsyncpa [#allocation23], 0  ;;  %s9144_s15 = smov [#allocation7]   ;;  %s9145_s18 = smov [#allocation10]  }
  0x62   :  { %s147_s16 = sshll.u32 %s9144_s15, 4  ;;  %s183_s22 = sshll.u32 %s9145_s18, 4  ;;  %s148_s16 = int_to_ptr.vmem [resolvable:$true] %s147_s16  ;;  %s184_s22 = int_to_ptr.vmem [resolvable:$true] %s183_s22 }
  0x63   :  { %s8848_s23 = scalar_lea.vmem %s148_s16, 6144  ;;  %p8853_p1 = scmp.lt.s32.totalorder %s148_s16, %s148_s16 }
  0x64   :  { %p8849_p0 = scmp.ne.s32.totalorder %s148_s16, %s8848_s23  ;;  %p8854_p2 = scmp.lt.s32.totalorder %s8848_s23, %s8848_s23 }
  0x66   :  { %p8855_p3 = por %p8854_p2, %p8853_p1 }
  0x68   :  { %p8856_p4 = pnand %p8855_p3, %p8849_p0 }
  0x6a   :  { %8859 = shalt.err (!%p8856_p4)
}
  0x6b   :  { %s9146_s0 = smov 128   ;;  %s9147_s26 = smov 8  }
  0x6c   :  { %153 = dma.hbm_to_vmem [thread:$0]  %s9214_s14, 6144, %s148_s16, [#allocation8], %s9146_s0, %s9146_s0, %s9147_s26  }
  0x6d   :  { %s8868_s28 = scalar_lea.vmem %s184_s22, 4096  ;;  %p8873_p6 = scmp.lt.s32.totalorder %s184_s22, %s184_s22 }
  0x6e   :  { %p8869_p5 = scmp.ne.s32.totalorder %s184_s22, %s8868_s28  ;;  %p8874_p7 = scmp.lt.s32.totalorder %s8868_s28, %s8868_s28 }
  0x70   :  { %p8875_p8 = por %p8874_p7, %p8873_p6 }
  0x72   :  { %p8876_p9 = pnand %p8875_p8, %p8869_p5 }
  0x74   :  { %8879 = shalt.err (!%p8876_p9)
}
  0x75   :  { %189 = dma.hbm_to_vmem [thread:$0]  %s9254_s4, 4096, %s184_s22, [#allocation11], %s9146_s0, %s9146_s0, %s9147_s26  }
  0x76   :  { %s9148_s1 = smov [#allocation13]   ;;  %s9149_s7 = smov [#allocation16]  }
  0x77   :  { %s219_s2 = sshll.u32 %s9148_s1, 4  ;;  %s255_s10 = sshll.u32 %s9149_s7, 4  ;;  %s220_s2 = int_to_ptr.vmem [resolvable:$true] %s219_s2  ;;  %s256_s10 = int_to_ptr.vmem [resolvable:$true] %s255_s10 }
  0x78   :  { %s8888_s11 = scalar_lea.vmem %s220_s2, 2048  ;;  %p8893_p11 = scmp.lt.s32.totalorder %s220_s2, %s220_s2 }
  0x79   :  { %p8889_p10 = scmp.ne.s32.totalorder %s220_s2, %s8888_s11  ;;  %p8894_p12 = scmp.lt.s32.totalorder %s8888_s11, %s8888_s11 }
  0x7b   :  { %p8895_p13 = por %p8894_p12, %p8893_p11 }
  0x7d   :  { %p8896_p0 = pnand %p8895_p13, %p8889_p10 }
  0x7f   :  { %8899 = shalt.err (!%p8896_p0)
}
  0x80   :  { %225 = dma.hbm_to_vmem [thread:$0]  %s9294_s24, 2048, %s220_s2, [#allocation14], %s9146_s0, %s9146_s0, %s9147_s26  }
  0x81   :  { %s8908_s14 = scalar_lea.vmem %s256_s10, 2048  ;;  %p8913_p2 = scmp.lt.s32.totalorder %s256_s10, %s256_s10 }
  0x82   :  { %p8909_p1 = scmp.ne.s32.totalorder %s256_s10, %s8908_s14  ;;  %p8914_p3 = scmp.lt.s32.totalorder %s8908_s14, %s8908_s14 }
  0x84   :  { %p8915_p4 = por %p8914_p3, %p8913_p2 }
  0x86   :  { %p8916_p5 = pnand %p8915_p4, %p8909_p1 }
  0x88   :  { %8919 = shalt.err (!%p8916_p5)
}
  0x89   :  { %261 = dma.hbm_to_vmem [thread:$0]  %s9334_s8, 2048, %s256_s10, [#allocation17], %s9146_s0, %s9146_s0, %s9147_s26  }
  0x8a   :  { %s9150_s4 = smov [#allocation19]   ;;  %s9151_s16 = smov [#allocation5]  }
  0x8b   :  { %s291_s15 = sshll.u32 %s9150_s4, 4  ;;  %s121_s18 = sshll.u32 %s9151_s16, 4  ;;  %s292_s15 = int_to_ptr.vmem [resolvable:$true] %s291_s15  ;;  %s122_s18 = int_to_ptr.vmem [resolvable:$true] %s121_s18 }
  0x8c   :  { %s8928_s22 = scalar_lea.vmem %s292_s15, 2048  ;;  %p8933_p7 = scmp.lt.s32.totalorder %s292_s15, %s292_s15 }
  0x8d   :  { %p8929_p6 = scmp.ne.s32.totalorder %s292_s15, %s8928_s22  ;;  %p8934_p8 = scmp.lt.s32.totalorder %s8928_s22, %s8928_s22 }
  0x8f   :  { %p8935_p9 = por %p8934_p8, %p8933_p7 }
  0x91   :  { %p8936_p10 = pnand %p8935_p9, %p8929_p6 }
  0x93   :  { %8939 = shalt.err (!%p8936_p10)
}
  0x94   :  { %297 = dma.hbm_to_vmem [thread:$0]  %s9374_s29, 2048, %s292_s15, [#allocation20], %s9146_s0, %s9146_s0, %s9147_s26  }
  0x95   :  { %s8948_s24 = scalar_lea.vmem %s122_s18, 10240  ;;  %p8953_p12 = scmp.lt.s32.totalorder %s122_s18, %s122_s18 }
  0x96   :  { %p8949_p11 = scmp.ne.s32.totalorder %s122_s18, %s8948_s24  ;;  %p8954_p13 = scmp.lt.s32.totalorder %s8948_s24, %s8948_s24 }
  0x98   :  { %p8955_p0 = por %p8954_p13, %p8953_p12 }
  0x9a   :  { %p8956_p1 = pnand %p8955_p0, %p8949_p11 }
  0x9c   :  { %8959 = shalt.err (!%p8956_p1)
}
  0x9d   :  { %127 = dma.hbm_to_vmem [thread:$0]  %s9174_s9, 10240, %s122_s18, [#allocation6], %s9146_s0, %s9146_s0, %s9147_s26  }
  0x9e   :  { %s9152_s8 = smov [#allocation9]  }
  0x9f   :  { %s165_s23 = sshll.u32 %s9152_s8, 4  ;;  %s166_s23 = int_to_ptr.vmem [resolvable:$true] %s165_s23 }
  0xa0   :  { %s8968_s28 = scalar_lea.vmem %s166_s23, 4096  ;;  %p8973_p3 = scmp.lt.s32.totalorder %s166_s23, %s166_s23 }
  0xa1   :  { %p8969_p2 = scmp.ne.s32.totalorder %s166_s23, %s8968_s28  ;;  %p8974_p4 = scmp.lt.s32.totalorder %s8968_s28, %s8968_s28 }
  0xa3   :  { %p8975_p5 = por %p8974_p4, %p8973_p3 }
  0xa5   :  { %p8976_p6 = pnand %p8975_p5, %p8969_p2 }
  0xa7   :  { %8979 = shalt.err (!%p8976_p6)
}
  0xa8   :  { %s9153_s29 = smov 256   ;;  %s9154_s1 = smov 16  }
  0xa9   :  { %171 = dma.hbm_to_vmem [thread:$0]  %s9234_s6, 4096, %s166_s23, [#allocation8], %s9153_s29, %s9153_s29, %s9154_s1  }
  0xaa   :  { %s9155_s2 = smov [#allocation12]   ;;  %s9156_s10 = smov [#allocation15]  }
  0xab   :  { %s201_s7 = sshll.u32 %s9155_s2, 4  ;;  %s237_s11 = sshll.u32 %s9156_s10, 4  ;;  %s202_s7 = int_to_ptr.vmem [resolvable:$true] %s201_s7  ;;  %s238_s11 = int_to_ptr.vmem [resolvable:$true] %s237_s11 }
  0xac   :  { %s8988_s9 = scalar_lea.vmem %s202_s7, 2048  ;;  %p8993_p8 = scmp.lt.s32.totalorder %s202_s7, %s202_s7 }
  0xad   :  { %p8989_p7 = scmp.ne.s32.totalorder %s202_s7, %s8988_s9  ;;  %p8994_p9 = scmp.lt.s32.totalorder %s8988_s9, %s8988_s9 }
  0xaf   :  { %p8995_p10 = por %p8994_p9, %p8993_p8 }
  0xb1   :  { %p8996_p11 = pnand %p8995_p10, %p8989_p7 }
  0xb3   :  { %8999 = shalt.err (!%p8996_p11)
}
  0xb4   :  { %207 = dma.hbm_to_vmem [thread:$0]  %s9274_s30, 2048, %s202_s7, [#allocation11], %s9146_s0, %s9146_s0, %s9147_s26  }
  0xb5   :  { %s9008_s14 = scalar_lea.vmem %s238_s11, 2048  ;;  %p9013_p13 = scmp.lt.s32.totalorder %s238_s11, %s238_s11 }
  0xb6   :  { %p9009_p12 = scmp.ne.s32.totalorder %s238_s11, %s9008_s14  ;;  %p9014_p0 = scmp.lt.s32.totalorder %s9008_s14, %s9008_s14 }
  0xb8   :  { %p9015_p1 = por %p9014_p0, %p9013_p13 }
  0xba   :  { %p9016_p2 = pnand %p9015_p1, %p9009_p12 }
  0xbc   :  { %9019 = shalt.err (!%p9016_p2)
}
  0xbd   :  { %243 = dma.hbm_to_vmem [thread:$0]  %s9314_s19, 2048, %s238_s11, [#allocation14], %s9146_s0, %s9146_s0, %s9147_s26  }
  0xbe   :  { %s9157_s6 = smov [#allocation18]   ;;  %s9158_s15 = smov [#allocation21]  }
  0xbf   :  { %s273_s4 = sshll.u32 %s9157_s6, 4  ;;  %s309_s16 = sshll.u32 %s9158_s15, 4  ;;  %s274_s4 = int_to_ptr.vmem [resolvable:$true] %s273_s4  ;;  %s310_s16 = int_to_ptr.vmem [resolvable:$true] %s309_s16 }
  0xc0   :  { %s9028_s18 = scalar_lea.vmem %s274_s4, 2048  ;;  %p9033_p4 = scmp.lt.s32.totalorder %s274_s4, %s274_s4 }
  0xc1   :  { %p9029_p3 = scmp.ne.s32.totalorder %s274_s4, %s9028_s18  ;;  %p9034_p5 = scmp.lt.s32.totalorder %s9028_s18, %s9028_s18 }
  0xc3   :  { %p9035_p6 = por %p9034_p5, %p9033_p4 }
  0xc5   :  { %p9036_p7 = pnand %p9035_p6, %p9029_p3 }
  0xc7   :  { %9039 = shalt.err (!%p9036_p7)
}
  0xc8   :  { %279 = dma.hbm_to_vmem [thread:$0]  %s9354_s3, 2048, %s274_s4, [#allocation17], %s9146_s0, %s9146_s0, %s9147_s26  }
  0xc9   :  { %s9048_s30 = scalar_lea.vmem %s310_s16, 2048  ;;  %p9053_p9 = scmp.lt.s32.totalorder %s310_s16, %s310_s16 }
  0xca   :  { %p9049_p8 = scmp.ne.s32.totalorder %s310_s16, %s9048_s30  ;;  %p9054_p10 = scmp.lt.s32.totalorder %s9048_s30, %s9048_s30 }
  0xcc   :  { %p9055_p11 = por %p9054_p10, %p9053_p9 }
  0xce   :  { %p9056_p12 = pnand %p9055_p11, %p9049_p8 }
  0xd0   :  { %9059 = shalt.err (!%p9056_p12)
}
  0xd1   :  { %315 = dma.hbm_to_vmem [thread:$0]  %s9394_s21, 2048, %s310_s16, [#allocation20], %s9146_s0, %s9146_s0, %s9147_s26  }
  0xd2   :  { %s9159_s19 = smov [#allocation22]  }
  0xd3   :  { %s323_s22 = sshll.u32 %s9159_s19, 4  ;;  %s324_s22 = int_to_ptr.vmem [resolvable:$true] %s323_s22 }
  0xd4   :  { %s9068_s24 = scalar_lea.vmem %s324_s22, 6144  ;;  %p9073_p0 = scmp.lt.s32.totalorder %s324_s22, %s324_s22 }
  0xd5   :  { %p9069_p13 = scmp.ne.s32.totalorder %s324_s22, %s9068_s24  ;;  %p9074_p1 = scmp.lt.s32.totalorder %s9068_s24, %s9068_s24 }
  0xd7   :  { %p9075_p2 = por %p9074_p1, %p9073_p0 }
  0xd9   :  { %p9076_p3 = pnand %p9075_p2, %p9069_p13 }
  0xdb   :  { %9079 = shalt.err (!%p9076_p3)
}
  0xdc   :  { %329 = dma.hbm_to_vmem [thread:$0]  %s9404_s20, 6144, %s324_s22, [#allocation23], %s9146_s0, %s9146_s0, %s9147_s26  }
  0xdd   :  { %9080 = dma.done.wait [#allocation6], 10240  }
  0xde   :  { %9081 = vsyncadd [#allocation6], 4294957056 }
  0xdf   :  { %9082 = dma.done.wait [#allocation8], 10240  }
  0xe0   :  { %9083 = vsyncadd [#allocation8], 4294957056 }
  0xe1   :  { %9084 = dma.done.wait [#allocation11], 6144  }
  0xe2   :  { %9085 = vsyncadd [#allocation11], 4294961152 }
  0xe3   :  { %9086 = dma.done.wait [#allocation14], 4096  }
  0xe4   :  { %9087 = vsyncadd [#allocation14], 4294963200 }
  0xe5   :  { %9088 = dma.done.wait [#allocation17], 4096  }
  0xe6   :  { %9089 = vsyncadd [#allocation17], 4294963200 }
  0xe7   :  { %9090 = dma.done.wait [#allocation20], 4096  }
  0xe8   :  { %9091 = vsyncadd [#allocation20], 4294963200 }
  0xe9   :  { %9092 = dma.done.wait [#allocation23], 6144  }
  0xea   :  { %9093 = vsyncadd [#allocation23], 4294961152  ;;  %v9160_v0 = vmov 0.0   ;;  %v481_v1 = vld [vmem:[#allocation5 + $0xf8] sm:$0xff]  ;;  %v480_v3 = vld [vmem:[#allocation5 + $0xf0] sm:$0xff]  ;;  %s11855_s21 = sld [smem:[#allocation33_spill]] }
  0xeb   :  { %384 = vst [vmem:[#allocation2] sm:$0xff] %v9160_v0  ;;  %385 = vst [vmem:[#allocation2 + $0x8] sm:$0xff] %v9160_v0  ;;  %v448_v2 = vld [vmem:[#allocation5 + $0x78] sm:$0xff]  ;;  %7539 = vmatprep.subr.mxu0 %v481_v1  ;;  %v447_v4 = vld [vmem:[#allocation5 + $0x70] sm:$0xff]  ;;  %s11857_s3 = sld [smem:[#allocation35_spill]] }
  0xec   :  { %386 = vst [vmem:[#allocation2 + $0x10] sm:$0xff] %v9160_v0  ;;  %387 = vst [vmem:[#allocation2 + $0x18] sm:$0xff] %v9160_v0  ;;  %7595 = vmatprep.subr.mxu1 %v448_v2  ;;  %7540 = vmatpush3.msra.mxu0 %v481_v1  ;;  %v479_v5 = vld [vmem:[#allocation5 + $0xe8] sm:$0xff]  ;;  %v478_v7 = vld [vmem:[#allocation5 + $0xe0] sm:$0xff]  ;;  %s11858_s20 = sld [smem:[#allocation36_spill]] }
  0xed   :  { %388 = vst [vmem:[#allocation2 + $0x20] sm:$0xff] %v9160_v0  ;;  %389 = vst [vmem:[#allocation2 + $0x28] sm:$0xff] %v9160_v0  ;;  %7596 = vmatpush3.msra.mxu1 %v448_v2  ;;  %v446_v6 = vld [vmem:[#allocation5 + $0x68] sm:$0xff]  ;;  %7541 = vmatprep.subr.mxu0 %v480_v3  ;;  %v445_v8 = vld [vmem:[#allocation5 + $0x60] sm:$0xff]  ;;  %s11859_s0 = sld [smem:[#allocation37_spill]] }
  0xee   :  { %390 = vst [vmem:[#allocation2 + $0x30] sm:$0xff] %v9160_v0  ;;  %391 = vst [vmem:[#allocation2 + $0x38] sm:$0xff] %v9160_v0  ;;  %7597 = vmatprep.subr.mxu1 %v447_v4  ;;  %7542 = vmatpush3.msra.mxu0 %v480_v3  ;;  %v477_v9 = vld [vmem:[#allocation5 + $0xd8] sm:$0xff]  ;;  %v476_v11 = vld [vmem:[#allocation5 + $0xd0] sm:$0xff]  ;;  %s11860_s26 = sld [smem:[#allocation38_spill]] }
  0xef   :  { %392 = vst [vmem:[#allocation2 + $0x40] sm:$0xff] %v9160_v0  ;;  %393 = vst [vmem:[#allocation2 + $0x48] sm:$0xff] %v9160_v0  ;;  %7598 = vmatpush3.msra.mxu1 %v447_v4  ;;  %7543 = vmatprep.subr.mxu0 %v479_v5  ;;  %v444_v10 = vld [vmem:[#allocation5 + $0x58] sm:$0xff]  ;;  %v443_v12 = vld [vmem:[#allocation5 + $0x50] sm:$0xff]  ;;  %s11861_s8 = sld [smem:[#allocation39_spill]] }
  0xf0   :  { %394 = vst [vmem:[#allocation2 + $0x50] sm:$0xff] %v9160_v0  ;;  %395 = vst [vmem:[#allocation2 + $0x58] sm:$0xff] %v9160_v0  ;;  %7599 = vmatprep.subr.mxu1 %v446_v6  ;;  %7544 = vmatpush3.msra.mxu0 %v479_v5  ;;  %v475_v13 = vld [vmem:[#allocation5 + $0xc8] sm:$0xff]  ;;  %v474_v16 = vld [vmem:[#allocation5 + $0xc0] sm:$0xff]  ;;  %s11862_s23 = sld [smem:[#allocation40_spill]] }
  0xf1   :  { %396 = vst [vmem:[#allocation2 + $0x60] sm:$0xff] %v9160_v0  ;;  %397 = vst [vmem:[#allocation2 + $0x68] sm:$0xff] %v9160_v0  ;;  %7600 = vmatpush3.msra.mxu1 %v446_v6  ;;  %7545 = vmatprep.subr.mxu0 %v478_v7  ;;  %v442_v14 = vld [vmem:[#allocation5 + $0x48] sm:$0xff]  ;;  %v9471_v17 = vld [vmem:[%s9169_s5 + $0x8] sm:$0xff]  ;;  %s11863_s28 = sld [smem:[#allocation41_spill]] }
  0xf2   :  { %398 = vst [vmem:[#allocation2 + $0x70] sm:$0xff] %v9160_v0  ;;  %399 = vst [vmem:[#allocation2 + $0x78] sm:$0xff] %v9160_v0  ;;  %7601 = vmatprep.subr.mxu1 %v445_v8  ;;  %7546 = vmatpush3.msra.mxu0 %v478_v7  ;;  %v9467_v15 = vld [vmem:[%s9169_s5] sm:$0xff]  ;;  %v441_v18 = vld [vmem:[#allocation5 + $0x40] sm:$0xff]  ;;  %s11864_s29 = sld [smem:[#allocation42_spill]] }
  0xf3   :  { %400 = vst [vmem:[#allocation2 + $0x80] sm:$0xf] %v9160_v0  ;;  %1534 = vst [vmem:[#allocation3] sm:$0xff] %v9160_v0  ;;  %7602 = vmatpush3.msra.mxu1 %v445_v8  ;;  %7547 = vmatprep.subr.mxu0 %v477_v9  ;;  %v9475_v19 = vld [vmem:[%s9169_s5 + $0x10] sm:$0xff]  ;;  %v9478_v20 = vld [vmem:[%s9169_s5 + $0x18] sm:$0xff]  ;;  %s11865_s1 = sld [smem:[#allocation43_spill]] }
  0xf4   :  { %1535 = vst [vmem:[#allocation3 + $0x8] sm:$0xff] %v9160_v0  ;;  %1536 = vst [vmem:[#allocation3 + $0x10] sm:$0xff] %v9160_v0  ;;  %7603 = vmatprep.subr.mxu1 %v444_v10  ;;  %7548 = vmatpush3.msra.mxu0 %v477_v9  ;;  %v473_v21 = vld [vmem:[#allocation5 + $0xb8] sm:$0xff]  ;;  %v9483_v23 = vld [vmem:[%s9169_s5 + $0x20] sm:$0xff]  ;;  %s11866_s2 = sld [smem:[#allocation44_spill]] }
  0xf5   :  { %1537 = vst [vmem:[#allocation3 + $0x18] sm:$0xff] %v9160_v0  ;;  %1538 = vst [vmem:[#allocation3 + $0x20] sm:$0xff] %v9160_v0  ;;  %7604 = vmatpush3.msra.mxu1 %v444_v10  ;;  %7549 = vmatprep.subr.mxu0 %v476_v11  ;;  %v440_v22 = vld [vmem:[#allocation5 + $0x38] sm:$0xff]  ;;  %v9486_v24 = vld [vmem:[%s9169_s5 + $0x28] sm:$0xff]  ;;  %s11867_s7 = sld [smem:[#allocation45_spill]] }
  0xf6   :  { %1539 = vst [vmem:[#allocation3 + $0x28] sm:$0xff] %v9160_v0  ;;  %1540 = vst [vmem:[#allocation3 + $0x30] sm:$0xff] %v9160_v0  ;;  %7605 = vmatprep.subr.mxu1 %v443_v12  ;;  %7550 = vmatpush3.msra.mxu0 %v476_v11  ;;  %v472_v25 = vld [vmem:[#allocation5 + $0xb0] sm:$0xff]  ;;  %v9491_v27 = vld [vmem:[%s9169_s5 + $0x30] sm:$0xff]  ;;  %s11868_s10 = sld [smem:[#allocation46_spill]] }
  0xf7   :  { %1541 = vst [vmem:[#allocation3 + $0x38] sm:$0xff] %v9160_v0  ;;  %1542 = vst [vmem:[#allocation3 + $0x40] sm:$0xff] %v9160_v0  ;;  %7606 = vmatpush3.msra.mxu1 %v443_v12  ;;  %7551 = vmatprep.subr.mxu0 %v475_v13  ;;  %v439_v26 = vld [vmem:[#allocation5 + $0x30] sm:$0xff]  ;;  %v9494_v28 = vld [vmem:[%s9169_s5 + $0x38] sm:$0xff]  ;;  %s11869_s11 = sld [smem:[#allocation47_spill]] }
  0xf8   :  { %1543 = vst [vmem:[#allocation3 + $0x48] sm:$0xff] %v9160_v0  ;;  %1544 = vst [vmem:[#allocation3 + $0x50] sm:$0xff] %v9160_v0  ;;  %7607 = vmatprep.subr.mxu1 %v442_v14  ;;  %7552 = vmatpush3.msra.mxu0 %v475_v13  ;;  %v471_v29 = vld [vmem:[#allocation5 + $0xa8] sm:$0xff]  ;;  %v470_v32 = vld [vmem:[#allocation5 + $0xa0] sm:$0xff]  ;;  %s11870_s9 = sld [smem:[#allocation48_spill]] }
  0xf9   :  { %1545 = vst [vmem:[#allocation3 + $0x58] sm:$0xff] %v9160_v0  ;;  %1546 = vst [vmem:[#allocation3 + $0x60] sm:$0xff] %v9160_v0  ;;  %7608 = vmatpush3.msra.mxu1 %v442_v14  ;;  %7553 = vmatprep.subr.mxu0 %v474_v16  ;;  %v438_v30 = vld [vmem:[#allocation5 + $0x28] sm:$0xff]  ;;  %v437_v33 = vld [vmem:[#allocation5 + $0x20] sm:$0xff]  ;;  %s11871_s14 = sld [smem:[#allocation49_spill]] }
  0xfa   :  { %1547 = vst [vmem:[#allocation3 + $0x68] sm:$0xff] %v9160_v0  ;;  %1548 = vst [vmem:[#allocation3 + $0x70] sm:$0xff] %v9160_v0  ;;  %7609 = vmatprep.subr.mxu1 %v441_v18  ;;  %7554 = vmatpush3.msra.mxu0 %v474_v16  ;;  %v9499_v31 = vld [vmem:[%s9169_s5 + $0x40] sm:$0xff]  ;;  %v9503_v34 = vld [vmem:[%s9169_s5 + $0x48] sm:$0xff]  ;;  %s11872_s6 = sld [smem:[#allocation50_spill]] }
  0xfb   :  { %1549 = vst [vmem:[#allocation3 + $0x78] sm:$0xff] %v9160_v0  ;;  %1550 = vst [vmem:[#allocation3 + $0x80] sm:$0x3] %v9160_v0  ;;  %7610 = vmatpush3.msra.mxu1 %v441_v18  ;;  %7555 = vmatprep.subr.mxu0 %v473_v21  ;;  %v469_v35 = vld [vmem:[#allocation5 + $0x98] sm:$0xff]  ;;  %v468_v37 = vld [vmem:[#allocation5 + $0x90] sm:$0xff]  ;;  %s11873_s4 = sld [smem:[#allocation51_spill]] }
  0xfc   :  { %6037 = vst [vmem:[#allocation4] sm:$0xff] %v9160_v0  ;;  %6038 = vst [vmem:[#allocation4 + $0x8] sm:$0xff] %v9160_v0  ;;  %7611 = vmatprep.subr.mxu1 %v440_v22  ;;  %7556 = vmatpush3.msra.mxu0 %v473_v21  ;;  %v436_v36 = vld [vmem:[#allocation5 + $0x18] sm:$0xff]  ;;  %v435_v38 = vld [vmem:[#allocation5 + $0x10] sm:$0xff]  ;;  %s11874_s15 = sld [smem:[#allocation52_spill]] }
  0xfd   :  { %6039 = vst [vmem:[#allocation4 + $0x10] sm:$0xff] %v9160_v0  ;;  %6040 = vst [vmem:[#allocation4 + $0x18] sm:$0xff] %v9160_v0  ;;  %7612 = vmatpush3.msra.mxu1 %v440_v22  ;;  %7557 = vmatprep.subr.mxu0 %v472_v25  ;;  %v9507_v39 = vld [vmem:[%s9169_s5 + $0x50] sm:$0xff]  ;;  %v467_v40 = vld [vmem:[#allocation5 + $0x88] sm:$0xff]  ;;  %s11875_s16 = sld [smem:[#allocation53_spill]] }
  0xfe   :  { %6041 = vst [vmem:[#allocation4 + $0x20] sm:$0xff] %v9160_v0  ;;  %6042 = vst [vmem:[#allocation4 + $0x28] sm:$0xff] %v9160_v0  ;;  %7613 = vmatprep.subr.mxu1 %v439_v26  ;;  %7558 = vmatpush3.msra.mxu0 %v472_v25  ;;  %v434_v41 = vld [vmem:[#allocation5 + $0x8] sm:$0xff]  ;;  %v9511_v42 = vld [vmem:[%s9169_s5 + $0x58] sm:$0xff]  ;;  %s11877_s18 = sld [smem:[#allocation55_spill]] }
  0xff   :  { %6043 = vst [vmem:[#allocation4 + $0x30] sm:$0xff] %v9160_v0  ;;  %6044 = vst [vmem:[#allocation4 + $0x38] sm:$0xff] %v9160_v0  ;;  %7614 = vmatpush3.msra.mxu1 %v439_v26  ;;  %7559 = vmatprep.subr.mxu0 %v471_v29  ;;  %v466_v43 = vld [vmem:[#allocation5 + $0x80] sm:$0xff]  ;;  %v9515_v45 = vld [vmem:[%s9169_s5 + $0x60] sm:$0xff]  ;;  %s11878_s30 = sld [smem:[#allocation56_spill]] }
 0x100   :  { %6045 = vst [vmem:[#allocation4 + $0x40] sm:$0xff] %v9160_v0  ;;  %6046 = vst [vmem:[#allocation4 + $0x48] sm:$0xff] %v9160_v0  ;;  %7615 = vmatprep.subr.mxu1 %v438_v30  ;;  %7560 = vmatpush3.msra.mxu0 %v471_v29  ;;  %v433_v44 = vld [vmem:[#allocation5] sm:$0xff]  ;;  %v9518_v46 = vld [vmem:[%s9169_s5 + $0x68] sm:$0xff]  ;;  %s11879_s19 = sld [smem:[#allocation57_spill]] }
 0x101   :  { %6047 = vst [vmem:[#allocation4 + $0x50] sm:$0xff] %v9160_v0  ;;  %6048 = vst [vmem:[#allocation4 + $0x58] sm:$0xff] %v9160_v0  ;;  %7616 = vmatpush3.msra.mxu1 %v438_v30  ;;  %7561 = vmatprep.subr.mxu0 %v470_v32  ;;  %v9523_v51 = vld [vmem:[%s9169_s5 + $0x70] sm:$0xff]  ;;  %v9526_v52 = vld [vmem:[%s9169_s5 + $0x78] sm:$0xff]  ;;  %s11853_s5 = sld [smem:[#allocation31_spill]] }
 0x102   :  { %6049 = vst [vmem:[#allocation4 + $0x60] sm:$0xff] %v9160_v0  ;;  %6050 = vst [vmem:[#allocation4 + $0x68] sm:$0xff] %v9160_v0  ;;  %7617 = vmatprep.subr.mxu1 %v437_v33  ;;  %7562 = vmatpush3.msra.mxu0 %v470_v32  ;;  %v804_v53 = vld [vmem:[#allocation5 + $0x178] sm:$0xff]  ;;  %v803_v56 = vld [vmem:[#allocation5 + $0x170] sm:$0xff]  ;;  %s11880_s22 = sld [smem:[#allocation58_spill]] }
 0x103   :  { %6051 = vst [vmem:[#allocation4 + $0x70] sm:$0xff] %v9160_v0  ;;  %6052 = vst [vmem:[#allocation4 + $0x78] sm:$0xff] %v9160_v0  ;;  %7618 = vmatpush3.msra.mxu1 %v437_v33  ;;  %7563 = vmatprep.subr.mxu0 %v469_v35  ;;  %v998_v54 = vld [vmem:[#allocation5 + $0x1f8] sm:$0xff]  ;;  %v802_v60 = vld [vmem:[#allocation5 + $0x168] sm:$0xff]  ;;  %s11881_s24 = sld [smem:[#allocation59_spill]] }
 0x104   :  { %6053 = vst [vmem:[#allocation4 + $0x80] sm:$0x3] %v9160_v0  ;;  %401 = vst [vmem:[#allocation2 + $0x2] sm:$0xff] %v9467_v15  ;;  %7619 = vmatprep.subr.mxu1 %v436_v36  ;;  %7564 = vmatpush3.msra.mxu0 %v469_v35  ;;  %v997_v61 = vld [vmem:[#allocation5 + $0x1f0] sm:$0xff]  ;;  %v801_v62 = vld [vmem:[#allocation5 + $0x160] sm:$0xff] }
 0x105   :  { %402 = vst [vmem:[#allocation2 + $0xa] sm:$0xff] %v9471_v17  ;;  %403 = vst [vmem:[#allocation2 + $0x12] sm:$0xff] %v9475_v19  ;;  %7620 = vmatpush3.msra.mxu1 %v436_v36  ;;  %7565 = vmatprep.subr.mxu0 %v468_v37  ;;  %v996_v63 = vld [vmem:[#allocation5 + $0x1e8] sm:$0xff]  ;;  %v800_v4 = vld [vmem:[#allocation5 + $0x158] sm:$0xff] }
 0x106   :  { %404 = vst [vmem:[#allocation2 + $0x1a] sm:$0xff] %v9478_v20  ;;  %405 = vst [vmem:[#allocation2 + $0x22] sm:$0xff] %v9483_v23  ;;  %7621 = vmatprep.subr.mxu1 %v435_v38  ;;  %7566 = vmatpush3.msra.mxu0 %v468_v37  ;;  %v995_v5 = vld [vmem:[#allocation5 + $0x1e0] sm:$0xff]  ;;  %v799_v6 = vld [vmem:[#allocation5 + $0x150] sm:$0xff] }
 0x107   :  { %406 = vst [vmem:[#allocation2 + $0x2a] sm:$0xff] %v9486_v24  ;;  %407 = vst [vmem:[#allocation2 + $0x32] sm:$0xff] %v9491_v27  ;;  %7622 = vmatpush3.msra.mxu1 %v435_v38  ;;  %7567 = vmatprep.subr.mxu0 %v467_v40  ;;  %v994_v7 = vld [vmem:[#allocation5 + $0x1d8] sm:$0xff]  ;;  %v798_v12 = vld [vmem:[#allocation5 + $0x148] sm:$0xff] }
 0x108   :  { %408 = vst [vmem:[#allocation2 + $0x3a] sm:$0xff] %v9494_v28  ;;  %409 = vst [vmem:[#allocation2 + $0x42] sm:$0xff] %v9499_v31  ;;  %7623 = vmatprep.subr.mxu1 %v434_v41  ;;  %7568 = vmatpush3.msra.mxu0 %v467_v40  ;;  %v993_v13 = vld [vmem:[#allocation5 + $0x1d0] sm:$0xff]  ;;  %v797_v14 = vld [vmem:[#allocation5 + $0x140] sm:$0xff] }
 0x109   :  { %410 = vst [vmem:[#allocation2 + $0x4a] sm:$0xff] %v9503_v34  ;;  %411 = vst [vmem:[#allocation2 + $0x52] sm:$0xff] %v9507_v39  ;;  %7624 = vmatpush3.msra.mxu1 %v434_v41  ;;  %7569 = vmatprep.subr.mxu0 %v466_v43  ;;  %v992_v16 = vld [vmem:[#allocation5 + $0x1c8] sm:$0xff]  ;;  %v796_v26 = vld [vmem:[#allocation5 + $0x138] sm:$0xff] }
 0x10a   :  { %412 = vst [vmem:[#allocation2 + $0x5a] sm:$0xff] %v9511_v42  ;;  %413 = vst [vmem:[#allocation2 + $0x62] sm:$0xff] %v9515_v45  ;;  %7625 = vmatprep.subr.mxu1 %v433_v44  ;;  %7570 = vmatpush3.msra.mxu0 %v466_v43  ;;  %v991_v29 = vld [vmem:[#allocation5 + $0x1c0] sm:$0xff]  ;;  %v795_v30 = vld [vmem:[#allocation5 + $0x130] sm:$0xff] }
 0x10b   :  { %v449_v47 = vld [vmem:[#allocation2 + $0x1] sm:$0xff]  ;;  %414 = vst [vmem:[#allocation2 + $0x6a] sm:$0xff] %v9518_v46  ;;  %415 = vst [vmem:[#allocation2 + $0x72] sm:$0xff] %v9523_v51  ;;  %7626 = vmatpush3.msra.mxu1 %v433_v44  ;;  %7651 = vmatprep.subr.mxu0 %v804_v53  ;;  %v990_v32 = vld [vmem:[#allocation5 + $0x1b8] sm:$0xff] }
 0x10c   :  { %v417_v48 = vld [vmem:[#allocation2] sm:$0xff]  ;;  %v450_v49 = vld [vmem:[#allocation2 + $0x9] sm:$0xff]  ;;  %7571 = vmatprep.mubr.f32.mxu0 %v449_v47  ;;  %416 = vst [vmem:[#allocation2 + $0x7a] sm:$0xff] %v9526_v52  ;;  %v451_v55 = vld [vmem:[#allocation2 + $0x11] sm:$0xff]  ;;  %7707 = vmatprep.subr.mxu1 %v998_v54 }
 0x10d   :  { %v418_v50 = vld [vmem:[#allocation2 + $0x8] sm:$0xff]  ;;  %7627 = vmatprep.mubr.f32.mxu1 %v417_v48  ;;  %7572 = vmatmul.mubr.f32.vlgmr.msra.gmra.mxu0 %v450_v49  ;;  %v419_v57 = vld [vmem:[#allocation2 + $0x10] sm:$0xff]  ;;  %v452_v58 = vld [vmem:[#allocation2 + $0x19] sm:$0xff] }
 0x10e   :  { %7628 = vmatmul.mubr.f32.vlgmr.msra.gmra.mxu1 %v418_v50  ;;  %7652 = vmatpush3.msra.mxu0 %v804_v53  ;;  %v420_v59 = vld [vmem:[#allocation2 + $0x18] sm:$0xff]  ;;  %v453_v0 = vld [vmem:[#allocation2 + $0x21] sm:$0xff]  ;;  %v454_v2 = vld [vmem:[#allocation2 + $0x29] sm:$0xff] }
 0x10f   :  { %7574 = vmatprep.mubr.f32.mxu0 %v451_v55  ;;  %7653 = vmatprep.subr.mxu0 %v803_v56  ;;  %v421_v1 = vld [vmem:[#allocation2 + $0x20] sm:$0xff]  ;;  %v422_v3 = vld [vmem:[#allocation2 + $0x28] sm:$0xff]  ;;  %v455_v8 = vld [vmem:[#allocation2 + $0x31] sm:$0xff] }
 0x110   :  { %7630 = vmatprep.mubr.f32.mxu1 %v419_v57  ;;  %7654 = vmatpush3.msra.mxu0 %v803_v56  ;;  %v423_v9 = vld [vmem:[#allocation2 + $0x30] sm:$0xff]  ;;  %v456_v10 = vld [vmem:[#allocation2 + $0x39] sm:$0xff]  ;;  %v457_v18 = vld [vmem:[#allocation2 + $0x41] sm:$0xff] }
 0x111   :  { %7708 = vmatpush3.msra.mxu1 %v998_v54  ;;  %7575 = vmatmul.mubr.f32.gmra.mxu0 %v452_v58  ;;  %v424_v11 = vld [vmem:[#allocation2 + $0x38] sm:$0xff]  ;;  %v425_v21 = vld [vmem:[#allocation2 + $0x40] sm:$0xff]  ;;  %v458_v22 = vld [vmem:[#allocation2 + $0x49] sm:$0xff] }
 0x112   :  { %7631 = vmatmul.mubr.f32.gmra.mxu1 %v420_v59  ;;  %7655 = vmatprep.subr.mxu0 %v802_v60  ;;  %v426_v25 = vld [vmem:[#allocation2 + $0x48] sm:$0xff]  ;;  %v459_v33 = vld [vmem:[#allocation2 + $0x51] sm:$0xff]  ;;  %v460_v36 = vld [vmem:[#allocation2 + $0x59] sm:$0xff] }
 0x113   :  { %7709 = vmatprep.subr.mxu1 %v997_v61  ;;  %7656 = vmatpush3.msra.mxu0 %v802_v60  ;;  %v427_v35 = vld [vmem:[#allocation2 + $0x50] sm:$0xff]  ;;  %v428_v37 = vld [vmem:[#allocation2 + $0x58] sm:$0xff]  ;;  %v794_v38 = vld [vmem:[#allocation5 + $0x128] sm:$0xff] }
 0x114   :  { %7710 = vmatpush3.msra.mxu1 %v997_v61  ;;  %7657 = vmatprep.subr.mxu0 %v801_v62  ;;  %v989_v40 = vld [vmem:[#allocation5 + $0x1b0] sm:$0xff]  ;;  %v793_v41 = vld [vmem:[#allocation5 + $0x120] sm:$0xff]  ;;  %v988_v43 = vld [vmem:[#allocation5 + $0x1a8] sm:$0xff] }
 0x115   :  { %7711 = vmatprep.subr.mxu1 %v996_v63  ;;  %7577 = vmatprep.mubr.f32.mxu0 %v453_v0  ;;  %v461_v44 = vld [vmem:[#allocation2 + $0x61] sm:$0xff]  ;;  %v462_v48 = vld [vmem:[#allocation2 + $0x69] sm:$0xff]  ;;  %v987_v53 = vld [vmem:[#allocation5 + $0x1a0] sm:$0xff] }
 0x116   :  { %7633 = vmatprep.mubr.f32.mxu1 %v421_v1  ;;  %7658 = vmatpush3.msra.mxu0 %v801_v62  ;;  %v429_v47 = vld [vmem:[#allocation2 + $0x60] sm:$0xff]  ;;  %v430_v49 = vld [vmem:[#allocation2 + $0x68] sm:$0xff]  ;;  %v792_v50 = vld [vmem:[#allocation5 + $0x118] sm:$0xff] }
 0x117   :  { %7712 = vmatpush3.msra.mxu1 %v996_v63  ;;  %7578 = vmatmul.mubr.f32.gmra.mxu0 %v454_v2  ;;  %v791_v54 = vld [vmem:[#allocation5 + $0x110] sm:$0xff]  ;;  %v986_v55 = vld [vmem:[#allocation5 + $0x198] sm:$0xff]  ;;  %v464_v58 = vld [vmem:[#allocation2 + $0x79] sm:$0xff] }
 0x118   :  { %7634 = vmatmul.mubr.f32.gmra.mxu1 %v422_v3  ;;  %7659 = vmatprep.subr.mxu0 %v800_v4  ;;  %v463_v56 = vld [vmem:[#allocation2 + $0x71] sm:$0xff]  ;;  %v790_v60 = vld [vmem:[#allocation5 + $0x108] sm:$0xff]  ;;  %v985_v61 = vld [vmem:[#allocation5 + $0x190] sm:$0xff] }
 0x119   :  { %7713 = vmatprep.subr.mxu1 %v995_v5  ;;  %7660 = vmatpush3.msra.mxu0 %v800_v4  ;;  %v431_v57 = vld [vmem:[#allocation2 + $0x70] sm:$0xff]  ;;  %v432_v59 = vld [vmem:[#allocation2 + $0x78] sm:$0xff]  ;;  %v984_v63 = vld [vmem:[#allocation5 + $0x188] sm:$0xff] }
 0x11a   :  { %7714 = vmatpush3.msra.mxu1 %v995_v5  ;;  %7661 = vmatprep.subr.mxu0 %v799_v6  ;;  %v789_v62 = vld [vmem:[#allocation5 + $0x100] sm:$0xff]  ;;  %v1192_v1 = vld [vmem:[#allocation5 + $0x278] sm:$0xff]  ;;  %v966_v2 = vld [vmem:[#allocation2 + $0x3] sm:$0xff] }
 0x11b   :  { %7715 = vmatprep.subr.mxu1 %v994_v7  ;;  %7580 = vmatprep.mubr.f32.mxu0 %v455_v8  ;;  %v983_v0 = vld [vmem:[#allocation5 + $0x180] sm:$0xff]  ;;  %v967_v3 = vld [vmem:[#allocation2 + $0xb] sm:$0xff] }
 0x11c   :  { %7636 = vmatprep.mubr.f32.mxu1 %v423_v9  ;;  %7662 = vmatpush3.msra.mxu0 %v799_v6  ;;  %v1191_v4 = vld [vmem:[#allocation5 + $0x270] sm:$0xff]  ;;  %v968_v5 = vld [vmem:[#allocation2 + $0x13] sm:$0xff]  ;;  %v1190_v6 = vld [vmem:[#allocation5 + $0x268] sm:$0xff] }
 0x11d   :  { %7716 = vmatpush3.msra.mxu1 %v994_v7  ;;  %7581 = vmatmul.mubr.f32.gmra.mxu0 %v456_v10  ;;  %v969_v7 = vld [vmem:[#allocation2 + $0x1b] sm:$0xff]  ;;  %v1188_v8 = vld [vmem:[#allocation5 + $0x258] sm:$0xff]  ;;  %v1187_v10 = vld [vmem:[#allocation5 + $0x250] sm:$0xff] }
 0x11e   :  { %7637 = vmatmul.mubr.f32.gmra.mxu1 %v424_v11  ;;  %7663 = vmatprep.subr.mxu0 %v798_v12  ;;  %v971_v9 = vld [vmem:[#allocation2 + $0x2b] sm:$0xff]  ;;  %v1186_v11 = vld [vmem:[#allocation5 + $0x248] sm:$0xff] }
 0x11f   :  { %7717 = vmatprep.subr.mxu1 %v993_v13  ;;  %7664 = vmatpush3.msra.mxu0 %v798_v12  ;;  %v1185_v12 = vld [vmem:[#allocation5 + $0x240] sm:$0xff] }
 0x120   :  { %7718 = vmatpush3.msra.mxu1 %v993_v13  ;;  %7665 = vmatprep.subr.mxu0 %v797_v14  ;;  %v1184_v13 = vld [vmem:[#allocation5 + $0x238] sm:$0xff] }
 0x121   :  { %7719 = vmatprep.subr.mxu1 %v992_v16  ;;  %7583 = vmatprep.mubr.f32.mxu0 %v457_v18  ;;  %v1181_v18 = vld [vmem:[#allocation5 + $0x220] sm:$0xff] }
 0x122   :  { %7639 = vmatprep.mubr.f32.mxu1 %v425_v21  ;;  %7666 = vmatpush3.msra.mxu0 %v797_v14  ;;  %v1183_v14 = vld [vmem:[#allocation5 + $0x230] sm:$0xff]  ;;  %v1180_v21 = vld [vmem:[#allocation5 + $0x218] sm:$0xff] }
 0x123   :  { %7720 = vmatpush3.msra.mxu1 %v992_v16  ;;  %7584 = vmatmul.mubr.f32.gmra.mxu0 %v458_v22  ;;  %v1182_v16 = vld [vmem:[#allocation5 + $0x228] sm:$0xff]  ;;  %v1179_v22 = vld [vmem:[#allocation5 + $0x210] sm:$0xff] }
 0x124   :  { %7640 = vmatmul.mubr.f32.gmra.mxu1 %v426_v25  ;;  %7667 = vmatprep.subr.mxu0 %v796_v26  ;;  %v1178_v25 = vld [vmem:[#allocation5 + $0x208] sm:$0xff] }
 0x125   :  { %7721 = vmatprep.subr.mxu1 %v991_v29  ;;  %7668 = vmatpush3.msra.mxu0 %v796_v26  ;;  %v1177_v26 = vld [vmem:[#allocation5 + $0x200] sm:$0xff] }
 0x126   :  { %7722 = vmatpush3.msra.mxu1 %v991_v29  ;;  %7669 = vmatprep.subr.mxu0 %v795_v30  ;;  %v1160_v29 = vld [vmem:[#allocation2 + $0x4] sm:$0xff] }
 0x127   :  { %7723 = vmatprep.subr.mxu1 %v990_v32  ;;  %7586 = vmatprep.mubr.f32.mxu0 %v459_v33  ;;  %v1166_v33 = vld [vmem:[#allocation2 + $0x34] sm:$0xff] }
 0x128   :  { %7642 = vmatprep.mubr.f32.mxu1 %v427_v35  ;;  %7670 = vmatpush3.msra.mxu0 %v795_v30  ;;  %v1163_v30 = vld [vmem:[#allocation2 + $0x1c] sm:$0xff] }
 0x129   :  { %7724 = vmatpush3.msra.mxu1 %v990_v32  ;;  %7587 = vmatmul.mubr.f32.gmra.mxu0 %v460_v36  ;;  %v1164_v32 = vld [vmem:[#allocation2 + $0x24] sm:$0xff]  ;;  %v1167_v35 = vld [vmem:[#allocation2 + $0x3c] sm:$0xff]  ;;  %v1169_v36 = vld [vmem:[#allocation2 + $0x4c] sm:$0xff] }
 0x12a   :  { %7643 = vmatmul.mubr.f32.gmra.mxu1 %v428_v37  ;;  %7671 = vmatprep.subr.mxu0 %v794_v38  ;;  %v1170_v37 = vld [vmem:[#allocation2 + $0x54] sm:$0xff] }
 0x12b   :  { %7725 = vmatprep.subr.mxu1 %v989_v40  ;;  %7672 = vmatpush3.msra.mxu0 %v794_v38  ;;  %v1171_v38 = vld [vmem:[#allocation2 + $0x5c] sm:$0xff] }
 0x12c   :  { %7726 = vmatpush3.msra.mxu1 %v989_v40  ;;  %7673 = vmatprep.subr.mxu0 %v793_v41  ;;  %v1172_v40 = vld [vmem:[#allocation2 + $0x64] sm:$0xff] }
 0x12d   :  { %7727 = vmatprep.subr.mxu1 %v988_v43  ;;  %7589 = vmatprep.mubr.f32.mxu0 %v461_v44  ;;  %v1175_v44 = vld [vmem:[#allocation2 + $0x7c] sm:$0xff] }
 0x12e   :  { %7645 = vmatprep.mubr.f32.mxu1 %v429_v47  ;;  %7674 = vmatpush3.msra.mxu0 %v793_v41  ;;  %v1173_v41 = vld [vmem:[#allocation2 + $0x6c] sm:$0xff] }
 0x12f   :  { %7728 = vmatpush3.msra.mxu1 %v988_v43  ;;  %7590 = vmatmul.mubr.f32.gmra.mxu0 %v462_v48  ;;  %v1174_v43 = vld [vmem:[#allocation2 + $0x74] sm:$0xff] }
 0x130   :  { %7646 = vmatmul.mubr.f32.gmra.mxu1 %v430_v49  ;;  %7675 = vmatprep.subr.mxu0 %v792_v50 }
 0x131   :  { %7729 = vmatprep.subr.mxu1 %v987_v53  ;;  %7676 = vmatpush3.msra.mxu0 %v792_v50 }
 0x132   :  { %7730 = vmatpush3.msra.mxu1 %v987_v53  ;;  %7677 = vmatprep.subr.mxu0 %v791_v54 }
 0x133   :  { %7731 = vmatprep.subr.mxu1 %v986_v55  ;;  %7592 = vmatprep.mubr.f32.mxu0 %v463_v56 }
 0x134   :  { %7648 = vmatprep.mubr.f32.mxu1 %v431_v57  ;;  %7678 = vmatpush3.msra.mxu0 %v791_v54 }
 0x135   :  { %7732 = vmatpush3.msra.mxu1 %v986_v55  ;;  %7593 = vmatmul.mubr.f32.gmra.mxu0 %v464_v58 }
 0x136   :  { %7649 = vmatmul.mubr.f32.gmra.mxu1 %v432_v59  ;;  %7679 = vmatprep.subr.mxu0 %v790_v60 }
 0x137   :  { %7733 = vmatprep.subr.mxu1 %v985_v61  ;;  %7680 = vmatpush3.msra.mxu0 %v790_v60 }
 0x138   :  { %7734 = vmatpush3.msra.mxu1 %v985_v61  ;;  %7681 = vmatprep.subr.mxu0 %v789_v62 }
 0x139   :  { %7735 = vmatprep.subr.mxu1 %v984_v63  ;;  %7682 = vmatpush3.msra.mxu0 %v789_v62 }
 0x13a   :  { %7683 = vmatprep.mubr.f32.mxu0 %v9467_v15  ;;  %7736 = vmatpush3.msra.mxu1 %v984_v63  ;;  %v1189_v15 = vld [vmem:[#allocation5 + $0x260] sm:$0xff] }
 0x13b   :  { %7684 = vmatmul.mubr.f32.vlgmr.msra.gmra.mxu0 %v9471_v17  ;;  %7737 = vmatprep.subr.mxu1 %v983_v0  ;;  %v970_v17 = vld [vmem:[#allocation2 + $0x23] sm:$0xff] }
 0x13c   :  { %7763 = vmatprep.subr.mxu0 %v1192_v1  ;;  %7738 = vmatpush3.msra.mxu1 %v983_v0 }
 0x13d   :  { %7739 = vmatprep.mubr.f32.mxu1 %v966_v2  ;;  %7764 = vmatpush3.msra.mxu0 %v1192_v1 }
 0x13e   :  { %7740 = vmatmul.mubr.f32.vlgmr.msra.gmra.mxu1 %v967_v3  ;;  %7765 = vmatprep.subr.mxu0 %v1191_v4 }
 0x13f   :  { %7686 = vmatprep.mubr.f32.mxu0 %v9475_v19  ;;  %7766 = vmatpush3.msra.mxu0 %v1191_v4  ;;  %v972_v19 = vld [vmem:[#allocation2 + $0x33] sm:$0xff] }
 0x140   :  { %7742 = vmatprep.mubr.f32.mxu1 %v968_v5  ;;  %7687 = vmatmul.mubr.f32.gmra.mxu0 %v9478_v20  ;;  %v973_v20 = vld [vmem:[#allocation2 + $0x3b] sm:$0xff] }
 0x141   :  { %7767 = vmatprep.subr.mxu0 %v1190_v6  ;;  %7689 = vmatprep.mubr.f32.mxu0 %v9483_v23  ;;  %v974_v23 = vld [vmem:[#allocation2 + $0x43] sm:$0xff] }
 0x142   :  { %7768 = vmatpush3.msra.mxu0 %v1190_v6  ;;  %7743 = vmatmul.mubr.f32.gmra.mxu1 %v969_v7 }
 0x143   :  { %7769 = vmatprep.subr.mxu0 %v1189_v15  ;;  %7745 = vmatprep.mubr.f32.mxu1 %v970_v17 }
 0x144   :  { %7770 = vmatpush3.msra.mxu0 %v1189_v15 }
 0x145   :  { %7690 = vmatmul.mubr.f32.gmra.mxu0 %v9486_v24  ;;  %7771 = vmatprep.subr.mxu0 %v1188_v8  ;;  %v975_v24 = vld [vmem:[#allocation2 + $0x4b] sm:$0xff] }
 0x146   :  { %7772 = vmatpush3.msra.mxu0 %v1188_v8  ;;  %7746 = vmatmul.mubr.f32.gmra.mxu1 %v971_v9 }
 0x147   :  { %7773 = vmatprep.subr.mxu0 %v1187_v10  ;;  %7692 = vmatprep.mubr.f32.mxu0 %v9491_v27  ;;  %v976_v27 = vld [vmem:[#allocation2 + $0x53] sm:$0xff] }
 0x148   :  { %7774 = vmatpush3.msra.mxu0 %v1187_v10  ;;  %7748 = vmatprep.mubr.f32.mxu1 %v972_v19 }
 0x149   :  { %7693 = vmatmul.mubr.f32.gmra.mxu0 %v9494_v28  ;;  %7775 = vmatprep.subr.mxu0 %v1186_v11  ;;  %v977_v28 = vld [vmem:[#allocation2 + $0x5b] sm:$0xff] }
 0x14a   :  { %7776 = vmatpush3.msra.mxu0 %v1186_v11  ;;  %7749 = vmatmul.mubr.f32.gmra.mxu1 %v973_v20 }
 0x14b   :  { %7777 = vmatprep.subr.mxu0 %v1185_v12  ;;  %7695 = vmatprep.mubr.f32.mxu0 %v9499_v31  ;;  %v978_v31 = vld [vmem:[#allocation2 + $0x63] sm:$0xff] }
 0x14c   :  { %7778 = vmatpush3.msra.mxu0 %v1185_v12  ;;  %7751 = vmatprep.mubr.f32.mxu1 %v974_v23 }
 0x14d   :  { %7696 = vmatmul.mubr.f32.gmra.mxu0 %v9503_v34  ;;  %7779 = vmatprep.subr.mxu0 %v1184_v13  ;;  %v979_v34 = vld [vmem:[#allocation2 + $0x6b] sm:$0xff] }
 0x14e   :  { %7780 = vmatpush3.msra.mxu0 %v1184_v13  ;;  %7752 = vmatmul.mubr.f32.gmra.mxu1 %v975_v24 }
 0x14f   :  { %7781 = vmatprep.subr.mxu0 %v1183_v14  ;;  %7698 = vmatprep.mubr.f32.mxu0 %v9507_v39  ;;  %v980_v39 = vld [vmem:[#allocation2 + $0x73] sm:$0xff] }
 0x150   :  { %7782 = vmatpush3.msra.mxu0 %v1183_v14  ;;  %7754 = vmatprep.mubr.f32.mxu1 %v976_v27 }
 0x151   :  { %7699 = vmatmul.mubr.f32.gmra.mxu0 %v9511_v42  ;;  %7783 = vmatprep.subr.mxu0 %v1182_v16  ;;  %v981_v42 = vld [vmem:[#allocation2 + $0x7b] sm:$0xff] }
 0x152   :  { %7784 = vmatpush3.msra.mxu0 %v1182_v16  ;;  %7755 = vmatmul.mubr.f32.gmra.mxu1 %v977_v28 }
 0x153   :  { %7785 = vmatprep.subr.mxu0 %v1181_v18  ;;  %7701 = vmatprep.mubr.f32.mxu0 %v9515_v45  ;;  %v1161_v45 = vld [vmem:[#allocation2 + $0xc] sm:$0xff] }
 0x154   :  { %7786 = vmatpush3.msra.mxu0 %v1181_v18  ;;  %7757 = vmatprep.mubr.f32.mxu1 %v978_v31  ;;  %v6741_v31 = vld [vmem:[%s9194_s25 + $0xf8] sm:$0xff] }
 0x155   :  { %7702 = vmatmul.mubr.f32.gmra.mxu0 %v9518_v46  ;;  %7787 = vmatprep.subr.mxu0 %v1180_v21  ;;  %v1162_v46 = vld [vmem:[#allocation2 + $0x14] sm:$0xff] }
 0x156   :  { %7788 = vmatpush3.msra.mxu0 %v1180_v21  ;;  %7758 = vmatmul.mubr.f32.gmra.mxu1 %v979_v34 }
 0x157   :  { %7789 = vmatprep.subr.mxu0 %v1179_v22  ;;  %7704 = vmatprep.mubr.f32.mxu0 %v9523_v51  ;;  %v1165_v51 = vld [vmem:[#allocation2 + $0x2c] sm:$0xff] }
 0x158   :  { %7790 = vmatpush3.msra.mxu0 %v1179_v22  ;;  %7760 = vmatprep.mubr.f32.mxu1 %v980_v39  ;;  %v6740_v22 = vld [vmem:[%s9194_s25 + $0xf0] sm:$0xff] }
 0x159   :  { %7705 = vmatmul.mubr.f32.gmra.mxu0 %v9526_v52  ;;  %7791 = vmatprep.subr.mxu0 %v1178_v25  ;;  %v1168_v52 = vld [vmem:[#allocation2 + $0x44] sm:$0xff] }
 0x15a   :  { %7792 = vmatpush3.msra.mxu0 %v1178_v25  ;;  %7761 = vmatmul.mubr.f32.gmra.mxu1 %v981_v42  ;;  %v6739_v25 = vld [vmem:[%s9194_s25 + $0xe8] sm:$0xff] }
 0x15b   :  { %7793 = vmatprep.subr.mxu0 %v1177_v26  ;;  %7795 = vmatprep.mubr.f32.mxu0 %v1160_v29  ;;  %v6738_v29 = vld [vmem:[%s9194_s25 + $0xe0] sm:$0xff] }
 0x15c   :  { %7794 = vmatpush3.msra.mxu0 %v1177_v26  ;;  %7819 = vmatprep.subr.mxu1 %v6741_v31 }
 0x15d   :  { %7796 = vmatmul.mubr.f32.vlgmr.msra.gmra.mxu0 %v1161_v45  ;;  %7820 = vmatpush3.msra.mxu1 %v6741_v31  ;;  %v1594_v31 = vld [vmem:[%s9194_s25 + $0x58] sm:$0xff] }
 0x15e   :  { %7798 = vmatprep.mubr.f32.mxu0 %v1162_v46  ;;  %7821 = vmatprep.subr.mxu1 %v6740_v22  ;;  %v1598_v46 = vld [vmem:[%s9194_s25 + $0x78] sm:$0xff] }
 0x15f   :  { %7822 = vmatpush3.msra.mxu1 %v6740_v22  ;;  %7875 = vmatprep.subr.mxu0 %v1598_v46  ;;  %v6733_v22 = vld [vmem:[%s9194_s25 + $0xb8] sm:$0xff] }
 0x160   :  { %7823 = vmatprep.subr.mxu1 %v6739_v25  ;;  %7876 = vmatpush3.msra.mxu0 %v1598_v46 }
 0x161   :  { %7799 = vmatmul.mubr.f32.gmra.mxu0 %v1163_v30  ;;  %7824 = vmatpush3.msra.mxu1 %v6739_v25  ;;  %v6737_v30 = vld [vmem:[%s9194_s25 + $0xd8] sm:$0xff] }
 0x162   :  { %7801 = vmatprep.mubr.f32.mxu0 %v1164_v32  ;;  %7825 = vmatprep.subr.mxu1 %v6738_v29 }
 0x163   :  { %7826 = vmatpush3.msra.mxu1 %v6738_v29 }
 0x164   :  { %7827 = vmatprep.subr.mxu1 %v6737_v30 }
 0x165   :  { %7802 = vmatmul.mubr.f32.gmra.mxu0 %v1165_v51  ;;  %7828 = vmatpush3.msra.mxu1 %v6737_v30 }
 0x166   :  { %7804 = vmatprep.mubr.f32.mxu0 %v1166_v33  ;;  %v1597_v33 = vld [vmem:[%s9194_s25 + $0x70] sm:$0xff] }
 0x167   :  { %7877 = vmatprep.subr.mxu0 %v1597_v33 }
 0x168   :  { %7878 = vmatpush3.msra.mxu0 %v1597_v33  ;;  %v1593_v33 = vld [vmem:[%s9194_s25 + $0x50] sm:$0xff] }
 0x169   :  { %7805 = vmatmul.mubr.f32.gmra.mxu0 %v1167_v35  ;;  %v6736_v35 = vld [vmem:[%s9194_s25 + $0xd0] sm:$0xff] }
 0x16a   :  { %7807 = vmatprep.mubr.f32.mxu0 %v1168_v52  ;;  %7829 = vmatprep.subr.mxu1 %v6736_v35 }
 0x16b   :  { %7830 = vmatpush3.msra.mxu1 %v6736_v35  ;;  %v6732_v35 = vld [vmem:[%s9194_s25 + $0xb0] sm:$0xff] }
 0x16d   :  { %7808 = vmatmul.mubr.f32.gmra.mxu0 %v1169_v36  ;;  %v1596_v36 = vld [vmem:[%s9194_s25 + $0x68] sm:$0xff] }
 0x16e   :  { %7810 = vmatprep.mubr.f32.mxu0 %v1170_v37  ;;  %v6735_v37 = vld [vmem:[%s9194_s25 + $0xc8] sm:$0xff]  ;;  %7879 = vmatprep.subr.mxu0 %v1596_v36 }
 0x16f   :  { %7831 = vmatprep.subr.mxu1 %v6735_v37  ;;  %7880 = vmatpush3.msra.mxu0 %v1596_v36 }
 0x170   :  { %7832 = vmatpush3.msra.mxu1 %v6735_v37 }
 0x171   :  { %7811 = vmatmul.mubr.f32.gmra.mxu0 %v1171_v38 }
 0x172   :  { %7813 = vmatprep.mubr.f32.mxu0 %v1172_v40 }
 0x175   :  { %7814 = vmatmul.mubr.f32.gmra.mxu0 %v1173_v41  ;;  %v1595_v41 = vld [vmem:[%s9194_s25 + $0x60] sm:$0xff] }
 0x176   :  { %7816 = vmatprep.mubr.f32.mxu0 %v1174_v43  ;;  %v6734_v43 = vld [vmem:[%s9194_s25 + $0xc0] sm:$0xff]  ;;  %7881 = vmatprep.subr.mxu0 %v1595_v41 }
 0x177   :  { %7833 = vmatprep.subr.mxu1 %v6734_v43  ;;  %7882 = vmatpush3.msra.mxu0 %v1595_v41 }
 0x178   :  { %7834 = vmatpush3.msra.mxu1 %v6734_v43  ;;  %7883 = vmatprep.subr.mxu0 %v1594_v31  ;;  %v1592_v43 = vld [vmem:[%s9194_s25 + $0x48] sm:$0xff] }
 0x179   :  { %7817 = vmatmul.mubr.f32.gmra.mxu0 %v1175_v44  ;;  %7835 = vmatprep.subr.mxu1 %v6733_v22 }
 0x17a   :  { %7884 = vmatpush3.msra.mxu0 %v1594_v31  ;;  %7836 = vmatpush3.msra.mxu1 %v6733_v22  ;;  %v6730_v31 = vld [vmem:[%s9194_s25 + $0xa0] sm:$0xff] }
 0x17b   :  { %7885 = vmatprep.subr.mxu0 %v1593_v33  ;;  %7837 = vmatprep.subr.mxu1 %v6732_v35 }
 0x17c   :  { %7886 = vmatpush3.msra.mxu0 %v1593_v33  ;;  %7838 = vmatpush3.msra.mxu1 %v6732_v35  ;;  %v1590_v33 = vld [vmem:[%s9194_s25 + $0x38] sm:$0xff] }
 0x17d   :  { %7887 = vmatprep.subr.mxu0 %v1592_v43 }
 0x17e   :  { %7888 = vmatpush3.msra.mxu0 %v1592_v43 }
 0x1cd   :  { %v9546_v47 = vpop.f32.mrf.mxu0 }
 0x1ce   :  { %v9548_v48 = vpop.f32.mrf.mxu1 }
 0x1cf   :  { %v9550_v49 = vpop.f32.mrf.mxu0  ;;  %v699_v46 = vadd.f32 %v9548_v48, %v9546_v47  ;;  %v6731_v47 = vld [vmem:[%s9194_s25 + $0xa8] sm:$0xff] }
 0x1d0   :  { %v9552_v50 = vpop.f32.mrf.mxu1  ;;  %7839 = vmatprep.subr.mxu1 %v6731_v47 }
 0x1d1   :  { %v9554_v53 = vpop.f32.mrf.mxu0  ;;  %v694_v30 = vadd.f32 %v9552_v50, %v9550_v49  ;;  %7840 = vmatpush3.msra.mxu1 %v6731_v47 }
 0x1d2   :  { %v9556_v54 = vpop.f32.mrf.mxu1  ;;  %7841 = vmatprep.subr.mxu1 %v6730_v31 }
 0x1d3   :  { %v9558_v55 = vpop.f32.mrf.mxu0  ;;  %v709_v48 = vadd.f32 %v9556_v54, %v9554_v53  ;;  %7842 = vmatpush3.msra.mxu1 %v6730_v31 }
 0x1d4   :  { %v9560_v56 = vpop.f32.mrf.mxu1 }
 0x1d7   :  { %v9562_v57 = vpop.f32.mrf.mxu0 }
 0x1d8   :  { %v9564_v58 = vpop.f32.mrf.mxu1 }
 0x1d9   :  { %v9566_v59 = vpop.f32.mrf.mxu0 }
 0x1da   :  { %v9568_v60 = vpop.f32.mrf.mxu1 }
 0x1dd   :  { %v9570_v61 = vpop.f32.mrf.mxu0 }
 0x1de   :  { %v9572_v62 = vpop.f32.mrf.mxu1 }
 0x1df   :  { %v9574_v63 = vpop.f32.mrf.mxu0 }
 0x1e0   :  { %v9576_v0 = vpop.f32.mrf.mxu1 }
 0x1e3   :  { %v9578_v1 = vpop.f32.mrf.mxu0 }
 0x1e4   :  { %v9580_v2 = vpop.f32.mrf.mxu1 }
 0x1e5   :  { %v9582_v3 = vpop.f32.mrf.mxu0 }
 0x1e6   :  { %v9584_v4 = vpop.f32.mrf.mxu1 }
 0x1e9   :  { %v9586_v5 = vpop.f32.mrf.mxu0 }
 0x1ea   :  { %v9588_v6 = vpop.f32.mrf.mxu1 }
 0x1eb   :  { %v9590_v7 = vpop.f32.mrf.mxu0 }
 0x1ec   :  { %v9592_v15 = vpop.f32.mrf.mxu1 }
 0x1ef   :  { %v9594_v17 = vpop.f32.mrf.mxu0 }
 0x1f0   :  { %v9596_v8 = vpop.f32.mrf.mxu1 }
 0x1f1   :  { %v9598_v9 = vpop.f32.mrf.mxu0 }
 0x1f2   :  { %v9600_v10 = vpop.f32.mrf.mxu1 }
 0x1f5   :  { %v9602_v19 = vpop.f32.mrf.mxu0 }
 0x1f6   :  { %v9604_v11 = vpop.f32.mrf.mxu1 }
 0x1f7   :  { %v9606_v20 = vpop.f32.mrf.mxu0 }
 0x1f8   :  { %v9610_v23 = vpop.f32.mrf.mxu1 }
 0x1fb   :  { %v9608_v12 = vpop.f32.mrf.mxu0 }
 0x1fc   :  { %v951_v37 = vadd.f32 %v9608_v12, %v699_v46  ;;  %v704_v12 = vadd.f32 %v9560_v56, %v9558_v55  ;;  %v6729_v55 = vld [vmem:[%s9194_s25 + $0x98] sm:$0xff]  ;;  %v719_v56 = vadd.f32 %v9564_v58, %v9562_v57  ;;  %v9707_v58 = vld [vmem:[%s9179_s13] ss:$0 sm:$0xff]  ;;  %s11854_s13 = sld [smem:[#allocation32_spill]] }
 0x1fd   :  { %v9612_v13 = vpop.f32.mrf.mxu0  ;;  %7843 = vmatprep.subr.mxu1 %v6729_v55 }
 0x1fe   :  { %v9614_v24 = vpop.f32.mrf.mxu1  ;;  %v950_v41 = vadd.f32 %v9612_v13, %v694_v30  ;;  %v1591_v13 = vld [vmem:[%s9194_s25 + $0x40] sm:$0xff]  ;;  %7844 = vmatpush3.msra.mxu1 %v6729_v55 }
 0x1ff   :  { %7889 = vmatprep.subr.mxu0 %v1591_v13  ;;  %v1145_v53 = vadd.f32 %v9614_v24, %v951_v37  ;;  %v714_v24 = vadd.f32 %v9568_v60, %v9566_v59  ;;  %v1589_v37 = vld [vmem:[%s9194_s25 + $0x30] sm:$0xff] }
 0x200   :  { %v9616_v14 = vpop.f32.mrf.mxu1  ;;  %v9618_v27 = vpop.f32.mrf.mxu0  ;;  %7890 = vmatpush3.msra.mxu0 %v1591_v13  ;;  %v724_v13 = vadd.f32 %v9576_v0, %v9574_v63 }
 0x201   :  { %v953_v22 = vadd.f32 %v9618_v27, %v709_v48  ;;  %v1144_v54 = vadd.f32 %v9616_v14, %v950_v41  ;;  %7891 = vmatprep.subr.mxu0 %v1590_v33  ;;  %v6728_v41 = vld [vmem:[%s9194_s25 + $0x90] sm:$0xff] }
 0x202   :  { %v9620_v16 = vpop.f32.mrf.mxu0  ;;  %v9622_v28 = vpop.f32.mrf.mxu1  ;;  %7892 = vmatpush3.msra.mxu0 %v1590_v33  ;;  %7845 = vmatprep.subr.mxu1 %v6728_v41 }
 0x203   :  { %v952_v30 = vadd.f32 %v9620_v16, %v704_v12  ;;  %v1147_v43 = vadd.f32 %v9622_v28, %v953_v22  ;;  %7893 = vmatprep.subr.mxu0 %v1589_v37  ;;  %v1588_v12 = vld [vmem:[%s9194_s25 + $0x28] sm:$0xff]  ;;  %7846 = vmatpush3.msra.mxu1 %v6728_v41 }
 0x204   :  { %v9627_v21 = vpop.f32.mrf.mxu1  ;;  %7894 = vmatpush3.msra.mxu0 %v1589_v37  ;;  %v6727_v28 = vld [vmem:[%s9194_s25 + $0x88] sm:$0xff] }
 0x205   :  { %v9624_v18 = vpop.f32.mrf.mxu0  ;;  %v1146_v48 = vadd.f32 %v9627_v21, %v952_v30  ;;  %7895 = vmatprep.subr.mxu0 %v1588_v12  ;;  %7847 = vmatprep.subr.mxu1 %v6727_v28  ;;  %v1584_v41 = vld [vmem:[%s9194_s25 + $0x8] sm:$0xff] }
 0x206   :  { %v9635_v42 = vpop.f32.mrf.mxu1  ;;  %v955_v57 = vadd.f32 %v9624_v18, %v719_v56  ;;  %v729_v18 = vadd.f32 %v9572_v62, %v9570_v61  ;;  %7896 = vmatpush3.msra.mxu0 %v1588_v12  ;;  %7848 = vmatpush3.msra.mxu1 %v6727_v28  ;;  %v1586_v56 = vld [vmem:[%s9194_s25 + $0x18] sm:$0xff] }
 0x207   :  { %v9629_v34 = vpop.f32.mrf.mxu0 }
 0x208   :  { %v9644_v32 = vpop.f32.mrf.mxu1  ;;  %v954_v59 = vadd.f32 %v9629_v34, %v714_v24  ;;  %v1149_v61 = vadd.f32 %v9635_v42, %v955_v57  ;;  %v734_v42 = vadd.f32 %v9584_v4, %v9582_v3  ;;  %v9751_v4 = vld [vmem:[%s9194_s25 + $0x178] sm:$0xff] }
 0x209   :  { %v9632_v39 = vpop.f32.mrf.mxu0 }
 0x20a   :  { %v9654_v38 = vpop.f32.mrf.mxu1  ;;  %v957_v62 = vadd.f32 %v9632_v39, %v729_v18  ;;  %v1148_v30 = vadd.f32 %v9644_v32, %v954_v59  ;;  %v739_v39 = vadd.f32 %v9580_v2, %v9578_v1  ;;  %v1583_v59 = vld [vmem:[%s9194_s25] sm:$0xff] }
 0x20b   :  { %v9637_v26 = vpop.f32.mrf.mxu0 }
 0x20c   :  { %v9664_v25 = vpop.f32.mrf.mxu1  ;;  %v956_v63 = vadd.f32 %v9637_v26, %v724_v13 }
 0x20d   :  { %v9640_v45 = vpop.f32.mrf.mxu0 }
 0x20e   :  { %v9682_v49 = vpop.f32.mrf.mxu1  ;;  %v959_v1 = vadd.f32 %v9640_v45, %v739_v39  ;;  %v1150_v2 = vadd.f32 %v9664_v25, %v956_v63  ;;  %v749_v45 = vadd.f32 %v9588_v6, %v9586_v5 }
 0x20f   :  { %v9646_v51 = vpop.f32.mrf.mxu0 }
 0x210   :  { %v9698_v27 = vpop.f32.mrf.mxu1  ;;  %v958_v57 = vadd.f32 %v9646_v51, %v734_v42 }
 0x211   :  { %v9650_v52 = vpop.f32.mrf.mxu0 }
 0x212   :  { %v9720_v31 = vpop.f32.mrf.mxu1  ;;  %v1152_v5 = vadd.f32 %v9698_v27, %v958_v57 }
 0x213   :  { %v9656_v40 = vpop.f32.mrf.mxu0 }
 0x214   :  { %v1115_v26 = vpop.f32.mrf.mxu1 }
 0x215   :  { %v9660_v44 = vpop.f32.mrf.mxu0 }
 0x216   :  { %v7759_v25 = vpop.f32.mrf.mxu1 }
 0x217   :  { %v9666_v29 = vpop.f32.mrf.mxu0 }
 0x219   :  { %v9674_v36 = vpop.f32.mrf.mxu0 }
 0x21b   :  { %v9684_v50 = vpop.f32.mrf.mxu0 }
 0x21d   :  { %v7797_v46 = vpop.f32.mrf.mxu0 }
 0x21e   :  { %v1339_v14 = vadd.f32 %v7797_v46, %v1145_v53  ;;  %v1587_v53 = vld [vmem:[%s9194_s25 + $0x20] sm:$0xff] }
 0x21f   :  { %v1259_v35 = vpop.f32.mrf.mxu0  ;;  %7897 = vmatprep.subr.mxu0 %v1587_v53 }
 0x220   :  { %v1338_v16 = vadd.f32 %v1259_v35, %v1144_v54  ;;  %v9723_v34 = vadd.f32 %v9707_v58, %v1339_v14  ;;  %v6726_v54 = vld [vmem:[%s9194_s25 + $0x80] sm:$0xff]  ;;  %7898 = vmatpush3.msra.mxu0 %v1587_v53  ;;  %v1585_v35 = vld [vmem:[%s9194_s25 + $0x10] sm:$0xff]  ;;  %v759_v53 = vadd.f32 %v9596_v8, %v9594_v17 }
 0x221   :  { %v7800_v47 = vpop.f32.mrf.mxu0  ;;  %7849 = vmatprep.subr.mxu1 %v6726_v54  ;;  %7899 = vmatprep.subr.mxu0 %v1586_v56 }
 0x222   :  { %v9712_v60 = vadd.f32 %v9707_v58, %v1338_v16  ;;  %v1341_v22 = vadd.f32 %v7800_v47, %v1147_v43  ;;  %7850 = vmatpush3.msra.mxu1 %v6726_v54  ;;  %7900 = vmatpush3.msra.mxu0 %v1586_v56  ;;  %v1151_v43 = vadd.f32 %v9654_v38, %v957_v62  ;;  %v1125_v54 = vpop.f32.mrf.mxu1 }
 0x223   :  { %v1269_v21 = vpop.f32.mrf.mxu0  ;;  %7901 = vmatprep.subr.mxu0 %v1585_v35  ;;  %7931 = vmatprep.subr.mxu1 %v9751_v4  ;;  %v744_v38 = vadd.f32 %v9592_v15, %v9590_v7  ;;  %v764_v56 = vadd.f32 %v9610_v23, %v9606_v20 }
 0x224   :  { %v1340_v46 = vadd.f32 %v1269_v21, %v1146_v48  ;;  %v1377_v33 = vadd.f32 %v9723_v34, %v9712_v60  ;;  %v9743_v24 = vadd.f32 %v9707_v58, %v1341_v22  ;;  %7902 = vmatpush3.msra.mxu0 %v1585_v35  ;;  %v1153_v21 = vadd.f32 %v9682_v49, %v959_v1  ;;  %v7762_v35 = vpop.f32.mrf.mxu1 }
 0x225   :  { %v7803_v0 = vpop.f32.mrf.mxu0  ;;  %7903 = vmatprep.subr.mxu0 %v1584_v41  ;;  %v961_v22 = vadd.f32 %v9650_v52, %v749_v45  ;;  %v960_v6 = vadd.f32 %v9656_v40, %v744_v38  ;;  %v754_v49 = vadd.f32 %v9600_v10, %v9598_v9  ;;  %v769_v10 = vadd.f32 %v9604_v11, %v9602_v19 }
 0x226   :  { %v9734_v55 = vadd.f32 %v9707_v58, %v1340_v46  ;;  %v1343_v16 = vadd.f32 %v7803_v0, %v1149_v61  ;;  %7904 = vmatpush3.msra.mxu0 %v1584_v41  ;;  %v963_v0 = vadd.f32 %v9660_v44, %v759_v53  ;;  %v1135_v41 = vpop.f32.mrf.mxu1 }
 0x227   :  { %v1279_v32 = vpop.f32.mrf.mxu0  ;;  %7905 = vmatprep.subr.mxu0 %v1583_v59  ;;  %v1155_v63 = vadd.f32 %v9720_v31, %v961_v22  ;;  %v962_v17 = vadd.f32 %v9666_v29, %v754_v49 }
 0x228   :  { %v1378_v14 = vadd.f32 %v1377_v33, %v9734_v55  ;;  %v1342_v37 = vadd.f32 %v1279_v32, %v1148_v30  ;;  %v9765_v51 = vadd.f32 %v9707_v58, %v1343_v16  ;;  %7906 = vmatpush3.msra.mxu0 %v1583_v59  ;;  %v1154_v33 = vadd.f32 %v1115_v26, %v960_v6 }
 0x229   :  { %v7806_v3 = vpop.f32.mrf.mxu0  ;;  %v1157_v29 = vadd.f32 %v7759_v25, %v963_v0  ;;  %v965_v32 = vadd.f32 %v9674_v36, %v769_v10  ;;  %v1156_v16 = vadd.f32 %v1125_v54, %v962_v17 }
 0x22a   :  { %v9755_v47 = vadd.f32 %v9707_v58, %v1342_v37  ;;  %v1379_v48 = vadd.f32 %v1378_v14, %v9743_v24  ;;  %v1345_v18 = vadd.f32 %v7806_v3, %v1151_v43  ;;  %v964_v37 = vadd.f32 %v9684_v50, %v764_v56 }
 0x22b   :  { %v1289_v12 = vpop.f32.mrf.mxu0  ;;  %v1159_v57 = vadd.f32 %v7762_v35, %v965_v32 }
 0x22c   :  { %v1380_v28 = vadd.f32 %v1379_v48, %v9755_v47  ;;  %v1344_v13 = vadd.f32 %v1289_v12, %v1150_v2  ;;  %v9781_v61 = vadd.f32 %v9707_v58, %v1345_v18  ;;  %v1158_v48 = vadd.f32 %v1135_v41, %v964_v37 }
 0x22d   :  { %v7809_v46 = vpop.f32.mrf.mxu0 }
 0x22e   :  { %v9773_v7 = vadd.f32 %v9707_v58, %v1344_v13  ;;  %v1381_v15 = vadd.f32 %v1380_v28, %v9765_v51  ;;  %v1347_v40 = vadd.f32 %v7809_v46, %v1153_v21 }
 0x22f   :  { %v1299_v52 = vpop.f32.mrf.mxu0 }
 0x230   :  { %v1382_v27 = vadd.f32 %v1381_v15, %v9773_v7  ;;  %v1346_v62 = vadd.f32 %v1299_v52, %v1152_v5  ;;  %v1370_v31 = vadd.f32 %v9707_v58, %v1347_v40 }
 0x231   :  { %v7812_v30 = vpop.f32.mrf.mxu0 }
 0x232   :  { %v9788_v8 = vadd.f32 %v9707_v58, %v1346_v62  ;;  %v1383_v9 = vadd.f32 %v1382_v27, %v9781_v61  ;;  %v1349_v42 = vadd.f32 %v7812_v30, %v1155_v63 }
 0x233   :  { %v1309_v39 = vpop.f32.mrf.mxu0 }
 0x234   :  { %v1384_v44 = vadd.f32 %v1383_v9, %v9788_v8  ;;  %v1348_v26 = vadd.f32 %v1309_v39, %v1154_v33  ;;  %v1372_v23 = vadd.f32 %v9707_v58, %v1349_v42 }
 0x235   :  { %v7815_v14 = vpop.f32.mrf.mxu0 }
 0x236   :  { %v1371_v19 = vadd.f32 %v9707_v58, %v1348_v26  ;;  %v1385_v11 = vadd.f32 %v1384_v44, %v1370_v31  ;;  %v1351_v1 = vadd.f32 %v7815_v14, %v1157_v29 }
 0x237   :  { %v1319_v20 = vpop.f32.mrf.mxu0 }
 0x238   :  { %v1386_v43 = vadd.f32 %v1385_v11, %v1371_v19  ;;  %v1350_v2 = vadd.f32 %v1319_v20, %v1156_v16  ;;  %v1374_v38 = vadd.f32 %v9707_v58, %v1351_v1 }
 0x239   :  { %v7818_v3 = vpop.f32.mrf.mxu0 }
 0x23a   :  { %v1373_v59 = vadd.f32 %v9707_v58, %v1350_v2  ;;  %v1387_v36 = vadd.f32 %v1386_v43, %v1372_v23  ;;  %v1353_v25 = vadd.f32 %v7818_v3, %v1159_v57 }
 0x23b   :  { %v1329_v45 = vpop.f32.mrf.mxu0 }
 0x23c   :  { %v1388_v50 = vadd.f32 %v1387_v36, %v1373_v59  ;;  %v1352_v12 = vadd.f32 %v1329_v45, %v1158_v48  ;;  %v1376_v13 = vadd.f32 %v9707_v58, %v1353_v25 }
 0x23e   :  { %v1375_v28 = vadd.f32 %v9707_v58, %v1352_v12  ;;  %v1389_v18 = vadd.f32 %v1388_v50, %v1374_v38 }
 0x240   :  { %v1390_v21 = vadd.f32 %v1389_v18, %v1375_v28 }
 0x242   :  { %v1391_v22 = vadd.f32 %v1390_v21, %v1376_v13 }
 0x244   :  { %v1392_v46 = vrot.slane %v1391_v22, 4 }
 0x246   :  { %v1393_v5 = vadd.f32 %v1392_v46, %v1391_v22 }
 0x248   :  { %v1394_v6 = vrot.slane %v1393_v5, 2 }
 0x24a   :  { %v1395_v15 = vadd.f32 %v1394_v6, %v1393_v5 }
 0x24c   :  { %v1396_v53 = vrot.slane %v1395_v15, 1 }
 0x24e   :  { %v1397_v49 = vadd.f32 %v1396_v53, %v1395_v15 }
 0x250   :  { %v1399_v54 = vmul.f32 0.0078125, %v1397_v49 }
 0x252   :  { %v1400_v52 = vsub.f32 %v9712_v60, %v1399_v54  ;;  %v1401_v27 = vsub.f32 %v9723_v34, %v1399_v54  ;;  %v1402_v40 = vsub.f32 %v9734_v55, %v1399_v54  ;;  %v1403_v0 = vsub.f32 %v9743_v24, %v1399_v54 }
 0x253   :  { %v1404_v58 = vsub.f32 %v9755_v47, %v1399_v54  ;;  %v1405_v17 = vsub.f32 %v9765_v51, %v1399_v54  ;;  %v1406_v56 = vsub.f32 %v9773_v7, %v1399_v54  ;;  %v1407_v34 = vsub.f32 %v9781_v61, %v1399_v54 }
 0x254   :  { %v1416_v62 = vmul.f32 %v1400_v52, %v1400_v52  ;;  %v1417_v63 = vmul.f32 %v1401_v27, %v1401_v27  ;;  %v1418_v30 = vmul.f32 %v1402_v40, %v1402_v40  ;;  %v1419_v9 = vmul.f32 %v1403_v0, %v1403_v0 }
 0x255   :  { %v1420_v35 = vmul.f32 %v1404_v58, %v1404_v58  ;;  %v1421_v39 = vmul.f32 %v1405_v17, %v1405_v17  ;;  %v1408_v44 = vsub.f32 %v9788_v8, %v1399_v54  ;;  %v1422_v42 = vmul.f32 %v1406_v56, %v1406_v56 }
 0x256   :  { %v1432_v33 = vadd.f32 %v1417_v63, %v1416_v62  ;;  %v1409_v26 = vsub.f32 %v1370_v31, %v1399_v54  ;;  %v1423_v47 = vmul.f32 %v1407_v34, %v1407_v34  ;;  %v1410_v32 = vsub.f32 %v1371_v19, %v1399_v54  ;;  %v6724_v63 = vld [vmem:[%s11853_s5] ss:$0 sm:$0xff]  ;;  %s11882_s5 = sld [smem:[#allocation60_spill]] }
 0x257   :  { %v1424_v14 = vmul.f32 %v1408_v44, %v1408_v44  ;;  %v1411_v16 = vsub.f32 %v1372_v23, %v1399_v54  ;;  %v1412_v7 = vsub.f32 %v1373_v59, %v1399_v54  ;;  %v1413_v43 = vsub.f32 %v1374_v38, %v1399_v54 }
 0x258   :  { %v1433_v10 = vadd.f32 %v1432_v33, %v1418_v30  ;;  %v1425_v37 = vmul.f32 %v1409_v26, %v1409_v26  ;;  %v1426_v41 = vmul.f32 %v1410_v32, %v1410_v32  ;;  %v1414_v2 = vsub.f32 %v1375_v28, %v1399_v54 }
 0x259   :  { %v1427_v61 = vmul.f32 %v1411_v16, %v1411_v16  ;;  %v1428_v3 = vmul.f32 %v1412_v7, %v1412_v7  ;;  %v1415_v57 = vsub.f32 %v1376_v13, %v1399_v54  ;;  %v1429_v48 = vmul.f32 %v1413_v43, %v1413_v43 }
 0x25a   :  { %v1434_v60 = vadd.f32 %v1433_v10, %v1419_v9  ;;  %v1430_v36 = vmul.f32 %v1414_v2, %v1414_v2 }
 0x25b   :  { %v1431_v19 = vmul.f32 %v1415_v57, %v1415_v57 }
 0x25c   :  { %v1435_v55 = vadd.f32 %v1434_v60, %v1420_v35 }
 0x25e   :  { %v1436_v24 = vadd.f32 %v1435_v55, %v1421_v39 }
 0x260   :  { %v1437_v29 = vadd.f32 %v1436_v24, %v1422_v42 }
 0x262   :  { %v1438_v51 = vadd.f32 %v1437_v29, %v1423_v47 }
 0x264   :  { %v1439_v11 = vadd.f32 %v1438_v51, %v1424_v14 }
 0x266   :  { %v1440_v20 = vadd.f32 %v1439_v11, %v1425_v37 }
 0x268   :  { %v1441_v1 = vadd.f32 %v1440_v20, %v1426_v41 }
 0x26a   :  { %v1442_v8 = vadd.f32 %v1441_v1, %v1427_v61 }
 0x26c   :  { %v1443_v31 = vadd.f32 %v1442_v8, %v1428_v3 }
 0x26e   :  { %v1444_v45 = vadd.f32 %v1443_v31, %v1429_v48 }
 0x270   :  { %v1445_v50 = vadd.f32 %v1444_v45, %v1430_v36 }
 0x272   :  { %v1446_v25 = vadd.f32 %v1445_v50, %v1431_v19 }
 0x274   :  { %v1447_v23 = vrot.slane %v1446_v25, 4 }
 0x276   :  { %v1448_v12 = vadd.f32 %v1447_v23, %v1446_v25 }
 0x278   :  { %v1449_v18 = vrot.slane %v1448_v12, 2 }
 0x27a   :  { %v1450_v59 = vadd.f32 %v1449_v18, %v1448_v12 }
 0x27c   :  { %v1451_v21 = vrot.slane %v1450_v59, 1 }
 0x27e   :  { %v1452_v38 = vadd.f32 %v1451_v21, %v1450_v59 }
 0x280   :  { %v1453_v22 = vmul.f32 0.0078125, %v1452_v38 }
 0x282   :  { %v1454_v46 = vadd.f32 1e-05, %v1453_v22 }
 0x284   :  { %8814 = vrsqrt.f32 %v1454_v46 }
 0x291   :  { %v8815_v28 = vpop.eup %8814 }
 0x292   :  { %v1456_v5 = vmul.f32 %v8815_v28, %v1400_v52  ;;  %v1457_v13 = vmul.f32 %v8815_v28, %v1401_v27  ;;  %v1458_v6 = vmul.f32 %v8815_v28, %v1402_v40  ;;  %v1459_v15 = vmul.f32 %v8815_v28, %v1403_v0 }
 0x293   :  { %v1460_v53 = vmul.f32 %v8815_v28, %v1404_v58  ;;  %v1461_v49 = vmul.f32 %v8815_v28, %v1405_v17  ;;  %v1462_v54 = vmul.f32 %v8815_v28, %v1406_v56  ;;  %v1463_v62 = vmul.f32 %v8815_v28, %v1407_v34  ;;  %v6725_v56 = vld [vmem:[%s11854_s13] ss:$0 sm:$0xff]  ;;  %s11883_s13 = sld [smem:[#allocation61_spill]] }
 0x294   :  { %v1464_v30 = vmul.f32 %v8815_v28, %v1408_v44  ;;  %v1465_v33 = vmul.f32 %v8815_v28, %v1409_v26  ;;  %v1466_v9 = vmul.f32 %v8815_v28, %v1410_v32  ;;  %v1467_v10 = vmul.f32 %v8815_v28, %v1411_v16 }
 0x295   :  { %v1468_v35 = vmul.f32 %v8815_v28, %v1412_v7  ;;  %v1469_v60 = vmul.f32 %v8815_v28, %v1413_v43  ;;  %v1470_v39 = vmul.f32 %v8815_v28, %v1414_v2  ;;  %v1471_v55 = vmul.f32 %v8815_v28, %v1415_v57 }
 0x296   :  { %v1479_v42 = vmul.f32 %v6724_v63, %v1456_v5  ;;  %v1480_v24 = vmul.f32 %v6724_v63, %v1457_v13  ;;  %v1481_v52 = vmul.f32 %v6724_v63, %v1458_v6  ;;  %v1482_v27 = vmul.f32 %v6724_v63, %v1459_v15  ;;  %v6756_v15 = vld [vmem:[%s9194_s25 + $0x170] sm:$0xff] }
 0x297   :  { %v1483_v40 = vmul.f32 %v6724_v63, %v1460_v53  ;;  %v1484_v0 = vmul.f32 %v6724_v63, %v1461_v49  ;;  %v1485_v58 = vmul.f32 %v6724_v63, %v1462_v54  ;;  %v1486_v17 = vmul.f32 %v6724_v63, %v1463_v62  ;;  %v6755_v53 = vld [vmem:[%s9194_s25 + $0x168] sm:$0xff]  ;;  %v6754_v49 = vld [vmem:[%s9194_s25 + $0x160] sm:$0xff]  ;;  %v6753_v54 = vld [vmem:[%s9194_s25 + $0x158] sm:$0xff] }
 0x298   :  { %v1487_v34 = vmul.f32 %v6724_v63, %v1464_v30  ;;  %v1488_v47 = vmul.f32 %v6724_v63, %v1465_v33  ;;  %v1489_v44 = vmul.f32 %v6724_v63, %v1466_v9  ;;  %v1490_v29 = vmul.f32 %v6724_v63, %v1467_v10 }
 0x299   :  { %v1491_v26 = vmul.f32 %v6724_v63, %v1468_v35  ;;  %v1492_v32 = vmul.f32 %v6724_v63, %v1469_v60  ;;  %v1493_v14 = vmul.f32 %v6724_v63, %v1470_v39  ;;  %v1494_v51 = vmul.f32 %v6724_v63, %v1471_v55  ;;  %v6752_v60 = vld [vmem:[%s9194_s25 + $0x150] sm:$0xff] }
 0x29a   :  { %v1503_v16 = vadd.f32 %v6725_v56, %v1480_v24  ;;  %v1504_v37 = vadd.f32 %v6725_v56, %v1481_v52  ;;  %v1505_v11 = vadd.f32 %v6725_v56, %v1482_v27  ;;  %v1506_v7 = vadd.f32 %v6725_v56, %v1483_v40  ;;  %v8838_v27 = vld [vmem:[#allocation4] sm:$0xff] }
 0x29b   :  { %v9816_v41 = vadd.f32 %v6725_v56, %v1484_v0  ;;  %v9818_v20 = vadd.f32 %v6725_v56, %v1485_v58  ;;  %v9820_v43 = vadd.f32 %v6725_v56, %v1486_v17  ;;  %v9822_v61 = vadd.f32 %v6725_v56, %v1487_v34 }
 0x29c   :  { %v9824_v1 = vadd.f32 %v6725_v56, %v1488_v47  ;;  %v9826_v2 = vadd.f32 %v6725_v56, %v1489_v44  ;;  %v9828_v3 = vadd.f32 %v6725_v56, %v1490_v29  ;;  %v9830_v8 = vadd.f32 %v6725_v56, %v1491_v26  ;;  %v6751_v26 = vld [vmem:[%s9194_s25 + $0x148] sm:$0xff] }
 0x29d   :  { %v9832_v57 = vadd.f32 %v6725_v56, %v1492_v32  ;;  %v9834_v48 = vadd.f32 %v6725_v56, %v1493_v14  ;;  %v9836_v31 = vadd.f32 %v6725_v56, %v1494_v51  ;;  %v1521_v36 = vmax.f32 %v1505_v11, 0.0 }
 0x29e   :  { %v1522_v45 = vmax.f32 %v1506_v7, 0.0  ;;  %v1523_v19 = vmax.f32 %v9816_v41, 0.0  ;;  %v1524_v50 = vmax.f32 %v9818_v20, 0.0  ;;  %v1525_v25 = vmax.f32 %v9820_v43, 0.0  ;;  %v6747_v43 = vld [vmem:[%s9194_s25 + $0x128] sm:$0xff] }
 0x29f   :  { %v1526_v23 = vmax.f32 %v9822_v61, 0.0  ;;  %v1527_v12 = vmax.f32 %v9824_v1, 0.0  ;;  %v1528_v18 = vmax.f32 %v9826_v2, 0.0  ;;  %v1529_v59 = vmax.f32 %v9828_v3, 0.0  ;;  %1554 = vst [vmem:[#allocation3 + $0x19] sm:$0xff] %v1521_v36  ;;  %v6746_v61 = vld [vmem:[%s9194_s25 + $0x120] sm:$0xff] }
 0x2a0   :  { %v1530_v21 = vmax.f32 %v9830_v8, 0.0  ;;  %v1531_v38 = vmax.f32 %v9832_v57, 0.0  ;;  %v1532_v22 = vmax.f32 %v9834_v48, 0.0  ;;  %v1533_v46 = vmax.f32 %v9836_v31, 0.0  ;;  %1555 = vst [vmem:[#allocation3 + $0x21] sm:$0xff] %v1522_v45  ;;  %1556 = vst [vmem:[#allocation3 + $0x29] sm:$0xff] %v1523_v19 }
 0x2a1   :  { %1557 = vst [vmem:[#allocation3 + $0x31] sm:$0xff] %v1524_v50  ;;  %1558 = vst [vmem:[#allocation3 + $0x39] sm:$0xff] %v1525_v25  ;;  %v1502_v28 = vadd.f32 %v6725_v56, %v1479_v42  ;;  %v1519_v5 = vmax.f32 %v1503_v16, 0.0  ;;  %v1520_v13 = vmax.f32 %v1504_v37, 0.0  ;;  %v6745_v1 = vld [vmem:[%s9194_s25 + $0x118] sm:$0xff]  ;;  %v6744_v2 = vld [vmem:[%s9194_s25 + $0x110] sm:$0xff] }
 0x2a2   :  { %1562 = vst [vmem:[#allocation3 + $0x59] sm:$0xff] %v1529_v59  ;;  %1559 = vst [vmem:[#allocation3 + $0x41] sm:$0xff] %v1526_v23  ;;  %v6743_v3 = vld [vmem:[%s9194_s25 + $0x108] sm:$0xff]  ;;  %v6742_v8 = vld [vmem:[%s9194_s25 + $0x100] sm:$0xff] }
 0x2a3   :  { %1560 = vst [vmem:[#allocation3 + $0x49] sm:$0xff] %v1527_v12  ;;  %1561 = vst [vmem:[#allocation3 + $0x51] sm:$0xff] %v1528_v18  ;;  %v1518_v6 = vmax.f32 %v1502_v28, 0.0  ;;  %v2391_v28 = vld [vmem:[#allocation7 + $0xf0] sm:$0xff] }
 0x2a4   :  { %1563 = vst [vmem:[#allocation3 + $0x61] sm:$0xff] %v1530_v21  ;;  %1564 = vst [vmem:[#allocation3 + $0x69] sm:$0xff] %v1531_v38 }
 0x2a5   :  { %1565 = vst [vmem:[#allocation3 + $0x71] sm:$0xff] %v1532_v22  ;;  %1566 = vst [vmem:[#allocation3 + $0x79] sm:$0xff] %v1533_v46  ;;  %7851 = vmatprep.mubr.f32.mxu1 %v1518_v6 }
 0x2a6   :  { %1552 = vst [vmem:[#allocation3 + $0x9] sm:$0xff] %v1519_v5  ;;  %1553 = vst [vmem:[#allocation3 + $0x11] sm:$0xff] %v1520_v13  ;;  %7852 = vmatmul.mubr.f32.vlgmr.msra.gmra.mxu1 %v1519_v5 }
 0x2a7   :  { %1551 = vst [vmem:[#allocation3 + $0x1] sm:$0xff] %v1518_v6  ;;  %7854 = vmatprep.mubr.f32.mxu1 %v1520_v13  ;;  %7932 = vmatpush3.msra.mxu1 %v9751_v4  ;;  %v1571_v30 = vld [vmem:[#allocation3 + $0x20] sm:$0xff]  ;;  %v9878_v35 = vld [vmem:[#allocation3 + $0x28] sm:$0xff]  ;;  %v2390_v6 = vld [vmem:[#allocation7 + $0xe8] sm:$0xff] }
 0x2a8   :  { %7933 = vmatprep.subr.mxu1 %v6756_v15  ;;  %v9880_v4 = vld [vmem:[#allocation3 + $0x30] sm:$0xff]  ;;  %v9883_v39 = vld [vmem:[#allocation3 + $0x38] sm:$0xff]  ;;  %v9897_v58 = vld [vmem:[#allocation3 + $0x22] sm:$0xff] }
 0x2a9   :  { %7934 = vmatpush3.msra.mxu1 %v6756_v15  ;;  %v9887_v42 = vld [vmem:[#allocation3 + $0x40] sm:$0xff]  ;;  %v9907_v47 = vld [vmem:[#allocation3 + $0x2a] sm:$0xff]  ;;  %v9909_v44 = vld [vmem:[#allocation3 + $0x32] sm:$0xff] }
 0x2aa   :  { %7855 = vmatmul.mubr.f32.gmra.mxu1 %v1521_v36  ;;  %7935 = vmatprep.subr.mxu1 %v6755_v53  ;;  %v9889_v24 = vld [vmem:[#allocation3 + $0x48] sm:$0xff]  ;;  %v9891_v52 = vld [vmem:[#allocation3 + $0x50] sm:$0xff]  ;;  %v9895_v0 = vld [vmem:[#allocation3 + $0x1a] sm:$0xff]  ;;  %2300 = vst [vmem:[#allocation3 + $0x28] sm:$0xff] %v8838_v27 }
 0x2ab   :  { %7857 = vmatprep.mubr.f32.mxu1 %v1522_v45  ;;  %7936 = vmatpush3.msra.mxu1 %v6755_v53  ;;  %v9901_v17 = vld [vmem:[#allocation3 + $0x58] sm:$0xff]  ;;  %v9903_v56 = vld [vmem:[#allocation3 + $0x60] sm:$0xff]  ;;  %v9905_v34 = vld [vmem:[#allocation3 + $0x68] sm:$0xff]  ;;  %2299 = vst [vmem:[#allocation3 + $0x20] sm:$0xff] %v8838_v27 }
 0x2ac   :  { %7937 = vmatprep.subr.mxu1 %v6754_v49  ;;  %v9911_v29 = vld [vmem:[#allocation3 + $0x3a] sm:$0xff]  ;;  %v9914_v32 = vld [vmem:[#allocation3 + $0x70] sm:$0xff]  ;;  %2301 = vst [vmem:[#allocation3 + $0x30] sm:$0xff] %v8838_v27  ;;  %v9916_v14 = vld [vmem:[#allocation3 + $0x42] sm:$0xff] }
 0x2ad   :  { %v1569_v62 = vld [vmem:[#allocation3 + $0x10] sm:$0xff]  ;;  %v1570_v63 = vld [vmem:[#allocation3 + $0x18] sm:$0xff]  ;;  %7938 = vmatpush3.msra.mxu1 %v6754_v49  ;;  %2302 = vst [vmem:[#allocation3 + $0x38] sm:$0xff] %v8838_v27  ;;  %2303 = vst [vmem:[#allocation3 + $0x40] sm:$0xff] %v8838_v27 }
 0x2ae   :  { %v9876_v33 = vld [vmem:[#allocation3 + $0xa] sm:$0xff]  ;;  %v1567_v9 = vld [vmem:[#allocation3] sm:$0xff]  ;;  %v9893_v40 = vld [vmem:[#allocation3 + $0x12] sm:$0xff]  ;;  %7858 = vmatmul.mubr.f32.gmra.mxu1 %v1523_v19  ;;  %7939 = vmatprep.subr.mxu1 %v6753_v54 }
 0x2af   :  { %v1568_v10 = vld [vmem:[#allocation3 + $0x8] sm:$0xff]  ;;  %7907 = vmatprep.mubr.f32.mxu0 %v1567_v9  ;;  %2297 = vst [vmem:[#allocation3 + $0x10] sm:$0xff] %v8838_v27  ;;  %2298 = vst [vmem:[#allocation3 + $0x18] sm:$0xff] %v8838_v27  ;;  %v9920_v16 = vld [vmem:[#allocation3 + $0x52] sm:$0xff]  ;;  %7860 = vmatprep.mubr.f32.mxu1 %v1524_v50 }
 0x2b0   :  { %v9885_v55 = vld [vmem:[#allocation3 + $0x2] sm:$0xff]  ;;  %7908 = vmatmul.mubr.f32.vlgmr.msra.gmra.mxu0 %v1568_v10  ;;  %v9918_v51 = vld [vmem:[#allocation3 + $0x4a] sm:$0xff]  ;;  %7940 = vmatpush3.msra.mxu1 %v6753_v54  ;;  %v9924_v37 = vld [vmem:[#allocation3 + $0x5a] sm:$0xff] }
 0x2b1   :  { %2295 = vst [vmem:[#allocation3] sm:$0xff] %v8838_v27  ;;  %2296 = vst [vmem:[#allocation3 + $0x8] sm:$0xff] %v8838_v27  ;;  %7910 = vmatprep.mubr.f32.mxu0 %v1569_v62  ;;  %v9926_v11 = vld [vmem:[#allocation3 + $0x62] sm:$0xff]  ;;  %v9928_v7 = vld [vmem:[#allocation3 + $0x6a] sm:$0xff]  ;;  %7941 = vmatprep.subr.mxu1 %v6752_v60 }
 0x2b2   :  { %2304 = vst [vmem:[#allocation3 + $0x48] sm:$0xff] %v8838_v27  ;;  %2305 = vst [vmem:[#allocation3 + $0x50] sm:$0xff] %v8838_v27  ;;  %v1582_v41 = vld [vmem:[#allocation3 + $0x78] sm:$0xff]  ;;  %7942 = vmatpush3.msra.mxu1 %v6752_v60  ;;  %v6749_v19 = vld [vmem:[%s9194_s25 + $0x138] sm:$0xff] }
 0x2b3   :  { %2306 = vst [vmem:[#allocation3 + $0x58] sm:$0xff] %v8838_v27  ;;  %2307 = vst [vmem:[#allocation3 + $0x60] sm:$0xff] %v8838_v27  ;;  %v9930_v36 = vld [vmem:[#allocation3 + $0x72] sm:$0xff]  ;;  %v9932_v20 = vld [vmem:[#allocation3 + $0x7a] sm:$0xff]  ;;  %7861 = vmatmul.mubr.f32.gmra.mxu1 %v1525_v25  ;;  %7943 = vmatprep.subr.mxu1 %v6751_v26 }
 0x2b4   :  { %2308 = vst [vmem:[#allocation3 + $0x68] sm:$0xff] %v8838_v27  ;;  %7911 = vmatmul.mubr.f32.gmra.mxu0 %v1570_v63  ;;  %2309 = vst [vmem:[#allocation3 + $0x70] sm:$0xff] %v8838_v27  ;;  %v6750_v45 = vld [vmem:[%s9194_s25 + $0x140] sm:$0xff]  ;;  %7863 = vmatprep.mubr.f32.mxu1 %v1526_v23  ;;  %v6748_v50 = vld [vmem:[%s9194_s25 + $0x130] sm:$0xff]  ;;  %s11856_s25 = sld [smem:[#allocation34_spill]] }
 0x2b5   :  { %2310 = vst [vmem:[#allocation3 + $0x78] sm:$0xff] %v8838_v27  ;;  %2311 = vst [vmem:[#allocation3 + $0x80] sm:$0x3] %v8838_v27  ;;  %7913 = vmatprep.mubr.f32.mxu0 %v1571_v30  ;;  %7944 = vmatpush3.msra.mxu1 %v6751_v26  ;;  %v2389_v53 = vld [vmem:[#allocation7 + $0xe0] sm:$0xff]  ;;  %v2359_v62 = vld [vmem:[#allocation7 + $0x78] sm:$0xff] }
 0x2b6   :  { %7945 = vmatprep.subr.mxu1 %v6750_v45  ;;  %v2388_v63 = vld [vmem:[#allocation7 + $0xd8] sm:$0xff]  ;;  %v2387_v9 = vld [vmem:[#allocation7 + $0xd0] sm:$0xff]  ;;  %v2386_v60 = vld [vmem:[#allocation7 + $0xc8] sm:$0xff] }
 0x2b7   :  { %7946 = vmatpush3.msra.mxu1 %v6750_v45  ;;  %v2355_v27 = vld [vmem:[#allocation7 + $0x58] sm:$0xff]  ;;  %v2352_v26 = vld [vmem:[#allocation7 + $0x40] sm:$0xff] }
 0x2b8   :  { %7914 = vmatmul.mubr.f32.gmra.mxu0 %v9878_v35  ;;  %7864 = vmatmul.mubr.f32.gmra.mxu1 %v1527_v12 }
 0x2b9   :  { %7916 = vmatprep.mubr.f32.mxu0 %v9880_v4  ;;  %7947 = vmatprep.subr.mxu1 %v6749_v19  ;;  %v2357_v4 = vld [vmem:[#allocation7 + $0x68] sm:$0xff] }
 0x2ba   :  { %7866 = vmatprep.mubr.f32.mxu1 %v1528_v18  ;;  %7948 = vmatpush3.msra.mxu1 %v6749_v19  ;;  %v2350_v19 = vld [vmem:[#allocation7 + $0x30] sm:$0xff] }
 0x2bb   :  { %7949 = vmatprep.subr.mxu1 %v6748_v50 }
 0x2bc   :  { %7917 = vmatmul.mubr.f32.gmra.mxu0 %v9883_v39  ;;  %7950 = vmatpush3.msra.mxu1 %v6748_v50  ;;  %v2379_v50 = vld [vmem:[#allocation7 + $0x90] sm:$0xff] }
 0x2bd   :  { %7919 = vmatprep.mubr.f32.mxu0 %v9887_v42  ;;  %7867 = vmatmul.mubr.f32.gmra.mxu1 %v1529_v59  ;;  %v2385_v42 = vld [vmem:[#allocation7 + $0xc0] sm:$0xff] }
 0x2be   :  { %7951 = vmatprep.subr.mxu1 %v6747_v43  ;;  %7869 = vmatprep.mubr.f32.mxu1 %v1530_v21 }
 0x2bf   :  { %7952 = vmatpush3.msra.mxu1 %v6747_v43 }
 0x2c0   :  { %7920 = vmatmul.mubr.f32.gmra.mxu0 %v9889_v24  ;;  %7953 = vmatprep.subr.mxu1 %v6746_v61 }
 0x2c1   :  { %7922 = vmatprep.mubr.f32.mxu0 %v9891_v52  ;;  %7954 = vmatpush3.msra.mxu1 %v6746_v61 }
 0x2c2   :  { %7870 = vmatmul.mubr.f32.gmra.mxu1 %v1531_v38  ;;  %7955 = vmatprep.subr.mxu1 %v6745_v1  ;;  %v2392_v38 = vld [vmem:[#allocation7 + $0xf8] sm:$0xff] }
 0x2c3   :  { %7872 = vmatprep.mubr.f32.mxu1 %v1532_v22  ;;  %7956 = vmatpush3.msra.mxu1 %v6745_v1 }
 0x2c4   :  { %7923 = vmatmul.mubr.f32.gmra.mxu0 %v9901_v17  ;;  %7957 = vmatprep.subr.mxu1 %v6744_v2  ;;  %v2383_v17 = vld [vmem:[#allocation7 + $0xb0] sm:$0xff] }
 0x2c5   :  { %7925 = vmatprep.mubr.f32.mxu0 %v9903_v56  ;;  %7958 = vmatpush3.msra.mxu1 %v6744_v2 }
 0x2c6   :  { %7873 = vmatmul.mubr.f32.gmra.mxu1 %v1533_v46  ;;  %7959 = vmatprep.subr.mxu1 %v6743_v3 }
 0x2c7   :  { %7960 = vmatpush3.msra.mxu1 %v6743_v3  ;;  %7963 = vmatprep.mubr.f32.mxu1 %v9885_v55  ;;  %v2356_v55 = vld [vmem:[#allocation7 + $0x60] sm:$0xff] }
 0x2c8   :  { %7926 = vmatmul.mubr.f32.gmra.mxu0 %v9905_v34  ;;  %7961 = vmatprep.subr.mxu1 %v6742_v8 }
 0x2c9   :  { %7928 = vmatprep.mubr.f32.mxu0 %v9914_v32  ;;  %7962 = vmatpush3.msra.mxu1 %v6742_v8  ;;  %v2381_v32 = vld [vmem:[#allocation7 + $0xa0] sm:$0xff]  ;;  %v2349_v8 = vld [vmem:[#allocation7 + $0x28] sm:$0xff] }
 0x2ca   :  { %7964 = vmatmul.mubr.f32.vlgmr.msra.gmra.mxu1 %v9876_v33  ;;  %7987 = vmatprep.subr.mxu0 %v2392_v38  ;;  %v2358_v33 = vld [vmem:[#allocation7 + $0x70] sm:$0xff] }
 0x2cb   :  { %7966 = vmatprep.mubr.f32.mxu1 %v9893_v40  ;;  %7988 = vmatpush3.msra.mxu0 %v2392_v38  ;;  %v2384_v40 = vld [vmem:[#allocation7 + $0xb8] sm:$0xff]  ;;  %v2377_v38 = vld [vmem:[#allocation7 + $0x80] sm:$0xff] }
 0x2cc   :  { %7929 = vmatmul.mubr.f32.gmra.mxu0 %v1582_v41  ;;  %7989 = vmatprep.subr.mxu0 %v2391_v28 }
 0x2cd   :  { %7990 = vmatpush3.msra.mxu0 %v2391_v28  ;;  %8043 = vmatprep.subr.mxu1 %v2359_v62 }
 0x2ce   :  { %7967 = vmatmul.mubr.f32.gmra.mxu1 %v9895_v0  ;;  %7991 = vmatprep.subr.mxu0 %v2390_v6 }
 0x2cf   :  { %7969 = vmatprep.mubr.f32.mxu1 %v9897_v58  ;;  %7992 = vmatpush3.msra.mxu0 %v2390_v6  ;;  %v2354_v58 = vld [vmem:[#allocation7 + $0x50] sm:$0xff] }
 0x2d0   :  { %7993 = vmatprep.subr.mxu0 %v2389_v53  ;;  %8044 = vmatpush3.msra.mxu1 %v2359_v62 }
 0x2d1   :  { %7994 = vmatpush3.msra.mxu0 %v2389_v53  ;;  %8045 = vmatprep.subr.mxu1 %v2358_v33 }
 0x2d2   :  { %7970 = vmatmul.mubr.f32.gmra.mxu1 %v9907_v47  ;;  %7995 = vmatprep.subr.mxu0 %v2388_v63  ;;  %v2353_v47 = vld [vmem:[#allocation7 + $0x48] sm:$0xff] }
 0x2d3   :  { %7972 = vmatprep.mubr.f32.mxu1 %v9909_v44  ;;  %7996 = vmatpush3.msra.mxu0 %v2388_v63  ;;  %v2382_v44 = vld [vmem:[#allocation7 + $0xa8] sm:$0xff] }
 0x2d4   :  { %7997 = vmatprep.subr.mxu0 %v2387_v9  ;;  %8046 = vmatpush3.msra.mxu1 %v2358_v33 }
 0x2d5   :  { %7998 = vmatpush3.msra.mxu0 %v2387_v9  ;;  %8047 = vmatprep.subr.mxu1 %v2357_v4  ;;  %v10071_v9 = vld [vmem:[#allocation7 + $0x178] sm:$0xff] }
 0x2d6   :  { %7973 = vmatmul.mubr.f32.gmra.mxu1 %v9911_v29  ;;  %7999 = vmatprep.subr.mxu0 %v2386_v60 }
 0x2d7   :  { %7975 = vmatprep.mubr.f32.mxu1 %v9916_v14  ;;  %8048 = vmatpush3.msra.mxu1 %v2357_v4 }
 0x2d8   :  { %8000 = vmatpush3.msra.mxu0 %v2386_v60  ;;  %8049 = vmatprep.subr.mxu1 %v2356_v55  ;;  %v2345_v60 = vld [vmem:[#allocation7 + $0x8] sm:$0xff] }
 0x2d9   :  { %8001 = vmatprep.subr.mxu0 %v2385_v42  ;;  %8050 = vmatpush3.msra.mxu1 %v2356_v55 }
 0x2da   :  { %7976 = vmatmul.mubr.f32.gmra.mxu1 %v9918_v51  ;;  %8002 = vmatpush3.msra.mxu0 %v2385_v42 }
 0x2db   :  { %7978 = vmatprep.mubr.f32.mxu1 %v9920_v16  ;;  %8051 = vmatprep.subr.mxu1 %v2355_v27 }
 0x2dc   :  { %8003 = vmatprep.subr.mxu0 %v2384_v40  ;;  %8052 = vmatpush3.msra.mxu1 %v2355_v27 }
 0x2dd   :  { %8004 = vmatpush3.msra.mxu0 %v2384_v40  ;;  %8053 = vmatprep.subr.mxu1 %v2354_v58 }
 0x2de   :  { %7979 = vmatmul.mubr.f32.gmra.mxu1 %v9924_v37  ;;  %8005 = vmatprep.subr.mxu0 %v2383_v17 }
 0x2df   :  { %7981 = vmatprep.mubr.f32.mxu1 %v9926_v11  ;;  %8054 = vmatpush3.msra.mxu1 %v2354_v58  ;;  %v2351_v11 = vld [vmem:[#allocation7 + $0x38] sm:$0xff] }
 0x2e0   :  { %8006 = vmatpush3.msra.mxu0 %v2383_v17  ;;  %8055 = vmatprep.subr.mxu1 %v2353_v47 }
 0x2e1   :  { %8007 = vmatprep.subr.mxu0 %v2382_v44  ;;  %8056 = vmatpush3.msra.mxu1 %v2353_v47  ;;  %v2344_v47 = vld [vmem:[#allocation7] sm:$0xff] }
 0x2e2   :  { %7982 = vmatmul.mubr.f32.gmra.mxu1 %v9928_v7  ;;  %8008 = vmatpush3.msra.mxu0 %v2382_v44  ;;  %v2380_v7 = vld [vmem:[#allocation7 + $0x98] sm:$0xff] }
 0x2e3   :  { %7984 = vmatprep.mubr.f32.mxu1 %v9930_v36  ;;  %8057 = vmatprep.subr.mxu1 %v2352_v26 }
 0x2e4   :  { %8009 = vmatprep.subr.mxu0 %v2381_v32  ;;  %8058 = vmatpush3.msra.mxu1 %v2352_v26 }
 0x2e5   :  { %8010 = vmatpush3.msra.mxu0 %v2381_v32  ;;  %8059 = vmatprep.subr.mxu1 %v2351_v11 }
 0x2e6   :  { %7985 = vmatmul.mubr.f32.gmra.mxu1 %v9932_v20  ;;  %8011 = vmatprep.subr.mxu0 %v2380_v7  ;;  %v10044_v20 = vld [vmem:[%s11855_s21] ss:$0 sm:$0xff]  ;;  %s11884_s21 = sld [smem:[#allocation62_spill]] }
 0x2e7   :  { %8060 = vmatpush3.msra.mxu1 %v2351_v11  ;;  %8012 = vmatpush3.msra.mxu0 %v2380_v7 }
 0x2e8   :  { %8061 = vmatprep.subr.mxu1 %v2350_v19  ;;  %8013 = vmatprep.subr.mxu0 %v2379_v50 }
 0x2e9   :  { %8062 = vmatpush3.msra.mxu1 %v2350_v19  ;;  %8014 = vmatpush3.msra.mxu0 %v2379_v50 }
 0x2ea   :  { %8063 = vmatprep.subr.mxu1 %v2349_v8 }
 0x2eb   :  { %8064 = vmatpush3.msra.mxu1 %v2349_v8 }
 0x366   :  { %v9987_v57 = vpop.f32.mrf.mxu1 }
 0x368   :  { %v9989_v48 = vpop.f32.mrf.mxu1 }
 0x36a   :  { %v9991_v31 = vpop.f32.mrf.mxu1 }
 0x36c   :  { %v9993_v25 = vpop.f32.mrf.mxu1 }
 0x36e   :  { %v9997_v12 = vpop.f32.mrf.mxu1 }
 0x370   :  { %v9995_v23 = vpop.f32.mrf.mxu0  ;;  %v10001_v59 = vpop.f32.mrf.mxu1 }
 0x371   :  { %v1849_v14 = vadd.f32 %v9995_v23, %v9987_v57  ;;  %v2378_v57 = vld [vmem:[#allocation7 + $0x88] sm:$0xff] }
 0x372   :  { %v9999_v18 = vpop.f32.mrf.mxu0  ;;  %8015 = vmatprep.subr.mxu0 %v2378_v57 }
 0x373   :  { %v10005_v22 = vpop.f32.mrf.mxu1  ;;  %v1844_v51 = vadd.f32 %v9999_v18, %v9989_v48  ;;  %8016 = vmatpush3.msra.mxu0 %v2378_v57 }
 0x374   :  { %v10003_v21 = vpop.f32.mrf.mxu0  ;;  %8017 = vmatprep.subr.mxu0 %v2377_v38 }
 0x375   :  { %v10009_v5 = vpop.f32.mrf.mxu1  ;;  %v1859_v43 = vadd.f32 %v10003_v21, %v9991_v31  ;;  %v2348_v21 = vld [vmem:[#allocation7 + $0x20] sm:$0xff]  ;;  %8018 = vmatpush3.msra.mxu0 %v2377_v38 }
 0x376   :  { %v10007_v46 = vpop.f32.mrf.mxu0  ;;  %8065 = vmatprep.subr.mxu1 %v2348_v21  ;;  %8099 = vmatprep.subr.mxu0 %v10071_v9 }
 0x377   :  { %v1854_v61 = vadd.f32 %v10007_v46, %v9993_v25  ;;  %8066 = vmatpush3.msra.mxu1 %v2348_v21 }
 0x378   :  { %v10011_v13 = vpop.f32.mrf.mxu0  ;;  %v10013_v15 = vpop.f32.mrf.mxu1 }
 0x379   :  { %v1869_v25 = vadd.f32 %v10011_v13, %v9997_v12  ;;  %v2347_v12 = vld [vmem:[#allocation7 + $0x18] sm:$0xff]  ;;  %v2346_v13 = vld [vmem:[#allocation7 + $0x10] sm:$0xff] }
 0x37a   :  { %v10015_v49 = vpop.f32.mrf.mxu0  ;;  %v10017_v54 = vpop.f32.mrf.mxu1  ;;  %8067 = vmatprep.subr.mxu1 %v2347_v12 }
 0x37b   :  { %v1864_v46 = vadd.f32 %v10015_v49, %v10001_v59  ;;  %8068 = vmatpush3.msra.mxu1 %v2347_v12 }
 0x37c   :  { %v10021_v10 = vpop.f32.mrf.mxu0  ;;  %8069 = vmatprep.subr.mxu1 %v2346_v13 }
 0x37d   :  { %v10019_v30 = vpop.f32.mrf.mxu1  ;;  %v1879_v55 = vadd.f32 %v10021_v10, %v10005_v22  ;;  %8070 = vmatpush3.msra.mxu1 %v2346_v13 }
 0x37e   :  { %v10027_v24 = vpop.f32.mrf.mxu0  ;;  %8071 = vmatprep.subr.mxu1 %v2345_v60 }
 0x37f   :  { %v10023_v35 = vpop.f32.mrf.mxu1  ;;  %v1874_v42 = vadd.f32 %v10027_v24, %v10009_v5  ;;  %8072 = vmatpush3.msra.mxu1 %v2345_v60 }
 0x380   :  { %v10033_v56 = vpop.f32.mrf.mxu0  ;;  %8073 = vmatprep.subr.mxu1 %v2344_v47 }
 0x381   :  { %v1889_v5 = vadd.f32 %v10033_v56, %v10013_v15  ;;  %8074 = vmatpush3.msra.mxu1 %v2344_v47 }
 0x382   :  { %v10025_v39 = vpop.f32.mrf.mxu1  ;;  %v10041_v16 = vpop.f32.mrf.mxu0 }
 0x383   :  { %v1884_v24 = vadd.f32 %v10041_v16, %v10017_v54 }
 0x384   :  { %v10029_v52 = vpop.f32.mrf.mxu1  ;;  %v10053_v2 = vpop.f32.mrf.mxu0 }
 0x385   :  { %v1899_v54 = vadd.f32 %v10053_v2, %v10019_v30 }
 0x386   :  { %v10031_v0 = vpop.f32.mrf.mxu1  ;;  %v1893_v53 = vpop.f32.mrf.mxu0 }
 0x387   :  { %v1894_v56 = vadd.f32 %v1893_v53, %v10023_v35 }
 0x388   :  { %v10035_v34 = vpop.f32.mrf.mxu1  ;;  %v7927_v58 = vpop.f32.mrf.mxu0 }
 0x38a   :  { %v7965_v29 = vpop.f32.mrf.mxu1 }
 0x38b   :  { %v2101_v41 = vadd.f32 %v7965_v29, %v1849_v14 }
 0x38c   :  { %v2021_v37 = vpop.f32.mrf.mxu1 }
 0x38d   :  { %v2100_v36 = vadd.f32 %v2021_v37, %v1844_v51  ;;  %v10056_v48 = vadd.f32 %v10044_v20, %v2101_v41  ;;  %v1903_v51 = vpop.f32.mrf.mxu0 }
 0x38e   :  { %v7968_v45 = vpop.f32.mrf.mxu1 }
 0x38f   :  { %v10051_v1 = vadd.f32 %v10044_v20, %v2100_v36  ;;  %v2103_v23 = vadd.f32 %v7968_v45, %v1859_v43  ;;  %v7930_v19 = vpop.f32.mrf.mxu0 }
 0x390   :  { %v2031_v3 = vpop.f32.mrf.mxu1  ;;  %v1919_v53 = vadd.f32 %v7930_v19, %v10031_v0 }
 0x391   :  { %v2102_v31 = vadd.f32 %v2031_v3, %v1854_v61  ;;  %v2139_v28 = vadd.f32 %v10056_v48, %v10051_v1  ;;  %v10068_v63 = vadd.f32 %v10044_v20, %v2103_v23  ;;  %v1909_v23 = vadd.f32 %v7927_v58, %v10025_v39  ;;  %v1913_v35 = vpop.f32.mrf.mxu0 }
 0x392   :  { %v7971_v18 = vpop.f32.mrf.mxu1 }
 0x393   :  { %v10065_v6 = vadd.f32 %v10044_v20, %v2102_v31  ;;  %v2105_v59 = vadd.f32 %v7971_v18, %v1869_v25  ;;  %v1904_v31 = vadd.f32 %v1903_v51, %v10029_v52 }
 0x394   :  { %v2041_v62 = vpop.f32.mrf.mxu1 }
 0x395   :  { %v2140_v33 = vadd.f32 %v2139_v28, %v10065_v6  ;;  %v2104_v49 = vadd.f32 %v2041_v62, %v1864_v46  ;;  %v10083_v44 = vadd.f32 %v10044_v20, %v2105_v59  ;;  %v1914_v62 = vadd.f32 %v1913_v35, %v10035_v34 }
 0x396   :  { %v7974_v4 = vpop.f32.mrf.mxu1 }
 0x397   :  { %v10079_v27 = vadd.f32 %v10044_v20, %v2104_v49  ;;  %v2141_v40 = vadd.f32 %v2140_v33, %v10068_v63  ;;  %v2107_v26 = vadd.f32 %v7974_v4, %v1879_v55 }
 0x398   :  { %v2051_v17 = vpop.f32.mrf.mxu1 }
 0x399   :  { %v2142_v29 = vadd.f32 %v2141_v40, %v10079_v27  ;;  %v2106_v22 = vadd.f32 %v2051_v17, %v1874_v42  ;;  %v10095_v11 = vadd.f32 %v10044_v20, %v2107_v26 }
 0x39a   :  { %v7977_v10 = vpop.f32.mrf.mxu1 }
 0x39b   :  { %v10091_v32 = vadd.f32 %v10044_v20, %v2106_v22  ;;  %v2143_v14 = vadd.f32 %v2142_v29, %v10083_v44  ;;  %v2109_v41 = vadd.f32 %v7977_v10, %v1889_v5 }
 0x39c   :  { %v2061_v37 = vpop.f32.mrf.mxu1 }
 0x39d   :  { %v2144_v7 = vadd.f32 %v2143_v14, %v10091_v32  ;;  %v2108_v36 = vadd.f32 %v2061_v37, %v1884_v24  ;;  %v2132_v43 = vadd.f32 %v10044_v20, %v2109_v41 }
 0x39e   :  { %v7980_v15 = vpop.f32.mrf.mxu1 }
 0x39f   :  { %v2131_v16 = vadd.f32 %v10044_v20, %v2108_v36  ;;  %v2145_v45 = vadd.f32 %v2144_v7, %v10095_v11  ;;  %v2111_v3 = vadd.f32 %v7980_v15, %v1899_v54 }
 0x3a0   :  { %v2071_v50 = vpop.f32.mrf.mxu1 }
 0x3a1   :  { %v2146_v61 = vadd.f32 %v2145_v45, %v2131_v16  ;;  %v2110_v8 = vadd.f32 %v2071_v50, %v1894_v56  ;;  %v2134_v18 = vadd.f32 %v10044_v20, %v2111_v3 }
 0x3a2   :  { %v7983_v57 = vpop.f32.mrf.mxu1 }
 0x3a3   :  { %v2133_v30 = vadd.f32 %v10044_v20, %v2110_v8  ;;  %v2147_v2 = vadd.f32 %v2146_v61, %v2132_v43  ;;  %v2113_v38 = vadd.f32 %v7983_v57, %v1909_v23 }
 0x3a4   :  { %v2081_v25 = vpop.f32.mrf.mxu1 }
 0x3a5   :  { %v2148_v21 = vadd.f32 %v2147_v2, %v2133_v30  ;;  %v2112_v46 = vadd.f32 %v2081_v25, %v1904_v31  ;;  %v2136_v52 = vadd.f32 %v10044_v20, %v2113_v38 }
 0x3a6   :  { %v7986_v28 = vpop.f32.mrf.mxu1 }
 0x3a7   :  { %v2135_v12 = vadd.f32 %v10044_v20, %v2112_v46  ;;  %v2149_v39 = vadd.f32 %v2148_v21, %v2134_v18  ;;  %v2115_v59 = vadd.f32 %v7986_v28, %v1919_v53 }
 0x3a8   :  { %v2091_v13 = vpop.f32.mrf.mxu1 }
 0x3a9   :  { %v2150_v33 = vadd.f32 %v2149_v39, %v2135_v12  ;;  %v2114_v49 = vadd.f32 %v2091_v13, %v1914_v62  ;;  %v2138_v55 = vadd.f32 %v10044_v20, %v2115_v59 }
 0x3ab   :  { %v2137_v4 = vadd.f32 %v10044_v20, %v2114_v49  ;;  %v2151_v60 = vadd.f32 %v2150_v33, %v2136_v52 }
 0x3ad   :  { %v2152_v42 = vadd.f32 %v2151_v60, %v2137_v4 }
 0x3af   :  { %v2153_v40 = vadd.f32 %v2152_v42, %v2138_v55 }
 0x3b1   :  { %v2154_v58 = vrot.slane %v2153_v40, 4 }
 0x3b3   :  { %v2155_v0 = vadd.f32 %v2154_v58, %v2153_v40 }
 0x3b5   :  { %v2156_v17 = vrot.slane %v2155_v0, 2 }
 0x3b7   :  { %v2157_v34 = vadd.f32 %v2156_v17, %v2155_v0 }
 0x3b9   :  { %v2158_v47 = vrot.slane %v2157_v34, 1 }
 0x3bb   :  { %v2159_v29 = vadd.f32 %v2158_v47, %v2157_v34 }
 0x3bd   :  { %v2160_v26 = vmul.f32 0.0078125, %v2159_v29 }
 0x3bf   :  { %v2161_v22 = vsub.f32 %v10051_v1, %v2160_v26  ;;  %v2162_v10 = vsub.f32 %v10056_v48, %v2160_v26  ;;  %v2163_v5 = vsub.f32 %v10065_v6, %v2160_v26  ;;  %v2164_v51 = vsub.f32 %v10068_v63, %v2160_v26 }
 0x3c0   :  { %v2165_v20 = vsub.f32 %v10079_v27, %v2160_v26  ;;  %v2166_v41 = vsub.f32 %v10083_v44, %v2160_v26  ;;  %v2167_v54 = vsub.f32 %v10091_v32, %v2160_v26  ;;  %v2168_v48 = vsub.f32 %v10095_v11, %v2160_v26 }
 0x3c1   :  { %v2177_v24 = vmul.f32 %v2161_v22, %v2161_v22  ;;  %v2178_v14 = vmul.f32 %v2162_v10, %v2162_v10  ;;  %v2179_v37 = vmul.f32 %v2163_v5, %v2163_v5  ;;  %v2180_v36 = vmul.f32 %v2164_v51, %v2164_v51 }
 0x3c2   :  { %v2181_v56 = vmul.f32 %v2165_v20, %v2165_v20  ;;  %v2182_v45 = vmul.f32 %v2166_v41, %v2166_v41  ;;  %v2169_v19 = vsub.f32 %v2131_v16, %v2160_v26  ;;  %v2183_v50 = vmul.f32 %v2167_v54, %v2167_v54 }
 0x3c3   :  { %v2193_v7 = vadd.f32 %v2178_v14, %v2177_v24  ;;  %v2170_v63 = vsub.f32 %v2132_v43, %v2160_v26  ;;  %v2184_v3 = vmul.f32 %v2168_v48, %v2168_v48  ;;  %v2171_v8 = vsub.f32 %v2133_v30, %v2160_v26  ;;  %v6759_v14 = vld [vmem:[%s11856_s25] ss:$0 sm:$0xff]  ;;  %s11885_s25 = sld [smem:[#allocation63_spill]] }
 0x3c4   :  { %v2185_v57 = vmul.f32 %v2169_v19, %v2169_v19  ;;  %v2172_v44 = vsub.f32 %v2134_v18, %v2160_v26  ;;  %v2173_v35 = vsub.f32 %v2135_v12, %v2160_v26  ;;  %v2174_v21 = vsub.f32 %v2136_v52, %v2160_v26 }
 0x3c5   :  { %v2194_v15 = vadd.f32 %v2193_v7, %v2179_v37  ;;  %v2186_v31 = vmul.f32 %v2170_v63, %v2170_v63  ;;  %v2187_v32 = vmul.f32 %v2171_v8, %v2171_v8  ;;  %v2175_v46 = vsub.f32 %v2137_v4, %v2160_v26 }
 0x3c6   :  { %v2188_v38 = vmul.f32 %v2172_v44, %v2172_v44  ;;  %v2189_v28 = vmul.f32 %v2173_v35, %v2173_v35  ;;  %v2176_v53 = vsub.f32 %v2138_v55, %v2160_v26  ;;  %v2190_v62 = vmul.f32 %v2174_v21, %v2174_v21 }
 0x3c7   :  { %v2195_v1 = vadd.f32 %v2194_v15, %v2180_v36  ;;  %v2191_v39 = vmul.f32 %v2175_v46, %v2175_v46 }
 0x3c8   :  { %v2192_v30 = vmul.f32 %v2176_v53, %v2176_v53 }
 0x3c9   :  { %v2196_v6 = vadd.f32 %v2195_v1, %v2181_v56 }
 0x3cb   :  { %v2197_v61 = vadd.f32 %v2196_v6, %v2182_v45 }
 0x3cd   :  { %v2198_v27 = vadd.f32 %v2197_v61, %v2183_v50 }
 0x3cf   :  { %v2199_v23 = vadd.f32 %v2198_v27, %v2184_v3 }
 0x3d1   :  { %v2200_v2 = vadd.f32 %v2199_v23, %v2185_v57 }
 0x3d3   :  { %v2201_v25 = vadd.f32 %v2200_v2, %v2186_v31 }
 0x3d5   :  { %v2202_v11 = vadd.f32 %v2201_v25, %v2187_v32 }
 0x3d7   :  { %v2203_v16 = vadd.f32 %v2202_v11, %v2188_v38 }
 0x3d9   :  { %v2204_v43 = vadd.f32 %v2203_v16, %v2189_v28 }
 0x3db   :  { %v2205_v13 = vadd.f32 %v2204_v43, %v2190_v62 }
 0x3dd   :  { %v2206_v33 = vadd.f32 %v2205_v13, %v2191_v39 }
 0x3df   :  { %v2207_v59 = vadd.f32 %v2206_v33, %v2192_v30 }
 0x3e1   :  { %v2208_v18 = vrot.slane %v2207_v59, 4 }
 0x3e3   :  { %v2209_v49 = vadd.f32 %v2208_v18, %v2207_v59 }
 0x3e5   :  { %v2210_v60 = vrot.slane %v2209_v49, 2 }
 0x3e7   :  { %v2211_v12 = vadd.f32 %v2210_v60, %v2209_v49 }
 0x3e9   :  { %v2212_v42 = vrot.slane %v2211_v12, 1 }
 0x3eb   :  { %v2213_v52 = vadd.f32 %v2212_v42, %v2211_v12 }
 0x3ed   :  { %v2214_v40 = vmul.f32 0.0078125, %v2213_v52 }
 0x3ef   :  { %v2215_v58 = vadd.f32 1e-05, %v2214_v40 }
 0x3f1   :  { %8816 = vrsqrt.f32 %v2215_v58 }
 0x3fe   :  { %v8817_v4 = vpop.eup %8816 }
 0x3ff   :  { %v2217_v0 = vmul.f32 %v8817_v4, %v2161_v22  ;;  %v2218_v55 = vmul.f32 %v8817_v4, %v2162_v10  ;;  %v2219_v17 = vmul.f32 %v8817_v4, %v2163_v5  ;;  %v2220_v34 = vmul.f32 %v8817_v4, %v2164_v51 }
 0x400   :  { %v2221_v47 = vmul.f32 %v8817_v4, %v2165_v20  ;;  %v2222_v29 = vmul.f32 %v8817_v4, %v2166_v41  ;;  %v2223_v26 = vmul.f32 %v8817_v4, %v2167_v54  ;;  %v2224_v24 = vmul.f32 %v8817_v4, %v2168_v48  ;;  %v6760_v54 = vld [vmem:[%s11857_s3] ss:$0 sm:$0xff] }
 0x401   :  { %v2225_v37 = vmul.f32 %v8817_v4, %v2169_v19  ;;  %v2226_v7 = vmul.f32 %v8817_v4, %v2170_v63  ;;  %v2227_v36 = vmul.f32 %v8817_v4, %v2171_v8  ;;  %v2228_v15 = vmul.f32 %v8817_v4, %v2172_v44 }
 0x402   :  { %v2229_v56 = vmul.f32 %v8817_v4, %v2173_v35  ;;  %v2230_v1 = vmul.f32 %v8817_v4, %v2174_v21  ;;  %v2231_v45 = vmul.f32 %v8817_v4, %v2175_v46  ;;  %v2232_v6 = vmul.f32 %v8817_v4, %v2176_v53  ;;  %v2714_v4 = vld [vmem:[#allocation7 + $0x170] sm:$0xff] }
 0x403   :  { %v2240_v50 = vmul.f32 %v6759_v14, %v2217_v0  ;;  %v2241_v61 = vmul.f32 %v6759_v14, %v2218_v55  ;;  %v2242_v22 = vmul.f32 %v6759_v14, %v2219_v17  ;;  %v2243_v10 = vmul.f32 %v6759_v14, %v2220_v34 }
 0x404   :  { %v2244_v5 = vmul.f32 %v6759_v14, %v2221_v47  ;;  %v2245_v51 = vmul.f32 %v6759_v14, %v2222_v29  ;;  %v2246_v20 = vmul.f32 %v6759_v14, %v2223_v26  ;;  %v2247_v41 = vmul.f32 %v6759_v14, %v2224_v24  ;;  %v2713_v47 = vld [vmem:[#allocation7 + $0x168] sm:$0xff]  ;;  %v2712_v29 = vld [vmem:[#allocation7 + $0x160] sm:$0xff]  ;;  %v2711_v24 = vld [vmem:[#allocation7 + $0x158] sm:$0xff] }
 0x405   :  { %v2248_v48 = vmul.f32 %v6759_v14, %v2225_v37  ;;  %v2249_v3 = vmul.f32 %v6759_v14, %v2226_v7  ;;  %v2250_v19 = vmul.f32 %v6759_v14, %v2227_v36  ;;  %v2251_v27 = vmul.f32 %v6759_v14, %v2228_v15  ;;  %v2710_v37 = vld [vmem:[#allocation7 + $0x150] sm:$0xff]  ;;  %v2709_v36 = vld [vmem:[#allocation7 + $0x148] sm:$0xff] }
 0x406   :  { %v2252_v63 = vmul.f32 %v6759_v14, %v2229_v56  ;;  %v2253_v8 = vmul.f32 %v6759_v14, %v2230_v1  ;;  %v2254_v57 = vmul.f32 %v6759_v14, %v2231_v45  ;;  %v2255_v23 = vmul.f32 %v6759_v14, %v2232_v6  ;;  %v2708_v56 = vld [vmem:[#allocation7 + $0x140] sm:$0xff]  ;;  %v2707_v45 = vld [vmem:[#allocation7 + $0x138] sm:$0xff] }
 0x407   :  { %v2263_v44 = vadd.f32 %v6760_v54, %v2240_v50  ;;  %v2264_v31 = vadd.f32 %v6760_v54, %v2241_v61  ;;  %v2265_v2 = vadd.f32 %v6760_v54, %v2242_v22  ;;  %v2266_v35 = vadd.f32 %v6760_v54, %v2243_v10  ;;  %v2706_v50 = vld [vmem:[#allocation7 + $0x130] sm:$0xff]  ;;  %v2705_v22 = vld [vmem:[#allocation7 + $0x128] sm:$0xff] }
 0x408   :  { %v2267_v32 = vadd.f32 %v6760_v54, %v2244_v5  ;;  %v10124_v25 = vadd.f32 %v6760_v54, %v2245_v51  ;;  %v10126_v21 = vadd.f32 %v6760_v54, %v2246_v20  ;;  %v10128_v38 = vadd.f32 %v6760_v54, %v2247_v41  ;;  %v2704_v5 = vld [vmem:[#allocation7 + $0x120] sm:$0xff]  ;;  %v2703_v20 = vld [vmem:[#allocation7 + $0x118] sm:$0xff] }
 0x409   :  { %v10130_v11 = vadd.f32 %v6760_v54, %v2248_v48  ;;  %v10132_v46 = vadd.f32 %v6760_v54, %v2249_v3  ;;  %v10134_v28 = vadd.f32 %v6760_v54, %v2250_v19  ;;  %v10136_v16 = vadd.f32 %v6760_v54, %v2251_v27  ;;  %v2701_v3 = vld [vmem:[#allocation7 + $0x108] sm:$0xff]  ;;  %v2700_v27 = vld [vmem:[#allocation7 + $0x100] sm:$0xff] }
 0x40a   :  { %v10138_v53 = vadd.f32 %v6760_v54, %v2252_v63  ;;  %v10140_v62 = vadd.f32 %v6760_v54, %v2253_v8  ;;  %v10142_v43 = vadd.f32 %v6760_v54, %v2254_v57  ;;  %v10144_v39 = vadd.f32 %v6760_v54, %v2255_v23  ;;  %v2702_v54 = vld [vmem:[#allocation7 + $0x110] sm:$0xff] }
 0x40b   :  { %v2279_v13 = vmax.f32 %v2263_v44, 0.0  ;;  %v2280_v30 = vmax.f32 %v2264_v31, 0.0  ;;  %v2281_v33 = vmax.f32 %v2265_v2, 0.0  ;;  %v2282_v59 = vmax.f32 %v2266_v35, 0.0  ;;  %v10186_v35 = vld [vmem:[#allocation4] sm:$0xff] }
 0x40c   :  { %v2283_v18 = vmax.f32 %v2267_v32, 0.0  ;;  %v2284_v49 = vmax.f32 %v10124_v25, 0.0  ;;  %v2285_v60 = vmax.f32 %v10126_v21, 0.0  ;;  %v2286_v12 = vmax.f32 %v10128_v38, 0.0 }
 0x40d   :  { %v2287_v42 = vmax.f32 %v10130_v11, 0.0  ;;  %v2288_v52 = vmax.f32 %v10132_v46, 0.0  ;;  %v2289_v40 = vmax.f32 %v10134_v28, 0.0  ;;  %v2290_v58 = vmax.f32 %v10136_v16, 0.0  ;;  %2312 = vst [vmem:[#allocation3 + $0x1] sm:$0xff] %v2279_v13  ;;  %2313 = vst [vmem:[#allocation3 + $0x9] sm:$0xff] %v2280_v30  ;;  %8019 = vmatprep.mubr.f32.mxu0 %v2279_v13 }
 0x40e   :  { %2314 = vst [vmem:[#allocation3 + $0x11] sm:$0xff] %v2281_v33  ;;  %2315 = vst [vmem:[#allocation3 + $0x19] sm:$0xff] %v2282_v59  ;;  %v2291_v0 = vmax.f32 %v10138_v53, 0.0  ;;  %v2292_v55 = vmax.f32 %v10140_v62, 0.0  ;;  %v2293_v17 = vmax.f32 %v10142_v43, 0.0  ;;  %v2294_v34 = vmax.f32 %v10144_v39, 0.0  ;;  %8020 = vmatmul.mubr.f32.vlgmr.msra.gmra.mxu0 %v2280_v30 }
 0x40f   :  { %2316 = vst [vmem:[#allocation3 + $0x21] sm:$0xff] %v2283_v18  ;;  %2317 = vst [vmem:[#allocation3 + $0x29] sm:$0xff] %v2284_v49  ;;  %8022 = vmatprep.mubr.f32.mxu0 %v2281_v33  ;;  %8100 = vmatpush3.msra.mxu0 %v10071_v9 }
 0x410   :  { %2318 = vst [vmem:[#allocation3 + $0x31] sm:$0xff] %v2285_v60  ;;  %2319 = vst [vmem:[#allocation3 + $0x39] sm:$0xff] %v2286_v12  ;;  %8101 = vmatprep.subr.mxu0 %v2714_v4 }
 0x411   :  { %2320 = vst [vmem:[#allocation3 + $0x41] sm:$0xff] %v2287_v42  ;;  %2321 = vst [vmem:[#allocation3 + $0x49] sm:$0xff] %v2288_v52  ;;  %8102 = vmatpush3.msra.mxu0 %v2714_v4  ;;  %v3083_v4 = vld [vmem:[#allocation9 + $0xd8] sm:$0xff] }
 0x412   :  { %2322 = vst [vmem:[#allocation3 + $0x51] sm:$0xff] %v2289_v40  ;;  %2323 = vst [vmem:[#allocation3 + $0x59] sm:$0xff] %v2290_v58  ;;  %8023 = vmatmul.mubr.f32.gmra.mxu0 %v2282_v59  ;;  %8103 = vmatprep.subr.mxu0 %v2713_v47 }
 0x413   :  { %2324 = vst [vmem:[#allocation3 + $0x61] sm:$0xff] %v2291_v0  ;;  %2325 = vst [vmem:[#allocation3 + $0x69] sm:$0xff] %v2292_v55  ;;  %8025 = vmatprep.mubr.f32.mxu0 %v2283_v18  ;;  %8104 = vmatpush3.msra.mxu0 %v2713_v47  ;;  %v3087_v18 = vld [vmem:[#allocation9 + $0xf8] sm:$0xff]  ;;  %v3080_v47 = vld [vmem:[#allocation9 + $0xc0] sm:$0xff] }
 0x414   :  { %2326 = vst [vmem:[#allocation3 + $0x71] sm:$0xff] %v2293_v17  ;;  %2327 = vst [vmem:[#allocation3 + $0x79] sm:$0xff] %v2294_v34  ;;  %v2328_v9 = vld [vmem:[#allocation3] sm:$0xff]  ;;  %v2329_v26 = vld [vmem:[#allocation3 + $0x8] sm:$0xff]  ;;  %8105 = vmatprep.subr.mxu0 %v2712_v29  ;;  %3100 = vmatprep.subr.mxu1 %v3087_v18 }
 0x415   :  { %8075 = vmatprep.mubr.f32.mxu1 %v2328_v9  ;;  %8106 = vmatpush3.msra.mxu0 %v2712_v29  ;;  %v2330_v14 = vld [vmem:[#allocation3 + $0x10] sm:$0xff]  ;;  %v2331_v7 = vld [vmem:[#allocation3 + $0x18] sm:$0xff]  ;;  %v2683_v63 = vld [vmem:[#allocation3 + $0x2] sm:$0xff] }
 0x416   :  { %8076 = vmatmul.mubr.f32.vlgmr.msra.gmra.mxu1 %v2329_v26  ;;  %8026 = vmatmul.mubr.f32.gmra.mxu0 %v2284_v49  ;;  %v2332_v15 = vld [vmem:[#allocation3 + $0x20] sm:$0xff]  ;;  %v2333_v1 = vld [vmem:[#allocation3 + $0x28] sm:$0xff]  ;;  %v2685_v44 = vld [vmem:[#allocation3 + $0x12] sm:$0xff] }
 0x417   :  { %8078 = vmatprep.mubr.f32.mxu1 %v2330_v14  ;;  %8107 = vmatprep.subr.mxu0 %v2711_v24  ;;  %v2334_v6 = vld [vmem:[#allocation3 + $0x30] sm:$0xff]  ;;  %v2335_v61 = vld [vmem:[#allocation3 + $0x38] sm:$0xff]  ;;  %v2687_v32 = vld [vmem:[#allocation3 + $0x22] sm:$0xff] }
 0x418   :  { %8028 = vmatprep.mubr.f32.mxu0 %v2285_v60  ;;  %8108 = vmatpush3.msra.mxu0 %v2711_v24  ;;  %v2336_v10 = vld [vmem:[#allocation3 + $0x40] sm:$0xff]  ;;  %v2337_v51 = vld [vmem:[#allocation3 + $0x48] sm:$0xff]  ;;  %v2689_v21 = vld [vmem:[#allocation3 + $0x32] sm:$0xff] }
 0x419   :  { %8109 = vmatprep.subr.mxu0 %v2710_v37  ;;  %v2338_v41 = vld [vmem:[#allocation3 + $0x50] sm:$0xff]  ;;  %v2339_v48 = vld [vmem:[#allocation3 + $0x58] sm:$0xff]  ;;  %v2691_v11 = vld [vmem:[#allocation3 + $0x42] sm:$0xff] }
 0x41a   :  { %8079 = vmatmul.mubr.f32.gmra.mxu1 %v2331_v7  ;;  %8110 = vmatpush3.msra.mxu0 %v2710_v37  ;;  %v2340_v19 = vld [vmem:[#allocation3 + $0x60] sm:$0xff]  ;;  %v2341_v8 = vld [vmem:[#allocation3 + $0x68] sm:$0xff]  ;;  %v2693_v28 = vld [vmem:[#allocation3 + $0x52] sm:$0xff] }
 0x41b   :  { %8081 = vmatprep.mubr.f32.mxu1 %v2332_v15  ;;  %8029 = vmatmul.mubr.f32.gmra.mxu0 %v2286_v12  ;;  %v2342_v57 = vld [vmem:[#allocation3 + $0x70] sm:$0xff]  ;;  %v2343_v31 = vld [vmem:[#allocation3 + $0x78] sm:$0xff]  ;;  %v2695_v53 = vld [vmem:[#allocation3 + $0x62] sm:$0xff] }
 0x41c   :  { %8111 = vmatprep.subr.mxu0 %v2709_v36  ;;  %8031 = vmatprep.mubr.f32.mxu0 %v2287_v42  ;;  %v2684_v23 = vld [vmem:[#allocation3 + $0xa] sm:$0xff]  ;;  %v2686_v2 = vld [vmem:[#allocation3 + $0x1a] sm:$0xff]  ;;  %v2697_v43 = vld [vmem:[#allocation3 + $0x72] sm:$0xff] }
 0x41d   :  { %8112 = vmatpush3.msra.mxu0 %v2709_v36  ;;  %v2688_v25 = vld [vmem:[#allocation3 + $0x2a] sm:$0xff]  ;;  %v2690_v38 = vld [vmem:[#allocation3 + $0x3a] sm:$0xff] }
 0x41e   :  { %8082 = vmatmul.mubr.f32.gmra.mxu1 %v2333_v1  ;;  %8113 = vmatprep.subr.mxu0 %v2708_v56  ;;  %v2692_v46 = vld [vmem:[#allocation3 + $0x4a] sm:$0xff]  ;;  %v2694_v16 = vld [vmem:[#allocation3 + $0x5a] sm:$0xff] }
 0x41f   :  { %8084 = vmatprep.mubr.f32.mxu1 %v2334_v6  ;;  %8114 = vmatpush3.msra.mxu0 %v2708_v56  ;;  %v2696_v62 = vld [vmem:[#allocation3 + $0x6a] sm:$0xff]  ;;  %v2698_v39 = vld [vmem:[#allocation3 + $0x7a] sm:$0xff] }
 0x420   :  { %8032 = vmatmul.mubr.f32.gmra.mxu0 %v2288_v52  ;;  %8115 = vmatprep.subr.mxu0 %v2707_v45  ;;  %v3086_v49 = vld [vmem:[#allocation9 + $0xf0] sm:$0xff]  ;;  %v3085_v42 = vld [vmem:[#allocation9 + $0xe8] sm:$0xff]  ;;  %v3084_v52 = vld [vmem:[#allocation9 + $0xe0] sm:$0xff] }
 0x421   :  { %8034 = vmatprep.mubr.f32.mxu0 %v2289_v40  ;;  %8116 = vmatpush3.msra.mxu0 %v2707_v45  ;;  %v3079_v9 = vld [vmem:[#allocation9 + $0xb8] sm:$0xff]  ;;  %v3078_v24 = vld [vmem:[#allocation9 + $0xb0] sm:$0xff]  ;;  %v3077_v37 = vld [vmem:[#allocation9 + $0xa8] sm:$0xff] }
 0x422   :  { %8085 = vmatmul.mubr.f32.gmra.mxu1 %v2335_v61  ;;  %8117 = vmatprep.subr.mxu0 %v2706_v50  ;;  %v3076_v7 = vld [vmem:[#allocation9 + $0xa0] sm:$0xff]  ;;  %v3075_v15 = vld [vmem:[#allocation9 + $0x98] sm:$0xff]  ;;  %v3074_v56 = vld [vmem:[#allocation9 + $0x90] sm:$0xff] }
 0x423   :  { %8087 = vmatprep.mubr.f32.mxu1 %v2336_v10  ;;  %8118 = vmatpush3.msra.mxu0 %v2706_v50  ;;  %v3073_v6 = vld [vmem:[#allocation9 + $0x88] sm:$0xff]  ;;  %v3072_v50 = vld [vmem:[#allocation9 + $0x80] sm:$0xff]  ;;  %v3070_v10 = vld [vmem:[#allocation9 + $0x70] sm:$0xff] }
 0x424   :  { %8035 = vmatmul.mubr.f32.gmra.mxu0 %v2290_v58  ;;  %8119 = vmatprep.subr.mxu0 %v2705_v22 }
 0x425   :  { %8037 = vmatprep.mubr.f32.mxu0 %v2291_v0  ;;  %8120 = vmatpush3.msra.mxu0 %v2705_v22  ;;  %v3082_v0 = vld [vmem:[#allocation9 + $0xd0] sm:$0xff]  ;;  %v3071_v22 = vld [vmem:[#allocation9 + $0x78] sm:$0xff] }
 0x426   :  { %8088 = vmatmul.mubr.f32.gmra.mxu1 %v2337_v51  ;;  %8121 = vmatprep.subr.mxu0 %v2704_v5 }
 0x427   :  { %8090 = vmatprep.mubr.f32.mxu1 %v2338_v41  ;;  %8122 = vmatpush3.msra.mxu0 %v2704_v5  ;;  %v3068_v41 = vld [vmem:[#allocation9 + $0x60] sm:$0xff] }
 0x428   :  { %8038 = vmatmul.mubr.f32.gmra.mxu0 %v2292_v55  ;;  %8123 = vmatprep.subr.mxu0 %v2703_v20 }
 0x429   :  { %8040 = vmatprep.mubr.f32.mxu0 %v2293_v17  ;;  %8124 = vmatpush3.msra.mxu0 %v2703_v20  ;;  %v3081_v17 = vld [vmem:[#allocation9 + $0xc8] sm:$0xff] }
 0x42a   :  { %8091 = vmatmul.mubr.f32.gmra.mxu1 %v2339_v48  ;;  %8125 = vmatprep.subr.mxu0 %v2702_v54  ;;  %v3069_v20 = vld [vmem:[#allocation9 + $0x68] sm:$0xff]  ;;  %v3067_v48 = vld [vmem:[#allocation9 + $0x58] sm:$0xff] }
 0x42b   :  { %8093 = vmatprep.mubr.f32.mxu1 %v2340_v19  ;;  %8126 = vmatpush3.msra.mxu0 %v2702_v54  ;;  %v3065_v19 = vld [vmem:[#allocation9 + $0x48] sm:$0xff] }
 0x42c   :  { %8041 = vmatmul.mubr.f32.gmra.mxu0 %v2294_v34  ;;  %8127 = vmatprep.subr.mxu0 %v2701_v3 }
 0x42d   :  { %8128 = vmatpush3.msra.mxu0 %v2701_v3  ;;  %8131 = vmatprep.mubr.f32.mxu0 %v2683_v63  ;;  %v3066_v3 = vld [vmem:[#allocation9 + $0x50] sm:$0xff] }
 0x42e   :  { %8094 = vmatmul.mubr.f32.gmra.mxu1 %v2341_v8  ;;  %8129 = vmatprep.subr.mxu0 %v2700_v27 }
 0x42f   :  { %8096 = vmatprep.mubr.f32.mxu1 %v2342_v57  ;;  %8130 = vmatpush3.msra.mxu0 %v2700_v27  ;;  %v3064_v27 = vld [vmem:[#allocation9 + $0x40] sm:$0xff]  ;;  %v3063_v57 = vld [vmem:[#allocation9 + $0x38] sm:$0xff] }
 0x430   :  { %8132 = vmatmul.mubr.f32.vlgmr.msra.gmra.mxu0 %v2684_v23  ;;  %3101 = vmatpush1.msra.mxu1 %v3086_v49  ;;  %v3062_v23 = vld [vmem:[#allocation9 + $0x30] sm:$0xff]  ;;  %v10240_v49 = vld [vmem:[%s11858_s20] ss:$0 sm:$0xff] }
 0x431   :  { %8134 = vmatprep.mubr.f32.mxu0 %v2685_v44  ;;  %3102 = vmatprep.subr.mxu1 %v3085_v42 }
 0x432   :  { %8097 = vmatmul.mubr.f32.gmra.mxu1 %v2343_v31  ;;  %v3061_v31 = vld [vmem:[#allocation9 + $0x28] sm:$0xff] }
 0x433   :  { %3164 = vmatprep.mubr.f32.mxu1 %v10186_v35  ;;  %3103 = vmatpush1.msra.mxu1 %v3084_v52 }
 0x434   :  { %8135 = vmatmul.mubr.f32.gmra.mxu0 %v2686_v2  ;;  %3104 = vmatprep.subr.mxu1 %v3083_v4  ;;  %v3060_v2 = vld [vmem:[#allocation9 + $0x20] sm:$0xff] }
 0x435   :  { %8137 = vmatprep.mubr.f32.mxu0 %v2687_v32  ;;  %3105 = vmatpush1.msra.mxu1 %v3082_v0 }
 0x436   :  { %3106 = vmatprep.subr.mxu1 %v3081_v17 }
 0x437   :  { %3107 = vmatpush1.msra.mxu1 %v3080_v47 }
 0x438   :  { %8138 = vmatmul.mubr.f32.gmra.mxu0 %v2688_v25  ;;  %3108 = vmatprep.subr.mxu1 %v3079_v9 }
 0x439   :  { %8140 = vmatprep.mubr.f32.mxu0 %v2689_v21  ;;  %3109 = vmatpush1.msra.mxu1 %v3078_v24  ;;  %v3059_v21 = vld [vmem:[#allocation9 + $0x18] sm:$0xff] }
 0x43a   :  { %3110 = vmatprep.subr.mxu1 %v3077_v37 }
 0x43b   :  { %3111 = vmatpush1.msra.mxu1 %v3076_v7 }
 0x43c   :  { %8141 = vmatmul.mubr.f32.gmra.mxu0 %v2690_v38  ;;  %3112 = vmatprep.subr.mxu1 %v3075_v15  ;;  %v3058_v38 = vld [vmem:[#allocation9 + $0x10] sm:$0xff] }
 0x43d   :  { %8143 = vmatprep.mubr.f32.mxu0 %v2691_v11  ;;  %3113 = vmatpush1.msra.mxu1 %v3074_v56 }
 0x43e   :  { %3114 = vmatprep.subr.mxu1 %v3073_v6 }
 0x43f   :  { %3115 = vmatpush1.msra.mxu1 %v3072_v50 }
 0x440   :  { %8144 = vmatmul.mubr.f32.gmra.mxu0 %v2692_v46  ;;  %3116 = vmatprep.subr.mxu1 %v3071_v22  ;;  %v3057_v46 = vld [vmem:[#allocation9 + $0x8] sm:$0xff] }
 0x441   :  { %8146 = vmatprep.mubr.f32.mxu0 %v2693_v28  ;;  %3117 = vmatpush1.msra.mxu1 %v3070_v10 }
 0x442   :  { %3118 = vmatprep.subr.mxu1 %v3069_v20 }
 0x443   :  { %3119 = vmatpush1.msra.mxu1 %v3068_v41 }
 0x444   :  { %8147 = vmatmul.mubr.f32.gmra.mxu0 %v2694_v16  ;;  %3120 = vmatprep.subr.mxu1 %v3067_v48 }
 0x445   :  { %8149 = vmatprep.mubr.f32.mxu0 %v2695_v53  ;;  %3121 = vmatpush1.msra.mxu1 %v3066_v3  ;;  %v3056_v53 = vld [vmem:[#allocation9] sm:$0xff] }
 0x446   :  { %3122 = vmatprep.subr.mxu1 %v3065_v19 }
 0x447   :  { %3123 = vmatpush1.msra.mxu1 %v3064_v27 }
 0x448   :  { %8150 = vmatmul.mubr.f32.gmra.mxu0 %v2696_v62  ;;  %3124 = vmatprep.subr.mxu1 %v3063_v57 }
 0x449   :  { %8152 = vmatprep.mubr.f32.mxu0 %v2697_v43  ;;  %3125 = vmatpush1.msra.mxu1 %v3062_v23 }
 0x44a   :  { %3126 = vmatprep.subr.mxu1 %v3061_v31 }
 0x44b   :  { %3127 = vmatpush1.msra.mxu1 %v3060_v2 }
 0x44c   :  { %8153 = vmatmul.mubr.f32.gmra.mxu0 %v2698_v39  ;;  %3128 = vmatprep.subr.mxu1 %v3059_v21 }
 0x44d   :  { %3129 = vmatpush1.msra.mxu1 %v3058_v38 }
 0x44e   :  { %3130 = vmatprep.subr.mxu1 %v3057_v46 }
 0x44f   :  { %3131 = vmatpush1.msra.mxu1 %v3056_v53 }
 0x4ce   :  { %v10189_v13 = vpop.f32.mrf.mxu0 }
 0x4d0   :  { %v10191_v30 = vpop.f32.mrf.mxu0 }
 0x4d2   :  { %v10193_v33 = vpop.f32.mrf.mxu0 }
 0x4d4   :  { %v10195_v59 = vpop.f32.mrf.mxu0 }
 0x4d6   :  { %v10197_v60 = vpop.f32.mrf.mxu1  ;;  %v10199_v12 = vpop.f32.mrf.mxu0 }
 0x4d7   :  { %v2610_v28 = vadd.f32 %v10197_v60, %v10189_v13 }
 0x4d8   :  { %v10201_v40 = vpop.f32.mrf.mxu1  ;;  %v10203_v58 = vpop.f32.mrf.mxu0 }
 0x4d9   :  { %v2605_v16 = vadd.f32 %v10201_v40, %v10191_v30 }
 0x4da   :  { %v10205_v55 = vpop.f32.mrf.mxu1 }
 0x4db   :  { %v10207_v34 = vpop.f32.mrf.mxu0  ;;  %v2620_v52 = vadd.f32 %v10205_v55, %v10193_v33 }
 0x4dc   :  { %v10209_v29 = vpop.f32.mrf.mxu1 }
 0x4dd   :  { %v10211_v26 = vpop.f32.mrf.mxu0  ;;  %v2615_v13 = vadd.f32 %v10209_v29, %v10195_v59 }
 0x4de   :  { %v10213_v14 = vpop.f32.mrf.mxu1 }
 0x4df   :  { %v2630_v9 = vadd.f32 %v10213_v14, %v10199_v12 }
 0x4e0   :  { %v10215_v36 = vpop.f32.mrf.mxu0  ;;  %v10217_v1 = vpop.f32.mrf.mxu1 }
 0x4e1   :  { %v2625_v33 = vadd.f32 %v10217_v1, %v10203_v58 }
 0x4e2   :  { %v10219_v45 = vpop.f32.mrf.mxu0  ;;  %v10223_v5 = vpop.f32.mrf.mxu1 }
 0x4e3   :  { %v2640_v12 = vadd.f32 %v10223_v5, %v10207_v34 }
 0x4e4   :  { %v10221_v61 = vpop.f32.mrf.mxu0  ;;  %v2634_v63 = vpop.f32.mrf.mxu1 }
 0x4e5   :  { %v2635_v58 = vadd.f32 %v2634_v63, %v10211_v26 }
 0x4e6   :  { %v10225_v51 = vpop.f32.mrf.mxu0  ;;  %v8089_v32 = vpop.f32.mrf.mxu1 }
 0x4e7   :  { %v2650_v19 = vadd.f32 %v8089_v32, %v10215_v36 }
 0x4e8   :  { %v10227_v54 = vpop.f32.mrf.mxu0  ;;  %v2644_v62 = vpop.f32.mrf.mxu1 }
 0x4e9   :  { %v2645_v34 = vadd.f32 %v2644_v62, %v10219_v45 }
 0x4ea   :  { %v10229_v8 = vpop.f32.mrf.mxu0  ;;  %v8092_v60 = vpop.f32.mrf.mxu1 }
 0x4eb   :  { %v2660_v38 = vadd.f32 %v8092_v60, %v10221_v61 }
 0x4ec   :  { %v10231_v44 = vpop.f32.mrf.mxu0  ;;  %v2654_v29 = vpop.f32.mrf.mxu1 }
 0x4ed   :  { %v2655_v36 = vadd.f32 %v2654_v29, %v10225_v51 }
 0x4ee   :  { %v10233_v25 = vpop.f32.mrf.mxu0  ;;  %v8095_v50 = vpop.f32.mrf.mxu1 }
 0x4f0   :  { %v8133_v11 = vpop.f32.mrf.mxu0  ;;  %v2664_v27 = vpop.f32.mrf.mxu1 }
 0x4f1   :  { %v2862_v39 = vadd.f32 %v8133_v11, %v2610_v28 }
 0x4f2   :  { %v2782_v43 = vpop.f32.mrf.mxu0  ;;  %v8098_v11 = vpop.f32.mrf.mxu1 }
 0x4f3   :  { %v2861_v18 = vadd.f32 %v2782_v43, %v2605_v16  ;;  %v10250_v4 = vadd.f32 %v10240_v49, %v2862_v39  ;;  %v2670_v39 = vadd.f32 %v8095_v50, %v10227_v54 }
 0x4f4   :  { %v8136_v42 = vpop.f32.mrf.mxu0  ;;  %v2674_v51 = vpop.f32.mrf.mxu1 }
 0x4f5   :  { %v10247_v30 = vadd.f32 %v10240_v49, %v2861_v18  ;;  %v2864_v0 = vadd.f32 %v8136_v42, %v2620_v52  ;;  %v2665_v18 = vadd.f32 %v2664_v27, %v10229_v8 }
 0x4f6   :  { %v2792_v40 = vpop.f32.mrf.mxu0 }
 0x4f7   :  { %v2863_v17 = vadd.f32 %v2792_v40, %v2615_v13  ;;  %v2900_v59 = vadd.f32 %v10250_v4, %v10247_v30  ;;  %v10262_v37 = vadd.f32 %v10240_v49, %v2864_v0 }
 0x4f8   :  { %v8139_v47 = vpop.f32.mrf.mxu0 }
 0x4f9   :  { %v10259_v55 = vadd.f32 %v10240_v49, %v2863_v17  ;;  %v2866_v15 = vadd.f32 %v8139_v47, %v2630_v9  ;;  %v2680_v47 = vadd.f32 %v8098_v11, %v10231_v44  ;;  %v2675_v9 = vadd.f32 %v2674_v51, %v10233_v25 }
 0x4fa   :  { %v2802_v24 = vpop.f32.mrf.mxu0 }
 0x4fb   :  { %v2901_v7 = vadd.f32 %v2900_v59, %v10259_v55  ;;  %v2865_v56 = vadd.f32 %v2802_v24, %v2625_v33  ;;  %v10273_v10 = vadd.f32 %v10240_v49, %v2866_v15 }
 0x4fc   :  { %v8142_v6 = vpop.f32.mrf.mxu0 }
 0x4fd   :  { %v10269_v14 = vadd.f32 %v10240_v49, %v2865_v56  ;;  %v2902_v1 = vadd.f32 %v2901_v7, %v10262_v37  ;;  %v2868_v41 = vadd.f32 %v8142_v6, %v2640_v12 }
 0x4fe   :  { %v2812_v22 = vpop.f32.mrf.mxu0 }
 0x4ff   :  { %v2903_v20 = vadd.f32 %v2902_v1, %v10269_v14  ;;  %v2867_v48 = vadd.f32 %v2812_v22, %v2635_v58  ;;  %v10283_v57 = vadd.f32 %v10240_v49, %v2868_v41 }
 0x500   :  { %v8145_v3 = vpop.f32.mrf.mxu0 }
 0x501   :  { %v10279_v26 = vadd.f32 %v10240_v49, %v2867_v48  ;;  %v2904_v5 = vadd.f32 %v2903_v20, %v10273_v10  ;;  %v2870_v31 = vadd.f32 %v8145_v3, %v2650_v19 }
 0x502   :  { %v2822_v63 = vpop.f32.mrf.mxu0 }
 0x503   :  { %v2905_v23 = vadd.f32 %v2904_v5, %v10279_v26  ;;  %v2869_v2 = vadd.f32 %v2822_v63, %v2645_v34  ;;  %v2893_v28 = vadd.f32 %v10240_v49, %v2870_v31 }
 0x504   :  { %v8148_v21 = vpop.f32.mrf.mxu0 }
 0x505   :  { %v2892_v45 = vadd.f32 %v10240_v49, %v2869_v2  ;;  %v2906_v32 = vadd.f32 %v2905_v23, %v10283_v57  ;;  %v2872_v53 = vadd.f32 %v8148_v21, %v2660_v38 }
 0x506   :  { %v2832_v46 = vpop.f32.mrf.mxu0 }
 0x507   :  { %v2907_v16 = vadd.f32 %v2906_v32, %v2892_v45  ;;  %v2871_v62 = vadd.f32 %v2832_v46, %v2655_v36  ;;  %v2895_v13 = vadd.f32 %v10240_v49, %v2872_v53 }
 0x508   :  { %v8151_v43 = vpop.f32.mrf.mxu0 }
 0x509   :  { %v2894_v61 = vadd.f32 %v10240_v49, %v2871_v62  ;;  %v2908_v42 = vadd.f32 %v2907_v16, %v2893_v28  ;;  %v2874_v40 = vadd.f32 %v8151_v43, %v2670_v39 }
 0x50a   :  { %v2842_v52 = vpop.f32.mrf.mxu0 }
 0x50b   :  { %v2909_v60 = vadd.f32 %v2908_v42, %v2894_v61  ;;  %v2873_v0 = vadd.f32 %v2842_v52, %v2665_v18  ;;  %v2897_v8 = vadd.f32 %v10240_v49, %v2874_v40 }
 0x50c   :  { %v8154_v17 = vpop.f32.mrf.mxu0 }
 0x50d   :  { %v2896_v33 = vadd.f32 %v10240_v49, %v2873_v0  ;;  %v2910_v54 = vadd.f32 %v2909_v60, %v2895_v13  ;;  %v2876_v24 = vadd.f32 %v8154_v17, %v2680_v47 }
 0x50e   :  { %v2852_v59 = vpop.f32.mrf.mxu0 }
 0x50f   :  { %v2911_v29 = vadd.f32 %v2910_v54, %v2896_v33  ;;  %v2875_v7 = vadd.f32 %v2852_v59, %v2675_v9  ;;  %v2899_v6 = vadd.f32 %v10240_v49, %v2876_v24 }
 0x511   :  { %v2898_v15 = vadd.f32 %v10240_v49, %v2875_v7  ;;  %v2912_v56 = vadd.f32 %v2911_v29, %v2897_v8 }
 0x513   :  { %v2913_v12 = vadd.f32 %v2912_v56, %v2898_v15 }
 0x515   :  { %v2914_v58 = vadd.f32 %v2913_v12, %v2899_v6 }
 0x517   :  { %v2915_v1 = vrot.slane %v2914_v58, 4 }
 0x519   :  { %v2916_v44 = vadd.f32 %v2915_v1, %v2914_v58  ;;  %v10360_v1 = vld [vmem:[%s11859_s0] ss:$0 sm:$0xff] }
 0x51b   :  { %v2917_v50 = vrot.slane %v2916_v44, 2 }
 0x51d   :  { %v2918_v25 = vadd.f32 %v2917_v50, %v2916_v44 }
 0x51f   :  { %v2919_v22 = vrot.slane %v2918_v25, 1 }
 0x521   :  { %v2920_v20 = vadd.f32 %v2919_v22, %v2918_v25  ;;  %v10368_v22 = vld [vmem:[%s11860_s26] ss:$0 sm:$0xff] }
 0x523   :  { %v2921_v41 = vmul.f32 0.0078125, %v2920_v20 }
 0x525   :  { %v2922_v48 = vsub.f32 %v10247_v30, %v2921_v41  ;;  %v2923_v3 = vsub.f32 %v10250_v4, %v2921_v41  ;;  %v2924_v19 = vsub.f32 %v10259_v55, %v2921_v41  ;;  %v10305_v27 = vsub.f32 %v10262_v37, %v2921_v41 }
 0x526   :  { %v10308_v49 = vsub.f32 %v10269_v14, %v2921_v41  ;;  %v10311_v31 = vsub.f32 %v10273_v10, %v2921_v41  ;;  %v10316_v4 = vsub.f32 %v10279_v26, %v2921_v41  ;;  %v10321_v21 = vsub.f32 %v10283_v57, %v2921_v41 }
 0x527   :  { %v2938_v34 = vmul.f32 %v2922_v48, %v2922_v48  ;;  %v2939_v5 = vmul.f32 %v2923_v3, %v2923_v3  ;;  %v2940_v63 = vmul.f32 %v2924_v19, %v2924_v19  ;;  %v2941_v30 = vmul.f32 %v10305_v27, %v10305_v27 }
 0x528   :  { %v2942_v55 = vmul.f32 %v10308_v49, %v10308_v49  ;;  %v2943_v14 = vmul.f32 %v10311_v31, %v10311_v31  ;;  %v10325_v10 = vsub.f32 %v2892_v45, %v2921_v41  ;;  %v2944_v36 = vmul.f32 %v10316_v4, %v10316_v4 }
 0x529   :  { %v2954_v23 = vadd.f32 %v2939_v5, %v2938_v34  ;;  %v10329_v11 = vsub.f32 %v2893_v28, %v2921_v41  ;;  %v2945_v26 = vmul.f32 %v10321_v21, %v10321_v21  ;;  %v10333_v16 = vsub.f32 %v2894_v61, %v2921_v41 }
 0x52a   :  { %v2946_v57 = vmul.f32 %v10325_v10, %v10325_v10  ;;  %v10337_v62 = vsub.f32 %v2895_v13, %v2921_v41  ;;  %v10341_v39 = vsub.f32 %v2896_v33, %v2921_v41  ;;  %v10345_v42 = vsub.f32 %v2897_v8, %v2921_v41 }
 0x52b   :  { %v2955_v2 = vadd.f32 %v2954_v23, %v2940_v63  ;;  %v2947_v45 = vmul.f32 %v10329_v11, %v10329_v11  ;;  %v2948_v28 = vmul.f32 %v10333_v16, %v10333_v16  ;;  %v2936_v52 = vsub.f32 %v2898_v15, %v2921_v41 }
 0x52c   :  { %v2949_v61 = vmul.f32 %v10337_v62, %v10337_v62  ;;  %v2950_v13 = vmul.f32 %v10341_v39, %v10341_v39  ;;  %v10351_v40 = vsub.f32 %v2899_v6, %v2921_v41  ;;  %v2951_v0 = vmul.f32 %v10345_v42, %v10345_v42 }
 0x52d   :  { %v2956_v37 = vadd.f32 %v2955_v2, %v2941_v30  ;;  %v2952_v47 = vmul.f32 %v2936_v52, %v2936_v52 }
 0x52e   :  { %v2953_v33 = vmul.f32 %v10351_v40, %v10351_v40 }
 0x52f   :  { %v2957_v38 = vadd.f32 %v2956_v37, %v2942_v55 }
 0x531   :  { %v2958_v32 = vadd.f32 %v2957_v38, %v2943_v14 }
 0x533   :  { %v2959_v46 = vadd.f32 %v2958_v32, %v2944_v36 }
 0x535   :  { %v2960_v53 = vadd.f32 %v2959_v46, %v2945_v26 }
 0x537   :  { %v2961_v43 = vadd.f32 %v2960_v53, %v2946_v57 }
 0x539   :  { %v2962_v18 = vadd.f32 %v2961_v43, %v2947_v45 }
 0x53b   :  { %v2963_v51 = vadd.f32 %v2962_v18, %v2948_v28 }
 0x53d   :  { %v2964_v60 = vadd.f32 %v2963_v51, %v2949_v61 }
 0x53f   :  { %v2965_v17 = vadd.f32 %v2964_v60, %v2950_v13 }
 0x541   :  { %v2966_v9 = vadd.f32 %v2965_v17, %v2951_v0 }
 0x543   :  { %v2967_v54 = vadd.f32 %v2966_v9, %v2952_v47 }
 0x545   :  { %v2968_v59 = vadd.f32 %v2967_v54, %v2953_v33 }
 0x547   :  { %v2969_v8 = vrot.slane %v2968_v59, 4 }
 0x549   :  { %v2970_v29 = vadd.f32 %v2969_v8, %v2968_v59 }
 0x54b   :  { %v2971_v24 = vrot.slane %v2970_v29, 2 }
 0x54d   :  { %v2972_v7 = vadd.f32 %v2971_v24, %v2970_v29 }
 0x54f   :  { %v2973_v15 = vrot.slane %v2972_v7, 1 }
 0x551   :  { %v2974_v56 = vadd.f32 %v2973_v15, %v2972_v7 }
 0x553   :  { %v2975_v6 = vmul.f32 0.0078125, %v2974_v56 }
 0x555   :  { %v2976_v12 = vadd.f32 1e-05, %v2975_v6 }
 0x557   :  { %8818 = vrsqrt.f32 %v2976_v12 }
 0x564   :  { %v10357_v58 = vpop.eup %8818 }
 0x565   :  { %v10363_v44 = vmul.f32 %v10357_v58, %v2936_v52  ;;  %v2978_v50 = vmul.f32 %v10357_v58, %v2922_v48  ;;  %v2979_v25 = vmul.f32 %v10357_v58, %v2923_v3  ;;  %v2980_v34 = vmul.f32 %v10357_v58, %v2924_v19 }
 0x566   :  { %v2981_v48 = vmul.f32 %v10357_v58, %v10305_v27  ;;  %v2982_v19 = vmul.f32 %v10357_v58, %v10308_v49  ;;  %v2983_v27 = vmul.f32 %v10357_v58, %v10311_v31  ;;  %v2984_v49 = vmul.f32 %v10357_v58, %v10316_v4 }
 0x567   :  { %v3001_v20 = vmul.f32 %v10360_v1, %v2978_v50  ;;  %v3002_v41 = vmul.f32 %v10360_v1, %v2979_v25  ;;  %v3003_v30 = vmul.f32 %v10360_v1, %v2980_v34  ;;  %v2985_v31 = vmul.f32 %v10357_v58, %v10321_v21 }
 0x568   :  { %v3004_v55 = vmul.f32 %v10360_v1, %v2981_v48  ;;  %v3005_v38 = vmul.f32 %v10360_v1, %v2982_v19  ;;  %v3006_v26 = vmul.f32 %v10360_v1, %v2983_v27  ;;  %v3007_v53 = vmul.f32 %v10360_v1, %v2984_v49  ;;  %v3597_v19 = vld [vmem:[#allocation10 + $0xe0] sm:$0xff]  ;;  %v3579_v49 = vld [vmem:[#allocation10 + $0x50] sm:$0xff] }
 0x569   :  { %v3024_v5 = vadd.f32 %v10368_v22, %v3001_v20  ;;  %v3025_v23 = vadd.f32 %v10368_v22, %v3002_v41  ;;  %v3026_v2 = vadd.f32 %v10368_v22, %v3003_v30  ;;  %v3008_v28 = vmul.f32 %v10360_v1, %v2985_v31  ;;  %v3578_v31 = vld [vmem:[#allocation10 + $0x48] sm:$0xff] }
 0x56a   :  { %v3027_v14 = vadd.f32 %v10368_v22, %v3004_v55  ;;  %v3028_v32 = vadd.f32 %v10368_v22, %v3005_v38  ;;  %v3029_v57 = vadd.f32 %v10368_v22, %v3006_v26  ;;  %v3030_v43 = vadd.f32 %v10368_v22, %v3007_v53  ;;  %v3596_v38 = vld [vmem:[#allocation10 + $0xd8] sm:$0xff]  ;;  %v3595_v26 = vld [vmem:[#allocation10 + $0xd0] sm:$0xff] }
 0x56b   :  { %v3040_v63 = vmax.f32 %v3024_v5, 0.0  ;;  %v3041_v3 = vmax.f32 %v3025_v23, 0.0  ;;  %v3042_v37 = vmax.f32 %v3026_v2, 0.0  ;;  %v2986_v4 = vmul.f32 %v10357_v58, %v10325_v10  ;;  %v3584_v23 = vld [vmem:[#allocation10 + $0x78] sm:$0xff]  ;;  %v3582_v2 = vld [vmem:[#allocation10 + $0x68] sm:$0xff] }
 0x56c   :  { %v3043_v36 = vmax.f32 %v3027_v14, 0.0  ;;  %v3044_v46 = vmax.f32 %v3028_v32, 0.0  ;;  %v3045_v45 = vmax.f32 %v3029_v57, 0.0  ;;  %v3046_v18 = vmax.f32 %v3030_v43, 0.0  ;;  %v3594_v57 = vld [vmem:[#allocation10 + $0xc8] sm:$0xff]  ;;  %v3593_v43 = vld [vmem:[#allocation10 + $0xc0] sm:$0xff] }
 0x56d   :  { %3165 = vmatmul.mubr.f32.vlgmr.msra.gmra.mxu1 %v3040_v63  ;;  %v3031_v61 = vadd.f32 %v10368_v22, %v3008_v28  ;;  %v3009_v51 = vmul.f32 %v10360_v1, %v2986_v4  ;;  %v2987_v21 = vmul.f32 %v10357_v58, %v10329_v11  ;;  %v2988_v10 = vmul.f32 %v10357_v58, %v10333_v16  ;;  %v3600_v63 = vld [vmem:[#allocation10 + $0xf8] sm:$0xff]  ;;  %v3577_v28 = vld [vmem:[#allocation10 + $0x40] sm:$0xff] }
 0x56e   :  { %3170 = vmatprep.mubr.f32.mxu1 %v10186_v35  ;;  %v2989_v11 = vmul.f32 %v10357_v58, %v10337_v62  ;;  %v2990_v16 = vmul.f32 %v10357_v58, %v10341_v39  ;;  %v2991_v62 = vmul.f32 %v10357_v58, %v10345_v42  ;;  %v3015_v6 = vmul.f32 %v10360_v1, %v10363_v44 }
 0x56f   :  { %v3047_v52 = vmax.f32 %v3031_v61, 0.0  ;;  %v3032_v13 = vadd.f32 %v10368_v22, %v3009_v51  ;;  %v3010_v60 = vmul.f32 %v10360_v1, %v2987_v21  ;;  %v3011_v47 = vmul.f32 %v10360_v1, %v2988_v10  ;;  %7139 = vmatprep.subr.mxu0 %v3600_v63  ;;  %v3576_v51 = vld [vmem:[#allocation10 + $0x38] sm:$0xff]  ;;  %v3088_v21 = vld [vmem:[%s11861_s8] sm:$0x3]  ;;  %v3575_v10 = vld [vmem:[#allocation10 + $0x30] sm:$0xff] }
 0x570   :  { %v3012_v54 = vmul.f32 %v10360_v1, %v2989_v11  ;;  %v3013_v29 = vmul.f32 %v10360_v1, %v2990_v16  ;;  %v3014_v15 = vmul.f32 %v10360_v1, %v2991_v62  ;;  %v2993_v42 = vmul.f32 %v10357_v58, %v10351_v40  ;;  %7140 = vmatpush3.msra.mxu0 %v3584_v23  ;;  %v3574_v11 = vld [vmem:[#allocation10 + $0x28] sm:$0xff]  ;;  %v3588_v16 = vld [vmem:[#allocation10 + $0x98] sm:$0xff]  ;;  %v3569_v63 = vld [vmem:[#allocation10] sm:$0xff] }
 0x571   :  { %3171 = vmatmul.mubr.f32.gmra.mxu1 %v3041_v3  ;;  %v3048_v0 = vmax.f32 %v3032_v13, 0.0  ;;  %v3033_v17 = vadd.f32 %v10368_v22, %v3010_v60  ;;  %v3034_v33 = vadd.f32 %v10368_v22, %v3011_v47  ;;  %v3038_v50 = vadd.f32 %v10368_v22, %v3015_v6  ;;  %v3598_v3 = vld [vmem:[#allocation10 + $0xe8] sm:$0xff]  ;;  %v3591_v13 = vld [vmem:[#allocation10 + $0xb0] sm:$0xff] }
 0x572   :  { %3176 = vmatprep.mubr.f32.mxu1 %v10186_v35  ;;  %v3035_v8 = vadd.f32 %v10368_v22, %v3012_v54  ;;  %v3036_v7 = vadd.f32 %v10368_v22, %v3013_v29  ;;  %v3037_v56 = vadd.f32 %v10368_v22, %v3014_v15  ;;  %v3016_v25 = vmul.f32 %v10360_v1, %v2993_v42  ;;  %v3573_v54 = vld [vmem:[#allocation10 + $0x20] sm:$0xff]  ;;  %v3572_v29 = vld [vmem:[#allocation10 + $0x18] sm:$0xff]  ;;  %v3586_v42 = vld [vmem:[#allocation10 + $0x88] sm:$0xff] }
 0x573   :  { %v3049_v9 = vmax.f32 %v3033_v17, 0.0  ;;  %v3050_v59 = vmax.f32 %v3034_v33, 0.0  ;;  %v3054_v20 = vmax.f32 %v3038_v50, 0.0  ;;  %v3090_v27 = vlaneseq  ;;  %v3590_v17 = vld [vmem:[#allocation10 + $0xa8] sm:$0xff]  ;;  %v3589_v33 = vld [vmem:[#allocation10 + $0xa0] sm:$0xff] }
 0x574   :  { %v3051_v24 = vmax.f32 %v3035_v8, 0.0  ;;  %v3052_v39 = vmax.f32 %v3036_v7, 0.0  ;;  %v3053_v12 = vmax.f32 %v3037_v56, 0.0  ;;  %v3039_v41 = vadd.f32 %v10368_v22, %v3016_v25  ;;  %v3599_v22 = vld [vmem:[#allocation10 + $0xf0] sm:$0xff] }
 0x575   :  { %3177 = vmatmul.mubr.f32.gmra.mxu1 %v3042_v37  ;;  %7141 = vmatprep.subr.mxu0 %v3599_v22  ;;  %v3581_v37 = vld [vmem:[#allocation10 + $0x60] sm:$0xff]  ;;  %v3091_v53 = vshrl.u32 %v3090_v27, 7  ;;  %v3571_v56 = vld [vmem:[#allocation10 + $0x10] sm:$0xff] }
 0x576   :  { %3182 = vmatprep.mubr.f32.mxu1 %v10186_v35  ;;  %v3055_v44 = vmax.f32 %v3039_v41, 0.0  ;;  %v3570_v41 = vld [vmem:[#allocation10 + $0x8] sm:$0xff] }
 0x577   :  { %v10469_v61 = vsub.s32 0, %v3091_v53  ;;  %v10474_v60 = vsub.s32 1, %v3091_v53 }
 0x579   :  { %3183 = vmatmul.mubr.f32.gmra.mxu1 %v3043_v36  ;;  %v3580_v36 = vld [vmem:[#allocation10 + $0x58] sm:$0xff]  ;;  %v10477_v47 = vrot.slane %v3088_v21, %v10469_v61 }
 0x57a   :  { %3188 = vmatprep.mubr.f32.mxu1 %v10186_v35 }
 0x57d   :  { %3189 = vmatmul.mubr.f32.gmra.mxu1 %v3044_v46 }
 0x57e   :  { %3194 = vmatprep.mubr.f32.mxu1 %v10186_v35 }
 0x581   :  { %3195 = vmatmul.mubr.f32.gmra.mxu1 %v3045_v45 }
 0x582   :  { %3200 = vmatprep.mubr.f32.mxu1 %v10186_v35 }
 0x585   :  { %3201 = vmatmul.mubr.f32.gmra.mxu1 %v3046_v18  ;;  %v3592_v18 = vld [vmem:[#allocation10 + $0xb8] sm:$0xff] }
 0x586   :  { %3206 = vmatprep.mubr.f32.mxu1 %v10186_v35 }
 0x589   :  { %3207 = vmatmul.mubr.f32.gmra.mxu1 %v3047_v52 }
 0x58a   :  { %3212 = vmatprep.mubr.f32.mxu1 %v10186_v35 }
 0x58d   :  { %3213 = vmatmul.mubr.f32.gmra.mxu1 %v3048_v0 }
 0x58e   :  { %3218 = vmatprep.mubr.f32.mxu1 %v10186_v35 }
 0x591   :  { %3219 = vmatmul.mubr.f32.gmra.mxu1 %v3049_v9 }
 0x592   :  { %3224 = vmatprep.mubr.f32.mxu1 %v10186_v35 }
 0x595   :  { %3225 = vmatmul.mubr.f32.gmra.mxu1 %v3050_v59  ;;  %v10480_v59 = vrot.slane %v3088_v21, %v10474_v60 }
 0x596   :  { %3230 = vmatprep.mubr.f32.mxu1 %v10186_v35 }
 0x599   :  { %3231 = vmatmul.mubr.f32.gmra.mxu1 %v3051_v24  ;;  %v3587_v24 = vld [vmem:[#allocation10 + $0x90] sm:$0xff] }
 0x59a   :  { %3236 = vmatprep.mubr.f32.mxu1 %v10186_v35 }
 0x59d   :  { %3237 = vmatmul.mubr.f32.gmra.mxu1 %v3052_v39 }
 0x59e   :  { %3242 = vmatprep.mubr.f32.mxu1 %v10186_v35 }
 0x5a1   :  { %3243 = vmatmul.mubr.f32.gmra.mxu1 %v3053_v12 }
 0x5a2   :  { %3248 = vmatprep.mubr.f32.mxu1 %v10186_v35 }
 0x5a5   :  { %3249 = vmatmul.mubr.f32.gmra.mxu1 %v3054_v20 }
 0x5a6   :  { %3254 = vmatprep.mubr.f32.mxu1 %v10186_v35  ;;  %v3583_v35 = vld [vmem:[#allocation10 + $0x70] sm:$0xff] }
 0x5a7   :  { %7142 = vmatpush3.msra.mxu0 %v3583_v35 }
 0x5a8   :  { %7143 = vmatprep.subr.mxu0 %v3598_v3 }
 0x5a9   :  { %3255 = vmatmul.mubr.f32.gmra.mxu1 %v3055_v44  ;;  %7144 = vmatpush3.msra.mxu0 %v3582_v2 }
 0x5aa   :  { %7145 = vmatprep.subr.mxu0 %v3597_v19 }
 0x5ab   :  { %7146 = vmatpush3.msra.mxu0 %v3581_v37 }
 0x5ac   :  { %7147 = vmatprep.subr.mxu0 %v3596_v38 }
 0x5ad   :  { %7148 = vmatpush3.msra.mxu0 %v3580_v36 }
 0x5ae   :  { %7149 = vmatprep.subr.mxu0 %v3595_v26 }
 0x5af   :  { %7150 = vmatpush3.msra.mxu0 %v3579_v49 }
 0x5b0   :  { %7151 = vmatprep.subr.mxu0 %v3594_v57 }
 0x5b1   :  { %7152 = vmatpush3.msra.mxu0 %v3578_v31 }
 0x5b2   :  { %7153 = vmatprep.subr.mxu0 %v3593_v43 }
 0x5b3   :  { %7154 = vmatpush3.msra.mxu0 %v3577_v28 }
 0x5b4   :  { %7155 = vmatprep.subr.mxu0 %v3592_v18 }
 0x5b5   :  { %7156 = vmatpush3.msra.mxu0 %v3576_v51 }
 0x5b6   :  { %7157 = vmatprep.subr.mxu0 %v3591_v13 }
 0x5b7   :  { %7158 = vmatpush3.msra.mxu0 %v3575_v10 }
 0x5b8   :  { %7159 = vmatprep.subr.mxu0 %v3590_v17 }
 0x5b9   :  { %7160 = vmatpush3.msra.mxu0 %v3574_v11 }
 0x5ba   :  { %7161 = vmatprep.subr.mxu0 %v3589_v33 }
 0x5bb   :  { %7162 = vmatpush3.msra.mxu0 %v3573_v54 }
 0x5bc   :  { %7163 = vmatprep.subr.mxu0 %v3588_v16 }
 0x5bd   :  { %7164 = vmatpush3.msra.mxu0 %v3572_v29 }
 0x5be   :  { %7165 = vmatprep.subr.mxu0 %v3587_v24 }
 0x5bf   :  { %7166 = vmatpush3.msra.mxu0 %v3571_v56 }
 0x5c0   :  { %7167 = vmatprep.subr.mxu0 %v3586_v42 }
 0x5c1   :  { %7168 = vmatpush3.msra.mxu0 %v3570_v41 }
 0x62d   :  { %v10443_v40 = vpop.f32.mrf.mxu1 }
 0x62e   :  { %v10488_v7 = vadd.f32 %v10443_v40, %v10477_v47  ;;  %v3585_v40 = vld [vmem:[#allocation10 + $0x80] sm:$0xff] }
 0x62f   :  { %v10445_v58 = vpop.f32.mrf.mxu1  ;;  %7169 = vmatprep.subr.mxu0 %v3585_v40 }
 0x630   :  { %v10500_v12 = vadd.f32 %v10445_v58, %v10480_v59  ;;  %7170 = vmatpush3.msra.mxu0 %v3569_v63 }
 0x631   :  { %v10447_v34 = vpop.f32.mrf.mxu1 }
 0x632   :  { %v10484_v8 = vadd.f32 %v10447_v34, %v10477_v47 }
 0x633   :  { %v10449_v5 = vpop.f32.mrf.mxu1 }
 0x634   :  { %v10492_v15 = vadd.f32 %v10449_v5, %v10480_v59  ;;  %v3261_v50 = vadd.f32 %v10484_v8, %v10488_v7 }
 0x635   :  { %v10451_v1 = vpop.f32.mrf.mxu1 }
 0x636   :  { %v10496_v39 = vadd.f32 %v10451_v1, %v10477_v47  ;;  %v3282_v58 = vadd.f32 %v10492_v15, %v10500_v12 }
 0x637   :  { %v10453_v30 = vpop.f32.mrf.mxu1 }
 0x638   :  { %v10506_v25 = vadd.f32 %v10453_v30, %v10480_v59  ;;  %v3262_v34 = vadd.f32 %v3261_v50, %v10496_v39 }
 0x639   :  { %v10455_v48 = vpop.f32.mrf.mxu1 }
 0x63a   :  { %v10510_v20 = vadd.f32 %v10455_v48, %v10477_v47  ;;  %v3283_v30 = vadd.f32 %v3282_v58, %v10506_v25 }
 0x63b   :  { %v10457_v55 = vpop.f32.mrf.mxu1 }
 0x63c   :  { %v10517_v5 = vadd.f32 %v10457_v55, %v10480_v59  ;;  %v3263_v22 = vadd.f32 %v3262_v34, %v10510_v20 }
 0x63d   :  { %v10459_v14 = vpop.f32.mrf.mxu1 }
 0x63e   :  { %v10521_v1 = vadd.f32 %v10459_v14, %v10477_v47  ;;  %v3284_v2 = vadd.f32 %v3283_v30, %v10517_v5 }
 0x63f   :  { %v10461_v32 = vpop.f32.mrf.mxu1 }
 0x640   :  { %v10527_v35 = vadd.f32 %v10461_v32, %v10480_v59  ;;  %v3264_v55 = vadd.f32 %v3263_v22, %v10521_v1 }
 0x641   :  { %v10463_v46 = vpop.f32.mrf.mxu1 }
 0x642   :  { %v10531_v48 = vadd.f32 %v10463_v46, %v10477_v47  ;;  %v3285_v38 = vadd.f32 %v3284_v2, %v10527_v35 }
 0x643   :  { %v10465_v45 = vpop.f32.mrf.mxu1 }
 0x644   :  { %v10537_v19 = vadd.f32 %v10465_v45, %v10480_v59  ;;  %v3265_v27 = vadd.f32 %v3264_v55, %v10531_v48 }
 0x645   :  { %v10467_v4 = vpop.f32.mrf.mxu1 }
 0x646   :  { %v10541_v37 = vadd.f32 %v10467_v4, %v10477_v47  ;;  %v3286_v49 = vadd.f32 %v3285_v38, %v10537_v19 }
 0x647   :  { %v10472_v52 = vpop.f32.mrf.mxu1 }
 0x648   :  { %v10547_v36 = vadd.f32 %v10472_v52, %v10480_v59  ;;  %v3266_v46 = vadd.f32 %v3265_v27, %v10541_v37 }
 0x649   :  { %v3208_v0 = vpop.f32.mrf.mxu1 }
 0x64a   :  { %v10550_v32 = vadd.f32 %v3208_v0, %v10477_v47  ;;  %v3287_v45 = vadd.f32 %v3286_v49, %v10547_v36 }
 0x64b   :  { %v3210_v9 = vpop.f32.mrf.mxu1 }
 0x64c   :  { %v10555_v57 = vadd.f32 %v3210_v9, %v10480_v59  ;;  %v3267_v43 = vadd.f32 %v3266_v46, %v10550_v32 }
 0x64d   :  { %v3214_v62 = vpop.f32.mrf.mxu1 }
 0x64e   :  { %v10558_v53 = vadd.f32 %v3214_v62, %v10477_v47  ;;  %v3288_v51 = vadd.f32 %v3287_v45, %v10555_v57 }
 0x64f   :  { %v3216_v6 = vpop.f32.mrf.mxu1 }
 0x650   :  { %v10563_v28 = vadd.f32 %v3216_v6, %v10480_v59  ;;  %v3268_v21 = vadd.f32 %v3267_v43, %v10558_v53 }
 0x651   :  { %v3220_v44 = vpop.f32.mrf.mxu1 }
 0x652   :  { %v10566_v4 = vadd.f32 %v3220_v44, %v10477_v47  ;;  %v3289_v0 = vadd.f32 %v3288_v51, %v10563_v28 }
 0x653   :  { %v3222_v23 = vpop.f32.mrf.mxu1 }
 0x654   :  { %v10571_v52 = vadd.f32 %v3222_v23, %v10480_v59  ;;  %v3269_v17 = vadd.f32 %v3268_v21, %v10566_v4 }
 0x655   :  { %v3226_v3 = vpop.f32.mrf.mxu1 }
 0x656   :  { %v10574_v13 = vadd.f32 %v3226_v3, %v10477_v47  ;;  %v3290_v54 = vadd.f32 %v3289_v0, %v10571_v52 }
 0x657   :  { %v3228_v14 = vpop.f32.mrf.mxu1 }
 0x658   :  { %v10579_v11 = vadd.f32 %v3228_v14, %v10480_v59  ;;  %v3270_v16 = vadd.f32 %v3269_v17, %v10574_v13 }
 0x659   :  { %v3232_v26 = vpop.f32.mrf.mxu1 }
 0x65a   :  { %v10582_v9 = vadd.f32 %v3232_v26, %v10477_v47  ;;  %v3291_v56 = vadd.f32 %v3290_v54, %v10579_v11 }
 0x65b   :  { %v3234_v31 = vpop.f32.mrf.mxu1 }
 0x65c   :  { %v10587_v29 = vadd.f32 %v3234_v31, %v10480_v59  ;;  %v3271_v6 = vadd.f32 %v3270_v16, %v10582_v9 }
 0x65d   :  { %v3238_v18 = vpop.f32.mrf.mxu1 }
 0x65e   :  { %v10590_v62 = vadd.f32 %v3238_v18, %v10477_v47  ;;  %v3292_v44 = vadd.f32 %v3291_v56, %v10587_v29 }
 0x65f   :  { %v3240_v10 = vpop.f32.mrf.mxu1 }
 0x660   :  { %v10595_v42 = vadd.f32 %v3240_v10, %v10480_v59  ;;  %v3272_v40 = vadd.f32 %v3271_v6, %v10590_v62 }
 0x661   :  { %v3244_v33 = vpop.f32.mrf.mxu1 }
 0x662   :  { %v10598_v50 = vadd.f32 %v3244_v33, %v10477_v47  ;;  %v3293_v23 = vadd.f32 %v3292_v44, %v10595_v42 }
 0x663   :  { %v3246_v24 = vpop.f32.mrf.mxu1 }
 0x664   :  { %v10603_v58 = vadd.f32 %v3246_v24, %v10480_v59  ;;  %v3273_v30 = vadd.f32 %v3272_v40, %v10598_v50 }
 0x665   :  { %v3250_v41 = vpop.f32.mrf.mxu1 }
 0x666   :  { %v10606_v34 = vadd.f32 %v3250_v41, %v10477_v47  ;;  %v3294_v2 = vadd.f32 %v3293_v23, %v10603_v58 }
 0x667   :  { %v3252_v63 = vpop.f32.mrf.mxu1 }
 0x668   :  { %v10611_v22 = vadd.f32 %v3252_v63, %v10480_v59  ;;  %v3274_v55 = vadd.f32 %v3273_v30, %v10606_v34 }
 0x669   :  { %v3256_v3 = vpop.f32.mrf.mxu1 }
 0x66a   :  { %v10616_v14 = vadd.f32 %v3256_v3, %v10477_v47  ;;  %v3295_v27 = vadd.f32 %v3294_v2, %v10611_v22 }
 0x66b   :  { %v3258_v38 = vpop.f32.mrf.mxu1 }
 0x66c   :  { %v3275_v26 = vadd.f32 %v3274_v55, %v10616_v14  ;;  %v10621_v49 = vadd.f32 %v3258_v38, %v10480_v59 }
 0x66e   :  { %v3276_v46 = vrot.slane %v3275_v26, 4  ;;  %v3296_v31 = vadd.f32 %v3295_v27, %v10621_v49 }
 0x670   :  { %v3277_v45 = vadd.f32 %v3276_v46, %v3275_v26  ;;  %v3297_v43 = vrot.slane %v3296_v31, 4 }
 0x672   :  { %v3278_v18 = vrot.slane %v3277_v45, 2  ;;  %v3298_v51 = vadd.f32 %v3297_v43, %v3296_v31 }
 0x674   :  { %v3279_v21 = vadd.f32 %v3278_v18, %v3277_v45  ;;  %v3299_v10 = vrot.slane %v3298_v51, 2 }
 0x676   :  { %v3280_v0 = vrot.slane %v3279_v21, 1  ;;  %v3300_v17 = vadd.f32 %v3299_v10, %v3298_v51 }
 0x678   :  { %v3281_v47 = vadd.f32 %v3280_v0, %v3279_v21  ;;  %v3301_v16 = vrot.slane %v3300_v17, 1 }
 0x67a   :  { %v10624_v33 = vmul.f32 0.0078125, %v3281_v47  ;;  %v3302_v41 = vadd.f32 %v3301_v16, %v3300_v17 }
 0x67c   :  { %v10628_v54 = vsub.f32 %v10488_v7, %v10624_v33  ;;  %v10632_v59 = vsub.f32 %v10484_v8, %v10624_v33  ;;  %v10636_v24 = vsub.f32 %v10496_v39, %v10624_v33  ;;  %v10644_v7 = vsub.f32 %v10510_v20, %v10624_v33 }
 0x67d   :  { %v10648_v8 = vsub.f32 %v10521_v1, %v10624_v33  ;;  %v10652_v40 = vmul.f32 0.0078125, %v3302_v41  ;;  %v10656_v63 = vsub.f32 %v10531_v48, %v10624_v33  ;;  %v10670_v3 = vsub.f32 %v10541_v37, %v10624_v33 }
 0x67e   :  { %v3337_v56 = vmul.f32 %v10628_v54, %v10628_v54  ;;  %v3339_v6 = vmul.f32 %v10632_v59, %v10632_v59  ;;  %v3341_v44 = vmul.f32 %v10636_v24, %v10636_v24  ;;  %v3343_v23 = vmul.f32 %v10644_v7, %v10644_v7 }
 0x67f   :  { %v10662_v20 = vsub.f32 %v10500_v12, %v10652_v40  ;;  %v10666_v1 = vsub.f32 %v10492_v15, %v10652_v40  ;;  %v3345_v48 = vmul.f32 %v10648_v8, %v10648_v8  ;;  %v10676_v55 = vsub.f32 %v10550_v32, %v10624_v33 }
 0x680   :  { %v3369_v39 = vadd.f32 %v3339_v6, %v3337_v56  ;;  %v3347_v12 = vmul.f32 %v10656_v63, %v10656_v63  ;;  %v10682_v15 = vsub.f32 %v10506_v25, %v10652_v40  ;;  %v10690_v26 = vsub.f32 %v10558_v53, %v10624_v33 }
 0x681   :  { %v3338_v37 = vmul.f32 %v10662_v20, %v10662_v20  ;;  %v3340_v27 = vmul.f32 %v10666_v1, %v10666_v1  ;;  %v3349_v32 = vmul.f32 %v10670_v3, %v10670_v3  ;;  %v10696_v31 = vsub.f32 %v10517_v5, %v10652_v40 }
 0x682   :  { %v3370_v30 = vadd.f32 %v3369_v39, %v3341_v44  ;;  %v10700_v25 = vsub.f32 %v10566_v4, %v10624_v33  ;;  %v3351_v45 = vmul.f32 %v10676_v55, %v10676_v55  ;;  %v10706_v53 = vsub.f32 %v10527_v35, %v10652_v40 }
 0x683   :  { %v3342_v18 = vmul.f32 %v10682_v15, %v10682_v15  ;;  %v3390_v51 = vadd.f32 %v3340_v27, %v3338_v37  ;;  %v10712_v5 = vsub.f32 %v10574_v13, %v10624_v33  ;;  %v3353_v4 = vmul.f32 %v10690_v26, %v10690_v26 }
 0x684   :  { %v3371_v2 = vadd.f32 %v3370_v30, %v3343_v23  ;;  %v10718_v10 = vsub.f32 %v10537_v19, %v10652_v40  ;;  %v3344_v35 = vmul.f32 %v10696_v31, %v10696_v31  ;;  %v10724_v47 = vsub.f32 %v10582_v9, %v10624_v33 }
 0x685   :  { %v3391_v0 = vadd.f32 %v3390_v51, %v3342_v18  ;;  %v3355_v13 = vmul.f32 %v10700_v25, %v10700_v25  ;;  %v10730_v16 = vsub.f32 %v10547_v36, %v10652_v40  ;;  %v3346_v19 = vmul.f32 %v10706_v53, %v10706_v53 }
 0x686   :  { %v3372_v38 = vadd.f32 %v3371_v2, %v3345_v48  ;;  %v10736_v6 = vsub.f32 %v10590_v62, %v10624_v33  ;;  %v3357_v9 = vmul.f32 %v10712_v5, %v10712_v5  ;;  %v10742_v44 = vsub.f32 %v10555_v57, %v10652_v40 }
 0x687   :  { %v3392_v56 = vadd.f32 %v3391_v0, %v3344_v35  ;;  %v3348_v36 = vmul.f32 %v10718_v10, %v10718_v10  ;;  %v10748_v23 = vsub.f32 %v10598_v50, %v10624_v33  ;;  %v3359_v62 = vmul.f32 %v10724_v47, %v10724_v47 }
 0x688   :  { %v3373_v46 = vadd.f32 %v3372_v38, %v3347_v12  ;;  %v10754_v48 = vsub.f32 %v10563_v28, %v10652_v40  ;;  %v3350_v57 = vmul.f32 %v10730_v16, %v10730_v16  ;;  %v10760_v12 = vsub.f32 %v10606_v34, %v10624_v33 }
 0x689   :  { %v3393_v39 = vadd.f32 %v3392_v56, %v3346_v19  ;;  %v3361_v50 = vmul.f32 %v10736_v6, %v10736_v6  ;;  %v10766_v37 = vsub.f32 %v10571_v52, %v10652_v40  ;;  %v3352_v28 = vmul.f32 %v10742_v44, %v10742_v44 }
 0x68a   :  { %v3374_v43 = vadd.f32 %v3373_v46, %v3349_v32  ;;  %v3335_v32 = vsub.f32 %v10616_v14, %v10624_v33  ;;  %v3363_v46 = vmul.f32 %v10748_v23, %v10748_v23  ;;  %v3365_v18 = vmul.f32 %v10760_v12, %v10760_v12 }
 0x68b   :  { %v3394_v2 = vadd.f32 %v3393_v39, %v3348_v36  ;;  %v3356_v14 = vmul.f32 %v10766_v37, %v10766_v37  ;;  %v10796_v19 = vsub.f32 %v10603_v58, %v10652_v40 }
 0x68c   :  { %v3375_v21 = vadd.f32 %v3374_v43, %v3351_v45  ;;  %v10776_v45 = vsub.f32 %v10579_v11, %v10652_v40  ;;  %v3354_v43 = vmul.f32 %v10754_v48, %v10754_v48  ;;  %v10790_v11 = vsub.f32 %v10595_v42, %v10652_v40 }
 0x68d   :  { %v3395_v27 = vadd.f32 %v3394_v2, %v3350_v57  ;;  %v3364_v58 = vmul.f32 %v10796_v19, %v10796_v19 }
 0x68e   :  { %v3376_v17 = vadd.f32 %v3375_v21, %v3353_v4  ;;  %v10784_v4 = vsub.f32 %v10587_v29, %v10652_v40  ;;  %v3367_v21 = vmul.f32 %v3335_v32, %v3335_v32  ;;  %v3358_v0 = vmul.f32 %v10776_v45, %v10776_v45 }
 0x68f   :  { %v3396_v52 = vadd.f32 %v3395_v27, %v3352_v28  ;;  %v3362_v42 = vmul.f32 %v10790_v11, %v10790_v11 }
 0x690   :  { %v3377_v41 = vadd.f32 %v3376_v17, %v3355_v13  ;;  %v3360_v29 = vmul.f32 %v10784_v4, %v10784_v4 }
 0x691   :  { %v3397_v33 = vadd.f32 %v3396_v52, %v3354_v43 }
 0x692   :  { %v3378_v30 = vadd.f32 %v3377_v41, %v3357_v9  ;;  %v10802_v41 = vsub.f32 %v10611_v22, %v10652_v40 }
 0x693   :  { %v3398_v13 = vadd.f32 %v3397_v33, %v3356_v14 }
 0x694   :  { %v3379_v38 = vadd.f32 %v3378_v30, %v3359_v62  ;;  %v3336_v62 = vsub.f32 %v10621_v49, %v10652_v40  ;;  %v3366_v2 = vmul.f32 %v10802_v41, %v10802_v41 }
 0x695   :  { %v3399_v56 = vadd.f32 %v3398_v13, %v3358_v0 }
 0x696   :  { %v3380_v34 = vadd.f32 %v3379_v38, %v3361_v50  ;;  %v3368_v22 = vmul.f32 %v3336_v62, %v3336_v62 }
 0x697   :  { %v3400_v36 = vadd.f32 %v3399_v56, %v3360_v29 }
 0x698   :  { %v3381_v51 = vadd.f32 %v3380_v34, %v3363_v46 }
 0x699   :  { %v3401_v30 = vadd.f32 %v3400_v36, %v3362_v42 }
 0x69a   :  { %v3382_v35 = vadd.f32 %v3381_v51, %v3365_v18 }
 0x69b   :  { %v3402_v50 = vadd.f32 %v3401_v30, %v3364_v58 }
 0x69c   :  { %v3383_v17 = vadd.f32 %v3382_v35, %v3367_v21 }
 0x69d   :  { %v3403_v28 = vadd.f32 %v3402_v50, %v3366_v2 }
 0x69e   :  { %v3384_v9 = vrot.slane %v3383_v17, 4 }
 0x69f   :  { %v3404_v46 = vadd.f32 %v3403_v28, %v3368_v22 }
 0x6a0   :  { %v3385_v39 = vadd.f32 %v3384_v9, %v3383_v17  ;;  %v3449_v17 = vld [vmem:[%s11862_s23] sm:$0x3] }
 0x6a1   :  { %v3405_v43 = vrot.slane %v3404_v46, 4  ;;  %v10819_v29 = vrot.slane %v3449_v17, %v10469_v61  ;;  %v3493_v9 = vld [vmem:[%s11863_s28] sm:$0x3]  ;;  %v10825_v42 = vrot.slane %v3449_v17, %v10474_v60 }
 0x6a2   :  { %v3386_v57 = vrot.slane %v3385_v39, 2  ;;  %v10833_v58 = vrot.slane %v3493_v9, %v10474_v60 }
 0x6a3   :  { %v3406_v49 = vadd.f32 %v3405_v43, %v3404_v46 }
 0x6a4   :  { %v3387_v38 = vadd.f32 %v3386_v57, %v3385_v39  ;;  %v10830_v39 = vrot.slane %v3493_v9, %v10469_v61 }
 0x6a5   :  { %v3407_v18 = vrot.slane %v3406_v49, 2 }
 0x6a6   :  { %v3388_v27 = vrot.slane %v3387_v38, 1 }
 0x6a7   :  { %v3408_v51 = vadd.f32 %v3407_v18, %v3406_v49 }
 0x6a8   :  { %v3389_v34 = vadd.f32 %v3388_v27, %v3387_v38 }
 0x6a9   :  { %v3409_v14 = vrot.slane %v3408_v51, 1 }
 0x6aa   :  { %v3411_v52 = vmul.f32 0.0078125, %v3389_v34 }
 0x6ab   :  { %v3410_v33 = vadd.f32 %v3409_v14, %v3408_v51 }
 0x6ac   :  { %v3413_v40 = vadd.f32 1e-05, %v3411_v52 }
 0x6ad   :  { %v3412_v21 = vmul.f32 0.0078125, %v3410_v33 }
 0x6ae   :  { %8820 = vrsqrt.f32 %v3413_v40 }
 0x6af   :  { %v3414_v35 = vadd.f32 1e-05, %v3412_v21 }
 0x6b1   :  { %8822 = vrsqrt.f32 %v3414_v35 }
 0x6bb   :  { %v10812_v0 = vpop.eup %8820 }
 0x6bc   :  { %v10815_v13 = vmul.f32 %v10812_v0, %v3335_v32  ;;  %v3417_v56 = vmul.f32 %v10812_v0, %v10628_v54  ;;  %v3419_v30 = vmul.f32 %v10812_v0, %v10632_v59  ;;  %v3423_v43 = vmul.f32 %v10812_v0, %v10644_v7 }
 0x6bd   :  { %v3425_v14 = vmul.f32 %v10812_v0, %v10648_v8  ;;  %v3427_v9 = vmul.f32 %v10812_v0, %v10656_v63 }
 0x6be   :  { %v10827_v36 = vpop.eup %8822  ;;  %v3461_v32 = vmul.f32 %v10819_v29, %v3417_v56  ;;  %v3463_v59 = vmul.f32 %v10819_v29, %v3419_v30  ;;  %v3467_v51 = vmul.f32 %v10819_v29, %v3423_v43 }
 0x6bf   :  { %v10839_v57 = vmul.f32 %v10827_v36, %v3336_v62  ;;  %v3418_v54 = vmul.f32 %v10827_v36, %v10662_v20  ;;  %v3420_v2 = vmul.f32 %v10827_v36, %v10666_v1  ;;  %v3422_v61 = vmul.f32 %v10827_v36, %v10682_v15 }
 0x6c0   :  { %v3505_v38 = vadd.f32 %v10830_v39, %v3461_v32  ;;  %v3421_v62 = vmul.f32 %v10812_v0, %v10636_v24  ;;  %v3424_v15 = vmul.f32 %v10827_v36, %v10696_v31  ;;  %v3507_v46 = vadd.f32 %v10830_v39, %v3463_v59 }
 0x6c1   :  { %v3462_v60 = vmul.f32 %v10825_v42, %v3418_v54  ;;  %v3464_v50 = vmul.f32 %v10825_v42, %v3420_v2  ;;  %v3466_v1 = vmul.f32 %v10825_v42, %v3422_v61  ;;  %v3426_v40 = vmul.f32 %v10827_v36, %v10706_v53 }
 0x6c2   :  { %v3537_v27 = vmax.f32 %v3505_v38, 0.0  ;;  %v3465_v34 = vmul.f32 %v10819_v29, %v3421_v62  ;;  %v3468_v49 = vmul.f32 %v10825_v42, %v3424_v15  ;;  %v3539_v31 = vmax.f32 %v3507_v46, 0.0 }
 0x6c3   :  { %v3506_v22 = vadd.f32 %v10833_v58, %v3462_v60  ;;  %v3508_v20 = vadd.f32 %v10833_v58, %v3464_v50  ;;  %v3510_v52 = vadd.f32 %v10833_v58, %v3466_v1  ;;  %v3470_v21 = vmul.f32 %v10825_v42, %v3426_v40 }
 0x6c4   :  { %v3509_v18 = vadd.f32 %v10830_v39, %v3465_v34  ;;  %v3512_v33 = vadd.f32 %v10833_v58, %v3468_v49  ;;  %v3428_v35 = vmul.f32 %v10827_v36, %v10718_v10  ;;  %v3511_v17 = vadd.f32 %v10830_v39, %v3467_v51 }
 0x6c5   :  { %v3538_v28 = vmax.f32 %v3506_v22, 0.0  ;;  %v3540_v24 = vmax.f32 %v3508_v20, 0.0  ;;  %v3542_v7 = vmax.f32 %v3510_v52, 0.0  ;;  %v3469_v56 = vmul.f32 %v10819_v29, %v3425_v14 }
 0x6c6   :  { %v3541_v53 = vmax.f32 %v3509_v18, 0.0  ;;  %v3544_v32 = vmax.f32 %v3512_v33, 0.0  ;;  %v3514_v8 = vadd.f32 %v10833_v58, %v3470_v21  ;;  %v3472_v30 = vmul.f32 %v10825_v42, %v3428_v35 }
 0x6c7   :  { %3672 = vmatprep.mubr.f32.mxu0 %v3538_v28  ;;  %v3430_v54 = vmul.f32 %v10827_v36, %v10730_v16  ;;  %v3543_v10 = vmax.f32 %v3511_v17, 0.0  ;;  %v3513_v2 = vadd.f32 %v10830_v39, %v3469_v56  ;;  %v3471_v61 = vmul.f32 %v10819_v29, %v3427_v9 }
 0x6c8   :  { %3673 = vmatmul.mubr.f32.vlgmr.msra.gmra.mxu0 %v3537_v27  ;;  %v3429_v60 = vmul.f32 %v10812_v0, %v10670_v3  ;;  %v3546_v50 = vmax.f32 %v3514_v8, 0.0  ;;  %v3516_v63 = vadd.f32 %v10833_v58, %v3472_v30  ;;  %v3432_v59 = vmul.f32 %v10827_v36, %v10742_v44 }
 0x6c9   :  { %3677 = vmatprep.mubr.f32.mxu0 %v3540_v24  ;;  %v3474_v38 = vmul.f32 %v10825_v42, %v3430_v54  ;;  %v3545_v16 = vmax.f32 %v3513_v2, 0.0  ;;  %v3515_v62 = vadd.f32 %v10830_v39, %v3471_v61  ;;  %v3431_v20 = vmul.f32 %v10812_v0, %v10676_v55 }
 0x6ca   :  { %v3473_v22 = vmul.f32 %v10819_v29, %v3429_v60  ;;  %v3548_v1 = vmax.f32 %v3516_v63, 0.0  ;;  %v3476_v15 = vmul.f32 %v10825_v42, %v3432_v59  ;;  %v3434_v28 = vmul.f32 %v10827_v36, %v10754_v48 }
 0x6cb   :  { %v3518_v3 = vadd.f32 %v10833_v58, %v3474_v38  ;;  %v3547_v44 = vmax.f32 %v3515_v62, 0.0  ;;  %v3475_v46 = vmul.f32 %v10819_v29, %v3431_v20  ;;  %v3433_v34 = vmul.f32 %v10812_v0, %v10690_v26 }
 0x6cc   :  { %3678 = vmatmul.mubr.f32.gmra.mxu0 %v3539_v31  ;;  %v3517_v27 = vadd.f32 %v10830_v39, %v3473_v22  ;;  %v3520_v55 = vadd.f32 %v10833_v58, %v3476_v15  ;;  %v3478_v24 = vmul.f32 %v10825_v42, %v3434_v28  ;;  %v3436_v52 = vmul.f32 %v10827_v36, %v10766_v37 }
 0x6cd   :  { %3682 = vmatprep.mubr.f32.mxu0 %v3542_v7  ;;  %v3550_v43 = vmax.f32 %v3518_v3, 0.0  ;;  %v3519_v49 = vadd.f32 %v10830_v39, %v3475_v46  ;;  %v3477_v40 = vmul.f32 %v10819_v29, %v3433_v34  ;;  %v3435_v31 = vmul.f32 %v10812_v0, %v10700_v25 }
 0x6ce   :  { %v3549_v48 = vmax.f32 %v3517_v27, 0.0  ;;  %v3552_v18 = vmax.f32 %v3520_v55, 0.0  ;;  %v3522_v26 = vadd.f32 %v10833_v58, %v3478_v24  ;;  %v3480_v51 = vmul.f32 %v10825_v42, %v3436_v52 }
 0x6cf   :  { %v3438_v14 = vmul.f32 %v10827_v36, %v10776_v45  ;;  %v3551_v37 = vmax.f32 %v3519_v49, 0.0  ;;  %v3521_v7 = vadd.f32 %v10830_v39, %v3477_v40  ;;  %v3479_v33 = vmul.f32 %v10819_v29, %v3435_v31 }
 0x6d0   :  { %3683 = vmatmul.mubr.f32.gmra.mxu0 %v3541_v53  ;;  %v3437_v21 = vmul.f32 %v10812_v0, %v10712_v5  ;;  %v3554_v35 = vmax.f32 %v3522_v26, 0.0  ;;  %v3524_v25 = vadd.f32 %v10833_v58, %v3480_v51  ;;  %v3440_v17 = vmul.f32 %v10827_v36, %v10784_v4  ;;  %v3924_v51 = vld [vmem:[#allocation12 + $0x78] sm:$0xff] }
 0x6d1   :  { %3687 = vmatprep.mubr.f32.mxu0 %v3544_v32  ;;  %v3482_v53 = vmul.f32 %v10825_v42, %v3438_v14  ;;  %v3553_v45 = vmax.f32 %v3521_v7, 0.0  ;;  %v3523_v56 = vadd.f32 %v10830_v39, %v3479_v33  ;;  %v3439_v32 = vmul.f32 %v10812_v0, %v10724_v47  ;;  %8155 = vmatprep.subr.mxu1 %v3924_v51  ;;  %v3921_v33 = vld [vmem:[#allocation12 + $0x60] sm:$0xff] }
 0x6d2   :  { %v3481_v9 = vmul.f32 %v10819_v29, %v3437_v21  ;;  %v3556_v8 = vmax.f32 %v3524_v25, 0.0  ;;  %v3484_v30 = vmul.f32 %v10825_v42, %v3440_v17  ;;  %v3442_v54 = vmul.f32 %v10827_v36, %v10790_v11  ;;  %8156 = vmatpush3.msra.mxu1 %v3924_v51 }
 0x6d3   :  { %v3526_v5 = vadd.f32 %v10833_v58, %v3482_v53  ;;  %v3555_v4 = vmax.f32 %v3523_v56, 0.0  ;;  %v3483_v2 = vmul.f32 %v10819_v29, %v3439_v32  ;;  %v3441_v61 = vmul.f32 %v10812_v0, %v10736_v6  ;;  %v3919_v53 = vld [vmem:[#allocation12 + $0x50] sm:$0xff]  ;;  %v3916_v32 = vld [vmem:[#allocation12 + $0x38] sm:$0xff] }
 0x6d4   :  { %3688 = vmatmul.mubr.f32.gmra.mxu0 %v3543_v10  ;;  %v3525_v10 = vadd.f32 %v10830_v39, %v3481_v9  ;;  %v3528_v47 = vadd.f32 %v10833_v58, %v3484_v30  ;;  %v3444_v63 = vmul.f32 %v10827_v36, %v10796_v19  ;;  %v3446_v20 = vmul.f32 %v10827_v36, %v10802_v41  ;;  %v3917_v9 = vld [vmem:[#allocation12 + $0x40] sm:$0xff] }
 0x6d5   :  { %3692 = vmatprep.mubr.f32.mxu0 %v3546_v50  ;;  %v3558_v60 = vmax.f32 %v3526_v5, 0.0  ;;  %v3486_v50 = vmul.f32 %v10825_v42, %v3442_v54  ;;  %v3527_v38 = vadd.f32 %v10830_v39, %v3483_v2  ;;  %v3485_v59 = vmul.f32 %v10819_v29, %v3441_v61  ;;  %v3915_v5 = vld [vmem:[#allocation12 + $0x30] sm:$0xff]  ;;  %v3914_v54 = vld [vmem:[#allocation12 + $0x28] sm:$0xff]  ;;  %v3913_v2 = vld [vmem:[#allocation12 + $0x20] sm:$0xff] }
 0x6d6   :  { %v3557_v11 = vmax.f32 %v3525_v10, 0.0  ;;  %v3560_v62 = vmax.f32 %v3528_v47, 0.0  ;;  %v3488_v22 = vmul.f32 %v10825_v42, %v3444_v63  ;;  %v3445_v15 = vmul.f32 %v10812_v0, %v10760_v12  ;;  %v10963_v63 = vld [vmem:[%s11864_s29] ss:$0 sm:$0xff] }
 0x6d7   :  { %v3530_v6 = vadd.f32 %v10833_v58, %v3486_v50  ;;  %v3559_v19 = vmax.f32 %v3527_v38, 0.0  ;;  %v3491_v12 = vmul.f32 %v10819_v29, %v10815_v13  ;;  %v3912_v50 = vld [vmem:[#allocation12 + $0x18] sm:$0xff] }
 0x6d8   :  { %3693 = vmatmul.mubr.f32.gmra.mxu0 %v3545_v16  ;;  %v3443_v16 = vmul.f32 %v10812_v0, %v10748_v23  ;;  %v3532_v23 = vadd.f32 %v10833_v58, %v3488_v22  ;;  %v3489_v36 = vmul.f32 %v10819_v29, %v3445_v15 }
 0x6d9   :  { %3697 = vmatprep.mubr.f32.mxu0 %v3548_v1  ;;  %v3529_v1 = vadd.f32 %v10830_v39, %v3485_v59  ;;  %v3562_v28 = vmax.f32 %v3530_v6, 0.0  ;;  %v3535_v49 = vadd.f32 %v10830_v39, %v3491_v12 }
 0x6da   :  { %v3487_v3 = vmul.f32 %v10819_v29, %v3443_v16  ;;  %v3564_v46 = vmax.f32 %v3532_v23, 0.0  ;;  %v3533_v55 = vadd.f32 %v10830_v39, %v3489_v36  ;;  %v3911_v16 = vld [vmem:[#allocation12 + $0x10] sm:$0xff]  ;;  %v3909_v23 = vld [vmem:[#allocation12] sm:$0xff] }
 0x6db   :  { %v3561_v27 = vmax.f32 %v3529_v1, 0.0 }
 0x6dc   :  { %3698 = vmatmul.mubr.f32.gmra.mxu0 %v3547_v44  ;;  %v3490_v44 = vmul.f32 %v10825_v42, %v3446_v20  ;;  %v3531_v41 = vadd.f32 %v10830_v39, %v3487_v3  ;;  %v3922_v39 = vld [vmem:[#allocation12 + $0x68] sm:$0xff] }
 0x6dd   :  { %3702 = vmatprep.mubr.f32.mxu0 %v3550_v43  ;;  %v3492_v43 = vmul.f32 %v10825_v42, %v10839_v57  ;;  %v3567_v42 = vmax.f32 %v3535_v49, 0.0 }
 0x6de   :  { %v3534_v34 = vadd.f32 %v10833_v58, %v3490_v44  ;;  %v3563_v0 = vmax.f32 %v3531_v41, 0.0 }
 0x6df   :  { %v3536_v52 = vadd.f32 %v10833_v58, %v3492_v43  ;;  %v3923_v58 = vld [vmem:[#allocation12 + $0x70] sm:$0xff] }
 0x6e0   :  { %3703 = vmatmul.mubr.f32.gmra.mxu0 %v3549_v48  ;;  %v3566_v24 = vmax.f32 %v3534_v34, 0.0  ;;  %v3565_v48 = vmax.f32 %v3533_v55, 0.0  ;;  %8157 = vmatprep.subr.mxu1 %v3923_v58 }
 0x6e1   :  { %3707 = vmatprep.mubr.f32.mxu0 %v3552_v18  ;;  %v3568_v40 = vmax.f32 %v3536_v52, 0.0  ;;  %8158 = vmatpush3.msra.mxu1 %v3923_v58 }
 0x6e2   :  { %8159 = vmatprep.subr.mxu1 %v3922_v39 }
 0x6e3   :  { %8160 = vmatpush3.msra.mxu1 %v3922_v39 }
 0x6e4   :  { %3708 = vmatmul.mubr.f32.gmra.mxu0 %v3551_v37  ;;  %8161 = vmatprep.subr.mxu1 %v3921_v33 }
 0x6e5   :  { %3712 = vmatprep.mubr.f32.mxu0 %v3554_v35  ;;  %8162 = vmatpush3.msra.mxu1 %v3921_v33  ;;  %v3920_v35 = vld [vmem:[#allocation12 + $0x58] sm:$0xff] }
 0x6e6   :  { %8163 = vmatprep.subr.mxu1 %v3920_v35 }
 0x6e7   :  { %8164 = vmatpush3.msra.mxu1 %v3920_v35 }
 0x6e8   :  { %3713 = vmatmul.mubr.f32.gmra.mxu0 %v3553_v45  ;;  %8165 = vmatprep.subr.mxu1 %v3919_v53  ;;  %v3918_v45 = vld [vmem:[#allocation12 + $0x48] sm:$0xff] }
 0x6e9   :  { %3717 = vmatprep.mubr.f32.mxu0 %v3556_v8  ;;  %8166 = vmatpush3.msra.mxu1 %v3919_v53 }
 0x6ea   :  { %8167 = vmatprep.subr.mxu1 %v3918_v45 }
 0x6eb   :  { %8168 = vmatpush3.msra.mxu1 %v3918_v45 }
 0x6ec   :  { %3718 = vmatmul.mubr.f32.gmra.mxu0 %v3555_v4  ;;  %8169 = vmatprep.subr.mxu1 %v3917_v9 }
 0x6ed   :  { %3722 = vmatprep.mubr.f32.mxu0 %v3558_v60  ;;  %8170 = vmatpush3.msra.mxu1 %v3917_v9 }
 0x6ee   :  { %8171 = vmatprep.subr.mxu1 %v3916_v32 }
 0x6ef   :  { %8172 = vmatpush3.msra.mxu1 %v3916_v32 }
 0x6f0   :  { %3723 = vmatmul.mubr.f32.gmra.mxu0 %v3557_v11  ;;  %8173 = vmatprep.subr.mxu1 %v3915_v5 }
 0x6f1   :  { %3727 = vmatprep.mubr.f32.mxu0 %v3560_v62  ;;  %8174 = vmatpush3.msra.mxu1 %v3915_v5 }
 0x6f2   :  { %8175 = vmatprep.subr.mxu1 %v3914_v54 }
 0x6f3   :  { %8176 = vmatpush3.msra.mxu1 %v3914_v54 }
 0x6f4   :  { %3728 = vmatmul.mubr.f32.gmra.mxu0 %v3559_v19  ;;  %8177 = vmatprep.subr.mxu1 %v3913_v2  ;;  %v3910_v19 = vld [vmem:[#allocation12 + $0x8] sm:$0xff] }
 0x6f5   :  { %3732 = vmatprep.mubr.f32.mxu0 %v3562_v28  ;;  %8178 = vmatpush3.msra.mxu1 %v3913_v2 }
 0x6f6   :  { %8179 = vmatprep.subr.mxu1 %v3912_v50 }
 0x6f7   :  { %8180 = vmatpush3.msra.mxu1 %v3912_v50 }
 0x6f8   :  { %3733 = vmatmul.mubr.f32.gmra.mxu0 %v3561_v27  ;;  %8181 = vmatprep.subr.mxu1 %v3911_v16 }
 0x6f9   :  { %3737 = vmatprep.mubr.f32.mxu0 %v3564_v46  ;;  %8182 = vmatpush3.msra.mxu1 %v3911_v16 }
 0x6fa   :  { %8183 = vmatprep.subr.mxu1 %v3910_v19 }
 0x6fb   :  { %8184 = vmatpush3.msra.mxu1 %v3910_v19 }
 0x6fc   :  { %3738 = vmatmul.mubr.f32.gmra.mxu0 %v3563_v0  ;;  %8185 = vmatprep.subr.mxu1 %v3909_v23 }
 0x6fd   :  { %3742 = vmatprep.mubr.f32.mxu0 %v3566_v24  ;;  %8186 = vmatpush3.msra.mxu1 %v3909_v23 }
 0x700   :  { %3743 = vmatmul.mubr.f32.gmra.mxu0 %v3565_v48 }
 0x701   :  { %3747 = vmatprep.mubr.f32.mxu0 %v3568_v40 }
 0x704   :  { %3748 = vmatmul.mubr.f32.gmra.mxu0 %v3567_v42 }
 0x788   :  { %v7171_v57 = vpop.f32.mrf.mxu0 }
 0x78a   :  { %v7172_v31 = vpop.f32.mrf.mxu0 }
 0x78b   :  { %v7173_v60 = vadd.f32 %v7172_v31, %v7171_v57 }
 0x78c   :  { %v7174_v18 = vpop.f32.mrf.mxu0 }
 0x78d   :  { %v10969_v6 = vadd.f32 %v7173_v60, %v10963_v63 }
 0x78e   :  { %v7175_v13 = vpop.f32.mrf.mxu0 }
 0x78f   :  { %v7176_v10 = vadd.f32 %v7175_v13, %v7174_v18 }
 0x790   :  { %v7177_v29 = vpop.f32.mrf.mxu0 }
 0x791   :  { %v10966_v38 = vadd.f32 %v7176_v10, %v10963_v63 }
 0x792   :  { %v7178_v26 = vpop.f32.mrf.mxu0 }
 0x793   :  { %v7179_v47 = vadd.f32 %v7178_v26, %v7177_v29  ;;  %v3753_v3 = vadd.f32 %v10966_v38, %v10969_v6 }
 0x794   :  { %v7180_v14 = vpop.f32.mrf.mxu0 }
 0x795   :  { %v10972_v22 = vadd.f32 %v7179_v47, %v10963_v63 }
 0x796   :  { %v7181_v37 = vpop.f32.mrf.mxu0 }
 0x797   :  { %v7182_v59 = vadd.f32 %v7181_v37, %v7180_v14  ;;  %v3754_v27 = vadd.f32 %v3753_v3, %v10972_v22 }
 0x798   :  { %v7183_v7 = vpop.f32.mrf.mxu0 }
 0x799   :  { %v10977_v15 = vadd.f32 %v7182_v59, %v10963_v63 }
 0x79a   :  { %v7184_v21 = vpop.f32.mrf.mxu0 }
 0x79b   :  { %v7185_v20 = vadd.f32 %v7184_v21, %v7183_v7  ;;  %v3755_v34 = vadd.f32 %v3754_v27, %v10977_v15 }
 0x79c   :  { %v7186_v25 = vpop.f32.mrf.mxu0 }
 0x79d   :  { %v3695_v41 = vadd.f32 %v7185_v20, %v10963_v63 }
 0x79e   :  { %v7187_v17 = vpop.f32.mrf.mxu0 }
 0x79f   :  { %v7188_v28 = vadd.f32 %v7187_v17, %v7186_v25  ;;  %v3756_v55 = vadd.f32 %v3755_v34, %v3695_v41 }
 0x7a0   :  { %v7189_v56 = vpop.f32.mrf.mxu0 }
 0x7a1   :  { %v3700_v43 = vadd.f32 %v7188_v28, %v10963_v63 }
 0x7a2   :  { %v7190_v8 = vpop.f32.mrf.mxu0 }
 0x7a3   :  { %v7191_v36 = vadd.f32 %v7190_v8, %v7189_v56  ;;  %v3757_v49 = vadd.f32 %v3756_v55, %v3700_v43 }
 0x7a4   :  { %v7192_v30 = vpop.f32.mrf.mxu0 }
 0x7a5   :  { %v3705_v24 = vadd.f32 %v7191_v36, %v10963_v63 }
 0x7a6   :  { %v7193_v4 = vpop.f32.mrf.mxu0 }
 0x7a7   :  { %v7194_v12 = vadd.f32 %v7193_v4, %v7192_v30  ;;  %v3758_v31 = vadd.f32 %v3757_v49, %v3705_v24 }
 0x7a8   :  { %v7195_v61 = vpop.f32.mrf.mxu0 }
 0x7a9   :  { %v3710_v40 = vadd.f32 %v7194_v12, %v10963_v63 }
 0x7aa   :  { %v7196_v11 = vpop.f32.mrf.mxu0 }
 0x7ab   :  { %v7197_v52 = vadd.f32 %v7196_v11, %v7195_v61  ;;  %v3759_v26 = vadd.f32 %v3758_v31, %v3710_v40 }
 0x7ac   :  { %v7198_v62 = vpop.f32.mrf.mxu0 }
 0x7ad   :  { %v3715_v18 = vadd.f32 %v7197_v52, %v10963_v63 }
 0x7ae   :  { %v7199_v1 = vpop.f32.mrf.mxu0 }
 0x7af   :  { %v7200_v42 = vadd.f32 %v7199_v1, %v7198_v62  ;;  %v3760_v37 = vadd.f32 %v3759_v26, %v3715_v18 }
 0x7b0   :  { %v7201_v44 = vpop.f32.mrf.mxu0 }
 0x7b1   :  { %v3720_v51 = vadd.f32 %v7200_v42, %v10963_v63 }
 0x7b2   :  { %v7202_v46 = vpop.f32.mrf.mxu0 }
 0x7b3   :  { %v7203_v13 = vadd.f32 %v7202_v46, %v7201_v44  ;;  %v3761_v21 = vadd.f32 %v3760_v37, %v3720_v51 }
 0x7b4   :  { %v7204_v0 = vpop.f32.mrf.mxu0 }
 0x7b5   :  { %v3725_v39 = vadd.f32 %v7203_v13, %v10963_v63 }
 0x7b6   :  { %v7205_v48 = vpop.f32.mrf.mxu0 }
 0x7b7   :  { %v7206_v14 = vadd.f32 %v7205_v48, %v7204_v0  ;;  %v3762_v17 = vadd.f32 %v3761_v21, %v3725_v39 }
 0x7b8   :  { %v7207_v57 = vpop.f32.mrf.mxu0 }
 0x7b9   :  { %v3730_v35 = vadd.f32 %v7206_v14, %v10963_v63 }
 0x7ba   :  { %v7208_v29 = vpop.f32.mrf.mxu0 }
 0x7bb   :  { %v7209_v7 = vadd.f32 %v7208_v29, %v7207_v57  ;;  %v3763_v9 = vadd.f32 %v3762_v17, %v3730_v35 }
 0x7bc   :  { %v7210_v58 = vpop.f32.mrf.mxu0 }
 0x7bd   :  { %v3735_v45 = vadd.f32 %v7209_v7, %v10963_v63 }
 0x7be   :  { %v7211_v33 = vpop.f32.mrf.mxu0 }
 0x7bf   :  { %v7212_v25 = vadd.f32 %v7211_v33, %v7210_v58  ;;  %v3764_v30 = vadd.f32 %v3763_v9, %v3735_v45 }
 0x7c0   :  { %v7213_v53 = vpop.f32.mrf.mxu0 }
 0x7c1   :  { %v3740_v32 = vadd.f32 %v7212_v25, %v10963_v63 }
 0x7c2   :  { %v7214_v56 = vpop.f32.mrf.mxu0 }
 0x7c3   :  { %v7215_v8 = vadd.f32 %v7214_v56, %v7213_v53  ;;  %v3765_v10 = vadd.f32 %v3764_v30, %v3740_v32 }
 0x7c4   :  { %v7216_v5 = vpop.f32.mrf.mxu0 }
 0x7c5   :  { %v3745_v54 = vadd.f32 %v7215_v8, %v10963_v63 }
 0x7c6   :  { %v7217_v4 = vpop.f32.mrf.mxu0 }
 0x7c7   :  { %v7218_v2 = vadd.f32 %v7217_v4, %v7216_v5  ;;  %v3766_v61 = vadd.f32 %v3765_v10, %v3745_v54 }
 0x7c9   :  { %v3750_v60 = vadd.f32 %v7218_v2, %v10963_v63 }
 0x7cb   :  { %v3767_v47 = vadd.f32 %v3766_v61, %v3750_v60 }
 0x7cd   :  { %v3768_v50 = vrot.slane %v3767_v47, 4 }
 0x7cf   :  { %v3769_v11 = vadd.f32 %v3768_v50, %v3767_v47  ;;  %v11034_v47 = vld [vmem:[%s11865_s1] ss:$0 sm:$0xff] }
 0x7d1   :  { %v3770_v59 = vrot.slane %v3769_v11, 2 }
 0x7d3   :  { %v3771_v16 = vadd.f32 %v3770_v59, %v3769_v11 }
 0x7d5   :  { %v3772_v62 = vrot.slane %v3771_v16, 1 }
 0x7d7   :  { %v3773_v20 = vadd.f32 %v3772_v62, %v3771_v16  ;;  %v11037_v16 = vld [vmem:[%s11866_s2] ss:$0 sm:$0xff] }
 0x7d9   :  { %v3774_v19 = vmul.f32 0.0078125, %v3773_v20 }
 0x7db   :  { %v3775_v1 = vsub.f32 %v10969_v6, %v3774_v19  ;;  %v3776_v3 = vsub.f32 %v10966_v38, %v3774_v19  ;;  %v3777_v28 = vsub.f32 %v10972_v22, %v3774_v19  ;;  %v3778_v27 = vsub.f32 %v10977_v15, %v3774_v19 }
 0x7dc   :  { %v3779_v36 = vsub.f32 %v3695_v41, %v3774_v19  ;;  %v3780_v34 = vsub.f32 %v3700_v43, %v3774_v19  ;;  %v3781_v55 = vsub.f32 %v3705_v24, %v3774_v19  ;;  %v10997_v49 = vsub.f32 %v3710_v40, %v3774_v19 }
 0x7dd   :  { %v3791_v23 = vmul.f32 %v3775_v1, %v3775_v1  ;;  %v3792_v44 = vmul.f32 %v3776_v3, %v3776_v3  ;;  %v3793_v63 = vmul.f32 %v3777_v28, %v3777_v28  ;;  %v3794_v12 = vmul.f32 %v3778_v27, %v3778_v27 }
 0x7de   :  { %v3795_v52 = vmul.f32 %v3779_v36, %v3779_v36  ;;  %v3796_v6 = vmul.f32 %v3780_v34, %v3780_v34  ;;  %v10999_v38 = vsub.f32 %v3715_v18, %v3774_v19  ;;  %v3797_v22 = vmul.f32 %v3781_v55, %v3781_v55 }
 0x7df   :  { %v3807_v46 = vadd.f32 %v3792_v44, %v3791_v23  ;;  %v11001_v31 = vsub.f32 %v3720_v51, %v3774_v19  ;;  %v3798_v15 = vmul.f32 %v10997_v49, %v10997_v49  ;;  %v11005_v43 = vsub.f32 %v3725_v39, %v3774_v19 }
 0x7e0   :  { %v3799_v24 = vmul.f32 %v10999_v38, %v10999_v38  ;;  %v11009_v40 = vsub.f32 %v3730_v35, %v3774_v19  ;;  %v11013_v26 = vsub.f32 %v3735_v45, %v3774_v19  ;;  %v11017_v58 = vsub.f32 %v3740_v32, %v3774_v19 }
 0x7e1   :  { %v3808_v0 = vadd.f32 %v3807_v46, %v3793_v63  ;;  %v3800_v18 = vmul.f32 %v11001_v31, %v11001_v31  ;;  %v3801_v51 = vmul.f32 %v11005_v43, %v11005_v43  ;;  %v11021_v7 = vsub.f32 %v3745_v54, %v3774_v19 }
 0x7e2   :  { %v3802_v37 = vmul.f32 %v11009_v40, %v11009_v40  ;;  %v3803_v33 = vmul.f32 %v11013_v26, %v11013_v26  ;;  %v11025_v35 = vsub.f32 %v3750_v60, %v3774_v19  ;;  %v3804_v25 = vmul.f32 %v11017_v58, %v11017_v58 }
 0x7e3   :  { %v3809_v48 = vadd.f32 %v3808_v0, %v3794_v12  ;;  %v3805_v17 = vmul.f32 %v11021_v7, %v11021_v7 }
 0x7e4   :  { %v3806_v56 = vmul.f32 %v11025_v35, %v11025_v35 }
 0x7e5   :  { %v3810_v42 = vadd.f32 %v3809_v48, %v3795_v52 }
 0x7e7   :  { %v3811_v57 = vadd.f32 %v3810_v42, %v3796_v6 }
 0x7e9   :  { %v3812_v41 = vadd.f32 %v3811_v57, %v3797_v22 }
 0x7eb   :  { %v3813_v13 = vadd.f32 %v3812_v41, %v3798_v15 }
 0x7ed   :  { %v3814_v29 = vadd.f32 %v3813_v13, %v3799_v24 }
 0x7ef   :  { %v3815_v14 = vadd.f32 %v3814_v29, %v3800_v18 }
 0x7f1   :  { %v3816_v39 = vadd.f32 %v3815_v14, %v3801_v51 }
 0x7f3   :  { %v3817_v21 = vadd.f32 %v3816_v39, %v3802_v37 }
 0x7f5   :  { %v3818_v53 = vadd.f32 %v3817_v21, %v3803_v33 }
 0x7f7   :  { %v3819_v45 = vadd.f32 %v3818_v53, %v3804_v25 }
 0x7f9   :  { %v3820_v9 = vadd.f32 %v3819_v45, %v3805_v17 }
 0x7fb   :  { %v3821_v32 = vadd.f32 %v3820_v9, %v3806_v56 }
 0x7fd   :  { %v3822_v8 = vrot.slane %v3821_v32, 4 }
 0x7ff   :  { %v3823_v5 = vadd.f32 %v3822_v8, %v3821_v32 }
 0x801   :  { %v3824_v30 = vrot.slane %v3823_v5, 2 }
 0x803   :  { %v3825_v54 = vadd.f32 %v3824_v30, %v3823_v5 }
 0x805   :  { %v3826_v4 = vrot.slane %v3825_v54, 1 }
 0x807   :  { %v3827_v10 = vadd.f32 %v3826_v4, %v3825_v54 }
 0x809   :  { %v3828_v2 = vmul.f32 0.0078125, %v3827_v10 }
 0x80b   :  { %v3829_v61 = vadd.f32 1e-05, %v3828_v2 }
 0x80d   :  { %8824 = vrsqrt.f32 %v3829_v61 }
 0x81a   :  { %v8825_v60 = vpop.eup %8824 }
 0x81b   :  { %v3831_v50 = vmul.f32 %v8825_v60, %v3775_v1  ;;  %v3832_v11 = vmul.f32 %v8825_v60, %v3776_v3  ;;  %v3833_v59 = vmul.f32 %v8825_v60, %v3777_v28  ;;  %v3834_v62 = vmul.f32 %v8825_v60, %v3778_v27 }
 0x81c   :  { %v3835_v20 = vmul.f32 %v8825_v60, %v3779_v36  ;;  %v3836_v46 = vmul.f32 %v8825_v60, %v3780_v34  ;;  %v3837_v12 = vmul.f32 %v8825_v60, %v3781_v55  ;;  %v3838_v6 = vmul.f32 %v8825_v60, %v10997_v49 }
 0x81d   :  { %v3854_v19 = vmul.f32 %v11034_v47, %v3831_v50  ;;  %v3855_v23 = vmul.f32 %v11034_v47, %v3832_v11  ;;  %v3856_v44 = vmul.f32 %v11034_v47, %v3833_v59  ;;  %v3857_v63 = vmul.f32 %v11034_v47, %v3834_v62  ;;  %v4248_v59 = vld [vmem:[#allocation13 + $0x78] sm:$0xff]  ;;  %v4246_v62 = vld [vmem:[#allocation13 + $0x68] sm:$0xff] }
 0x81e   :  { %v3858_v28 = vmul.f32 %v11034_v47, %v3835_v20  ;;  %v3859_v48 = vmul.f32 %v11034_v47, %v3836_v46  ;;  %v3860_v55 = vmul.f32 %v11034_v47, %v3837_v12  ;;  %v3839_v22 = vmul.f32 %v8825_v60, %v10999_v38  ;;  %8211 = vmatprep.subr.mxu0 %v4248_v59  ;;  %v4245_v20 = vld [vmem:[#allocation13 + $0x60] sm:$0xff]  ;;  %v4239_v46 = vld [vmem:[#allocation13 + $0x30] sm:$0xff]  ;;  %v4238_v12 = vld [vmem:[#allocation13 + $0x28] sm:$0xff] }
 0x81f   :  { %v3877_v0 = vadd.f32 %v11037_v16, %v3854_v19  ;;  %v3878_v1 = vadd.f32 %v11037_v16, %v3855_v23  ;;  %v3879_v3 = vadd.f32 %v11037_v16, %v3856_v44  ;;  %v3880_v52 = vadd.f32 %v11037_v16, %v3857_v63  ;;  %8212 = vmatpush3.msra.mxu0 %v4248_v59  ;;  %v4244_v19 = vld [vmem:[#allocation13 + $0x58] sm:$0xff]  ;;  %v4242_v23 = vld [vmem:[#allocation13 + $0x48] sm:$0xff]  ;;  %v4241_v44 = vld [vmem:[#allocation13 + $0x40] sm:$0xff] }
 0x820   :  { %v3881_v34 = vadd.f32 %v11037_v16, %v3858_v28  ;;  %v3882_v15 = vadd.f32 %v11037_v16, %v3859_v48  ;;  %v3861_v41 = vmul.f32 %v11034_v47, %v3838_v6  ;;  %v3840_v24 = vmul.f32 %v8825_v60, %v11001_v31  ;;  %v4240_v63 = vld [vmem:[#allocation13 + $0x38] sm:$0xff]  ;;  %v4233_v6 = vld [vmem:[#allocation13] sm:$0xff] }
 0x821   :  { %v3893_v27 = vmax.f32 %v3877_v0, 0.0  ;;  %v3894_v36 = vmax.f32 %v3878_v1, 0.0  ;;  %v3895_v42 = vmax.f32 %v3879_v3, 0.0  ;;  %v3896_v57 = vmax.f32 %v3880_v52, 0.0  ;;  %v4237_v0 = vld [vmem:[#allocation13 + $0x20] sm:$0xff]  ;;  %v4236_v1 = vld [vmem:[#allocation13 + $0x18] sm:$0xff] }
 0x822   :  { %v3897_v13 = vmax.f32 %v3881_v34, 0.0  ;;  %v3883_v49 = vadd.f32 %v11037_v16, %v3860_v55  ;;  %v3862_v18 = vmul.f32 %v11034_v47, %v3839_v22  ;;  %v3841_v29 = vmul.f32 %v8825_v60, %v11005_v43  ;;  %v4235_v3 = vld [vmem:[#allocation13 + $0x10] sm:$0xff] }
 0x823   :  { %8187 = vmatprep.mubr.f32.mxu1 %v3893_v27  ;;  %v3898_v51 = vmax.f32 %v3882_v15, 0.0  ;;  %v3884_v38 = vadd.f32 %v11037_v16, %v3861_v41  ;;  %v3863_v14 = vmul.f32 %v11034_v47, %v3840_v24  ;;  %v3842_v37 = vmul.f32 %v8825_v60, %v11009_v40  ;;  %v4234_v27 = vld [vmem:[#allocation13 + $0x8] sm:$0xff] }
 0x824   :  { %8188 = vmatmul.mubr.f32.vlgmr.msra.gmra.mxu1 %v3894_v36  ;;  %v3899_v39 = vmax.f32 %v3883_v49, 0.0  ;;  %v3885_v33 = vadd.f32 %v11037_v16, %v3862_v18  ;;  %v3864_v31 = vmul.f32 %v11034_v47, %v3841_v29  ;;  %v3843_v21 = vmul.f32 %v8825_v60, %v11013_v26  ;;  %v6767_v36 = vld [vmem:[%s11867_s7] ss:$0 sm:$0xff] }
 0x825   :  { %8190 = vmatprep.mubr.f32.mxu1 %v3895_v42  ;;  %v3900_v25 = vmax.f32 %v3884_v38, 0.0  ;;  %v3886_v43 = vadd.f32 %v11037_v16, %v3863_v14  ;;  %v3865_v53 = vmul.f32 %v11034_v47, %v3842_v37  ;;  %v3844_v17 = vmul.f32 %v8825_v60, %v11017_v58 }
 0x826   :  { %v3901_v45 = vmax.f32 %v3885_v33, 0.0  ;;  %v3887_v56 = vadd.f32 %v11037_v16, %v3864_v31  ;;  %v3866_v40 = vmul.f32 %v11034_v47, %v3843_v21  ;;  %v3845_v9 = vmul.f32 %v8825_v60, %v11021_v7 }
 0x827   :  { %v3846_v26 = vmul.f32 %v8825_v60, %v11025_v35  ;;  %v3902_v32 = vmax.f32 %v3886_v43, 0.0  ;;  %v3888_v8 = vadd.f32 %v11037_v16, %v3865_v53  ;;  %v3867_v5 = vmul.f32 %v11034_v47, %v3844_v17 }
 0x828   :  { %8191 = vmatmul.mubr.f32.gmra.mxu1 %v3896_v57  ;;  %v3903_v30 = vmax.f32 %v3887_v56, 0.0  ;;  %v3889_v54 = vadd.f32 %v11037_v16, %v3866_v40  ;;  %v3868_v58 = vmul.f32 %v11034_v47, %v3845_v9 }
 0x829   :  { %8193 = vmatprep.mubr.f32.mxu1 %v3897_v13  ;;  %v3869_v4 = vmul.f32 %v11034_v47, %v3846_v26  ;;  %v3904_v10 = vmax.f32 %v3888_v8, 0.0  ;;  %v3890_v7 = vadd.f32 %v11037_v16, %v3867_v5  ;;  %v4247_v47 = vld [vmem:[#allocation13 + $0x70] sm:$0xff] }
 0x82a   :  { %v3905_v2 = vmax.f32 %v3889_v54, 0.0  ;;  %v3891_v35 = vadd.f32 %v11037_v16, %v3868_v58  ;;  %8213 = vmatprep.subr.mxu0 %v4247_v47 }
 0x82b   :  { %v3906_v61 = vmax.f32 %v3890_v7, 0.0  ;;  %v3892_v60 = vadd.f32 %v11037_v16, %v3869_v4  ;;  %8214 = vmatpush3.msra.mxu0 %v4247_v47  ;;  %v4243_v16 = vld [vmem:[#allocation13 + $0x50] sm:$0xff] }
 0x82c   :  { %8194 = vmatmul.mubr.f32.gmra.mxu1 %v3898_v51  ;;  %v3907_v50 = vmax.f32 %v3891_v35, 0.0  ;;  %8215 = vmatprep.subr.mxu0 %v4246_v62 }
 0x82d   :  { %8196 = vmatprep.mubr.f32.mxu1 %v3899_v39  ;;  %v3908_v11 = vmax.f32 %v3892_v60, 0.0  ;;  %8216 = vmatpush3.msra.mxu0 %v4246_v62 }
 0x82e   :  { %8217 = vmatprep.subr.mxu0 %v4245_v20 }
 0x82f   :  { %8218 = vmatpush3.msra.mxu0 %v4245_v20 }
 0x830   :  { %8197 = vmatmul.mubr.f32.gmra.mxu1 %v3900_v25  ;;  %8219 = vmatprep.subr.mxu0 %v4244_v19 }
 0x831   :  { %8199 = vmatprep.mubr.f32.mxu1 %v3901_v45  ;;  %8220 = vmatpush3.msra.mxu0 %v4244_v19 }
 0x832   :  { %8221 = vmatprep.subr.mxu0 %v4243_v16 }
 0x833   :  { %8222 = vmatpush3.msra.mxu0 %v4243_v16 }
 0x834   :  { %8200 = vmatmul.mubr.f32.gmra.mxu1 %v3902_v32  ;;  %8223 = vmatprep.subr.mxu0 %v4242_v23 }
 0x835   :  { %8202 = vmatprep.mubr.f32.mxu1 %v3903_v30  ;;  %8224 = vmatpush3.msra.mxu0 %v4242_v23 }
 0x836   :  { %8225 = vmatprep.subr.mxu0 %v4241_v44 }
 0x837   :  { %8226 = vmatpush3.msra.mxu0 %v4241_v44 }
 0x838   :  { %8203 = vmatmul.mubr.f32.gmra.mxu1 %v3904_v10  ;;  %8227 = vmatprep.subr.mxu0 %v4240_v63 }
 0x839   :  { %8205 = vmatprep.mubr.f32.mxu1 %v3905_v2  ;;  %8228 = vmatpush3.msra.mxu0 %v4240_v63 }
 0x83a   :  { %8229 = vmatprep.subr.mxu0 %v4239_v46 }
 0x83b   :  { %8230 = vmatpush3.msra.mxu0 %v4239_v46 }
 0x83c   :  { %8206 = vmatmul.mubr.f32.gmra.mxu1 %v3906_v61  ;;  %8231 = vmatprep.subr.mxu0 %v4238_v12 }
 0x83d   :  { %8208 = vmatprep.mubr.f32.mxu1 %v3907_v50  ;;  %8232 = vmatpush3.msra.mxu0 %v4238_v12 }
 0x83e   :  { %8233 = vmatprep.subr.mxu0 %v4237_v0 }
 0x83f   :  { %8234 = vmatpush3.msra.mxu0 %v4237_v0 }
 0x840   :  { %8209 = vmatmul.mubr.f32.gmra.mxu1 %v3908_v11  ;;  %8235 = vmatprep.subr.mxu0 %v4236_v1 }
 0x841   :  { %8236 = vmatpush3.msra.mxu0 %v4236_v1 }
 0x842   :  { %8237 = vmatprep.subr.mxu0 %v4235_v3 }
 0x843   :  { %8238 = vmatpush3.msra.mxu0 %v4235_v3 }
 0x844   :  { %8239 = vmatprep.subr.mxu0 %v4234_v27 }
 0x845   :  { %8240 = vmatpush3.msra.mxu0 %v4234_v27 }
 0x846   :  { %8241 = vmatprep.subr.mxu0 %v4233_v6 }
 0x847   :  { %8242 = vmatpush3.msra.mxu0 %v4233_v6 }
 0x8e4   :  { %v8189_v28 = vpop.f32.mrf.mxu1 }
 0x8e5   :  { %v4004_v34 = vadd.f32 %v8189_v28, %v6767_v36 }
 0x8e6   :  { %v3998_v52 = vpop.f32.mrf.mxu1 }
 0x8e7   :  { %v3999_v48 = vadd.f32 %v6767_v36, %v3998_v52 }
 0x8e8   :  { %v8192_v42 = vpop.f32.mrf.mxu1 }
 0x8e9   :  { %v4077_v22 = vadd.f32 %v4004_v34, %v3999_v48  ;;  %v4014_v41 = vadd.f32 %v8192_v42, %v6767_v36 }
 0x8ea   :  { %v4008_v55 = vpop.f32.mrf.mxu1 }
 0x8eb   :  { %v4009_v57 = vadd.f32 %v6767_v36, %v4008_v55 }
 0x8ec   :  { %v8195_v15 = vpop.f32.mrf.mxu1 }
 0x8ed   :  { %v4078_v24 = vadd.f32 %v4077_v22, %v4009_v57  ;;  %v4024_v51 = vadd.f32 %v8195_v15, %v6767_v36 }
 0x8ee   :  { %v4018_v13 = vpop.f32.mrf.mxu1 }
 0x8ef   :  { %v4019_v49 = vadd.f32 %v6767_v36, %v4018_v13  ;;  %v4079_v18 = vadd.f32 %v4078_v24, %v4014_v41 }
 0x8f0   :  { %v8198_v29 = vpop.f32.mrf.mxu1 }
 0x8f1   :  { %v4080_v38 = vadd.f32 %v4079_v18, %v4019_v49  ;;  %v4034_v31 = vadd.f32 %v8198_v29, %v6767_v36 }
 0x8f2   :  { %v4028_v14 = vpop.f32.mrf.mxu1 }
 0x8f3   :  { %v4029_v37 = vadd.f32 %v6767_v36, %v4028_v14  ;;  %v4081_v39 = vadd.f32 %v4080_v38, %v4024_v51 }
 0x8f4   :  { %v8201_v33 = vpop.f32.mrf.mxu1 }
 0x8f5   :  { %v4082_v21 = vadd.f32 %v4081_v39, %v4029_v37  ;;  %v4044_v45 = vadd.f32 %v8201_v33, %v6767_v36 }
 0x8f6   :  { %v4038_v25 = vpop.f32.mrf.mxu1 }
 0x8f7   :  { %v4039_v43 = vadd.f32 %v6767_v36, %v4038_v25  ;;  %v4083_v53 = vadd.f32 %v4082_v21, %v4034_v31 }
 0x8f8   :  { %v8204_v17 = vpop.f32.mrf.mxu1 }
 0x8f9   :  { %v4084_v56 = vadd.f32 %v4083_v53, %v4039_v43  ;;  %v4054_v8 = vadd.f32 %v8204_v17, %v6767_v36 }
 0x8fa   :  { %v4048_v40 = vpop.f32.mrf.mxu1 }
 0x8fb   :  { %v4049_v9 = vadd.f32 %v6767_v36, %v4048_v40  ;;  %v4085_v26 = vadd.f32 %v4084_v56, %v4044_v45 }
 0x8fc   :  { %v8207_v32 = vpop.f32.mrf.mxu1 }
 0x8fd   :  { %v4086_v5 = vadd.f32 %v4085_v26, %v4049_v9  ;;  %v4064_v10 = vadd.f32 %v8207_v32, %v6767_v36 }
 0x8fe   :  { %v4058_v30 = vpop.f32.mrf.mxu1 }
 0x8ff   :  { %v4059_v54 = vadd.f32 %v6767_v36, %v4058_v30  ;;  %v4087_v58 = vadd.f32 %v4086_v5, %v4054_v8 }
 0x900   :  { %v8210_v4 = vpop.f32.mrf.mxu1 }
 0x901   :  { %v4088_v7 = vadd.f32 %v4087_v58, %v4059_v54  ;;  %v4074_v60 = vadd.f32 %v8210_v4, %v6767_v36 }
 0x902   :  { %v4068_v2 = vpop.f32.mrf.mxu1 }
 0x903   :  { %v4069_v35 = vadd.f32 %v6767_v36, %v4068_v2  ;;  %v4089_v61 = vadd.f32 %v4088_v7, %v4064_v10 }
 0x905   :  { %v4090_v50 = vadd.f32 %v4089_v61, %v4069_v35 }
 0x907   :  { %v4091_v11 = vadd.f32 %v4090_v50, %v4074_v60 }
 0x909   :  { %v4092_v59 = vrot.slane %v4091_v11, 4 }
 0x90b   :  { %v4093_v47 = vadd.f32 %v4092_v59, %v4091_v11  ;;  %v11120_v11 = vld [vmem:[%s11868_s10] ss:$0 sm:$0xff] }
 0x90d   :  { %v4094_v62 = vrot.slane %v4093_v47, 2 }
 0x90f   :  { %v4095_v20 = vadd.f32 %v4094_v62, %v4093_v47 }
 0x911   :  { %v4096_v19 = vrot.slane %v4095_v20, 1 }
 0x913   :  { %v4097_v16 = vadd.f32 %v4096_v19, %v4095_v20  ;;  %v11126_v20 = vld [vmem:[%s11869_s11] ss:$0 sm:$0xff] }
 0x915   :  { %v4098_v23 = vmul.f32 0.0078125, %v4097_v16 }
 0x917   :  { %v4099_v44 = vsub.f32 %v3999_v48, %v4098_v23  ;;  %v4100_v63 = vsub.f32 %v4004_v34, %v4098_v23  ;;  %v4101_v46 = vsub.f32 %v4009_v57, %v4098_v23  ;;  %v4102_v1 = vsub.f32 %v4014_v41, %v4098_v23 }
 0x918   :  { %v4103_v3 = vsub.f32 %v4019_v49, %v4098_v23  ;;  %v4104_v52 = vsub.f32 %v4024_v51, %v4098_v23  ;;  %v4105_v42 = vsub.f32 %v4029_v37, %v4098_v23  ;;  %v11081_v15 = vsub.f32 %v4034_v31, %v4098_v23 }
 0x919   :  { %v4115_v12 = vmul.f32 %v4099_v44, %v4099_v44  ;;  %v4116_v0 = vmul.f32 %v4100_v63, %v4100_v63  ;;  %v4117_v28 = vmul.f32 %v4101_v46, %v4101_v46  ;;  %v4118_v36 = vmul.f32 %v4102_v1, %v4102_v1 }
 0x91a   :  { %v4119_v55 = vmul.f32 %v4103_v3, %v4103_v3  ;;  %v4120_v24 = vmul.f32 %v4104_v52, %v4104_v52  ;;  %v11083_v18 = vsub.f32 %v4039_v43, %v4098_v23  ;;  %v4121_v48 = vmul.f32 %v4105_v42, %v4105_v42 }
 0x91b   :  { %v4131_v27 = vadd.f32 %v4116_v0, %v4115_v12  ;;  %v11085_v57 = vsub.f32 %v4044_v45, %v4098_v23  ;;  %v4122_v41 = vmul.f32 %v11081_v15, %v11081_v15  ;;  %v11089_v29 = vsub.f32 %v4049_v9, %v4098_v23 }
 0x91c   :  { %v4123_v51 = vmul.f32 %v11083_v18, %v11083_v18  ;;  %v11093_v14 = vsub.f32 %v4054_v8, %v4098_v23  ;;  %v11097_v33 = vsub.f32 %v4059_v54, %v4098_v23  ;;  %v11101_v25 = vsub.f32 %v4064_v10, %v4098_v23 }
 0x91d   :  { %v4132_v6 = vadd.f32 %v4131_v27, %v4117_v28  ;;  %v4124_v37 = vmul.f32 %v11085_v57, %v11085_v57  ;;  %v4125_v31 = vmul.f32 %v11089_v29, %v11089_v29  ;;  %v11105_v17 = vsub.f32 %v4069_v35, %v4098_v23 }
 0x91e   :  { %v4126_v43 = vmul.f32 %v11093_v14, %v11093_v14  ;;  %v4127_v45 = vmul.f32 %v11097_v33, %v11097_v33  ;;  %v11109_v40 = vsub.f32 %v4074_v60, %v4098_v23  ;;  %v4128_v9 = vmul.f32 %v11101_v25, %v11101_v25 }
 0x91f   :  { %v4133_v22 = vadd.f32 %v4132_v6, %v4118_v36  ;;  %v4129_v32 = vmul.f32 %v11105_v17, %v11105_v17 }
 0x920   :  { %v4130_v5 = vmul.f32 %v11109_v40, %v11109_v40 }
 0x921   :  { %v4134_v13 = vadd.f32 %v4133_v22, %v4119_v55 }
 0x923   :  { %v4135_v34 = vadd.f32 %v4134_v13, %v4120_v24 }
 0x925   :  { %v4136_v49 = vadd.f32 %v4135_v34, %v4121_v48 }
 0x927   :  { %v4137_v38 = vadd.f32 %v4136_v49, %v4122_v41 }
 0x929   :  { %v4138_v39 = vadd.f32 %v4137_v38, %v4123_v51 }
 0x92b   :  { %v4139_v21 = vadd.f32 %v4138_v39, %v4124_v37 }
 0x92d   :  { %v4140_v53 = vadd.f32 %v4139_v21, %v4125_v31 }
 0x92f   :  { %v4141_v56 = vadd.f32 %v4140_v53, %v4126_v43 }
 0x931   :  { %v4142_v26 = vadd.f32 %v4141_v56, %v4127_v45 }
 0x933   :  { %v4143_v8 = vadd.f32 %v4142_v26, %v4128_v9 }
 0x935   :  { %v4144_v30 = vadd.f32 %v4143_v8, %v4129_v32 }
 0x937   :  { %v4145_v54 = vadd.f32 %v4144_v30, %v4130_v5 }
 0x939   :  { %v4146_v58 = vrot.slane %v4145_v54, 4 }
 0x93b   :  { %v4147_v4 = vadd.f32 %v4146_v58, %v4145_v54 }
 0x93d   :  { %v4148_v10 = vrot.slane %v4147_v4, 2 }
 0x93f   :  { %v4149_v7 = vadd.f32 %v4148_v10, %v4147_v4 }
 0x941   :  { %v4150_v2 = vrot.slane %v4149_v7, 1 }
 0x943   :  { %v4151_v35 = vadd.f32 %v4150_v2, %v4149_v7 }
 0x945   :  { %v4152_v61 = vmul.f32 0.0078125, %v4151_v35 }
 0x947   :  { %v4153_v60 = vadd.f32 1e-05, %v4152_v61 }
 0x949   :  { %8826 = vrsqrt.f32 %v4153_v60 }
 0x956   :  { %v11117_v50 = vpop.eup %8826 }
 0x957   :  { %v4155_v59 = vmul.f32 %v11117_v50, %v4099_v44  ;;  %v4156_v47 = vmul.f32 %v11117_v50, %v4100_v63  ;;  %v4157_v62 = vmul.f32 %v11117_v50, %v4101_v46  ;;  %v4158_v19 = vmul.f32 %v11117_v50, %v4102_v1 }
 0x958   :  { %v4159_v16 = vmul.f32 %v11117_v50, %v4103_v3  ;;  %v4160_v44 = vmul.f32 %v11117_v50, %v4104_v52  ;;  %v4161_v63 = vmul.f32 %v11117_v50, %v4105_v42  ;;  %v4162_v24 = vmul.f32 %v11117_v50, %v11081_v15 }
 0x959   :  { %v4178_v23 = vmul.f32 %v11120_v11, %v4155_v59  ;;  %v4179_v12 = vmul.f32 %v11120_v11, %v4156_v47  ;;  %v4180_v0 = vmul.f32 %v11120_v11, %v4157_v62  ;;  %v4181_v28 = vmul.f32 %v11120_v11, %v4158_v19  ;;  %v4572_v62 = vld [vmem:[#allocation15 + $0x78] sm:$0xff]  ;;  %v4571_v19 = vld [vmem:[#allocation15 + $0x70] sm:$0xff] }
 0x95a   :  { %v4182_v3 = vmul.f32 %v11120_v11, %v4159_v16  ;;  %v4183_v22 = vmul.f32 %v11120_v11, %v4160_v44  ;;  %v4184_v13 = vmul.f32 %v11120_v11, %v4161_v63  ;;  %v4163_v48 = vmul.f32 %v11117_v50, %v11083_v18  ;;  %8267 = vmatprep.subr.mxu1 %v4572_v62  ;;  %v4569_v16 = vld [vmem:[#allocation15 + $0x60] sm:$0xff]  ;;  %v4563_v44 = vld [vmem:[#allocation15 + $0x30] sm:$0xff]  ;;  %v4562_v63 = vld [vmem:[#allocation15 + $0x28] sm:$0xff] }
 0x95b   :  { %v4201_v46 = vadd.f32 %v11126_v20, %v4178_v23  ;;  %v4202_v27 = vadd.f32 %v11126_v20, %v4179_v12  ;;  %v4203_v1 = vadd.f32 %v11126_v20, %v4180_v0  ;;  %v4204_v55 = vadd.f32 %v11126_v20, %v4181_v28  ;;  %8268 = vmatpush3.msra.mxu1 %v4572_v62  ;;  %v4568_v23 = vld [vmem:[#allocation15 + $0x58] sm:$0xff]  ;;  %v4566_v12 = vld [vmem:[#allocation15 + $0x48] sm:$0xff]  ;;  %v4565_v0 = vld [vmem:[#allocation15 + $0x40] sm:$0xff] }
 0x95c   :  { %v4205_v42 = vadd.f32 %v11126_v20, %v4182_v3  ;;  %v4206_v41 = vadd.f32 %v11126_v20, %v4183_v22  ;;  %v4185_v49 = vmul.f32 %v11120_v11, %v4162_v24  ;;  %v4164_v51 = vmul.f32 %v11117_v50, %v11085_v57  ;;  %8269 = vmatprep.subr.mxu1 %v4571_v19  ;;  %v4564_v28 = vld [vmem:[#allocation15 + $0x38] sm:$0xff]  ;;  %v4558_v3 = vld [vmem:[#allocation15 + $0x8] sm:$0xff] }
 0x95d   :  { %v4217_v36 = vmax.f32 %v4201_v46, 0.0  ;;  %v4218_v6 = vmax.f32 %v4202_v27, 0.0  ;;  %v4219_v52 = vmax.f32 %v4203_v1, 0.0  ;;  %v4220_v34 = vmax.f32 %v4204_v55, 0.0  ;;  %8270 = vmatpush3.msra.mxu1 %v4571_v19  ;;  %v4561_v46 = vld [vmem:[#allocation15 + $0x20] sm:$0xff]  ;;  %v4560_v27 = vld [vmem:[#allocation15 + $0x18] sm:$0xff] }
 0x95e   :  { %v4221_v15 = vmax.f32 %v4205_v42, 0.0  ;;  %v4207_v38 = vadd.f32 %v11126_v20, %v4184_v13  ;;  %v4186_v37 = vmul.f32 %v11120_v11, %v4163_v48  ;;  %v4165_v39 = vmul.f32 %v11117_v50, %v11089_v29  ;;  %v4559_v1 = vld [vmem:[#allocation15 + $0x10] sm:$0xff]  ;;  %v6770_v55 = vld [vmem:[%s11870_s9] ss:$0 sm:$0xff] }
 0x95f   :  { %8243 = vmatprep.mubr.f32.mxu0 %v4217_v36  ;;  %v4222_v18 = vmax.f32 %v4206_v41, 0.0  ;;  %v4208_v31 = vadd.f32 %v11126_v20, %v4185_v49  ;;  %v4187_v21 = vmul.f32 %v11120_v11, %v4164_v51  ;;  %v4166_v43 = vmul.f32 %v11117_v50, %v11093_v14 }
 0x960   :  { %8244 = vmatmul.mubr.f32.vlgmr.msra.gmra.mxu0 %v4218_v6  ;;  %v4223_v53 = vmax.f32 %v4207_v38, 0.0  ;;  %v4209_v57 = vadd.f32 %v11126_v20, %v4186_v37  ;;  %v4188_v45 = vmul.f32 %v11120_v11, %v4165_v39  ;;  %v4167_v56 = vmul.f32 %v11117_v50, %v11097_v33  ;;  %v4557_v6 = vld [vmem:[#allocation15] sm:$0xff] }
 0x961   :  { %8246 = vmatprep.mubr.f32.mxu0 %v4219_v52  ;;  %v4224_v29 = vmax.f32 %v4208_v31, 0.0  ;;  %v4210_v9 = vadd.f32 %v11126_v20, %v4187_v21  ;;  %v4189_v26 = vmul.f32 %v11120_v11, %v4166_v43  ;;  %v4168_v32 = vmul.f32 %v11117_v50, %v11101_v25 }
 0x962   :  { %v4169_v14 = vmul.f32 %v11117_v50, %v11105_v17  ;;  %v4225_v8 = vmax.f32 %v4209_v57, 0.0  ;;  %v4211_v5 = vadd.f32 %v11126_v20, %v4188_v45  ;;  %v4190_v30 = vmul.f32 %v11120_v11, %v4167_v56 }
 0x963   :  { %v4226_v33 = vmax.f32 %v4210_v9, 0.0  ;;  %v4212_v54 = vadd.f32 %v11126_v20, %v4189_v26  ;;  %v4191_v58 = vmul.f32 %v11120_v11, %v4168_v32  ;;  %v4170_v4 = vmul.f32 %v11117_v50, %v11109_v40 }
 0x964   :  { %8247 = vmatmul.mubr.f32.gmra.mxu0 %v4220_v34  ;;  %v4227_v10 = vmax.f32 %v4211_v5, 0.0  ;;  %v4213_v25 = vadd.f32 %v11126_v20, %v4190_v30  ;;  %v4192_v17 = vmul.f32 %v11120_v11, %v4169_v14 }
 0x965   :  { %8249 = vmatprep.mubr.f32.mxu0 %v4221_v15  ;;  %v4228_v7 = vmax.f32 %v4212_v54, 0.0  ;;  %v4214_v2 = vadd.f32 %v11126_v20, %v4191_v58  ;;  %v4193_v35 = vmul.f32 %v11120_v11, %v4170_v4  ;;  %v4570_v11 = vld [vmem:[#allocation15 + $0x68] sm:$0xff] }
 0x966   :  { %v4229_v61 = vmax.f32 %v4213_v25, 0.0  ;;  %v4215_v60 = vadd.f32 %v11126_v20, %v4192_v17  ;;  %8271 = vmatprep.subr.mxu1 %v4570_v11 }
 0x967   :  { %v4230_v59 = vmax.f32 %v4214_v2, 0.0  ;;  %v4216_v40 = vadd.f32 %v11126_v20, %v4193_v35  ;;  %8272 = vmatpush3.msra.mxu1 %v4570_v11  ;;  %v4567_v20 = vld [vmem:[#allocation15 + $0x50] sm:$0xff] }
 0x968   :  { %8250 = vmatmul.mubr.f32.gmra.mxu0 %v4222_v18  ;;  %v4231_v50 = vmax.f32 %v4215_v60, 0.0  ;;  %8273 = vmatprep.subr.mxu1 %v4569_v16 }
 0x969   :  { %8252 = vmatprep.mubr.f32.mxu0 %v4223_v53  ;;  %v4232_v47 = vmax.f32 %v4216_v40, 0.0  ;;  %8274 = vmatpush3.msra.mxu1 %v4569_v16 }
 0x96a   :  { %8275 = vmatprep.subr.mxu1 %v4568_v23 }
 0x96b   :  { %8276 = vmatpush3.msra.mxu1 %v4568_v23 }
 0x96c   :  { %8253 = vmatmul.mubr.f32.gmra.mxu0 %v4224_v29  ;;  %8277 = vmatprep.subr.mxu1 %v4567_v20 }
 0x96d   :  { %8255 = vmatprep.mubr.f32.mxu0 %v4225_v8  ;;  %8278 = vmatpush3.msra.mxu1 %v4567_v20 }
 0x96e   :  { %8279 = vmatprep.subr.mxu1 %v4566_v12 }
 0x96f   :  { %8280 = vmatpush3.msra.mxu1 %v4566_v12 }
 0x970   :  { %8256 = vmatmul.mubr.f32.gmra.mxu0 %v4226_v33  ;;  %8281 = vmatprep.subr.mxu1 %v4565_v0 }
 0x971   :  { %8258 = vmatprep.mubr.f32.mxu0 %v4227_v10  ;;  %8282 = vmatpush3.msra.mxu1 %v4565_v0 }
 0x972   :  { %8283 = vmatprep.subr.mxu1 %v4564_v28 }
 0x973   :  { %8284 = vmatpush3.msra.mxu1 %v4564_v28 }
 0x974   :  { %8259 = vmatmul.mubr.f32.gmra.mxu0 %v4228_v7  ;;  %8285 = vmatprep.subr.mxu1 %v4563_v44 }
 0x975   :  { %8261 = vmatprep.mubr.f32.mxu0 %v4229_v61  ;;  %8286 = vmatpush3.msra.mxu1 %v4563_v44 }
 0x976   :  { %8287 = vmatprep.subr.mxu1 %v4562_v63 }
 0x977   :  { %8288 = vmatpush3.msra.mxu1 %v4562_v63 }
 0x978   :  { %8262 = vmatmul.mubr.f32.gmra.mxu0 %v4230_v59  ;;  %8289 = vmatprep.subr.mxu1 %v4561_v46 }
 0x979   :  { %8264 = vmatprep.mubr.f32.mxu0 %v4231_v50  ;;  %8290 = vmatpush3.msra.mxu1 %v4561_v46 }
 0x97a   :  { %8291 = vmatprep.subr.mxu1 %v4560_v27 }
 0x97b   :  { %8292 = vmatpush3.msra.mxu1 %v4560_v27 }
 0x97c   :  { %8265 = vmatmul.mubr.f32.gmra.mxu0 %v4232_v47  ;;  %8293 = vmatprep.subr.mxu1 %v4559_v1 }
 0x97d   :  { %8294 = vmatpush3.msra.mxu1 %v4559_v1 }
 0x97e   :  { %8295 = vmatprep.subr.mxu1 %v4558_v3 }
 0x97f   :  { %8296 = vmatpush3.msra.mxu1 %v4558_v3 }
 0x980   :  { %8297 = vmatprep.subr.mxu1 %v4557_v6 }
 0x981   :  { %8298 = vmatpush3.msra.mxu1 %v4557_v6 }
 0xa20   :  { %v8245_v36 = vpop.f32.mrf.mxu0 }
 0xa21   :  { %v4328_v42 = vadd.f32 %v8245_v36, %v6770_v55 }
 0xa22   :  { %v4322_v22 = vpop.f32.mrf.mxu0 }
 0xa23   :  { %v4323_v24 = vadd.f32 %v6770_v55, %v4322_v22 }
 0xa24   :  { %v8248_v52 = vpop.f32.mrf.mxu0 }
 0xa25   :  { %v4401_v48 = vadd.f32 %v4328_v42, %v4323_v24  ;;  %v4338_v49 = vadd.f32 %v8248_v52, %v6770_v55 }
 0xa26   :  { %v4332_v13 = vpop.f32.mrf.mxu0 }
 0xa27   :  { %v4333_v34 = vadd.f32 %v6770_v55, %v4332_v13 }
 0xa28   :  { %v8251_v41 = vpop.f32.mrf.mxu0 }
 0xa29   :  { %v4402_v51 = vadd.f32 %v4401_v48, %v4333_v34  ;;  %v4348_v18 = vadd.f32 %v8251_v41, %v6770_v55 }
 0xa2a   :  { %v4342_v15 = vpop.f32.mrf.mxu0 }
 0xa2b   :  { %v4343_v38 = vadd.f32 %v6770_v55, %v4342_v15  ;;  %v4403_v37 = vadd.f32 %v4402_v51, %v4338_v49 }
 0xa2c   :  { %v8254_v39 = vpop.f32.mrf.mxu0 }
 0xa2d   :  { %v4404_v31 = vadd.f32 %v4403_v37, %v4343_v38  ;;  %v4358_v45 = vadd.f32 %v8254_v39, %v6770_v55 }
 0xa2e   :  { %v4352_v21 = vpop.f32.mrf.mxu0 }
 0xa2f   :  { %v4353_v43 = vadd.f32 %v6770_v55, %v4352_v21  ;;  %v4405_v53 = vadd.f32 %v4404_v31, %v4348_v18 }
 0xa30   :  { %v8257_v57 = vpop.f32.mrf.mxu0 }
 0xa31   :  { %v4406_v56 = vadd.f32 %v4405_v53, %v4353_v43  ;;  %v4368_v14 = vadd.f32 %v8257_v57, %v6770_v55 }
 0xa32   :  { %v4362_v29 = vpop.f32.mrf.mxu0 }
 0xa33   :  { %v4363_v9 = vadd.f32 %v6770_v55, %v4362_v29  ;;  %v4407_v26 = vadd.f32 %v4406_v56, %v4358_v45 }
 0xa34   :  { %v8260_v32 = vpop.f32.mrf.mxu0 }
 0xa35   :  { %v4408_v8 = vadd.f32 %v4407_v26, %v4363_v9  ;;  %v4378_v58 = vadd.f32 %v8260_v32, %v6770_v55 }
 0xa36   :  { %v4372_v5 = vpop.f32.mrf.mxu0 }
 0xa37   :  { %v4373_v30 = vadd.f32 %v6770_v55, %v4372_v5  ;;  %v4409_v33 = vadd.f32 %v4408_v8, %v4368_v14 }
 0xa38   :  { %v8263_v54 = vpop.f32.mrf.mxu0 }
 0xa39   :  { %v4410_v4 = vadd.f32 %v4409_v33, %v4373_v30  ;;  %v4388_v2 = vadd.f32 %v8263_v54, %v6770_v55 }
 0xa3a   :  { %v4382_v10 = vpop.f32.mrf.mxu0 }
 0xa3b   :  { %v4383_v25 = vadd.f32 %v6770_v55, %v4382_v10  ;;  %v4411_v17 = vadd.f32 %v4410_v4, %v4378_v58 }
 0xa3c   :  { %v8266_v7 = vpop.f32.mrf.mxu0 }
 0xa3d   :  { %v4412_v35 = vadd.f32 %v4411_v17, %v4383_v25  ;;  %v4398_v40 = vadd.f32 %v8266_v7, %v6770_v55 }
 0xa3e   :  { %v4392_v61 = vpop.f32.mrf.mxu0 }
 0xa3f   :  { %v4393_v60 = vadd.f32 %v6770_v55, %v4392_v61  ;;  %v4413_v59 = vadd.f32 %v4412_v35, %v4388_v2 }
 0xa41   :  { %v4414_v50 = vadd.f32 %v4413_v59, %v4393_v60 }
 0xa43   :  { %v4415_v47 = vadd.f32 %v4414_v50, %v4398_v40 }
 0xa45   :  { %v4416_v62 = vrot.slane %v4415_v47, 4 }
 0xa47   :  { %v4417_v19 = vadd.f32 %v4416_v62, %v4415_v47  ;;  %v11222_v47 = vld [vmem:[%s11871_s14] ss:$0 sm:$0xff] }
 0xa49   :  { %v4418_v11 = vrot.slane %v4417_v19, 2 }
 0xa4b   :  { %v4419_v16 = vadd.f32 %v4418_v11, %v4417_v19 }
 0xa4d   :  { %v4420_v23 = vrot.slane %v4419_v16, 1 }
 0xa4f   :  { %v4421_v20 = vadd.f32 %v4420_v23, %v4419_v16  ;;  %v11228_v16 = vld [vmem:[%s11872_s6] ss:$0 sm:$0xff] }
 0xa51   :  { %v4422_v12 = vmul.f32 0.0078125, %v4421_v20 }
 0xa53   :  { %v4423_v0 = vsub.f32 %v4323_v24, %v4422_v12  ;;  %v4424_v28 = vsub.f32 %v4328_v42, %v4422_v12  ;;  %v4425_v44 = vsub.f32 %v4333_v34, %v4422_v12  ;;  %v4426_v27 = vsub.f32 %v4338_v49, %v4422_v12 }
 0xa54   :  { %v4427_v1 = vsub.f32 %v4343_v38, %v4422_v12  ;;  %v4428_v6 = vsub.f32 %v4348_v18, %v4422_v12  ;;  %v4429_v52 = vsub.f32 %v4353_v43, %v4422_v12  ;;  %v11183_v41 = vsub.f32 %v4358_v45, %v4422_v12 }
 0xa55   :  { %v4439_v63 = vmul.f32 %v4423_v0, %v4423_v0  ;;  %v4440_v46 = vmul.f32 %v4424_v28, %v4424_v28  ;;  %v4441_v3 = vmul.f32 %v4425_v44, %v4425_v44  ;;  %v4442_v55 = vmul.f32 %v4426_v27, %v4426_v27 }
 0xa56   :  { %v4443_v13 = vmul.f32 %v4427_v1, %v4427_v1  ;;  %v4444_v51 = vmul.f32 %v4428_v6, %v4428_v6  ;;  %v11185_v37 = vsub.f32 %v4363_v9, %v4422_v12  ;;  %v4445_v24 = vmul.f32 %v4429_v52, %v4429_v52 }
 0xa57   :  { %v4455_v36 = vadd.f32 %v4440_v46, %v4439_v63  ;;  %v11187_v34 = vsub.f32 %v4368_v14, %v4422_v12  ;;  %v4446_v49 = vmul.f32 %v11183_v41, %v11183_v41  ;;  %v11191_v39 = vsub.f32 %v4373_v30, %v4422_v12 }
 0xa58   :  { %v4447_v18 = vmul.f32 %v11185_v37, %v11185_v37  ;;  %v11195_v21 = vsub.f32 %v4378_v58, %v4422_v12  ;;  %v11199_v57 = vsub.f32 %v4383_v25, %v4422_v12  ;;  %v11203_v29 = vsub.f32 %v4388_v2, %v4422_v12 }
 0xa59   :  { %v4456_v22 = vadd.f32 %v4455_v36, %v4441_v3  ;;  %v4448_v43 = vmul.f32 %v11187_v34, %v11187_v34  ;;  %v4449_v45 = vmul.f32 %v11191_v39, %v11191_v39  ;;  %v11207_v32 = vsub.f32 %v4393_v60, %v4422_v12 }
 0xa5a   :  { %v4450_v9 = vmul.f32 %v11195_v21, %v11195_v21  ;;  %v4451_v14 = vmul.f32 %v11199_v57, %v11199_v57  ;;  %v11211_v5 = vsub.f32 %v4398_v40, %v4422_v12  ;;  %v4452_v30 = vmul.f32 %v11203_v29, %v11203_v29 }
 0xa5b   :  { %v4457_v48 = vadd.f32 %v4456_v22, %v4442_v55  ;;  %v4453_v54 = vmul.f32 %v11207_v32, %v11207_v32 }
 0xa5c   :  { %v4454_v4 = vmul.f32 %v11211_v5, %v11211_v5 }
 0xa5d   :  { %v4458_v15 = vadd.f32 %v4457_v48, %v4443_v13 }
 0xa5f   :  { %v4459_v42 = vadd.f32 %v4458_v15, %v4444_v51 }
 0xa61   :  { %v4460_v38 = vadd.f32 %v4459_v42, %v4445_v24 }
 0xa63   :  { %v4461_v31 = vadd.f32 %v4460_v38, %v4446_v49 }
 0xa65   :  { %v4462_v53 = vadd.f32 %v4461_v31, %v4447_v18 }
 0xa67   :  { %v4463_v56 = vadd.f32 %v4462_v53, %v4448_v43 }
 0xa69   :  { %v4464_v26 = vadd.f32 %v4463_v56, %v4449_v45 }
 0xa6b   :  { %v4465_v8 = vadd.f32 %v4464_v26, %v4450_v9 }
 0xa6d   :  { %v4466_v33 = vadd.f32 %v4465_v8, %v4451_v14 }
 0xa6f   :  { %v4467_v58 = vadd.f32 %v4466_v33, %v4452_v30 }
 0xa71   :  { %v4468_v10 = vadd.f32 %v4467_v58, %v4453_v54 }
 0xa73   :  { %v4469_v25 = vadd.f32 %v4468_v10, %v4454_v4 }
 0xa75   :  { %v4470_v17 = vrot.slane %v4469_v25, 4 }
 0xa77   :  { %v4471_v7 = vadd.f32 %v4470_v17, %v4469_v25 }
 0xa79   :  { %v4472_v2 = vrot.slane %v4471_v7, 2 }
 0xa7b   :  { %v4473_v35 = vadd.f32 %v4472_v2, %v4471_v7 }
 0xa7d   :  { %v4474_v61 = vrot.slane %v4473_v35, 1 }
 0xa7f   :  { %v4475_v60 = vadd.f32 %v4474_v61, %v4473_v35 }
 0xa81   :  { %v4476_v59 = vmul.f32 0.0078125, %v4475_v60 }
 0xa83   :  { %v4477_v40 = vadd.f32 1e-05, %v4476_v59 }
 0xa85   :  { %8828 = vrsqrt.f32 %v4477_v40 }
 0xa92   :  { %v11219_v50 = vpop.eup %8828 }
 0xa93   :  { %v4479_v62 = vmul.f32 %v11219_v50, %v4423_v0  ;;  %v4480_v19 = vmul.f32 %v11219_v50, %v4424_v28  ;;  %v4481_v11 = vmul.f32 %v11219_v50, %v4425_v44  ;;  %v4482_v23 = vmul.f32 %v11219_v50, %v4426_v27 }
 0xa94   :  { %v4483_v20 = vmul.f32 %v11219_v50, %v4427_v1  ;;  %v4484_v0 = vmul.f32 %v11219_v50, %v4428_v6  ;;  %v4485_v28 = vmul.f32 %v11219_v50, %v4429_v52  ;;  %v4486_v51 = vmul.f32 %v11219_v50, %v11183_v41 }
 0xa95   :  { %v4502_v12 = vmul.f32 %v11222_v47, %v4479_v62  ;;  %v4503_v63 = vmul.f32 %v11222_v47, %v4480_v19  ;;  %v4504_v46 = vmul.f32 %v11222_v47, %v4481_v11  ;;  %v4505_v3 = vmul.f32 %v11222_v47, %v4482_v23  ;;  %v4912_v11 = vld [vmem:[#allocation16 + $0x78] sm:$0xff]  ;;  %v4911_v23 = vld [vmem:[#allocation16 + $0x70] sm:$0xff] }
 0xa96   :  { %v4506_v1 = vmul.f32 %v11222_v47, %v4483_v20  ;;  %v4507_v48 = vmul.f32 %v11222_v47, %v4484_v0  ;;  %v4508_v15 = vmul.f32 %v11222_v47, %v4485_v28  ;;  %v4487_v24 = vmul.f32 %v11219_v50, %v11185_v37  ;;  %8323 = vmatprep.subr.mxu0 %v4912_v11  ;;  %v4909_v20 = vld [vmem:[#allocation16 + $0x60] sm:$0xff]  ;;  %v4903_v0 = vld [vmem:[#allocation16 + $0x30] sm:$0xff]  ;;  %v4902_v28 = vld [vmem:[#allocation16 + $0x28] sm:$0xff] }
 0xa97   :  { %v4525_v44 = vadd.f32 %v11228_v16, %v4502_v12  ;;  %v4526_v36 = vadd.f32 %v11228_v16, %v4503_v63  ;;  %v4527_v27 = vadd.f32 %v11228_v16, %v4504_v46  ;;  %v4528_v13 = vadd.f32 %v11228_v16, %v4505_v3  ;;  %8324 = vmatpush3.msra.mxu0 %v4912_v11  ;;  %v4908_v12 = vld [vmem:[#allocation16 + $0x58] sm:$0xff]  ;;  %v4906_v63 = vld [vmem:[#allocation16 + $0x48] sm:$0xff]  ;;  %v4905_v46 = vld [vmem:[#allocation16 + $0x40] sm:$0xff] }
 0xa98   :  { %v4529_v52 = vadd.f32 %v11228_v16, %v4506_v1  ;;  %v4530_v49 = vadd.f32 %v11228_v16, %v4507_v48  ;;  %v4509_v38 = vmul.f32 %v11222_v47, %v4486_v51  ;;  %v4488_v18 = vmul.f32 %v11219_v50, %v11187_v34  ;;  %8325 = vmatprep.subr.mxu0 %v4911_v23  ;;  %v4904_v3 = vld [vmem:[#allocation16 + $0x38] sm:$0xff]  ;;  %v4898_v1 = vld [vmem:[#allocation16 + $0x8] sm:$0xff] }
 0xa99   :  { %v4541_v55 = vmax.f32 %v4525_v44, 0.0  ;;  %v4542_v22 = vmax.f32 %v4526_v36, 0.0  ;;  %v4543_v6 = vmax.f32 %v4527_v27, 0.0  ;;  %v4544_v42 = vmax.f32 %v4528_v13, 0.0  ;;  %8326 = vmatpush3.msra.mxu0 %v4911_v23  ;;  %v4901_v44 = vld [vmem:[#allocation16 + $0x20] sm:$0xff]  ;;  %v4900_v36 = vld [vmem:[#allocation16 + $0x18] sm:$0xff] }
 0xa9a   :  { %v4545_v41 = vmax.f32 %v4529_v52, 0.0  ;;  %v4531_v31 = vadd.f32 %v11228_v16, %v4508_v15  ;;  %v4510_v43 = vmul.f32 %v11222_v47, %v4487_v24  ;;  %v4489_v53 = vmul.f32 %v11219_v50, %v11191_v39  ;;  %v4899_v27 = vld [vmem:[#allocation16 + $0x10] sm:$0xff]  ;;  %v6773_v13 = vld [vmem:[%s11873_s4] ss:$0 sm:$0xff] }
 0xa9b   :  { %8299 = vmatprep.mubr.f32.mxu1 %v4541_v55  ;;  %v4546_v37 = vmax.f32 %v4530_v49, 0.0  ;;  %v4532_v45 = vadd.f32 %v11228_v16, %v4509_v38  ;;  %v4511_v56 = vmul.f32 %v11222_v47, %v4488_v18  ;;  %v4490_v9 = vmul.f32 %v11219_v50, %v11195_v21 }
 0xa9c   :  { %8300 = vmatmul.mubr.f32.vlgmr.msra.gmra.mxu1 %v4542_v22  ;;  %v4547_v26 = vmax.f32 %v4531_v31, 0.0  ;;  %v4533_v34 = vadd.f32 %v11228_v16, %v4510_v43  ;;  %v4512_v14 = vmul.f32 %v11222_v47, %v4489_v53  ;;  %v4491_v8 = vmul.f32 %v11219_v50, %v11199_v57  ;;  %v4897_v22 = vld [vmem:[#allocation16] sm:$0xff] }
 0xa9d   :  { %8302 = vmatprep.mubr.f32.mxu1 %v4543_v6  ;;  %v4548_v39 = vmax.f32 %v4532_v45, 0.0  ;;  %v4534_v30 = vadd.f32 %v11228_v16, %v4511_v56  ;;  %v4513_v33 = vmul.f32 %v11222_v47, %v4490_v9  ;;  %v4492_v54 = vmul.f32 %v11219_v50, %v11203_v29 }
 0xa9e   :  { %v4493_v21 = vmul.f32 %v11219_v50, %v11207_v32  ;;  %v4549_v58 = vmax.f32 %v4533_v34, 0.0  ;;  %v4535_v4 = vadd.f32 %v11228_v16, %v4512_v14  ;;  %v4514_v10 = vmul.f32 %v11222_v47, %v4491_v8 }
 0xa9f   :  { %v4550_v57 = vmax.f32 %v4534_v30, 0.0  ;;  %v4536_v25 = vadd.f32 %v11228_v16, %v4513_v33  ;;  %v4515_v17 = vmul.f32 %v11222_v47, %v4492_v54  ;;  %v4494_v7 = vmul.f32 %v11219_v50, %v11211_v5 }
 0xaa0   :  { %8303 = vmatmul.mubr.f32.gmra.mxu1 %v4544_v42  ;;  %v4551_v2 = vmax.f32 %v4535_v4, 0.0  ;;  %v4537_v29 = vadd.f32 %v11228_v16, %v4514_v10  ;;  %v4516_v32 = vmul.f32 %v11222_v47, %v4493_v21 }
 0xaa1   :  { %8305 = vmatprep.mubr.f32.mxu1 %v4545_v41  ;;  %v4552_v35 = vmax.f32 %v4536_v25, 0.0  ;;  %v4538_v61 = vadd.f32 %v11228_v16, %v4515_v17  ;;  %v4517_v60 = vmul.f32 %v11222_v47, %v4494_v7  ;;  %v4910_v47 = vld [vmem:[#allocation16 + $0x68] sm:$0xff] }
 0xaa2   :  { %v4553_v59 = vmax.f32 %v4537_v29, 0.0  ;;  %v4539_v40 = vadd.f32 %v11228_v16, %v4516_v32  ;;  %8327 = vmatprep.subr.mxu0 %v4910_v47 }
 0xaa3   :  { %v4554_v62 = vmax.f32 %v4538_v61, 0.0  ;;  %v4540_v5 = vadd.f32 %v11228_v16, %v4517_v60  ;;  %8328 = vmatpush3.msra.mxu0 %v4910_v47  ;;  %v4907_v16 = vld [vmem:[#allocation16 + $0x50] sm:$0xff] }
 0xaa4   :  { %8306 = vmatmul.mubr.f32.gmra.mxu1 %v4546_v37  ;;  %v4555_v50 = vmax.f32 %v4539_v40, 0.0  ;;  %8329 = vmatprep.subr.mxu0 %v4909_v20 }
 0xaa5   :  { %8308 = vmatprep.mubr.f32.mxu1 %v4547_v26  ;;  %v4556_v19 = vmax.f32 %v4540_v5, 0.0  ;;  %8330 = vmatpush3.msra.mxu0 %v4909_v20 }
 0xaa6   :  { %8331 = vmatprep.subr.mxu0 %v4908_v12 }
 0xaa7   :  { %8332 = vmatpush3.msra.mxu0 %v4908_v12 }
 0xaa8   :  { %8309 = vmatmul.mubr.f32.gmra.mxu1 %v4548_v39  ;;  %8333 = vmatprep.subr.mxu0 %v4907_v16 }
 0xaa9   :  { %8311 = vmatprep.mubr.f32.mxu1 %v4549_v58  ;;  %8334 = vmatpush3.msra.mxu0 %v4907_v16 }
 0xaaa   :  { %8335 = vmatprep.subr.mxu0 %v4906_v63 }
 0xaab   :  { %8336 = vmatpush3.msra.mxu0 %v4906_v63 }
 0xaac   :  { %8312 = vmatmul.mubr.f32.gmra.mxu1 %v4550_v57  ;;  %8337 = vmatprep.subr.mxu0 %v4905_v46 }
 0xaad   :  { %8314 = vmatprep.mubr.f32.mxu1 %v4551_v2  ;;  %8338 = vmatpush3.msra.mxu0 %v4905_v46 }
 0xaae   :  { %8339 = vmatprep.subr.mxu0 %v4904_v3 }
 0xaaf   :  { %8340 = vmatpush3.msra.mxu0 %v4904_v3 }
 0xab0   :  { %8315 = vmatmul.mubr.f32.gmra.mxu1 %v4552_v35  ;;  %8341 = vmatprep.subr.mxu0 %v4903_v0 }
 0xab1   :  { %8317 = vmatprep.mubr.f32.mxu1 %v4553_v59  ;;  %8342 = vmatpush3.msra.mxu0 %v4903_v0 }
 0xab2   :  { %8343 = vmatprep.subr.mxu0 %v4902_v28 }
 0xab3   :  { %8344 = vmatpush3.msra.mxu0 %v4902_v28 }
 0xab4   :  { %8318 = vmatmul.mubr.f32.gmra.mxu1 %v4554_v62  ;;  %8345 = vmatprep.subr.mxu0 %v4901_v44 }
 0xab5   :  { %8320 = vmatprep.mubr.f32.mxu1 %v4555_v50  ;;  %8346 = vmatpush3.msra.mxu0 %v4901_v44 }
 0xab6   :  { %8347 = vmatprep.subr.mxu0 %v4900_v36 }
 0xab7   :  { %8348 = vmatpush3.msra.mxu0 %v4900_v36 }
 0xab8   :  { %8321 = vmatmul.mubr.f32.gmra.mxu1 %v4556_v19  ;;  %8349 = vmatprep.subr.mxu0 %v4899_v27 }
 0xab9   :  { %8350 = vmatpush3.msra.mxu0 %v4899_v27 }
 0xaba   :  { %8351 = vmatprep.subr.mxu0 %v4898_v1 }
 0xabb   :  { %8352 = vmatpush3.msra.mxu0 %v4898_v1 }
 0xabc   :  { %8353 = vmatprep.subr.mxu0 %v4897_v22 }
 0xabd   :  { %8354 = vmatpush3.msra.mxu0 %v4897_v22 }
 0xb5c   :  { %v8301_v55 = vpop.f32.mrf.mxu1 }
 0xb5d   :  { %v4652_v52 = vadd.f32 %v8301_v55, %v6773_v13 }
 0xb5e   :  { %v4646_v48 = vpop.f32.mrf.mxu1 }
 0xb5f   :  { %v4647_v51 = vadd.f32 %v6773_v13, %v4646_v48 }
 0xb60   :  { %v8304_v6 = vpop.f32.mrf.mxu1 }
 0xb61   :  { %v4725_v24 = vadd.f32 %v4652_v52, %v4647_v51  ;;  %v4662_v38 = vadd.f32 %v8304_v6, %v6773_v13 }
 0xb62   :  { %v4656_v15 = vpop.f32.mrf.mxu1 }
 0xb63   :  { %v4657_v42 = vadd.f32 %v6773_v13, %v4656_v15 }
 0xb64   :  { %v8307_v49 = vpop.f32.mrf.mxu1 }
 0xb65   :  { %v4726_v18 = vadd.f32 %v4725_v24, %v4657_v42  ;;  %v4672_v37 = vadd.f32 %v8307_v49, %v6773_v13 }
 0xb66   :  { %v4666_v41 = vpop.f32.mrf.mxu1 }
 0xb67   :  { %v4667_v31 = vadd.f32 %v6773_v13, %v4666_v41  ;;  %v4727_v43 = vadd.f32 %v4726_v18, %v4662_v38 }
 0xb68   :  { %v8310_v53 = vpop.f32.mrf.mxu1 }
 0xb69   :  { %v4728_v45 = vadd.f32 %v4727_v43, %v4667_v31  ;;  %v4682_v14 = vadd.f32 %v8310_v53, %v6773_v13 }
 0xb6a   :  { %v4676_v56 = vpop.f32.mrf.mxu1 }
 0xb6b   :  { %v4677_v9 = vadd.f32 %v6773_v13, %v4676_v56  ;;  %v4729_v26 = vadd.f32 %v4728_v45, %v4672_v37 }
 0xb6c   :  { %v8313_v34 = vpop.f32.mrf.mxu1 }
 0xb6d   :  { %v4730_v8 = vadd.f32 %v4729_v26, %v4677_v9  ;;  %v4692_v21 = vadd.f32 %v8313_v34, %v6773_v13 }
 0xb6e   :  { %v4686_v39 = vpop.f32.mrf.mxu1 }
 0xb6f   :  { %v4687_v30 = vadd.f32 %v6773_v13, %v4686_v39  ;;  %v4731_v33 = vadd.f32 %v4730_v8, %v4682_v14 }
 0xb70   :  { %v8316_v54 = vpop.f32.mrf.mxu1 }
 0xb71   :  { %v4732_v58 = vadd.f32 %v4731_v33, %v4687_v30  ;;  %v4702_v17 = vadd.f32 %v8316_v54, %v6773_v13 }
 0xb72   :  { %v4696_v4 = vpop.f32.mrf.mxu1 }
 0xb73   :  { %v4697_v10 = vadd.f32 %v6773_v13, %v4696_v4  ;;  %v4733_v57 = vadd.f32 %v4732_v58, %v4692_v21 }
 0xb74   :  { %v8319_v25 = vpop.f32.mrf.mxu1 }
 0xb75   :  { %v4734_v7 = vadd.f32 %v4733_v57, %v4697_v10  ;;  %v4712_v61 = vadd.f32 %v8319_v25, %v6773_v13 }
 0xb76   :  { %v4706_v2 = vpop.f32.mrf.mxu1 }
 0xb77   :  { %v4707_v29 = vadd.f32 %v6773_v13, %v4706_v2  ;;  %v4735_v32 = vadd.f32 %v4734_v7, %v4702_v17 }
 0xb78   :  { %v8322_v35 = vpop.f32.mrf.mxu1 }
 0xb79   :  { %v4736_v60 = vadd.f32 %v4735_v32, %v4707_v29  ;;  %v4722_v5 = vadd.f32 %v8322_v35, %v6773_v13 }
 0xb7a   :  { %v4716_v59 = vpop.f32.mrf.mxu1 }
 0xb7b   :  { %v4717_v40 = vadd.f32 %v6773_v13, %v4716_v59  ;;  %v4737_v62 = vadd.f32 %v4736_v60, %v4712_v61 }
 0xb7d   :  { %v4738_v50 = vadd.f32 %v4737_v62, %v4717_v40 }
 0xb7f   :  { %v4739_v19 = vadd.f32 %v4738_v50, %v4722_v5 }
 0xb81   :  { %v4740_v11 = vrot.slane %v4739_v19, 4 }
 0xb83   :  { %v4741_v23 = vadd.f32 %v4740_v11, %v4739_v19  ;;  %v11318_v19 = vld [vmem:[%s11874_s15] ss:$0 sm:$0xff] }
 0xb85   :  { %v4742_v47 = vrot.slane %v4741_v23, 2 }
 0xb87   :  { %v4743_v20 = vadd.f32 %v4742_v47, %v4741_v23 }
 0xb89   :  { %v4744_v12 = vrot.slane %v4743_v20, 1 }
 0xb8b   :  { %v4745_v16 = vadd.f32 %v4744_v12, %v4743_v20  ;;  %v11321_v12 = vld [vmem:[%s11875_s16] ss:$0 sm:$0xff] }
 0xb8d   :  { %v4746_v63 = vmul.f32 0.0078125, %v4745_v16 }
 0xb8f   :  { %v4747_v46 = vsub.f32 %v4647_v51, %v4746_v63  ;;  %v4748_v3 = vsub.f32 %v4652_v52, %v4746_v63  ;;  %v4749_v0 = vsub.f32 %v4657_v42, %v4746_v63  ;;  %v4750_v36 = vsub.f32 %v4662_v38, %v4746_v63 }
 0xb90   :  { %v4751_v27 = vsub.f32 %v4667_v31, %v4746_v63  ;;  %v4752_v22 = vsub.f32 %v4672_v37, %v4746_v63  ;;  %v4753_v6 = vsub.f32 %v4677_v9, %v4746_v63  ;;  %v11285_v49 = vsub.f32 %v4682_v14, %v4746_v63 }
 0xb91   :  { %v4763_v28 = vmul.f32 %v4747_v46, %v4747_v46  ;;  %v4764_v44 = vmul.f32 %v4748_v3, %v4748_v3  ;;  %v4765_v1 = vmul.f32 %v4749_v0, %v4749_v0  ;;  %v4766_v13 = vmul.f32 %v4750_v36, %v4750_v36 }
 0xb92   :  { %v4767_v15 = vmul.f32 %v4751_v27, %v4751_v27  ;;  %v4768_v18 = vmul.f32 %v4752_v22, %v4752_v22  ;;  %v11287_v43 = vsub.f32 %v4687_v30, %v4746_v63  ;;  %v4769_v51 = vmul.f32 %v4753_v6, %v4753_v6 }
 0xb93   :  { %v4779_v55 = vadd.f32 %v4764_v44, %v4763_v28  ;;  %v11289_v42 = vsub.f32 %v4692_v21, %v4746_v63  ;;  %v4770_v38 = vmul.f32 %v11285_v49, %v11285_v49  ;;  %v11293_v53 = vsub.f32 %v4697_v10, %v4746_v63 }
 0xb94   :  { %v4771_v37 = vmul.f32 %v11287_v43, %v11287_v43  ;;  %v11297_v56 = vsub.f32 %v4702_v17, %v4746_v63  ;;  %v11301_v34 = vsub.f32 %v4707_v29, %v4746_v63  ;;  %v11305_v39 = vsub.f32 %v4712_v61, %v4746_v63 }
 0xb95   :  { %v4780_v48 = vadd.f32 %v4779_v55, %v4765_v1  ;;  %v4772_v9 = vmul.f32 %v11289_v42, %v11289_v42  ;;  %v4773_v14 = vmul.f32 %v11293_v53, %v11293_v53  ;;  %v4761_v54 = vsub.f32 %v4717_v40, %v4746_v63 }
 0xb96   :  { %v4774_v30 = vmul.f32 %v11297_v56, %v11297_v56  ;;  %v4775_v21 = vmul.f32 %v11301_v34, %v11301_v34  ;;  %v11311_v4 = vsub.f32 %v4722_v5, %v4746_v63  ;;  %v4776_v10 = vmul.f32 %v11305_v39, %v11305_v39 }
 0xb97   :  { %v4781_v24 = vadd.f32 %v4780_v48, %v4766_v13  ;;  %v4777_v25 = vmul.f32 %v4761_v54, %v4761_v54 }
 0xb98   :  { %v4778_v7 = vmul.f32 %v11311_v4, %v11311_v4 }
 0xb99   :  { %v4782_v41 = vadd.f32 %v4781_v24, %v4767_v15 }
 0xb9b   :  { %v4783_v52 = vadd.f32 %v4782_v41, %v4768_v18 }
 0xb9d   :  { %v4784_v31 = vadd.f32 %v4783_v52, %v4769_v51 }
 0xb9f   :  { %v4785_v45 = vadd.f32 %v4784_v31, %v4770_v38 }
 0xba1   :  { %v4786_v26 = vadd.f32 %v4785_v45, %v4771_v37 }
 0xba3   :  { %v4787_v8 = vadd.f32 %v4786_v26, %v4772_v9 }
 0xba5   :  { %v4788_v33 = vadd.f32 %v4787_v8, %v4773_v14 }
 0xba7   :  { %v4789_v58 = vadd.f32 %v4788_v33, %v4774_v30 }
 0xba9   :  { %v4790_v57 = vadd.f32 %v4789_v58, %v4775_v21 }
 0xbab   :  { %v4791_v17 = vadd.f32 %v4790_v57, %v4776_v10 }
 0xbad   :  { %v4792_v2 = vadd.f32 %v4791_v17, %v4777_v25 }
 0xbaf   :  { %v4793_v29 = vadd.f32 %v4792_v2, %v4778_v7 }
 0xbb1   :  { %v4794_v32 = vrot.slane %v4793_v29, 4 }
 0xbb3   :  { %v4795_v35 = vadd.f32 %v4794_v32, %v4793_v29 }
 0xbb5   :  { %v4796_v61 = vrot.slane %v4795_v35, 2 }
 0xbb7   :  { %v4797_v60 = vadd.f32 %v4796_v61, %v4795_v35 }
 0xbb9   :  { %v4798_v59 = vrot.slane %v4797_v60, 1 }
 0xbbb   :  { %v4799_v40 = vadd.f32 %v4798_v59, %v4797_v60 }
 0xbbd   :  { %v4800_v62 = vmul.f32 0.0078125, %v4799_v40 }
 0xbbf   :  { %v4801_v5 = vadd.f32 1e-05, %v4800_v62 }
 0xbc1   :  { %8830 = vrsqrt.f32 %v4801_v5 }
 0xbce   :  { %v8831_v50 = vpop.eup %8830 }
 0xbcf   :  { %v4817_v11 = vmul.f32 %v8831_v50, %v4761_v54  ;;  %v4803_v23 = vmul.f32 %v8831_v50, %v4747_v46  ;;  %v4804_v47 = vmul.f32 %v8831_v50, %v4748_v3  ;;  %v4805_v20 = vmul.f32 %v8831_v50, %v4749_v0 }
 0xbd0   :  { %v4806_v16 = vmul.f32 %v8831_v50, %v4750_v36  ;;  %v4807_v63 = vmul.f32 %v8831_v50, %v4751_v27  ;;  %v4808_v28 = vmul.f32 %v8831_v50, %v4752_v22  ;;  %v4809_v44 = vmul.f32 %v8831_v50, %v4753_v6 }
 0xbd1   :  { %v4840_v1 = vmul.f32 %v11318_v19, %v4817_v11  ;;  %v4826_v55 = vmul.f32 %v11318_v19, %v4803_v23  ;;  %v4827_v13 = vmul.f32 %v11318_v19, %v4804_v47  ;;  %v4828_v48 = vmul.f32 %v11318_v19, %v4805_v20  ;;  %v5236_v23 = vld [vmem:[#allocation18 + $0x78] sm:$0xff]  ;;  %v5235_v47 = vld [vmem:[#allocation18 + $0x70] sm:$0xff]  ;;  %v5234_v20 = vld [vmem:[#allocation18 + $0x68] sm:$0xff] }
 0xbd2   :  { %v4829_v46 = vmul.f32 %v11318_v19, %v4806_v16  ;;  %v4830_v3 = vmul.f32 %v11318_v19, %v4807_v63  ;;  %v4831_v0 = vmul.f32 %v11318_v19, %v4808_v28  ;;  %v4832_v36 = vmul.f32 %v11318_v19, %v4809_v44  ;;  %8379 = vmatprep.subr.mxu1 %v5236_v23  ;;  %v5232_v16 = vld [vmem:[#allocation18 + $0x58] sm:$0xff]  ;;  %v5231_v63 = vld [vmem:[#allocation18 + $0x50] sm:$0xff]  ;;  %v5230_v28 = vld [vmem:[#allocation18 + $0x48] sm:$0xff] }
 0xbd3   :  { %v4849_v27 = vadd.f32 %v11321_v12, %v4826_v55  ;;  %v4850_v22 = vadd.f32 %v11321_v12, %v4827_v13  ;;  %v4851_v6 = vadd.f32 %v11321_v12, %v4828_v48  ;;  %v4810_v15 = vmul.f32 %v8831_v50, %v11285_v49  ;;  %8380 = vmatpush3.msra.mxu1 %v5236_v23  ;;  %v5229_v44 = vld [vmem:[#allocation18 + $0x40] sm:$0xff]  ;;  %v5227_v55 = vld [vmem:[#allocation18 + $0x30] sm:$0xff]  ;;  %v5226_v13 = vld [vmem:[#allocation18 + $0x28] sm:$0xff] }
 0xbd4   :  { %v4852_v24 = vadd.f32 %v11321_v12, %v4829_v46  ;;  %v4853_v18 = vadd.f32 %v11321_v12, %v4830_v3  ;;  %v4854_v41 = vadd.f32 %v11321_v12, %v4831_v0  ;;  %v4855_v51 = vadd.f32 %v11321_v12, %v4832_v36  ;;  %8381 = vmatprep.subr.mxu1 %v5235_v47  ;;  %v5225_v48 = vld [vmem:[#allocation18 + $0x20] sm:$0xff]  ;;  %v5224_v46 = vld [vmem:[#allocation18 + $0x18] sm:$0xff]  ;;  %v5223_v3 = vld [vmem:[#allocation18 + $0x10] sm:$0xff] }
 0xbd5   :  { %4865 = vst [vmem:[%s9414_s17] sm:$0xff] %v4849_v27  ;;  %v4881_v52 = vmax.f32 %v4849_v27, 0.0  ;;  %4866 = vst [vmem:[%s9414_s17 + $0x8] sm:$0xff] %v4850_v22  ;;  %v4882_v38 = vmax.f32 %v4850_v22, 0.0  ;;  %v4833_v31 = vmul.f32 %v11318_v19, %v4810_v15  ;;  %v4883_v37 = vmax.f32 %v4851_v6, 0.0  ;;  %8382 = vmatpush3.msra.mxu1 %v5235_v47  ;;  %v5222_v36 = vld [vmem:[#allocation18 + $0x8] sm:$0xff]  ;;  %v5221_v15 = vld [vmem:[#allocation18] sm:$0xff] }
 0xbd6   :  { %4867 = vst [vmem:[%s9414_s17 + $0x10] sm:$0xff] %v4851_v6  ;;  %4868 = vst [vmem:[%s9414_s17 + $0x18] sm:$0xff] %v4852_v24  ;;  %v4811_v45 = vmul.f32 %v8831_v50, %v11287_v43  ;;  %v4812_v9 = vmul.f32 %v8831_v50, %v11289_v42  ;;  %v4813_v26 = vmul.f32 %v8831_v50, %v11293_v53  ;;  %v4884_v54 = vmax.f32 %v4852_v24, 0.0 }
 0xbd7   :  { %4869 = vst [vmem:[%s9414_s17 + $0x20] sm:$0xff] %v4853_v18  ;;  %4870 = vst [vmem:[%s9414_s17 + $0x28] sm:$0xff] %v4854_v41  ;;  %8355 = vmatprep.mubr.f32.mxu0 %v4881_v52  ;;  %v4856_v49 = vadd.f32 %v11321_v12, %v4833_v31  ;;  %v4814_v14 = vmul.f32 %v8831_v50, %v11297_v56  ;;  %v4815_v8 = vmul.f32 %v8831_v50, %v11301_v34 }
 0xbd8   :  { %4871 = vst [vmem:[%s9414_s17 + $0x30] sm:$0xff] %v4855_v51  ;;  %8356 = vmatmul.mubr.f32.vlgmr.msra.gmra.mxu0 %v4882_v38  ;;  %v4816_v30 = vmul.f32 %v8831_v50, %v11305_v39  ;;  %v4863_v33 = vadd.f32 %v11321_v12, %v4840_v1  ;;  %v4834_v21 = vmul.f32 %v11318_v19, %v4811_v45  ;;  %v4885_v53 = vmax.f32 %v4853_v18, 0.0  ;;  %v5228_v1 = vld [vmem:[#allocation18 + $0x38] sm:$0xff] }
 0xbd9   :  { %8358 = vmatprep.mubr.f32.mxu0 %v4883_v37  ;;  %4872 = vst [vmem:[%s9414_s17 + $0x38] sm:$0xff] %v4856_v49  ;;  %v4835_v43 = vmul.f32 %v11318_v19, %v4812_v9  ;;  %v4836_v42 = vmul.f32 %v11318_v19, %v4813_v26  ;;  %v4837_v56 = vmul.f32 %v11318_v19, %v4814_v14  ;;  %v4886_v32 = vmax.f32 %v4854_v41, 0.0 }
 0xbda   :  { %v4838_v34 = vmul.f32 %v11318_v19, %v4815_v8  ;;  %v4839_v39 = vmul.f32 %v11318_v19, %v4816_v30  ;;  %4879 = vst [vmem:[%s9414_s17 + $0x70] sm:$0xff] %v4863_v33  ;;  %v4857_v58 = vadd.f32 %v11321_v12, %v4834_v21  ;;  %v4818_v25 = vmul.f32 %v8831_v50, %v11311_v4 }
 0xbdb   :  { %v4858_v10 = vadd.f32 %v11321_v12, %v4835_v43  ;;  %v4859_v57 = vadd.f32 %v11321_v12, %v4836_v42  ;;  %v4860_v17 = vadd.f32 %v11321_v12, %v4837_v56  ;;  %v4887_v35 = vmax.f32 %v4855_v51, 0.0  ;;  %8383 = vmatprep.subr.mxu1 %v5234_v20 }
 0xbdc   :  { %8359 = vmatmul.mubr.f32.gmra.mxu0 %v4884_v54  ;;  %v4861_v7 = vadd.f32 %v11321_v12, %v4838_v34  ;;  %v4862_v2 = vadd.f32 %v11321_v12, %v4839_v39  ;;  %4873 = vst [vmem:[%s9414_s17 + $0x40] sm:$0xff] %v4857_v58  ;;  %v4841_v29 = vmul.f32 %v11318_v19, %v4818_v25  ;;  %v4888_v61 = vmax.f32 %v4856_v49, 0.0 }
 0xbdd   :  { %8361 = vmatprep.mubr.f32.mxu0 %v4885_v53  ;;  %4874 = vst [vmem:[%s9414_s17 + $0x48] sm:$0xff] %v4858_v10  ;;  %4875 = vst [vmem:[%s9414_s17 + $0x50] sm:$0xff] %v4859_v57  ;;  %v4889_v60 = vmax.f32 %v4857_v58, 0.0  ;;  %v4890_v59 = vmax.f32 %v4858_v10, 0.0  ;;  %v4891_v40 = vmax.f32 %v4859_v57, 0.0  ;;  %v4892_v62 = vmax.f32 %v4860_v17, 0.0  ;;  %8384 = vmatpush3.msra.mxu1 %v5234_v20 }
 0xbde   :  { %4876 = vst [vmem:[%s9414_s17 + $0x58] sm:$0xff] %v4860_v17  ;;  %4877 = vst [vmem:[%s9414_s17 + $0x60] sm:$0xff] %v4861_v7  ;;  %v4864_v4 = vadd.f32 %v11321_v12, %v4841_v29  ;;  %v4893_v5 = vmax.f32 %v4861_v7, 0.0  ;;  %v4894_v50 = vmax.f32 %v4862_v2, 0.0  ;;  %v4895_v19 = vmax.f32 %v4863_v33, 0.0  ;;  %v5233_v12 = vld [vmem:[#allocation18 + $0x60] sm:$0xff] }
 0xbdf   :  { %4878 = vst [vmem:[%s9414_s17 + $0x68] sm:$0xff] %v4862_v2  ;;  %8385 = vmatprep.subr.mxu1 %v5233_v12 }
 0xbe0   :  { %8362 = vmatmul.mubr.f32.gmra.mxu0 %v4886_v32  ;;  %4880 = vst [vmem:[%s9414_s17 + $0x78] sm:$0xff] %v4864_v4  ;;  %v4896_v11 = vmax.f32 %v4864_v4, 0.0  ;;  %8386 = vmatpush3.msra.mxu1 %v5233_v12  ;;  %s11876_s17 = sld [smem:[#allocation54_spill]] }
 0xbe1   :  { %8364 = vmatprep.mubr.f32.mxu0 %v4887_v35  ;;  %8387 = vmatprep.subr.mxu1 %v5232_v16 }
 0xbe2   :  { %8388 = vmatpush3.msra.mxu1 %v5232_v16 }
 0xbe3   :  { %8389 = vmatprep.subr.mxu1 %v5231_v63 }
 0xbe4   :  { %8365 = vmatmul.mubr.f32.gmra.mxu0 %v4888_v61  ;;  %8390 = vmatpush3.msra.mxu1 %v5231_v63 }
 0xbe5   :  { %8367 = vmatprep.mubr.f32.mxu0 %v4889_v60  ;;  %8391 = vmatprep.subr.mxu1 %v5230_v28 }
 0xbe6   :  { %8392 = vmatpush3.msra.mxu1 %v5230_v28  ;;  %v6776_v27 = vld [vmem:[%s11876_s17] ss:$0 sm:$0xff] }
 0xbe7   :  { %8393 = vmatprep.subr.mxu1 %v5229_v44 }
 0xbe8   :  { %8368 = vmatmul.mubr.f32.gmra.mxu0 %v4890_v59  ;;  %8394 = vmatpush3.msra.mxu1 %v5229_v44 }
 0xbe9   :  { %8370 = vmatprep.mubr.f32.mxu0 %v4891_v40  ;;  %8395 = vmatprep.subr.mxu1 %v5228_v1 }
 0xbea   :  { %8396 = vmatpush3.msra.mxu1 %v5228_v1 }
 0xbeb   :  { %8397 = vmatprep.subr.mxu1 %v5227_v55 }
 0xbec   :  { %8371 = vmatmul.mubr.f32.gmra.mxu0 %v4892_v62  ;;  %8398 = vmatpush3.msra.mxu1 %v5227_v55 }
 0xbed   :  { %8373 = vmatprep.mubr.f32.mxu0 %v4893_v5  ;;  %8399 = vmatprep.subr.mxu1 %v5226_v13 }
 0xbee   :  { %8400 = vmatpush3.msra.mxu1 %v5226_v13 }
 0xbef   :  { %8401 = vmatprep.subr.mxu1 %v5225_v48 }
 0xbf0   :  { %8374 = vmatmul.mubr.f32.gmra.mxu0 %v4894_v50  ;;  %8402 = vmatpush3.msra.mxu1 %v5225_v48 }
 0xbf1   :  { %8376 = vmatprep.mubr.f32.mxu0 %v4895_v19  ;;  %8403 = vmatprep.subr.mxu1 %v5224_v46 }
 0xbf2   :  { %8404 = vmatpush3.msra.mxu1 %v5224_v46 }
 0xbf3   :  { %8405 = vmatprep.subr.mxu1 %v5223_v3 }
 0xbf4   :  { %8377 = vmatmul.mubr.f32.gmra.mxu0 %v4896_v11  ;;  %8406 = vmatpush3.msra.mxu1 %v5223_v3 }
 0xbf5   :  { %8407 = vmatprep.subr.mxu1 %v5222_v36 }
 0xbf6   :  { %8408 = vmatpush3.msra.mxu1 %v5222_v36 }
 0xbf7   :  { %8409 = vmatprep.subr.mxu1 %v5221_v15 }
 0xbf8   :  { %8410 = vmatpush3.msra.mxu1 %v5221_v15 }
 0xc98   :  { %v8357_v0 = vpop.f32.mrf.mxu0 }
 0xc99   :  { %v4992_v18 = vadd.f32 %v8357_v0, %v6776_v27 }
 0xc9a   :  { %v4986_v22 = vpop.f32.mrf.mxu0 }
 0xc9b   :  { %v4987_v6 = vadd.f32 %v6776_v27, %v4986_v22 }
 0xc9c   :  { %v8360_v24 = vpop.f32.mrf.mxu0 }
 0xc9d   :  { %v5065_v51 = vadd.f32 %v4992_v18, %v4987_v6  ;;  %v5002_v31 = vadd.f32 %v8360_v24, %v6776_v27 }
 0xc9e   :  { %v4996_v41 = vpop.f32.mrf.mxu0 }
 0xc9f   :  { %v4997_v52 = vadd.f32 %v6776_v27, %v4996_v41 }
 0xca0   :  { %v8363_v38 = vpop.f32.mrf.mxu0 }
 0xca1   :  { %v5066_v37 = vadd.f32 %v5065_v51, %v4997_v52  ;;  %v5012_v14 = vadd.f32 %v8363_v38, %v6776_v27 }
 0xca2   :  { %v5006_v49 = vpop.f32.mrf.mxu0 }
 0xca3   :  { %v5007_v45 = vadd.f32 %v6776_v27, %v5006_v49  ;;  %v5067_v9 = vadd.f32 %v5066_v37, %v5002_v31 }
 0xca4   :  { %v8366_v26 = vpop.f32.mrf.mxu0 }
 0xca5   :  { %v5068_v8 = vadd.f32 %v5067_v9, %v5007_v45  ;;  %v5022_v43 = vadd.f32 %v8366_v26, %v6776_v27 }
 0xca6   :  { %v5016_v30 = vpop.f32.mrf.mxu0 }
 0xca7   :  { %v5017_v33 = vadd.f32 %v6776_v27, %v5016_v30  ;;  %v5069_v54 = vadd.f32 %v5068_v8, %v5012_v14 }
 0xca8   :  { %v8369_v21 = vpop.f32.mrf.mxu0 }
 0xca9   :  { %v5070_v42 = vadd.f32 %v5069_v54, %v5017_v33  ;;  %v5032_v58 = vadd.f32 %v8369_v21, %v6776_v27 }
 0xcaa   :  { %v5026_v53 = vpop.f32.mrf.mxu0 }
 0xcab   :  { %v5027_v56 = vadd.f32 %v6776_v27, %v5026_v53  ;;  %v5071_v34 = vadd.f32 %v5070_v42, %v5022_v43 }
 0xcac   :  { %v8372_v39 = vpop.f32.mrf.mxu0 }
 0xcad   :  { %v5072_v10 = vadd.f32 %v5071_v34, %v5027_v56  ;;  %v5042_v2 = vadd.f32 %v8372_v39, %v6776_v27 }
 0xcae   :  { %v5036_v57 = vpop.f32.mrf.mxu0 }
 0xcaf   :  { %v5037_v25 = vadd.f32 %v6776_v27, %v5036_v57  ;;  %v5073_v17 = vadd.f32 %v5072_v10, %v5032_v58 }
 0xcb0   :  { %v8375_v7 = vpop.f32.mrf.mxu0 }
 0xcb1   :  { %v5074_v29 = vadd.f32 %v5073_v17, %v5037_v25  ;;  %v5052_v60 = vadd.f32 %v8375_v7, %v6776_v27 }
 0xcb2   :  { %v5046_v32 = vpop.f32.mrf.mxu0 }
 0xcb3   :  { %v5047_v35 = vadd.f32 %v6776_v27, %v5046_v32  ;;  %v5075_v4 = vadd.f32 %v5074_v29, %v5042_v2 }
 0xcb4   :  { %v8378_v61 = vpop.f32.mrf.mxu0 }
 0xcb5   :  { %v5076_v59 = vadd.f32 %v5075_v4, %v5047_v35  ;;  %v5062_v50 = vadd.f32 %v8378_v61, %v6776_v27 }
 0xcb6   :  { %v5056_v40 = vpop.f32.mrf.mxu0 }
 0xcb7   :  { %v5057_v62 = vadd.f32 %v6776_v27, %v5056_v40  ;;  %v5077_v5 = vadd.f32 %v5076_v59, %v5052_v60 }
 0xcb9   :  { %v5078_v19 = vadd.f32 %v5077_v5, %v5057_v62 }
 0xcbb   :  { %v5079_v11 = vadd.f32 %v5078_v19, %v5062_v50 }
 0xcbd   :  { %v5080_v23 = vrot.slane %v5079_v11, 4 }
 0xcbf   :  { %v5081_v47 = vadd.f32 %v5080_v23, %v5079_v11  ;;  %v11419_v11 = vld [vmem:[%s11877_s18] ss:$0 sm:$0xff] }
 0xcc1   :  { %v5082_v20 = vrot.slane %v5081_v47, 2 }
 0xcc3   :  { %v5083_v12 = vadd.f32 %v5082_v20, %v5081_v47 }
 0xcc5   :  { %v5084_v16 = vrot.slane %v5083_v12, 1 }
 0xcc7   :  { %v5085_v63 = vadd.f32 %v5084_v16, %v5083_v12  ;;  %v11425_v12 = vld [vmem:[%s11878_s30] ss:$0 sm:$0xff] }
 0xcc9   :  { %v5086_v28 = vmul.f32 0.0078125, %v5085_v63 }
 0xccb   :  { %v5087_v44 = vsub.f32 %v4987_v6, %v5086_v28  ;;  %v5088_v1 = vsub.f32 %v4992_v18, %v5086_v28  ;;  %v5089_v55 = vsub.f32 %v4997_v52, %v5086_v28  ;;  %v5090_v46 = vsub.f32 %v5002_v31, %v5086_v28 }
 0xccc   :  { %v5091_v3 = vsub.f32 %v5007_v45, %v5086_v28  ;;  %v5092_v22 = vsub.f32 %v5012_v14, %v5086_v28  ;;  %v5093_v24 = vsub.f32 %v5017_v33, %v5086_v28  ;;  %v11380_v38 = vsub.f32 %v5022_v43, %v5086_v28 }
 0xccd   :  { %v5103_v13 = vmul.f32 %v5087_v44, %v5087_v44  ;;  %v5104_v48 = vmul.f32 %v5088_v1, %v5088_v1  ;;  %v5105_v0 = vmul.f32 %v5089_v55, %v5089_v55  ;;  %v5106_v27 = vmul.f32 %v5090_v46, %v5090_v46 }
 0xcce   :  { %v5107_v41 = vmul.f32 %v5091_v3, %v5091_v3  ;;  %v5108_v37 = vmul.f32 %v5092_v22, %v5092_v22  ;;  %v11382_v9 = vsub.f32 %v5027_v56, %v5086_v28  ;;  %v5109_v6 = vmul.f32 %v5093_v24, %v5093_v24 }
 0xccf   :  { %v5119_v36 = vadd.f32 %v5104_v48, %v5103_v13  ;;  %v11384_v52 = vsub.f32 %v5032_v58, %v5086_v28  ;;  %v5110_v31 = vmul.f32 %v11380_v38, %v11380_v38  ;;  %v11388_v26 = vsub.f32 %v5037_v25, %v5086_v28 }
 0xcd0   :  { %v5111_v14 = vmul.f32 %v11382_v9, %v11382_v9  ;;  %v11392_v30 = vsub.f32 %v5042_v2, %v5086_v28  ;;  %v11396_v21 = vsub.f32 %v5047_v35, %v5086_v28  ;;  %v11400_v53 = vsub.f32 %v5052_v60, %v5086_v28 }
 0xcd1   :  { %v5120_v15 = vadd.f32 %v5119_v36, %v5105_v0  ;;  %v5112_v33 = vmul.f32 %v11384_v52, %v11384_v52  ;;  %v5113_v43 = vmul.f32 %v11388_v26, %v11388_v26  ;;  %v11404_v39 = vsub.f32 %v5057_v62, %v5086_v28 }
 0xcd2   :  { %v5114_v56 = vmul.f32 %v11392_v30, %v11392_v30  ;;  %v5115_v58 = vmul.f32 %v11396_v21, %v11396_v21  ;;  %v11408_v57 = vsub.f32 %v5062_v50, %v5086_v28  ;;  %v5116_v25 = vmul.f32 %v11400_v53, %v11400_v53 }
 0xcd3   :  { %v5121_v51 = vadd.f32 %v5120_v15, %v5106_v27  ;;  %v5117_v7 = vmul.f32 %v11404_v39, %v11404_v39 }
 0xcd4   :  { %v5118_v29 = vmul.f32 %v11408_v57, %v11408_v57 }
 0xcd5   :  { %v5122_v49 = vadd.f32 %v5121_v51, %v5107_v41 }
 0xcd7   :  { %v5123_v18 = vadd.f32 %v5122_v49, %v5108_v37 }
 0xcd9   :  { %v5124_v45 = vadd.f32 %v5123_v18, %v5109_v6 }
 0xcdb   :  { %v5125_v8 = vadd.f32 %v5124_v45, %v5110_v31 }
 0xcdd   :  { %v5126_v54 = vadd.f32 %v5125_v8, %v5111_v14 }
 0xcdf   :  { %v5127_v42 = vadd.f32 %v5126_v54, %v5112_v33 }
 0xce1   :  { %v5128_v34 = vadd.f32 %v5127_v42, %v5113_v43 }
 0xce3   :  { %v5129_v10 = vadd.f32 %v5128_v34, %v5114_v56 }
 0xce5   :  { %v5130_v17 = vadd.f32 %v5129_v10, %v5115_v58 }
 0xce7   :  { %v5131_v2 = vadd.f32 %v5130_v17, %v5116_v25 }
 0xce9   :  { %v5132_v32 = vadd.f32 %v5131_v2, %v5117_v7 }
 0xceb   :  { %v5133_v35 = vadd.f32 %v5132_v32, %v5118_v29 }
 0xced   :  { %v5134_v4 = vrot.slane %v5133_v35, 4 }
 0xcef   :  { %v5135_v61 = vadd.f32 %v5134_v4, %v5133_v35 }
 0xcf1   :  { %v5136_v60 = vrot.slane %v5135_v61, 2 }
 0xcf3   :  { %v5137_v59 = vadd.f32 %v5136_v60, %v5135_v61 }
 0xcf5   :  { %v5138_v40 = vrot.slane %v5137_v59, 1 }
 0xcf7   :  { %v5139_v62 = vadd.f32 %v5138_v40, %v5137_v59 }
 0xcf9   :  { %v5140_v5 = vmul.f32 0.0078125, %v5139_v62 }
 0xcfb   :  { %v5141_v50 = vadd.f32 1e-05, %v5140_v5 }
 0xcfd   :  { %8832 = vrsqrt.f32 %v5141_v50 }
 0xd0a   :  { %v11416_v19 = vpop.eup %8832 }
 0xd0b   :  { %v5143_v23 = vmul.f32 %v11416_v19, %v5087_v44  ;;  %v5144_v47 = vmul.f32 %v11416_v19, %v5088_v1  ;;  %v5145_v20 = vmul.f32 %v11416_v19, %v5089_v55  ;;  %v5146_v16 = vmul.f32 %v11416_v19, %v5090_v46 }
 0xd0c   :  { %v5147_v63 = vmul.f32 %v11416_v19, %v5091_v3  ;;  %v5148_v44 = vmul.f32 %v11416_v19, %v5092_v22  ;;  %v5149_v1 = vmul.f32 %v11416_v19, %v5093_v24  ;;  %v5150_v37 = vmul.f32 %v11416_v19, %v11380_v38 }
 0xd0d   :  { %v5166_v28 = vmul.f32 %v11419_v11, %v5143_v23  ;;  %v5167_v13 = vmul.f32 %v11419_v11, %v5144_v47  ;;  %v5168_v48 = vmul.f32 %v11419_v11, %v5145_v20  ;;  %v5169_v0 = vmul.f32 %v11419_v11, %v5146_v16  ;;  %v5560_v20 = vld [vmem:[#allocation19 + $0x78] sm:$0xff]  ;;  %v5559_v16 = vld [vmem:[#allocation19 + $0x70] sm:$0xff] }
 0xd0e   :  { %v5170_v3 = vmul.f32 %v11419_v11, %v5147_v63  ;;  %v5171_v51 = vmul.f32 %v11419_v11, %v5148_v44  ;;  %v5172_v49 = vmul.f32 %v11419_v11, %v5149_v1  ;;  %v5151_v6 = vmul.f32 %v11416_v19, %v11382_v9  ;;  %8435 = vmatprep.subr.mxu0 %v5560_v20  ;;  %v5557_v63 = vld [vmem:[#allocation19 + $0x60] sm:$0xff]  ;;  %v5551_v44 = vld [vmem:[#allocation19 + $0x30] sm:$0xff]  ;;  %v5550_v1 = vld [vmem:[#allocation19 + $0x28] sm:$0xff] }
 0xd0f   :  { %v5189_v55 = vadd.f32 %v11425_v12, %v5166_v28  ;;  %v5190_v36 = vadd.f32 %v11425_v12, %v5167_v13  ;;  %v5191_v46 = vadd.f32 %v11425_v12, %v5168_v48  ;;  %v5192_v41 = vadd.f32 %v11425_v12, %v5169_v0  ;;  %8436 = vmatpush3.msra.mxu0 %v5560_v20  ;;  %v5556_v28 = vld [vmem:[#allocation19 + $0x58] sm:$0xff]  ;;  %v5554_v13 = vld [vmem:[#allocation19 + $0x48] sm:$0xff]  ;;  %v5553_v48 = vld [vmem:[#allocation19 + $0x40] sm:$0xff] }
 0xd10   :  { %v5193_v24 = vadd.f32 %v11425_v12, %v5170_v3  ;;  %v5194_v31 = vadd.f32 %v11425_v12, %v5171_v51  ;;  %v5173_v45 = vmul.f32 %v11419_v11, %v5150_v37  ;;  %v5152_v14 = vmul.f32 %v11416_v19, %v11384_v52  ;;  %8437 = vmatprep.subr.mxu0 %v5559_v16  ;;  %v5552_v0 = vld [vmem:[#allocation19 + $0x38] sm:$0xff]  ;;  %v5546_v3 = vld [vmem:[#allocation19 + $0x8] sm:$0xff] }
 0xd11   :  { %v5205_v27 = vmax.f32 %v5189_v55, 0.0  ;;  %v5206_v15 = vmax.f32 %v5190_v36, 0.0  ;;  %v5207_v22 = vmax.f32 %v5191_v46, 0.0  ;;  %v5208_v18 = vmax.f32 %v5192_v41, 0.0  ;;  %8438 = vmatpush3.msra.mxu0 %v5559_v16  ;;  %v5549_v55 = vld [vmem:[#allocation19 + $0x20] sm:$0xff]  ;;  %v5548_v36 = vld [vmem:[#allocation19 + $0x18] sm:$0xff] }
 0xd12   :  { %v5209_v38 = vmax.f32 %v5193_v24, 0.0  ;;  %v5195_v8 = vadd.f32 %v11425_v12, %v5172_v49  ;;  %v5174_v33 = vmul.f32 %v11419_v11, %v5151_v6  ;;  %v5153_v54 = vmul.f32 %v11416_v19, %v11388_v26  ;;  %v5547_v46 = vld [vmem:[#allocation19 + $0x10] sm:$0xff]  ;;  %v6779_v41 = vld [vmem:[%s11879_s19] ss:$0 sm:$0xff] }
 0xd13   :  { %8411 = vmatprep.mubr.f32.mxu1 %v5205_v27  ;;  %v5210_v9 = vmax.f32 %v5194_v31, 0.0  ;;  %v5196_v43 = vadd.f32 %v11425_v12, %v5173_v45  ;;  %v5175_v42 = vmul.f32 %v11419_v11, %v5152_v14  ;;  %v5154_v56 = vmul.f32 %v11416_v19, %v11392_v30 }
 0xd14   :  { %8412 = vmatmul.mubr.f32.vlgmr.msra.gmra.mxu1 %v5206_v15  ;;  %v5211_v34 = vmax.f32 %v5195_v8, 0.0  ;;  %v5197_v52 = vadd.f32 %v11425_v12, %v5174_v33  ;;  %v5176_v58 = vmul.f32 %v11419_v11, %v5153_v54  ;;  %v5155_v10 = vmul.f32 %v11416_v19, %v11396_v21  ;;  %v5545_v15 = vld [vmem:[#allocation19] sm:$0xff] }
 0xd15   :  { %8414 = vmatprep.mubr.f32.mxu1 %v5207_v22  ;;  %v5212_v26 = vmax.f32 %v5196_v43, 0.0  ;;  %v5198_v25 = vadd.f32 %v11425_v12, %v5175_v42  ;;  %v5177_v17 = vmul.f32 %v11419_v11, %v5154_v56  ;;  %v5156_v7 = vmul.f32 %v11416_v19, %v11400_v53 }
 0xd16   :  { %v5157_v30 = vmul.f32 %v11416_v19, %v11404_v39  ;;  %v5213_v2 = vmax.f32 %v5197_v52, 0.0  ;;  %v5199_v29 = vadd.f32 %v11425_v12, %v5176_v58  ;;  %v5178_v32 = vmul.f32 %v11419_v11, %v5155_v10 }
 0xd17   :  { %v5214_v21 = vmax.f32 %v5198_v25, 0.0  ;;  %v5200_v35 = vadd.f32 %v11425_v12, %v5177_v17  ;;  %v5179_v4 = vmul.f32 %v11419_v11, %v5156_v7  ;;  %v5158_v61 = vmul.f32 %v11416_v19, %v11408_v57 }
 0xd18   :  { %8415 = vmatmul.mubr.f32.gmra.mxu1 %v5208_v18  ;;  %v5215_v60 = vmax.f32 %v5199_v29, 0.0  ;;  %v5201_v53 = vadd.f32 %v11425_v12, %v5178_v32  ;;  %v5180_v39 = vmul.f32 %v11419_v11, %v5157_v30 }
 0xd19   :  { %8417 = vmatprep.mubr.f32.mxu1 %v5209_v38  ;;  %v5216_v59 = vmax.f32 %v5200_v35, 0.0  ;;  %v5202_v40 = vadd.f32 %v11425_v12, %v5179_v4  ;;  %v5181_v62 = vmul.f32 %v11419_v11, %v5158_v61  ;;  %v5558_v11 = vld [vmem:[#allocation19 + $0x68] sm:$0xff] }
 0xd1a   :  { %v5217_v5 = vmax.f32 %v5201_v53, 0.0  ;;  %v5203_v50 = vadd.f32 %v11425_v12, %v5180_v39  ;;  %8439 = vmatprep.subr.mxu0 %v5558_v11 }
 0xd1b   :  { %v5218_v23 = vmax.f32 %v5202_v40, 0.0  ;;  %v5204_v57 = vadd.f32 %v11425_v12, %v5181_v62  ;;  %8440 = vmatpush3.msra.mxu0 %v5558_v11  ;;  %v5555_v12 = vld [vmem:[#allocation19 + $0x50] sm:$0xff] }
 0xd1c   :  { %8418 = vmatmul.mubr.f32.gmra.mxu1 %v5210_v9  ;;  %v5219_v19 = vmax.f32 %v5203_v50, 0.0  ;;  %8441 = vmatprep.subr.mxu0 %v5557_v63 }
 0xd1d   :  { %8420 = vmatprep.mubr.f32.mxu1 %v5211_v34  ;;  %v5220_v47 = vmax.f32 %v5204_v57, 0.0  ;;  %8442 = vmatpush3.msra.mxu0 %v5557_v63 }
 0xd1e   :  { %8443 = vmatprep.subr.mxu0 %v5556_v28 }
 0xd1f   :  { %8444 = vmatpush3.msra.mxu0 %v5556_v28 }
 0xd20   :  { %8421 = vmatmul.mubr.f32.gmra.mxu1 %v5212_v26  ;;  %8445 = vmatprep.subr.mxu0 %v5555_v12 }
 0xd21   :  { %8423 = vmatprep.mubr.f32.mxu1 %v5213_v2  ;;  %8446 = vmatpush3.msra.mxu0 %v5555_v12 }
 0xd22   :  { %8447 = vmatprep.subr.mxu0 %v5554_v13 }
 0xd23   :  { %8448 = vmatpush3.msra.mxu0 %v5554_v13 }
 0xd24   :  { %8424 = vmatmul.mubr.f32.gmra.mxu1 %v5214_v21  ;;  %8449 = vmatprep.subr.mxu0 %v5553_v48 }
 0xd25   :  { %8426 = vmatprep.mubr.f32.mxu1 %v5215_v60  ;;  %8450 = vmatpush3.msra.mxu0 %v5553_v48 }
 0xd26   :  { %8451 = vmatprep.subr.mxu0 %v5552_v0 }
 0xd27   :  { %8452 = vmatpush3.msra.mxu0 %v5552_v0 }
 0xd28   :  { %8427 = vmatmul.mubr.f32.gmra.mxu1 %v5216_v59  ;;  %8453 = vmatprep.subr.mxu0 %v5551_v44 }
 0xd29   :  { %8429 = vmatprep.mubr.f32.mxu1 %v5217_v5  ;;  %8454 = vmatpush3.msra.mxu0 %v5551_v44 }
 0xd2a   :  { %8455 = vmatprep.subr.mxu0 %v5550_v1 }
 0xd2b   :  { %8456 = vmatpush3.msra.mxu0 %v5550_v1 }
 0xd2c   :  { %8430 = vmatmul.mubr.f32.gmra.mxu1 %v5218_v23  ;;  %8457 = vmatprep.subr.mxu0 %v5549_v55 }
 0xd2d   :  { %8432 = vmatprep.mubr.f32.mxu1 %v5219_v19  ;;  %8458 = vmatpush3.msra.mxu0 %v5549_v55 }
 0xd2e   :  { %8459 = vmatprep.subr.mxu0 %v5548_v36 }
 0xd2f   :  { %8460 = vmatpush3.msra.mxu0 %v5548_v36 }
 0xd30   :  { %8433 = vmatmul.mubr.f32.gmra.mxu1 %v5220_v47  ;;  %8461 = vmatprep.subr.mxu0 %v5547_v46 }
 0xd31   :  { %8462 = vmatpush3.msra.mxu0 %v5547_v46 }
 0xd32   :  { %8463 = vmatprep.subr.mxu0 %v5546_v3 }
 0xd33   :  { %8464 = vmatpush3.msra.mxu0 %v5546_v3 }
 0xd34   :  { %8465 = vmatprep.subr.mxu0 %v5545_v15 }
 0xd35   :  { %8466 = vmatpush3.msra.mxu0 %v5545_v15 }
 0xdd4   :  { %v8413_v27 = vpop.f32.mrf.mxu1 }
 0xdd5   :  { %v5316_v24 = vadd.f32 %v8413_v27, %v6779_v41 }
 0xdd6   :  { %v5310_v51 = vpop.f32.mrf.mxu1 }
 0xdd7   :  { %v5311_v37 = vadd.f32 %v6779_v41, %v5310_v51 }
 0xdd8   :  { %v8416_v22 = vpop.f32.mrf.mxu1 }
 0xdd9   :  { %v5389_v6 = vadd.f32 %v5316_v24, %v5311_v37  ;;  %v5326_v45 = vadd.f32 %v8416_v22, %v6779_v41 }
 0xdda   :  { %v5320_v49 = vpop.f32.mrf.mxu1 }
 0xddb   :  { %v5321_v18 = vadd.f32 %v6779_v41, %v5320_v49 }
 0xddc   :  { %v8419_v31 = vpop.f32.mrf.mxu1 }
 0xddd   :  { %v5390_v14 = vadd.f32 %v5389_v6, %v5321_v18  ;;  %v5336_v9 = vadd.f32 %v8419_v31, %v6779_v41 }
 0xdde   :  { %v5330_v38 = vpop.f32.mrf.mxu1 }
 0xddf   :  { %v5331_v8 = vadd.f32 %v6779_v41, %v5330_v38  ;;  %v5391_v33 = vadd.f32 %v5390_v14, %v5326_v45 }
 0xde0   :  { %v8422_v54 = vpop.f32.mrf.mxu1 }
 0xde1   :  { %v5392_v43 = vadd.f32 %v5391_v33, %v5331_v8  ;;  %v5346_v58 = vadd.f32 %v8422_v54, %v6779_v41 }
 0xde2   :  { %v5340_v42 = vpop.f32.mrf.mxu1 }
 0xde3   :  { %v5341_v56 = vadd.f32 %v6779_v41, %v5340_v42  ;;  %v5393_v34 = vadd.f32 %v5392_v43, %v5336_v9 }
 0xde4   :  { %v8425_v52 = vpop.f32.mrf.mxu1 }
 0xde5   :  { %v5394_v10 = vadd.f32 %v5393_v34, %v5341_v56  ;;  %v5356_v30 = vadd.f32 %v8425_v52, %v6779_v41 }
 0xde6   :  { %v5350_v26 = vpop.f32.mrf.mxu1 }
 0xde7   :  { %v5351_v25 = vadd.f32 %v6779_v41, %v5350_v26  ;;  %v5395_v17 = vadd.f32 %v5394_v10, %v5346_v58 }
 0xde8   :  { %v8428_v7 = vpop.f32.mrf.mxu1 }
 0xde9   :  { %v5396_v2 = vadd.f32 %v5395_v17, %v5351_v25  ;;  %v5366_v4 = vadd.f32 %v8428_v7, %v6779_v41 }
 0xdea   :  { %v5360_v29 = vpop.f32.mrf.mxu1 }
 0xdeb   :  { %v5361_v32 = vadd.f32 %v6779_v41, %v5360_v29  ;;  %v5397_v21 = vadd.f32 %v5396_v2, %v5356_v30 }
 0xdec   :  { %v8431_v35 = vpop.f32.mrf.mxu1 }
 0xded   :  { %v5398_v61 = vadd.f32 %v5397_v21, %v5361_v32  ;;  %v5376_v40 = vadd.f32 %v8431_v35, %v6779_v41 }
 0xdee   :  { %v5370_v60 = vpop.f32.mrf.mxu1 }
 0xdef   :  { %v5371_v53 = vadd.f32 %v6779_v41, %v5370_v60  ;;  %v5399_v39 = vadd.f32 %v5398_v61, %v5366_v4 }
 0xdf0   :  { %v8434_v59 = vpop.f32.mrf.mxu1 }
 0xdf1   :  { %v5400_v62 = vadd.f32 %v5399_v39, %v5371_v53  ;;  %v5386_v57 = vadd.f32 %v8434_v59, %v6779_v41 }
 0xdf2   :  { %v5380_v5 = vpop.f32.mrf.mxu1 }
 0xdf3   :  { %v5381_v50 = vadd.f32 %v6779_v41, %v5380_v5  ;;  %v5401_v23 = vadd.f32 %v5400_v62, %v5376_v40 }
 0xdf5   :  { %v5402_v19 = vadd.f32 %v5401_v23, %v5381_v50 }
 0xdf7   :  { %v5403_v47 = vadd.f32 %v5402_v19, %v5386_v57 }
 0xdf9   :  { %v5404_v20 = vrot.slane %v5403_v47, 4 }
 0xdfb   :  { %v5405_v16 = vadd.f32 %v5404_v20, %v5403_v47  ;;  %v11521_v47 = vld [vmem:[%s11880_s22] ss:$0 sm:$0xff] }
 0xdfd   :  { %v5406_v11 = vrot.slane %v5405_v16, 2 }
 0xdff   :  { %v5407_v63 = vadd.f32 %v5406_v11, %v5405_v16 }
 0xe01   :  { %v5408_v28 = vrot.slane %v5407_v63, 1 }
 0xe03   :  { %v5409_v12 = vadd.f32 %v5408_v28, %v5407_v63  ;;  %v11527_v63 = vld [vmem:[%s11881_s24] ss:$0 sm:$0xff] }
 0xe05   :  { %v5410_v13 = vmul.f32 0.0078125, %v5409_v12 }
 0xe07   :  { %v5411_v48 = vsub.f32 %v5311_v37, %v5410_v13  ;;  %v5412_v0 = vsub.f32 %v5316_v24, %v5410_v13  ;;  %v5413_v44 = vsub.f32 %v5321_v18, %v5410_v13  ;;  %v5414_v36 = vsub.f32 %v5326_v45, %v5410_v13 }
 0xe08   :  { %v5415_v46 = vsub.f32 %v5331_v8, %v5410_v13  ;;  %v5416_v15 = vsub.f32 %v5336_v9, %v5410_v13  ;;  %v5417_v22 = vsub.f32 %v5341_v56, %v5410_v13  ;;  %v11482_v31 = vsub.f32 %v5346_v58, %v5410_v13 }
 0xe09   :  { %v5427_v1 = vmul.f32 %v5411_v48, %v5411_v48  ;;  %v5428_v55 = vmul.f32 %v5412_v0, %v5412_v0  ;;  %v5429_v3 = vmul.f32 %v5413_v44, %v5413_v44  ;;  %v5430_v41 = vmul.f32 %v5414_v36, %v5414_v36 }
 0xe0a   :  { %v5431_v49 = vmul.f32 %v5415_v46, %v5415_v46  ;;  %v5432_v14 = vmul.f32 %v5416_v15, %v5416_v15  ;;  %v11484_v33 = vsub.f32 %v5351_v25, %v5410_v13  ;;  %v5433_v37 = vmul.f32 %v5417_v22, %v5417_v22 }
 0xe0b   :  { %v5443_v27 = vadd.f32 %v5428_v55, %v5427_v1  ;;  %v11486_v18 = vsub.f32 %v5356_v30, %v5410_v13  ;;  %v5434_v45 = vmul.f32 %v11482_v31, %v11482_v31  ;;  %v11490_v54 = vsub.f32 %v5361_v32, %v5410_v13 }
 0xe0c   :  { %v5435_v9 = vmul.f32 %v11484_v33, %v11484_v33  ;;  %v11494_v42 = vsub.f32 %v5366_v4, %v5410_v13  ;;  %v11498_v52 = vsub.f32 %v5371_v53, %v5410_v13  ;;  %v11502_v26 = vsub.f32 %v5376_v40, %v5410_v13 }
 0xe0d   :  { %v5444_v51 = vadd.f32 %v5443_v27, %v5429_v3  ;;  %v5436_v56 = vmul.f32 %v11486_v18, %v11486_v18  ;;  %v5437_v58 = vmul.f32 %v11490_v54, %v11490_v54  ;;  %v11506_v7 = vsub.f32 %v5381_v50, %v5410_v13 }
 0xe0e   :  { %v5438_v25 = vmul.f32 %v11494_v42, %v11494_v42  ;;  %v5439_v30 = vmul.f32 %v11498_v52, %v11498_v52  ;;  %v11510_v29 = vsub.f32 %v5386_v57, %v5410_v13  ;;  %v5440_v32 = vmul.f32 %v11502_v26, %v11502_v26 }
 0xe0f   :  { %v5445_v6 = vadd.f32 %v5444_v51, %v5430_v41  ;;  %v5441_v35 = vmul.f32 %v11506_v7, %v11506_v7 }
 0xe10   :  { %v5442_v61 = vmul.f32 %v11510_v29, %v11510_v29 }
 0xe11   :  { %v5446_v38 = vadd.f32 %v5445_v6, %v5431_v49 }
 0xe13   :  { %v5447_v24 = vadd.f32 %v5446_v38, %v5432_v14 }
 0xe15   :  { %v5448_v8 = vadd.f32 %v5447_v24, %v5433_v37 }
 0xe17   :  { %v5449_v43 = vadd.f32 %v5448_v8, %v5434_v45 }
 0xe19   :  { %v5450_v34 = vadd.f32 %v5449_v43, %v5435_v9 }
 0xe1b   :  { %v5451_v10 = vadd.f32 %v5450_v34, %v5436_v56 }
 0xe1d   :  { %v5452_v17 = vadd.f32 %v5451_v10, %v5437_v58 }
 0xe1f   :  { %v5453_v2 = vadd.f32 %v5452_v17, %v5438_v25 }
 0xe21   :  { %v5454_v21 = vadd.f32 %v5453_v2, %v5439_v30 }
 0xe23   :  { %v5455_v4 = vadd.f32 %v5454_v21, %v5440_v32 }
 0xe25   :  { %v5456_v60 = vadd.f32 %v5455_v4, %v5441_v35 }
 0xe27   :  { %v5457_v53 = vadd.f32 %v5456_v60, %v5442_v61 }
 0xe29   :  { %v5458_v39 = vrot.slane %v5457_v53, 4 }
 0xe2b   :  { %v5459_v59 = vadd.f32 %v5458_v39, %v5457_v53 }
 0xe2d   :  { %v5460_v40 = vrot.slane %v5459_v59, 2 }
 0xe2f   :  { %v5461_v62 = vadd.f32 %v5460_v40, %v5459_v59 }
 0xe31   :  { %v5462_v5 = vrot.slane %v5461_v62, 1 }
 0xe33   :  { %v5463_v50 = vadd.f32 %v5462_v5, %v5461_v62 }
 0xe35   :  { %v5464_v23 = vmul.f32 0.0078125, %v5463_v50 }
 0xe37   :  { %v5465_v57 = vadd.f32 1e-05, %v5464_v23 }
 0xe39   :  { %8834 = vrsqrt.f32 %v5465_v57 }
 0xe46   :  { %v11518_v19 = vpop.eup %8834 }
 0xe47   :  { %v5467_v20 = vmul.f32 %v11518_v19, %v5411_v48  ;;  %v5468_v16 = vmul.f32 %v11518_v19, %v5412_v0  ;;  %v5469_v11 = vmul.f32 %v11518_v19, %v5413_v44  ;;  %v5470_v28 = vmul.f32 %v11518_v19, %v5414_v36 }
 0xe48   :  { %v5471_v12 = vmul.f32 %v11518_v19, %v5415_v46  ;;  %v5472_v48 = vmul.f32 %v11518_v19, %v5416_v15  ;;  %v5473_v0 = vmul.f32 %v11518_v19, %v5417_v22  ;;  %v5474_v14 = vmul.f32 %v11518_v19, %v11482_v31 }
 0xe49   :  { %v5490_v13 = vmul.f32 %v11521_v47, %v5467_v20  ;;  %v5491_v1 = vmul.f32 %v11521_v47, %v5468_v16  ;;  %v5492_v55 = vmul.f32 %v11521_v47, %v5469_v11  ;;  %v5493_v3 = vmul.f32 %v11521_v47, %v5470_v28  ;;  %v5884_v11 = vld [vmem:[#allocation21 + $0x78] sm:$0xff]  ;;  %v5883_v28 = vld [vmem:[#allocation21 + $0x70] sm:$0xff] }
 0xe4a   :  { %v5494_v46 = vmul.f32 %v11521_v47, %v5471_v12  ;;  %v5495_v6 = vmul.f32 %v11521_v47, %v5472_v48  ;;  %v5496_v38 = vmul.f32 %v11521_v47, %v5473_v0  ;;  %v5475_v37 = vmul.f32 %v11518_v19, %v11484_v33  ;;  %8491 = vmatprep.subr.mxu1 %v5884_v11  ;;  %v5881_v12 = vld [vmem:[#allocation21 + $0x60] sm:$0xff]  ;;  %v5875_v48 = vld [vmem:[#allocation21 + $0x30] sm:$0xff]  ;;  %v5874_v0 = vld [vmem:[#allocation21 + $0x28] sm:$0xff] }
 0xe4b   :  { %v5513_v44 = vadd.f32 %v11527_v63, %v5490_v13  ;;  %v5514_v27 = vadd.f32 %v11527_v63, %v5491_v1  ;;  %v5515_v36 = vadd.f32 %v11527_v63, %v5492_v55  ;;  %v5516_v49 = vadd.f32 %v11527_v63, %v5493_v3  ;;  %8492 = vmatpush3.msra.mxu1 %v5884_v11  ;;  %v5880_v13 = vld [vmem:[#allocation21 + $0x58] sm:$0xff]  ;;  %v5878_v1 = vld [vmem:[#allocation21 + $0x48] sm:$0xff]  ;;  %v5877_v55 = vld [vmem:[#allocation21 + $0x40] sm:$0xff] }
 0xe4c   :  { %v5517_v22 = vadd.f32 %v11527_v63, %v5494_v46  ;;  %v5518_v45 = vadd.f32 %v11527_v63, %v5495_v6  ;;  %v5497_v8 = vmul.f32 %v11521_v47, %v5474_v14  ;;  %v5476_v9 = vmul.f32 %v11518_v19, %v11486_v18  ;;  %8493 = vmatprep.subr.mxu1 %v5883_v28  ;;  %v5876_v3 = vld [vmem:[#allocation21 + $0x38] sm:$0xff]  ;;  %v5870_v46 = vld [vmem:[#allocation21 + $0x8] sm:$0xff] }
 0xe4d   :  { %v5529_v41 = vmax.f32 %v5513_v44, 0.0  ;;  %v5530_v51 = vmax.f32 %v5514_v27, 0.0  ;;  %v5531_v15 = vmax.f32 %v5515_v36, 0.0  ;;  %v5532_v24 = vmax.f32 %v5516_v49, 0.0  ;;  %8494 = vmatpush3.msra.mxu1 %v5883_v28  ;;  %v5873_v44 = vld [vmem:[#allocation21 + $0x20] sm:$0xff]  ;;  %v5872_v27 = vld [vmem:[#allocation21 + $0x18] sm:$0xff] }
 0xe4e   :  { %v5533_v31 = vmax.f32 %v5517_v22, 0.0  ;;  %v5519_v43 = vadd.f32 %v11527_v63, %v5496_v38  ;;  %v5498_v56 = vmul.f32 %v11521_v47, %v5475_v37  ;;  %v5477_v34 = vmul.f32 %v11518_v19, %v11490_v54  ;;  %v5871_v36 = vld [vmem:[#allocation21 + $0x10] sm:$0xff]  ;;  %v6782_v49 = vld [vmem:[%s11882_s5] ss:$0 sm:$0xff]  ;;  %v6131_v28 = vld [vmem:[#allocation22 + $0xe0] sm:$0xff] }
 0xe4f   :  { %8467 = vmatprep.mubr.f32.mxu0 %v5529_v41  ;;  %v5534_v33 = vmax.f32 %v5518_v45, 0.0  ;;  %v5520_v58 = vadd.f32 %v11527_v63, %v5497_v8  ;;  %v5499_v10 = vmul.f32 %v11521_v47, %v5476_v9  ;;  %v5478_v25 = vmul.f32 %v11518_v19, %v11494_v42 }
 0xe50   :  { %8468 = vmatmul.mubr.f32.vlgmr.msra.gmra.mxu0 %v5530_v51  ;;  %v5535_v17 = vmax.f32 %v5519_v43, 0.0  ;;  %v5521_v18 = vadd.f32 %v11527_v63, %v5498_v56  ;;  %v5500_v30 = vmul.f32 %v11521_v47, %v5477_v34  ;;  %v5479_v2 = vmul.f32 %v11518_v19, %v11498_v52  ;;  %v5869_v51 = vld [vmem:[#allocation21] sm:$0xff] }
 0xe51   :  { %8470 = vmatprep.mubr.f32.mxu0 %v5531_v15  ;;  %v5536_v54 = vmax.f32 %v5520_v58, 0.0  ;;  %v5522_v32 = vadd.f32 %v11527_v63, %v5499_v10  ;;  %v5501_v21 = vmul.f32 %v11521_v47, %v5478_v25  ;;  %v5480_v35 = vmul.f32 %v11518_v19, %v11502_v26 }
 0xe52   :  { %v5481_v42 = vmul.f32 %v11518_v19, %v11506_v7  ;;  %v5537_v4 = vmax.f32 %v5521_v18, 0.0  ;;  %v5523_v61 = vadd.f32 %v11527_v63, %v5500_v30  ;;  %v5502_v60 = vmul.f32 %v11521_v47, %v5479_v2 }
 0xe53   :  { %v5538_v52 = vmax.f32 %v5522_v32, 0.0  ;;  %v5524_v53 = vadd.f32 %v11527_v63, %v5501_v21  ;;  %v5503_v39 = vmul.f32 %v11521_v47, %v5480_v35  ;;  %v5482_v59 = vmul.f32 %v11518_v19, %v11510_v29 }
 0xe54   :  { %8471 = vmatmul.mubr.f32.gmra.mxu0 %v5532_v24  ;;  %v5539_v40 = vmax.f32 %v5523_v61, 0.0  ;;  %v5525_v26 = vadd.f32 %v11527_v63, %v5502_v60  ;;  %v5504_v7 = vmul.f32 %v11521_v47, %v5481_v42 }
 0xe55   :  { %8473 = vmatprep.mubr.f32.mxu0 %v5533_v31  ;;  %v5540_v62 = vmax.f32 %v5524_v53, 0.0  ;;  %v5526_v5 = vadd.f32 %v11527_v63, %v5503_v39  ;;  %v5505_v50 = vmul.f32 %v11521_v47, %v5482_v59  ;;  %v5882_v47 = vld [vmem:[#allocation21 + $0x68] sm:$0xff] }
 0xe56   :  { %v5541_v23 = vmax.f32 %v5525_v26, 0.0  ;;  %v5527_v57 = vadd.f32 %v11527_v63, %v5504_v7  ;;  %8495 = vmatprep.subr.mxu1 %v5882_v47 }
 0xe57   :  { %v5542_v20 = vmax.f32 %v5526_v5, 0.0  ;;  %v5528_v29 = vadd.f32 %v11527_v63, %v5505_v50  ;;  %8496 = vmatpush3.msra.mxu1 %v5882_v47  ;;  %v5879_v63 = vld [vmem:[#allocation21 + $0x50] sm:$0xff]  ;;  %v6134_v5 = vld [vmem:[#allocation22 + $0xf8] sm:$0xff] }
 0xe58   :  { %8474 = vmatmul.mubr.f32.gmra.mxu0 %v5534_v33  ;;  %v5543_v19 = vmax.f32 %v5527_v57, 0.0  ;;  %8497 = vmatprep.subr.mxu1 %v5881_v12  ;;  %v11622_v50 = vld [vmem:[#allocation22 + $0x78] sm:$0xff] }
 0xe59   :  { %8476 = vmatprep.mubr.f32.mxu0 %v5535_v17  ;;  %v5544_v16 = vmax.f32 %v5528_v29, 0.0  ;;  %8498 = vmatpush3.msra.mxu1 %v5881_v12 }
 0xe5a   :  { %8499 = vmatprep.subr.mxu1 %v5880_v13  ;;  %8547 = vmatprep.subr.mxu0 %v6134_v5 }
 0xe5b   :  { %8500 = vmatpush3.msra.mxu1 %v5880_v13  ;;  %8548 = vmatpush3.msra.mxu0 %v6134_v5  ;;  %v6130_v13 = vld [vmem:[#allocation22 + $0xd8] sm:$0xff] }
 0xe5c   :  { %8477 = vmatmul.mubr.f32.gmra.mxu0 %v5536_v54  ;;  %8501 = vmatprep.subr.mxu1 %v5879_v63 }
 0xe5d   :  { %8479 = vmatprep.mubr.f32.mxu0 %v5537_v4  ;;  %8502 = vmatpush3.msra.mxu1 %v5879_v63 }
 0xe5e   :  { %8503 = vmatprep.subr.mxu1 %v5878_v1 }
 0xe5f   :  { %8504 = vmatpush3.msra.mxu1 %v5878_v1  ;;  %v6129_v1 = vld [vmem:[#allocation22 + $0xd0] sm:$0xff] }
 0xe60   :  { %8480 = vmatmul.mubr.f32.gmra.mxu0 %v5538_v52  ;;  %8505 = vmatprep.subr.mxu1 %v5877_v55 }
 0xe61   :  { %8482 = vmatprep.mubr.f32.mxu0 %v5539_v40  ;;  %8506 = vmatpush3.msra.mxu1 %v5877_v55 }
 0xe62   :  { %8507 = vmatprep.subr.mxu1 %v5876_v3 }
 0xe63   :  { %8508 = vmatpush3.msra.mxu1 %v5876_v3  ;;  %v6128_v3 = vld [vmem:[#allocation22 + $0xc8] sm:$0xff] }
 0xe64   :  { %8483 = vmatmul.mubr.f32.gmra.mxu0 %v5540_v62  ;;  %8509 = vmatprep.subr.mxu1 %v5875_v48 }
 0xe65   :  { %8485 = vmatprep.mubr.f32.mxu0 %v5541_v23  ;;  %8510 = vmatpush3.msra.mxu1 %v5875_v48  ;;  %v6133_v23 = vld [vmem:[#allocation22 + $0xf0] sm:$0xff] }
 0xe66   :  { %8511 = vmatprep.subr.mxu1 %v5874_v0  ;;  %8549 = vmatprep.subr.mxu0 %v6133_v23 }
 0xe67   :  { %8512 = vmatpush3.msra.mxu1 %v5874_v0  ;;  %8550 = vmatpush3.msra.mxu0 %v6133_v23  ;;  %v6127_v0 = vld [vmem:[#allocation22 + $0xc0] sm:$0xff] }
 0xe68   :  { %8486 = vmatmul.mubr.f32.gmra.mxu0 %v5542_v20  ;;  %8513 = vmatprep.subr.mxu1 %v5873_v44 }
 0xe69   :  { %8488 = vmatprep.mubr.f32.mxu0 %v5543_v19  ;;  %8514 = vmatpush3.msra.mxu1 %v5873_v44  ;;  %v6132_v19 = vld [vmem:[#allocation22 + $0xe8] sm:$0xff] }
 0xe6a   :  { %8515 = vmatprep.subr.mxu1 %v5872_v27  ;;  %8551 = vmatprep.subr.mxu0 %v6132_v19 }
 0xe6b   :  { %8516 = vmatpush3.msra.mxu1 %v5872_v27  ;;  %8552 = vmatpush3.msra.mxu0 %v6132_v19  ;;  %v6126_v27 = vld [vmem:[#allocation22 + $0xb8] sm:$0xff] }
 0xe6c   :  { %8489 = vmatmul.mubr.f32.gmra.mxu0 %v5544_v16  ;;  %8517 = vmatprep.subr.mxu1 %v5871_v36 }
 0xe6d   :  { %8518 = vmatpush3.msra.mxu1 %v5871_v36  ;;  %8553 = vmatprep.subr.mxu0 %v6131_v28 }
 0xe6e   :  { %8519 = vmatprep.subr.mxu1 %v5870_v46  ;;  %8554 = vmatpush3.msra.mxu0 %v6131_v28 }
 0xe6f   :  { %8520 = vmatpush3.msra.mxu1 %v5870_v46  ;;  %8555 = vmatprep.subr.mxu0 %v6130_v13 }
 0xe70   :  { %8521 = vmatprep.subr.mxu1 %v5869_v51  ;;  %8556 = vmatpush3.msra.mxu0 %v6130_v13 }
 0xe71   :  { %8522 = vmatpush3.msra.mxu1 %v5869_v51  ;;  %8557 = vmatprep.subr.mxu0 %v6129_v1 }
 0xe72   :  { %8603 = vmatprep.subr.mxu1 %v11622_v50  ;;  %8558 = vmatpush3.msra.mxu0 %v6129_v1 }
 0xe73   :  { %8559 = vmatprep.subr.mxu0 %v6128_v3 }
 0xe74   :  { %8560 = vmatpush3.msra.mxu0 %v6128_v3 }
 0xe75   :  { %8561 = vmatprep.subr.mxu0 %v6127_v0 }
 0xe76   :  { %8562 = vmatpush3.msra.mxu0 %v6127_v0  ;;  %v11690_v0 = vld [vmem:[%s11883_s13] ss:$0 sm:$0xff] }
 0xe77   :  { %8563 = vmatprep.subr.mxu0 %v6126_v27 }
 0xe78   :  { %8564 = vmatpush3.msra.mxu0 %v6126_v27 }
 0xf10   :  { %v8469_v41 = vpop.f32.mrf.mxu0 }
 0xf11   :  { %v11586_v22 = vadd.f32 %v8469_v41, %v6782_v49 }
 0xf12   :  { %v5634_v6 = vpop.f32.mrf.mxu0 }
 0xf13   :  { %v11584_v14 = vadd.f32 %v6782_v49, %v5634_v6 }
 0xf14   :  { %v8472_v15 = vpop.f32.mrf.mxu0 }
 0xf15   :  { %v5713_v37 = vadd.f32 %v11586_v22, %v11584_v14  ;;  %v11592_v8 = vadd.f32 %v8472_v15, %v6782_v49 }
 0xf16   :  { %v5644_v38 = vpop.f32.mrf.mxu0 }
 0xf17   :  { %v11590_v24 = vadd.f32 %v6782_v49, %v5644_v38 }
 0xf18   :  { %v8475_v45 = vpop.f32.mrf.mxu0 }
 0xf19   :  { %v5714_v9 = vadd.f32 %v5713_v37, %v11590_v24  ;;  %v11598_v33 = vadd.f32 %v8475_v45, %v6782_v49 }
 0xf1a   :  { %v5654_v31 = vpop.f32.mrf.mxu0 }
 0xf1b   :  { %v11595_v43 = vadd.f32 %v6782_v49, %v5654_v31  ;;  %v5715_v56 = vadd.f32 %v5714_v9, %v11592_v8 }
 0xf1c   :  { %v8478_v34 = vpop.f32.mrf.mxu0 }
 0xf1d   :  { %v5716_v58 = vadd.f32 %v5715_v56, %v11595_v43  ;;  %v11604_v30 = vadd.f32 %v8478_v34, %v6782_v49 }
 0xf1e   :  { %v5664_v10 = vpop.f32.mrf.mxu0 }
 0xf1f   :  { %v11601_v25 = vadd.f32 %v6782_v49, %v5664_v10  ;;  %v5717_v17 = vadd.f32 %v5716_v58, %v11598_v33 }
 0xf20   :  { %v8481_v18 = vpop.f32.mrf.mxu0 }
 0xf21   :  { %v5718_v2 = vadd.f32 %v5717_v17, %v11601_v25  ;;  %v11610_v42 = vadd.f32 %v8481_v18, %v6782_v49 }
 0xf22   :  { %v5674_v54 = vpop.f32.mrf.mxu0 }
 0xf23   :  { %v11607_v32 = vadd.f32 %v6782_v49, %v5674_v54  ;;  %v5719_v21 = vadd.f32 %v5718_v2, %v11604_v30 }
 0xf24   :  { %v8484_v35 = vpop.f32.mrf.mxu0 }
 0xf25   :  { %v5720_v4 = vadd.f32 %v5719_v21, %v11607_v32  ;;  %v11616_v39 = vadd.f32 %v8484_v35, %v6782_v49 }
 0xf26   :  { %v5684_v61 = vpop.f32.mrf.mxu0 }
 0xf27   :  { %v11613_v60 = vadd.f32 %v6782_v49, %v5684_v61  ;;  %v5721_v52 = vadd.f32 %v5720_v4, %v11610_v42 }
 0xf28   :  { %v8487_v53 = vpop.f32.mrf.mxu0 }
 0xf29   :  { %v5722_v59 = vadd.f32 %v5721_v52, %v11613_v60  ;;  %v11624_v57 = vadd.f32 %v8487_v53, %v6782_v49 }
 0xf2a   :  { %v5694_v40 = vpop.f32.mrf.mxu0 }
 0xf2b   :  { %v11619_v26 = vadd.f32 %v6782_v49, %v5694_v40  ;;  %v5723_v7 = vadd.f32 %v5722_v59, %v11616_v39 }
 0xf2c   :  { %v8490_v62 = vpop.f32.mrf.mxu0 }
 0xf2d   :  { %v5724_v20 = vadd.f32 %v5723_v7, %v11619_v26  ;;  %v11631_v47 = vadd.f32 %v8490_v62, %v6782_v49 }
 0xf2e   :  { %v5704_v29 = vpop.f32.mrf.mxu0 }
 0xf2f   :  { %v11628_v16 = vadd.f32 %v6782_v49, %v5704_v29  ;;  %v5725_v11 = vadd.f32 %v5724_v20, %v11624_v57 }
 0xf31   :  { %v5726_v12 = vadd.f32 %v5725_v11, %v11628_v16 }
 0xf33   :  { %v5727_v63 = vadd.f32 %v5726_v12, %v11631_v47 }
 0xf35   :  { %v5728_v55 = vrot.slane %v5727_v63, 4 }
 0xf37   :  { %v5729_v48 = vadd.f32 %v5728_v55, %v5727_v63 }
 0xf39   :  { %v5730_v44 = vrot.slane %v5729_v48, 2 }
 0xf3b   :  { %v5731_v36 = vadd.f32 %v5730_v44, %v5729_v48 }
 0xf3d   :  { %v5732_v46 = vrot.slane %v5731_v36, 1 }
 0xf3f   :  { %v5733_v41 = vadd.f32 %v5732_v46, %v5731_v36  ;;  %v11696_v46 = vld [vmem:[%s11884_s21] ss:$0 sm:$0xff] }
 0xf41   :  { %v5734_v51 = vmul.f32 0.0078125, %v5733_v41 }
 0xf43   :  { %v5735_v49 = vsub.f32 %v11584_v14, %v5734_v51  ;;  %v5736_v6 = vsub.f32 %v11586_v22, %v5734_v51  ;;  %v5737_v15 = vsub.f32 %v11590_v24, %v5734_v51  ;;  %v5738_v45 = vsub.f32 %v11592_v8, %v5734_v51 }
 0xf44   :  { %v5739_v9 = vsub.f32 %v11595_v43, %v5734_v51  ;;  %v5740_v34 = vsub.f32 %v11598_v33, %v5734_v51  ;;  %v5741_v17 = vsub.f32 %v11601_v25, %v5734_v51  ;;  %v11643_v22 = vsub.f32 %v11604_v30, %v5734_v51 }
 0xf45   :  { %v5751_v38 = vmul.f32 %v5735_v49, %v5735_v49  ;;  %v5752_v37 = vmul.f32 %v5736_v6, %v5736_v6  ;;  %v5753_v31 = vmul.f32 %v5737_v15, %v5737_v15  ;;  %v5754_v58 = vmul.f32 %v5738_v45, %v5738_v45 }
 0xf46   :  { %v5755_v18 = vmul.f32 %v5739_v9, %v5739_v9  ;;  %v5756_v24 = vmul.f32 %v5740_v34, %v5740_v34  ;;  %v11646_v54 = vsub.f32 %v11607_v32, %v5734_v51  ;;  %v5757_v8 = vmul.f32 %v5741_v17, %v5741_v17 }
 0xf47   :  { %v5767_v56 = vadd.f32 %v5752_v37, %v5751_v38  ;;  %v11649_v21 = vsub.f32 %v11610_v42, %v5734_v51  ;;  %v5758_v33 = vmul.f32 %v11643_v22, %v11643_v22  ;;  %v11654_v25 = vsub.f32 %v11613_v60, %v5734_v51 }
 0xf48   :  { %v5759_v30 = vmul.f32 %v11646_v54, %v11646_v54  ;;  %v11659_v61 = vsub.f32 %v11616_v39, %v5734_v51  ;;  %v11664_v42 = vsub.f32 %v11619_v26, %v5734_v51  ;;  %v11669_v60 = vsub.f32 %v11624_v57, %v5734_v51 }
 0xf49   :  { %v5768_v10 = vadd.f32 %v5767_v56, %v5753_v31  ;;  %v5760_v32 = vmul.f32 %v11649_v21, %v11649_v21  ;;  %v5761_v53 = vmul.f32 %v11654_v25, %v11654_v25  ;;  %v11674_v39 = vsub.f32 %v11628_v16, %v5734_v51 }
 0xf4a   :  { %v5762_v40 = vmul.f32 %v11659_v61, %v11659_v61  ;;  %v5763_v62 = vmul.f32 %v11664_v42, %v11664_v42  ;;  %v11679_v26 = vsub.f32 %v11631_v47, %v5734_v51  ;;  %v5764_v23 = vmul.f32 %v11669_v60, %v11669_v60 }
 0xf4b   :  { %v5769_v14 = vadd.f32 %v5768_v10, %v5754_v58  ;;  %v5765_v57 = vmul.f32 %v11674_v39, %v11674_v39 }
 0xf4c   :  { %v5766_v19 = vmul.f32 %v11679_v26, %v11679_v26 }
 0xf4d   :  { %v5770_v2 = vadd.f32 %v5769_v14, %v5755_v18 }
 0xf4f   :  { %v5771_v43 = vadd.f32 %v5770_v2, %v5756_v24 }
 0xf51   :  { %v5772_v35 = vadd.f32 %v5771_v43, %v5757_v8 }
 0xf53   :  { %v5773_v4 = vadd.f32 %v5772_v35, %v5758_v33  ;;  %v6100_v33 = vld [vmem:[#allocation22 + $0x70] sm:$0xff] }
 0xf55   :  { %v5774_v52 = vadd.f32 %v5773_v4, %v5759_v30 }
 0xf57   :  { %v5775_v59 = vadd.f32 %v5774_v52, %v5760_v32 }
 0xf59   :  { %v5776_v7 = vadd.f32 %v5775_v59, %v5761_v53  ;;  %v6099_v59 = vld [vmem:[#allocation22 + $0x68] sm:$0xff] }
 0xf5b   :  { %v5777_v5 = vadd.f32 %v5776_v7, %v5762_v40  ;;  %v6098_v40 = vld [vmem:[#allocation22 + $0x60] sm:$0xff] }
 0xf5d   :  { %v5778_v20 = vadd.f32 %v5777_v5, %v5763_v62 }
 0xf5f   :  { %v5779_v29 = vadd.f32 %v5778_v20, %v5764_v23 }
 0xf61   :  { %v5780_v16 = vadd.f32 %v5779_v29, %v5765_v57  ;;  %v6097_v57 = vld [vmem:[#allocation22 + $0x58] sm:$0xff]  ;;  %v6096_v29 = vld [vmem:[#allocation22 + $0x50] sm:$0xff] }
 0xf63   :  { %v5781_v11 = vadd.f32 %v5780_v16, %v5766_v19 }
 0xf65   :  { %v5782_v28 = vrot.slane %v5781_v11, 4 }
 0xf67   :  { %v5783_v12 = vadd.f32 %v5782_v28, %v5781_v11 }
 0xf69   :  { %v5784_v13 = vrot.slane %v5783_v12, 2 }
 0xf6b   :  { %v5785_v47 = vadd.f32 %v5784_v13, %v5783_v12 }
 0xf6d   :  { %v5786_v63 = vrot.slane %v5785_v47, 1 }
 0xf6f   :  { %v5787_v1 = vadd.f32 %v5786_v63, %v5785_v47  ;;  %v6095_v47 = vld [vmem:[#allocation22 + $0x48] sm:$0xff]  ;;  %v6094_v63 = vld [vmem:[#allocation22 + $0x40] sm:$0xff] }
 0xf71   :  { %v5788_v55 = vmul.f32 0.0078125, %v5787_v1 }
 0xf73   :  { %v5789_v3 = vadd.f32 1e-05, %v5788_v55 }
 0xf75   :  { %8836 = vrsqrt.f32 %v5789_v3 }
 0xf82   :  { %v11687_v48 = vpop.eup %8836 }
 0xf83   :  { %v5791_v44 = vmul.f32 %v11687_v48, %v5735_v49  ;;  %v5792_v27 = vmul.f32 %v11687_v48, %v5736_v6  ;;  %v5793_v36 = vmul.f32 %v11687_v48, %v5737_v15  ;;  %v5794_v41 = vmul.f32 %v11687_v48, %v5738_v45 }
 0xf84   :  { %v5795_v51 = vmul.f32 %v11687_v48, %v5739_v9  ;;  %v5796_v49 = vmul.f32 %v11687_v48, %v5740_v34  ;;  %v5797_v6 = vmul.f32 %v11687_v48, %v5741_v17  ;;  %v5798_v2 = vmul.f32 %v11687_v48, %v11643_v22 }
 0xf85   :  { %v5814_v38 = vmul.f32 %v11690_v0, %v5791_v44  ;;  %v5815_v37 = vmul.f32 %v11690_v0, %v5792_v27  ;;  %v5816_v31 = vmul.f32 %v11690_v0, %v5793_v36  ;;  %v5817_v56 = vmul.f32 %v11690_v0, %v5794_v41  ;;  %v6093_v36 = vld [vmem:[#allocation22 + $0x38] sm:$0xff] }
 0xf86   :  { %v5818_v9 = vmul.f32 %v11690_v0, %v5795_v51  ;;  %v5819_v24 = vmul.f32 %v11690_v0, %v5796_v49  ;;  %v5820_v8 = vmul.f32 %v11690_v0, %v5797_v6  ;;  %v5799_v43 = vmul.f32 %v11687_v48, %v11646_v54  ;;  %v6125_v6 = vld [vmem:[#allocation22 + $0xb0] sm:$0xff] }
 0xf87   :  { %v5837_v15 = vadd.f32 %v11696_v46, %v5814_v38  ;;  %v5838_v58 = vadd.f32 %v11696_v46, %v5815_v37  ;;  %v5839_v45 = vadd.f32 %v11696_v46, %v5816_v31  ;;  %v5840_v14 = vadd.f32 %v11696_v46, %v5817_v56  ;;  %8565 = vmatprep.subr.mxu0 %v6125_v6 }
 0xf88   :  { %v5841_v17 = vadd.f32 %v11696_v46, %v5818_v9  ;;  %v5842_v30 = vadd.f32 %v11696_v46, %v5819_v24  ;;  %v5821_v4 = vmul.f32 %v11690_v0, %v5798_v2  ;;  %v5800_v22 = vmul.f32 %v11687_v48, %v11649_v21  ;;  %8566 = vmatpush3.msra.mxu0 %v6125_v6  ;;  %v6122_v9 = vld [vmem:[#allocation22 + $0x98] sm:$0xff]  ;;  %v6120_v24 = vld [vmem:[#allocation22 + $0x88] sm:$0xff] }
 0xf89   :  { %v5853_v10 = vmax.f32 %v5837_v15, 0.0  ;;  %v5854_v18 = vmax.f32 %v5838_v58, 0.0  ;;  %v5855_v34 = vmax.f32 %v5839_v45, 0.0  ;;  %v5856_v35 = vmax.f32 %v5840_v14, 0.0  ;;  %v6092_v15 = vld [vmem:[#allocation22 + $0x30] sm:$0xff]  ;;  %v6091_v58 = vld [vmem:[#allocation22 + $0x28] sm:$0xff] }
 0xf8a   :  { %v5857_v32 = vmax.f32 %v5841_v17, 0.0  ;;  %v5843_v52 = vadd.f32 %v11696_v46, %v5820_v8  ;;  %v5822_v53 = vmul.f32 %v11690_v0, %v5799_v43  ;;  %v5801_v54 = vmul.f32 %v11687_v48, %v11654_v25  ;;  %v6123_v45 = vld [vmem:[#allocation22 + $0xa0] sm:$0xff]  ;;  %v6088_v14 = vld [vmem:[#allocation22 + $0x10] sm:$0xff]  ;;  %v6087_v2 = vld [vmem:[#allocation22 + $0x8] sm:$0xff] }
 0xf8b   :  { %8523 = vmatprep.mubr.f32.mxu1 %v5853_v10  ;;  %v5858_v7 = vmax.f32 %v5842_v30, 0.0  ;;  %v5844_v62 = vadd.f32 %v11696_v46, %v5821_v4  ;;  %v5823_v21 = vmul.f32 %v11690_v0, %v5800_v22  ;;  %v5803_v20 = vmul.f32 %v11687_v48, %v11664_v42  ;;  %v6089_v10 = vld [vmem:[#allocation22 + $0x18] sm:$0xff]  ;;  %v6086_v17 = vld [vmem:[#allocation22] sm:$0xff]  ;;  %v11754_v43 = vld [vmem:[%s11885_s25] ss:$0 sm:$0xff] }
 0xf8c   :  { %8524 = vmatmul.mubr.f32.vlgmr.msra.gmra.mxu1 %v5854_v18  ;;  %v5859_v5 = vmax.f32 %v5843_v52, 0.0  ;;  %v5845_v23 = vadd.f32 %v11696_v46, %v5822_v53  ;;  %v5824_v25 = vmul.f32 %v11690_v0, %v5801_v54  ;;  %v5804_v11 = vmul.f32 %v11687_v48, %v11669_v60  ;;  %v6121_v18 = vld [vmem:[#allocation22 + $0x90] sm:$0xff]  ;;  %v6457_v8 = vld [vmem:[#allocation22 + $0x178] sm:$0xff] }
 0xf8d   :  { %8526 = vmatprep.mubr.f32.mxu1 %v5855_v34  ;;  %8604 = vmatpush3.msra.mxu1 %v11622_v50  ;;  %v5802_v50 = vmul.f32 %v11687_v48, %v11659_v61  ;;  %v5860_v19 = vmax.f32 %v5844_v62, 0.0  ;;  %v5846_v16 = vadd.f32 %v11696_v46, %v5823_v21  ;;  %v5805_v28 = vmul.f32 %v11687_v48, %v11674_v39  ;;  %v6119_v34 = vld [vmem:[#allocation22 + $0x80] sm:$0xff]  ;;  %v6456_v52 = vld [vmem:[#allocation22 + $0x170] sm:$0xff]  ;;  %v6449_v6 = vld [vmem:[#allocation22 + $0x138] sm:$0xff] }
 0xf8e   :  { %8605 = vmatprep.subr.mxu1 %v6100_v33  ;;  %v5861_v42 = vmax.f32 %v5845_v23, 0.0  ;;  %v5847_v12 = vadd.f32 %v11696_v46, %v5824_v25  ;;  %v5826_v13 = vmul.f32 %v11690_v0, %v5803_v20  ;;  %v5827_v60 = vmul.f32 %v11690_v0, %v5804_v11  ;;  %v6454_v62 = vld [vmem:[#allocation22 + $0x160] sm:$0xff] }
 0xf8f   :  { %8606 = vmatpush3.msra.mxu1 %v6100_v33  ;;  %v5825_v61 = vmul.f32 %v11690_v0, %v5802_v50  ;;  %v5862_v1 = vmax.f32 %v5846_v16, 0.0  ;;  %v5806_v39 = vmul.f32 %v11687_v48, %v11679_v26  ;;  %v5828_v27 = vmul.f32 %v11690_v0, %v5805_v28 }
 0xf90   :  { %8527 = vmatmul.mubr.f32.gmra.mxu1 %v5856_v35  ;;  %8607 = vmatprep.subr.mxu1 %v6099_v59  ;;  %v5863_v3 = vmax.f32 %v5847_v12, 0.0  ;;  %v5849_v44 = vadd.f32 %v11696_v46, %v5826_v13  ;;  %v5850_v51 = vadd.f32 %v11696_v46, %v5827_v60 }
 0xf91   :  { %8529 = vmatprep.mubr.f32.mxu1 %v5857_v32  ;;  %8608 = vmatpush3.msra.mxu1 %v6099_v59  ;;  %v5848_v55 = vadd.f32 %v11696_v46, %v5825_v61  ;;  %v5829_v38 = vmul.f32 %v11690_v0, %v5806_v39  ;;  %v5851_v26 = vadd.f32 %v11696_v46, %v5828_v27  ;;  %v6124_v0 = vld [vmem:[#allocation22 + $0xa8] sm:$0xff] }
 0xf92   :  { %8609 = vmatprep.subr.mxu1 %v6098_v40  ;;  %v5865_v37 = vmax.f32 %v5849_v44, 0.0  ;;  %v5866_v48 = vmax.f32 %v5850_v51, 0.0  ;;  %8567 = vmatprep.subr.mxu0 %v6124_v0  ;;  %v6455_v59 = vld [vmem:[#allocation22 + $0x168] sm:$0xff] }
 0xf93   :  { %8610 = vmatpush3.msra.mxu1 %v6098_v40  ;;  %v5864_v41 = vmax.f32 %v5848_v55, 0.0  ;;  %v5852_v31 = vadd.f32 %v11696_v46, %v5829_v38  ;;  %v5867_v56 = vmax.f32 %v5851_v26, 0.0  ;;  %8568 = vmatpush3.msra.mxu0 %v6124_v0  ;;  %v6090_v46 = vld [vmem:[#allocation22 + $0x20] sm:$0xff]  ;;  %v6448_v0 = vld [vmem:[#allocation22 + $0x130] sm:$0xff] }
 0xf94   :  { %8530 = vmatmul.mubr.f32.gmra.mxu1 %v5858_v7  ;;  %8611 = vmatprep.subr.mxu1 %v6097_v57  ;;  %v6450_v38 = vld [vmem:[#allocation22 + $0x140] sm:$0xff] }
 0xf95   :  { %8532 = vmatprep.mubr.f32.mxu1 %v5859_v5  ;;  %8612 = vmatpush3.msra.mxu1 %v6097_v57  ;;  %v5868_v49 = vmax.f32 %v5852_v31, 0.0  ;;  %v6453_v57 = vld [vmem:[#allocation22 + $0x158] sm:$0xff] }
 0xf96   :  { %8613 = vmatprep.subr.mxu1 %v6096_v29  ;;  %8569 = vmatprep.subr.mxu0 %v6123_v45 }
 0xf97   :  { %8614 = vmatpush3.msra.mxu1 %v6096_v29  ;;  %8570 = vmatpush3.msra.mxu0 %v6123_v45 }
 0xf98   :  { %8533 = vmatmul.mubr.f32.gmra.mxu1 %v5860_v19  ;;  %8615 = vmatprep.subr.mxu1 %v6095_v47 }
 0xf99   :  { %8535 = vmatprep.mubr.f32.mxu1 %v5861_v42  ;;  %8616 = vmatpush3.msra.mxu1 %v6095_v47  ;;  %v6452_v42 = vld [vmem:[#allocation22 + $0x150] sm:$0xff] }
 0xf9a   :  { %8617 = vmatprep.subr.mxu1 %v6094_v63  ;;  %8571 = vmatprep.subr.mxu0 %v6122_v9 }
 0xf9b   :  { %8618 = vmatpush3.msra.mxu1 %v6094_v63  ;;  %8572 = vmatpush3.msra.mxu0 %v6122_v9  ;;  %v6446_v9 = vld [vmem:[#allocation22 + $0x120] sm:$0xff] }
 0xf9c   :  { %8536 = vmatmul.mubr.f32.gmra.mxu1 %v5862_v1  ;;  %8619 = vmatprep.subr.mxu1 %v6093_v36 }
 0xf9d   :  { %8538 = vmatprep.mubr.f32.mxu1 %v5863_v3  ;;  %8620 = vmatpush3.msra.mxu1 %v6093_v36  ;;  %v6451_v36 = vld [vmem:[#allocation22 + $0x148] sm:$0xff] }
 0xf9e   :  { %8621 = vmatprep.subr.mxu1 %v6092_v15  ;;  %8573 = vmatprep.subr.mxu0 %v6121_v18 }
 0xf9f   :  { %8622 = vmatpush3.msra.mxu1 %v6092_v15  ;;  %8574 = vmatpush3.msra.mxu0 %v6121_v18 }
 0xfa0   :  { %8539 = vmatmul.mubr.f32.gmra.mxu1 %v5864_v41  ;;  %8623 = vmatprep.subr.mxu1 %v6091_v58 }
 0xfa1   :  { %8541 = vmatprep.mubr.f32.mxu1 %v5865_v37  ;;  %8624 = vmatpush3.msra.mxu1 %v6091_v58 }
 0xfa2   :  { %8625 = vmatprep.subr.mxu1 %v6090_v46  ;;  %8575 = vmatprep.subr.mxu0 %v6120_v24 }
 0xfa3   :  { %8626 = vmatpush3.msra.mxu1 %v6090_v46  ;;  %8576 = vmatpush3.msra.mxu0 %v6120_v24  ;;  %v6447_v46 = vld [vmem:[#allocation22 + $0x128] sm:$0xff]  ;;  %v6444_v24 = vld [vmem:[#allocation22 + $0x110] sm:$0xff] }
 0xfa4   :  { %8542 = vmatmul.mubr.f32.gmra.mxu1 %v5866_v48  ;;  %8627 = vmatprep.subr.mxu1 %v6089_v10 }
 0xfa5   :  { %8544 = vmatprep.mubr.f32.mxu1 %v5867_v56  ;;  %8628 = vmatpush3.msra.mxu1 %v6089_v10 }
 0xfa6   :  { %8629 = vmatprep.subr.mxu1 %v6088_v14  ;;  %8577 = vmatprep.subr.mxu0 %v6119_v34 }
 0xfa7   :  { %8630 = vmatpush3.msra.mxu1 %v6088_v14  ;;  %8578 = vmatpush3.msra.mxu0 %v6119_v34  ;;  %v6445_v14 = vld [vmem:[#allocation22 + $0x118] sm:$0xff] }
 0xfa8   :  { %8545 = vmatmul.mubr.f32.gmra.mxu1 %v5868_v49  ;;  %8631 = vmatprep.subr.mxu1 %v6087_v2 }
 0xfa9   :  { %8632 = vmatpush3.msra.mxu1 %v6087_v2  ;;  %8659 = vmatprep.subr.mxu0 %v6457_v8 }
 0xfaa   :  { %8633 = vmatprep.subr.mxu1 %v6086_v17 }
 0xfab   :  { %8634 = vmatpush3.msra.mxu1 %v6086_v17  ;;  %v6443_v17 = vld [vmem:[#allocation22 + $0x108] sm:$0xff] }
 0xfac   :  { %8715 = vmatprep.subr.mxu1 %v6457_v8 }
0x104c   :  { %v8525_v33 = vpop.f32.mrf.mxu1 }
0x104d   :  { %v5964_v35 = vadd.f32 %v8525_v33, %v11754_v43 }
0x104e   :  { %v5958_v30 = vpop.f32.mrf.mxu1 }
0x104f   :  { %6055 = vst [vmem:[#allocation4 + $0x9] sm:$0xff] %v5964_v35  ;;  %v5959_v4 = vadd.f32 %v11754_v43, %v5958_v30 }
0x1050   :  { %v8528_v22 = vpop.f32.mrf.mxu1 }
0x1051   :  { %6054 = vst [vmem:[#allocation4 + $0x1] sm:$0xff] %v5959_v4  ;;  %v5974_v32 = vadd.f32 %v8528_v22, %v11754_v43  ;;  %8579 = vmatprep.mubr.f32.mxu0 %v5959_v4 }
0x1052   :  { %v5968_v53 = vpop.f32.mrf.mxu1  ;;  %8580 = vmatmul.mubr.f32.vlgmr.msra.gmra.mxu0 %v5964_v35 }
0x1053   :  { %6057 = vst [vmem:[#allocation4 + $0x19] sm:$0xff] %v5974_v32  ;;  %v5969_v54 = vadd.f32 %v11754_v43, %v5968_v53  ;;  %8660 = vmatpush3.msra.mxu0 %v6457_v8 }
0x1054   :  { %v8531_v40 = vpop.f32.mrf.mxu1  ;;  %8661 = vmatprep.subr.mxu0 %v6456_v52 }
0x1055   :  { %6056 = vst [vmem:[#allocation4 + $0x11] sm:$0xff] %v5969_v54  ;;  %v5984_v7 = vadd.f32 %v8531_v40, %v11754_v43  ;;  %8582 = vmatprep.mubr.f32.mxu0 %v5969_v54  ;;  %8662 = vmatpush3.msra.mxu0 %v6456_v52 }
0x1056   :  { %v5978_v21 = vpop.f32.mrf.mxu1  ;;  %8583 = vmatmul.mubr.f32.gmra.mxu0 %v5974_v32  ;;  %8663 = vmatprep.subr.mxu0 %v6455_v59 }
0x1057   :  { %6059 = vst [vmem:[#allocation4 + $0x29] sm:$0xff] %v5984_v7  ;;  %v5979_v50 = vadd.f32 %v11754_v43, %v5978_v21  ;;  %8664 = vmatpush3.msra.mxu0 %v6455_v59 }
0x1058   :  { %v8534_v5 = vpop.f32.mrf.mxu1  ;;  %v6070_v23 = vld [vmem:[#allocation4] sm:$0xff]  ;;  %v6071_v25 = vld [vmem:[#allocation4 + $0x8] sm:$0xff]  ;;  %8665 = vmatprep.subr.mxu0 %v6454_v62 }
0x1059   :  { %6058 = vst [vmem:[#allocation4 + $0x21] sm:$0xff] %v5979_v50  ;;  %v5994_v20 = vadd.f32 %v8534_v5, %v11754_v43  ;;  %8635 = vmatprep.mubr.f32.mxu1 %v6070_v23  ;;  %8585 = vmatprep.mubr.f32.mxu0 %v5979_v50 }
0x105a   :  { %v5988_v29 = vpop.f32.mrf.mxu1  ;;  %8636 = vmatmul.mubr.f32.vlgmr.msra.gmra.mxu1 %v6071_v25  ;;  %8666 = vmatpush3.msra.mxu0 %v6454_v62 }
0x105b   :  { %6061 = vst [vmem:[#allocation4 + $0x39] sm:$0xff] %v5994_v20  ;;  %v5989_v19 = vadd.f32 %v11754_v43, %v5988_v29  ;;  %8731 = vmatpush3.msra.mxu1 %v6457_v8  ;;  %8586 = vmatmul.mubr.f32.gmra.mxu0 %v5984_v7  ;;  %v6442_v8 = vld [vmem:[#allocation22 + $0x100] sm:$0xff] }
0x105c   :  { %v8537_v16 = vpop.f32.mrf.mxu1  ;;  %8716 = vmatprep.subr.mxu1 %v6456_v52  ;;  %v6072_v61 = vld [vmem:[#allocation4 + $0x10] sm:$0xff]  ;;  %v6073_v11 = vld [vmem:[#allocation4 + $0x18] sm:$0xff]  ;;  %8667 = vmatprep.subr.mxu0 %v6453_v57 }
0x105d   :  { %6060 = vst [vmem:[#allocation4 + $0x31] sm:$0xff] %v5989_v19  ;;  %v6004_v28 = vadd.f32 %v8537_v16, %v11754_v43  ;;  %8638 = vmatprep.mubr.f32.mxu1 %v6072_v61  ;;  %8732 = vmatpush3.msra.mxu1 %v6456_v52  ;;  %v6426_v35 = vld [vmem:[#allocation4 + $0xa] sm:$0xff]  ;;  %v6427_v4 = vld [vmem:[#allocation4 + $0x12] sm:$0xff] }
0x105e   :  { %v5998_v12 = vpop.f32.mrf.mxu1  ;;  %8639 = vmatmul.mubr.f32.gmra.mxu1 %v6073_v11  ;;  %8717 = vmatprep.subr.mxu1 %v6455_v59 }
0x105f   :  { %6063 = vst [vmem:[#allocation4 + $0x49] sm:$0xff] %v6004_v28  ;;  %v5999_v13 = vadd.f32 %v11754_v43, %v5998_v12  ;;  %8733 = vmatpush3.msra.mxu1 %v6455_v59  ;;  %8668 = vmatpush3.msra.mxu0 %v6453_v57 }
0x1060   :  { %v8540_v47 = vpop.f32.mrf.mxu1  ;;  %8718 = vmatprep.subr.mxu1 %v6454_v62  ;;  %v6074_v63 = vld [vmem:[#allocation4 + $0x20] sm:$0xff]  ;;  %v6075_v1 = vld [vmem:[#allocation4 + $0x28] sm:$0xff]  ;;  %8669 = vmatprep.subr.mxu0 %v6452_v42 }
0x1061   :  { %6062 = vst [vmem:[#allocation4 + $0x41] sm:$0xff] %v5999_v13  ;;  %v6014_v55 = vadd.f32 %v8540_v47, %v11754_v43  ;;  %8641 = vmatprep.mubr.f32.mxu1 %v6074_v63  ;;  %8734 = vmatpush3.msra.mxu1 %v6454_v62  ;;  %v6428_v32 = vld [vmem:[#allocation4 + $0x1a] sm:$0xff]  ;;  %v6429_v53 = vld [vmem:[#allocation4 + $0x22] sm:$0xff] }
0x1062   :  { %v6008_v60 = vpop.f32.mrf.mxu1  ;;  %8642 = vmatmul.mubr.f32.gmra.mxu1 %v6075_v1  ;;  %8719 = vmatprep.subr.mxu1 %v6453_v57 }
0x1063   :  { %6065 = vst [vmem:[#allocation4 + $0x59] sm:$0xff] %v6014_v55  ;;  %v6009_v39 = vadd.f32 %v11754_v43, %v6008_v60  ;;  %8735 = vmatpush3.msra.mxu1 %v6453_v57  ;;  %8588 = vmatprep.mubr.f32.mxu0 %v5989_v19 }
0x1064   :  { %v8543_v3 = vpop.f32.mrf.mxu1  ;;  %8720 = vmatprep.subr.mxu1 %v6452_v42  ;;  %v6076_v44 = vld [vmem:[#allocation4 + $0x30] sm:$0xff]  ;;  %8670 = vmatpush3.msra.mxu0 %v6452_v42  ;;  %v6077_v27 = vld [vmem:[#allocation4 + $0x38] sm:$0xff] }
0x1065   :  { %6064 = vst [vmem:[#allocation4 + $0x51] sm:$0xff] %v6009_v39  ;;  %v6024_v41 = vadd.f32 %v8543_v3, %v11754_v43  ;;  %8644 = vmatprep.mubr.f32.mxu1 %v6076_v44  ;;  %8736 = vmatpush3.msra.mxu1 %v6452_v42  ;;  %v6430_v59 = vld [vmem:[#allocation4 + $0x2a] sm:$0xff]  ;;  %v6431_v7 = vld [vmem:[#allocation4 + $0x32] sm:$0xff] }
0x1066   :  { %v6018_v51 = vpop.f32.mrf.mxu1  ;;  %8589 = vmatmul.mubr.f32.gmra.mxu0 %v5994_v20  ;;  %8645 = vmatmul.mubr.f32.gmra.mxu1 %v6077_v27 }
0x1067   :  { %6067 = vst [vmem:[#allocation4 + $0x69] sm:$0xff] %v6024_v41  ;;  %v6019_v37 = vadd.f32 %v11754_v43, %v6018_v51  ;;  %8671 = vmatprep.subr.mxu0 %v6451_v36  ;;  %8721 = vmatprep.subr.mxu1 %v6451_v36 }
0x1068   :  { %8672 = vmatpush3.msra.mxu0 %v6451_v36  ;;  %8737 = vmatpush3.msra.mxu1 %v6451_v36  ;;  %v8546_v26 = vpop.f32.mrf.mxu1  ;;  %v6078_v48 = vld [vmem:[#allocation4 + $0x40] sm:$0xff]  ;;  %v6079_v56 = vld [vmem:[#allocation4 + $0x48] sm:$0xff] }
0x1069   :  { %6066 = vst [vmem:[#allocation4 + $0x61] sm:$0xff] %v6019_v37  ;;  %v6034_v31 = vadd.f32 %v8546_v26, %v11754_v43  ;;  %8673 = vmatprep.subr.mxu0 %v6450_v38  ;;  %8722 = vmatprep.subr.mxu1 %v6450_v38  ;;  %v6433_v33 = vld [vmem:[#allocation4 + $0x42] sm:$0xff]  ;;  %v6432_v21 = vld [vmem:[#allocation4 + $0x3a] sm:$0xff] }
0x106a   :  { %8591 = vmatprep.mubr.f32.mxu0 %v5999_v13  ;;  %8647 = vmatprep.mubr.f32.mxu1 %v6078_v48  ;;  %v6028_v49 = vpop.f32.mrf.mxu1 }
0x106b   :  { %6069 = vst [vmem:[#allocation4 + $0x79] sm:$0xff] %v6034_v31  ;;  %8674 = vmatpush3.msra.mxu0 %v6450_v38  ;;  %8738 = vmatpush3.msra.mxu1 %v6450_v38  ;;  %v6029_v15 = vadd.f32 %v11754_v43, %v6028_v49  ;;  %v6425_v43 = vld [vmem:[#allocation4 + $0x2] sm:$0xff] }
0x106c   :  { %8592 = vmatmul.mubr.f32.gmra.mxu0 %v6004_v28  ;;  %8648 = vmatmul.mubr.f32.gmra.mxu1 %v6079_v56  ;;  %v6080_v58 = vld [vmem:[#allocation4 + $0x50] sm:$0xff]  ;;  %v6081_v45 = vld [vmem:[#allocation4 + $0x58] sm:$0xff] }
0x106d   :  { %6068 = vst [vmem:[#allocation4 + $0x71] sm:$0xff] %v6029_v15  ;;  %8675 = vmatprep.subr.mxu0 %v6449_v6  ;;  %8723 = vmatprep.subr.mxu1 %v6449_v6  ;;  %v6434_v30 = vld [vmem:[#allocation4 + $0x4a] sm:$0xff]  ;;  %v6435_v22 = vld [vmem:[#allocation4 + $0x52] sm:$0xff] }
0x106e   :  { %8676 = vmatpush3.msra.mxu0 %v6449_v6  ;;  %8739 = vmatpush3.msra.mxu1 %v6449_v6 }
0x106f   :  { %8677 = vmatprep.subr.mxu0 %v6448_v0  ;;  %8724 = vmatprep.subr.mxu1 %v6448_v0 }
0x1070   :  { %8594 = vmatprep.mubr.f32.mxu0 %v6009_v39  ;;  %8650 = vmatprep.mubr.f32.mxu1 %v6080_v58  ;;  %v6082_v10 = vld [vmem:[#allocation4 + $0x60] sm:$0xff]  ;;  %v6083_v18 = vld [vmem:[#allocation4 + $0x68] sm:$0xff] }
0x1071   :  { %8678 = vmatpush3.msra.mxu0 %v6448_v0  ;;  %8740 = vmatpush3.msra.mxu1 %v6448_v0  ;;  %v6436_v52 = vld [vmem:[#allocation4 + $0x5a] sm:$0xff]  ;;  %v6437_v54 = vld [vmem:[#allocation4 + $0x62] sm:$0xff]  ;;  %v11781_v0 = vld [vmem:[%s9409_s27] ss:$0 sm:$0xff] }
0x1072   :  { %8595 = vmatmul.mubr.f32.gmra.mxu0 %v6014_v55  ;;  %8651 = vmatmul.mubr.f32.gmra.mxu1 %v6081_v45  ;;  %v6440_v50 = vld [vmem:[#allocation4 + $0x7a] sm:$0xff] }
0x1073   :  { %8679 = vmatprep.subr.mxu0 %v6447_v46  ;;  %8725 = vmatprep.subr.mxu1 %v6447_v46 }
0x1074   :  { %8680 = vmatpush3.msra.mxu0 %v6447_v46  ;;  %8741 = vmatpush3.msra.mxu1 %v6447_v46  ;;  %v6084_v2 = vld [vmem:[#allocation4 + $0x70] sm:$0xff]  ;;  %v6085_v34 = vld [vmem:[#allocation4 + $0x78] sm:$0xff] }
0x1075   :  { %8681 = vmatprep.subr.mxu0 %v6446_v9  ;;  %8726 = vmatprep.subr.mxu1 %v6446_v9  ;;  %v6438_v40 = vld [vmem:[#allocation4 + $0x6a] sm:$0xff]  ;;  %v6439_v62 = vld [vmem:[#allocation4 + $0x72] sm:$0xff] }
0x1076   :  { %8597 = vmatprep.mubr.f32.mxu0 %v6019_v37  ;;  %8653 = vmatprep.mubr.f32.mxu1 %v6082_v10 }
0x1077   :  { %8682 = vmatpush3.msra.mxu0 %v6446_v9  ;;  %8742 = vmatpush3.msra.mxu1 %v6446_v9 }
0x1078   :  { %8598 = vmatmul.mubr.f32.gmra.mxu0 %v6024_v41  ;;  %8654 = vmatmul.mubr.f32.gmra.mxu1 %v6083_v18 }
0x1079   :  { %8683 = vmatprep.subr.mxu0 %v6445_v14  ;;  %8727 = vmatprep.subr.mxu1 %v6445_v14 }
0x107a   :  { %8684 = vmatpush3.msra.mxu0 %v6445_v14  ;;  %8743 = vmatpush3.msra.mxu1 %v6445_v14 }
0x107b   :  { %8685 = vmatprep.subr.mxu0 %v6444_v24  ;;  %8728 = vmatprep.subr.mxu1 %v6444_v24 }
0x107c   :  { %8600 = vmatprep.mubr.f32.mxu0 %v6029_v15  ;;  %8656 = vmatprep.mubr.f32.mxu1 %v6084_v2 }
0x107d   :  { %8686 = vmatpush3.msra.mxu0 %v6444_v24  ;;  %8744 = vmatpush3.msra.mxu1 %v6444_v24 }
0x107e   :  { %8601 = vmatmul.mubr.f32.gmra.mxu0 %v6034_v31  ;;  %8657 = vmatmul.mubr.f32.gmra.mxu1 %v6085_v34 }
0x107f   :  { %8687 = vmatprep.subr.mxu0 %v6443_v17  ;;  %8729 = vmatprep.subr.mxu1 %v6443_v17 }
0x1080   :  { %8688 = vmatpush3.msra.mxu0 %v6443_v17  ;;  %8745 = vmatpush3.msra.mxu1 %v6443_v17 }
0x1081   :  { %8691 = vmatprep.mubr.f32.mxu0 %v6425_v43  ;;  %8703 = vmatprep.mubr.f32.mxu1 %v6433_v33 }
0x1082   :  { %8689 = vmatprep.subr.mxu0 %v6442_v8  ;;  %8730 = vmatprep.subr.mxu1 %v6442_v8 }
0x1083   :  { %8690 = vmatpush3.msra.mxu0 %v6442_v8  ;;  %8746 = vmatpush3.msra.mxu1 %v6442_v8 }
0x1084   :  { %8692 = vmatmul.mubr.f32.vlgmr.msra.gmra.mxu0 %v6426_v35  ;;  %8704 = vmatmul.mubr.f32.vlgmr.msra.gmra.mxu1 %v6434_v30 }
0x1085   :  { %8694 = vmatprep.mubr.f32.mxu0 %v6427_v4  ;;  %8706 = vmatprep.mubr.f32.mxu1 %v6435_v22 }
0x1088   :  { %8695 = vmatmul.mubr.f32.gmra.mxu0 %v6428_v32  ;;  %8707 = vmatmul.mubr.f32.gmra.mxu1 %v6436_v52 }
0x1089   :  { %8697 = vmatprep.mubr.f32.mxu0 %v6429_v53  ;;  %8709 = vmatprep.mubr.f32.mxu1 %v6437_v54 }
0x108c   :  { %8698 = vmatmul.mubr.f32.gmra.mxu0 %v6430_v59  ;;  %8710 = vmatmul.mubr.f32.gmra.mxu1 %v6438_v40 }
0x108d   :  { %8700 = vmatprep.mubr.f32.mxu0 %v6431_v7  ;;  %8712 = vmatprep.mubr.f32.mxu1 %v6439_v62 }
0x1090   :  { %8701 = vmatmul.mubr.f32.gmra.mxu0 %v6432_v21  ;;  %8713 = vmatmul.mubr.f32.gmra.mxu1 %v6440_v50 }
0x1112   :  { %v8581_v5 = vpop.f32.mrf.mxu0 }
0x1114   :  { %v6201_v23 = vpop.f32.mrf.mxu0 }
0x1116   :  { %v8584_v25 = vpop.f32.mrf.mxu0 }
0x1118   :  { %v6211_v57 = vpop.f32.mrf.mxu0 }
0x111a   :  { %v8637_v20 = vpop.f32.mrf.mxu1 }
0x111b   :  { %v8587_v16 = vpop.f32.mrf.mxu0  ;;  %v6352_v49 = vadd.f32 %v8637_v20, %v8581_v5 }
0x111c   :  { %v6346_v29 = vpop.f32.mrf.mxu1 }
0x111d   :  { %v6221_v28 = vpop.f32.mrf.mxu0  ;;  %v6347_v45 = vadd.f32 %v6346_v29, %v6201_v23 }
0x111e   :  { %v8640_v19 = vpop.f32.mrf.mxu1 }
0x111f   :  { %v6362_v18 = vadd.f32 %v8640_v19, %v8584_v25 }
0x1120   :  { %v6356_v61 = vpop.f32.mrf.mxu1 }
0x1121   :  { %v6357_v33 = vadd.f32 %v6356_v61, %v6211_v57 }
0x1122   :  { %v8643_v11 = vpop.f32.mrf.mxu1 }
0x1123   :  { %v6372_v54 = vadd.f32 %v8643_v11, %v8587_v16 }
0x1124   :  { %v6366_v42 = vpop.f32.mrf.mxu1 }
0x1125   :  { %v6367_v23 = vadd.f32 %v6366_v42, %v6221_v28 }
0x1126   :  { %v11772_v12 = vpop.f32.mrf.mxu0  ;;  %v11774_v13 = vpop.f32.mrf.mxu1 }
0x1127   :  { %v6382_v11 = vadd.f32 %v11774_v13, %v11772_v12 }
0x1128   :  { %v11776_v47 = vpop.f32.mrf.mxu0  ;;  %v11778_v63 = vpop.f32.mrf.mxu1 }
0x112c   :  { %v8593_v1 = vpop.f32.mrf.mxu0  ;;  %v8649_v55 = vpop.f32.mrf.mxu1 }
0x112d   :  { %v6392_v6 = vadd.f32 %v8649_v55, %v8593_v1 }
0x112e   :  { %v6241_v60 = vpop.f32.mrf.mxu0  ;;  %v6386_v39 = vpop.f32.mrf.mxu1 }
0x112f   :  { %v6387_v46 = vadd.f32 %v6386_v39, %v6241_v60 }
0x1132   :  { %v8596_v3 = vpop.f32.mrf.mxu0  ;;  %v8652_v44 = vpop.f32.mrf.mxu1 }
0x1133   :  { %v6402_v14 = vadd.f32 %v8652_v44, %v8596_v3  ;;  %v6377_v44 = vadd.f32 %v11778_v63, %v11776_v47 }
0x1134   :  { %v6251_v27 = vpop.f32.mrf.mxu0  ;;  %v6396_v36 = vpop.f32.mrf.mxu1 }
0x1135   :  { %v6397_v35 = vadd.f32 %v6396_v36, %v6251_v27 }
0x1138   :  { %v8599_v41 = vpop.f32.mrf.mxu0  ;;  %v8655_v51 = vpop.f32.mrf.mxu1 }
0x1139   :  { %v6412_v59 = vadd.f32 %v8655_v51, %v8599_v41 }
0x113a   :  { %v6261_v38 = vpop.f32.mrf.mxu0  ;;  %v6406_v37 = vpop.f32.mrf.mxu1 }
0x113b   :  { %v6407_v25 = vadd.f32 %v6406_v37, %v6261_v38 }
0x113e   :  { %v8602_v26 = vpop.f32.mrf.mxu0  ;;  %v8658_v48 = vpop.f32.mrf.mxu1 }
0x113f   :  { %v6422_v1 = vadd.f32 %v8658_v48, %v8602_v26 }
0x1140   :  { %v6271_v31 = vpop.f32.mrf.mxu0  ;;  %v6416_v56 = vpop.f32.mrf.mxu1 }
0x1141   :  { %v6417_v27 = vadd.f32 %v6416_v56, %v6271_v31 }
0x1144   :  { %v8693_v15 = vpop.f32.mrf.mxu0  ;;  %v8705_v58 = vpop.f32.mrf.mxu1 }
0x1145   :  { %v6604_v9 = vadd.f32 %v8693_v15, %v6352_v49  ;;  %v6612_v10 = vadd.f32 %v8705_v58, %v6392_v6 }
0x1146   :  { %v6524_v24 = vpop.f32.mrf.mxu0  ;;  %v6564_v2 = vpop.f32.mrf.mxu1 }
0x1147   :  { %v6627_v34 = vadd.f32 %v11781_v0, %v6604_v9  ;;  %v6635_v17 = vadd.f32 %v11781_v0, %v6612_v10  ;;  %v6603_v8 = vadd.f32 %v6524_v24, %v6347_v45  ;;  %v6611_v43 = vadd.f32 %v6564_v2, %v6387_v46 }
0x1148   :  { %v8696_v30 = vpop.f32.mrf.mxu0  ;;  %v8708_v4 = vpop.f32.mrf.mxu1 }
0x1149   :  { %6643 = vst [vmem:[%s9419_s12 + $0x8] sm:$0xff] %v6627_v34  ;;  %6651 = vst [vmem:[%s9419_s12 + $0x48] sm:$0xff] %v6635_v17  ;;  %v6626_v22 = vadd.f32 %v11781_v0, %v6603_v8  ;;  %v6634_v32 = vadd.f32 %v11781_v0, %v6611_v43  ;;  %v6606_v52 = vadd.f32 %v8696_v30, %v6362_v18 }
0x114a   :  { %v6614_v53 = vadd.f32 %v8708_v4, %v6402_v14  ;;  %v6534_v40 = vpop.f32.mrf.mxu0  ;;  %v6574_v7 = vpop.f32.mrf.mxu1 }
0x114b   :  { %6642 = vst [vmem:[%s9419_s12] sm:$0xff] %v6626_v22  ;;  %6650 = vst [vmem:[%s9419_s12 + $0x40] sm:$0xff] %v6634_v32  ;;  %v6629_v62 = vadd.f32 %v11781_v0, %v6606_v52  ;;  %v6605_v50 = vadd.f32 %v6534_v40, %v6357_v33  ;;  %v6613_v5 = vadd.f32 %v6574_v7, %v6397_v35 }
0x114c   :  { %v6637_v21 = vadd.f32 %v11781_v0, %v6614_v53  ;;  %v8699_v20 = vpop.f32.mrf.mxu0  ;;  %v8711_v57 = vpop.f32.mrf.mxu1 }
0x114d   :  { %6645 = vst [vmem:[%s9419_s12 + $0x18] sm:$0xff] %v6629_v62  ;;  %v6628_v29 = vadd.f32 %v11781_v0, %v6605_v50  ;;  %v6636_v19 = vadd.f32 %v11781_v0, %v6613_v5  ;;  %v6608_v16 = vadd.f32 %v8699_v20, %v6372_v54  ;;  %v6616_v61 = vadd.f32 %v8711_v57, %v6412_v59 }
0x114e   :  { %6653 = vst [vmem:[%s9419_s12 + $0x58] sm:$0xff] %v6637_v21  ;;  %v6544_v55 = vpop.f32.mrf.mxu0  ;;  %v6584_v60 = vpop.f32.mrf.mxu1 }
0x114f   :  { %6644 = vst [vmem:[%s9419_s12 + $0x10] sm:$0xff] %v6628_v29  ;;  %6652 = vst [vmem:[%s9419_s12 + $0x50] sm:$0xff] %v6636_v19  ;;  %v6631_v28 = vadd.f32 %v11781_v0, %v6608_v16  ;;  %v6639_v42 = vadd.f32 %v11781_v0, %v6616_v61  ;;  %v6607_v39 = vadd.f32 %v6544_v55, %v6367_v23 }
0x1150   :  { %v6615_v3 = vadd.f32 %v6584_v60, %v6407_v25  ;;  %v8702_v36 = vpop.f32.mrf.mxu0  ;;  %v8714_v12 = vpop.f32.mrf.mxu1 }
0x1151   :  { %6647 = vst [vmem:[%s9419_s12 + $0x28] sm:$0xff] %v6631_v28  ;;  %6655 = vst [vmem:[%s9419_s12 + $0x68] sm:$0xff] %v6639_v42  ;;  %v6630_v13 = vadd.f32 %v11781_v0, %v6607_v39  ;;  %v6610_v51 = vadd.f32 %v8702_v36, %v6382_v11  ;;  %v6618_v38 = vadd.f32 %v8714_v12, %v6422_v1 }
0x1152   :  { %v6638_v41 = vadd.f32 %v11781_v0, %v6615_v3  ;;  %v6554_v37 = vpop.f32.mrf.mxu0  ;;  %v6594_v26 = vpop.f32.mrf.mxu1 }
0x1153   :  { %6646 = vst [vmem:[%s9419_s12 + $0x20] sm:$0xff] %v6630_v13  ;;  %v6633_v47 = vadd.f32 %v11781_v0, %v6610_v51  ;;  %v6641_v63 = vadd.f32 %v11781_v0, %v6618_v38  ;;  %v6609_v48 = vadd.f32 %v6554_v37, %v6377_v44  ;;  %v6617_v31 = vadd.f32 %v6594_v26, %v6417_v27 }
0x1154   :  { %6654 = vst [vmem:[%s9419_s12 + $0x60] sm:$0xff] %v6638_v41 }
0x1155   :  { %6649 = vst [vmem:[%s9419_s12 + $0x38] sm:$0xff] %v6633_v47  ;;  %6657 = vst [vmem:[%s9419_s12 + $0x78] sm:$0xff] %v6641_v63  ;;  %v6632_v56 = vadd.f32 %v11781_v0, %v6609_v48  ;;  %v6640_v49 = vadd.f32 %v11781_v0, %v6617_v31 }
0x1157   :  { %6648 = vst [vmem:[%s9419_s12 + $0x30] sm:$0xff] %v6632_v56  ;;  %6656 = vst [vmem:[%s9419_s12 + $0x70] sm:$0xff] %v6640_v49 }
0x1158   :  { %6666 = vsyncpa [#allocation6], 1 }
0x1159   :  { %6667 = vsyncpa [#allocation8], 1 }
0x115a   :  { %6668 = vsyncpa [#allocation11], 1 }
0x115b   :  { %6669 = vsyncpa [#allocation14], 1 }
0x115c   :  { %6670 = vsyncpa [#allocation17], 1 }
0x115d   :  { %6671 = vsyncpa [#allocation20], 1 }
0x115e   :  { %6672 = vsyncpa [#allocation23], 1 }

</bundles_post_ra>
